<compile_context>
chip_gen: v5e
topology: v5e:2x2
jax: 0.10.0
libtpu: 0.0.40
codegen_flags: <defaults>
</compile_context>

<pallas_src>
import numpy as np
import jax
import jax.numpy as jnp
from jax.experimental import pallas as pl
from jax.experimental.pallas import tpu as pltpu


def _median_gcn_kernel(a_ref, x_ref, w1_ref, b1_ref, w2_ref, b2_ref,
                       out_ref, *hidden_refs):
    """Fused: h1 = X@W1+b1 -> median-agg -> ReLU -> h2 = .@W2+b2 -> median-agg."""
    n = a_ref.shape[0]

    # Adjacency-derived quantities, computed once and shared by both layers.
    neigh = a_ref[...] > 0.5                          # (N, N) in-neighbour mask
    a_bf = neigh.astype(jnp.bfloat16)                 # exact {0,1} MXU operand
    deg = jnp.sum(neigh.astype(jnp.float32), axis=1, keepdims=True)   # (N, 1)
    target = jnp.floor((deg + 1.0) * 0.5)             # 1-indexed lower-median rank
    has_neigh = deg > 0.5

    def median_aggregate(h):
        """Element-wise lower median of h over each node's in-neighbourhood.

        Selection by counting: the lower median of feature d at node i is
          min{ h[j,d] : j in N(i), #{m in N(i): h[m,d] <= h[j,d]} >= ceil(deg_i/2) }.
        The counts for all (j, d) come from ONE lane-dense MXU matmul.
        """
        d_out = h.shape[1]
        # Lane-pad the (narrow) feature dim to 128 before the single small
        # transpose so the transpose operand is a full (8,128)-tiled shape.
        lane_pad = (-d_out) % 128
        h_padded = (jnp.concatenate([h, jnp.zeros((n, lane_pad), h.dtype)], axis=1)
                    if lane_pad else h)
        ht = jnp.transpose(h_padded)                  # (128, N): feature values on lanes

        # comp[m, d*N + j] = 1.0 iff h[m, d] <= h[j, d]; per-feature blocks are
        # concatenated along lanes so a single matmul covers every feature.
        comp = jnp.concatenate(
            [(h[:, d:d + 1] <= ht[d:d + 1, :]).astype(jnp.float32)
             for d in range(d_out)],
            axis=1)                                   # (N, N*D)
        # cnt[i, d*N + j] = #{m in N(i) : h[m, d] <= h[j, d]}
        # (exact: operands are {0,1} in bf16, accumulation in f32).
        cnt = jnp.dot(a_bf, comp.astype(jnp.bfloat16),
                      preferred_element_type=jnp.float32)             # (N, N*D)

        # Residual per-feature loop is cheap VPU/XLU work on (N, N) slabs with
        # tiny live ranges; the expensive MXU work above is already batched, so
        # a fori_loop/scratch variant would only add dynamic-slice overhead at
        # D <= 16.
        med_cols = []
        for d in range(d_out):
            eligible = neigh & (cnt[:, d * n:(d + 1) * n] >= target)
            vals = jnp.where(eligible, ht[d:d + 1, :], jnp.inf)
            med_cols.append(jnp.min(vals, axis=1, keepdims=True))     # (N, 1)
        med = jnp.concatenate(med_cols, axis=1)       # (N, D): one dense store later
        return jnp.where(has_neigh, med, 0.0)         # isolated nodes -> 0

    # Layer 1: MedianConv -> ReLU.  Dropout(0.5) is the identity in eval mode.
    # TODO(synk): training-mode RNG dropout is not implemented.
    h1 = (jnp.dot(x_ref[...], w1_ref[...], preferred_element_type=jnp.float32)
          + b1_ref[...])
    z1 = jnp.maximum(median_aggregate(h1), 0.0)

    # Layer 2: MedianConv (no activation).
    h2 = jnp.dot(z1, w2_ref[...], preferred_element_type=jnp.float32) + b2_ref[...]
    out_ref[...] = median_aggregate(h2)

    if hidden_refs:                                   # debug/test-only extra outputs
        h1_ref, z1_ref, h2_ref = hidden_refs
        h1_ref[...] = h1
        z1_ref[...] = z1
        h2_ref[...] = h2


_VMEM = pl.BlockSpec(memory_space=pltpu.MemorySpace.VMEM)


def _build_call(n, hid, out_dim, with_hidden):
    if with_hidden:
        out_shape = (jax.ShapeDtypeStruct((n, out_dim), jnp.float32),   # out
                     jax.ShapeDtypeStruct((n, hid), jnp.float32),       # h1
                     jax.ShapeDtypeStruct((n, hid), jnp.float32),       # z1
                     jax.ShapeDtypeStruct((n, out_dim), jnp.float32))   # h2
        out_specs = (_VMEM, _VMEM, _VMEM, _VMEM)
    else:
        out_shape = jax.ShapeDtypeStruct((n, out_dim), jnp.float32)
        out_specs = _VMEM
    return pl.pallas_call(
        _median_gcn_kernel,
        out_shape=out_shape,
        in_specs=[_VMEM] * 6,
        out_specs=out_specs,
    )


def median_gcn_forward(adj, feat, params):
    """MedianGCN forward (eval mode), fully fused into one pallas_call."""
    n = feat.shape[0]
    call = _build_call(n, params["w1"].shape[1], params["w2"].shape[1],
                       with_hidden=False)
    return call(adj, feat, params["w1"], params["b1"], params["w2"], params["b2"])


def median_gcn_forward_debug(adj, feat, params):
    """Same fused kernel; additionally returns (h1, z1, h2) for verification."""
    n = feat.shape[0]
    call = _build_call(n, params["w1"].shape[1], params["w2"].shape[1],
                       with_hidden=True)
    return call(adj, feat, params["w1"], params["b1"], params["w2"], params["b2"])


# ------------------------------ driver / test ------------------------------ #

def _lower_median_agg(a_np, h_np):
    """Numpy reference: per-node, per-feature lower median over in-neighbours."""
    n, d = h_np.shape
    out = np.zeros((n, d), np.float32)
    for i in range(n):
        idx = np.nonzero(a_np[i] > 0.5)[0]
        if idx.size:
            s = np.sort(h_np[idx], axis=0)
            out[i] = s[(idx.size - 1) // 2]
    return out


if __name__ == "__main__":
    N, F, HID, OUT = 64, 32, 16, 8      # nodes, in_feats, hids=[16], out_feats

    key = jax.random.PRNGKey(0)
    k1, k2, k3, k4 = jax.random.split(key, 4)

    x = jax.random.normal(k1, (N, F), dtype=jnp.float32)

    # Random sparse directed graph plus self-loops (so no node is isolated).
    adj = (jax.random.uniform(k2, (N, N)) < 0.10).astype(jnp.float32)
    adj = jnp.maximum(adj, jnp.eye(N, dtype=jnp.float32))

    # torch nn.Linear-style parameters, stored transposed: W:(in, out), b:(1, out).
    params = {
        "w1": jax.random.normal(k3, (F, HID), dtype=jnp.float32) / np.sqrt(F),
        "b1": jnp.full((1, HID), 0.01, dtype=jnp.float32),
        "w2": jax.random.normal(k4, (HID, OUT), dtype=jnp.float32) / np.sqrt(HID),
        "b2": jnp.full((1, OUT), -0.01, dtype=jnp.float32),
    }

    out = jax.block_until_ready(median_gcn_forward(adj, x, params))

    # -------- correctness check against a numpy lower-median reference --------
    out_dbg, h1, z1, h2 = [np.asarray(t)
                           for t in median_gcn_forward_debug(adj, x, params)]
    a_np, x_np = np.asarray(adj), np.asarray(x)
    w1, b1 = np.asarray(params["w1"]), np.asarray(params["b1"])
    w2, b2 = np.asarray(params["w2"]), np.asarray(params["b2"])

    # Linear wiring (loose tolerance: MXU f32 matmul vs numpy accumulation order).
    np.testing.assert_allclose(h1, x_np @ w1 + b1, rtol=5e-2, atol=5e-2)
    np.testing.assert_allclose(h2, z1 @ w2 + b2, rtol=5e-2, atol=5e-2)
    # Median aggregation is pure value selection over the kernel's own h values,
    # so it must match the reference exactly.
    np.testing.assert_allclose(
        z1, np.maximum(_lower_median_agg(a_np, h1), 0.0), rtol=0, atol=1e-6)
    np.testing.assert_allclose(
        out_dbg, _lower_median_agg(a_np, h2), rtol=0, atol=1e-6)
    # Production (single-output) kernel agrees with the debug variant.
    np.testing.assert_allclose(np.asarray(out), out_dbg, rtol=0, atol=1e-6)

    print("KERNEL_OK")
</pallas_src>

<mosaic_0001>
module attributes {stable_mosaic.version = 11 : i64} {
  func.func @_median_gcn_kernel(%arg0: memref<64x64xf32, #tpu.memory_space<vmem>>, %arg1: memref<64x32xf32, #tpu.memory_space<vmem>>, %arg2: memref<32x16xf32, #tpu.memory_space<vmem>>, %arg3: memref<1x16xf32, #tpu.memory_space<vmem>>, %arg4: memref<16x8xf32, #tpu.memory_space<vmem>>, %arg5: memref<1x8xf32, #tpu.memory_space<vmem>>, %arg6: memref<64x8xf32, #tpu.memory_space<vmem>>) attributes {dimension_semantics = [], scalar_prefetch = 0 : i64, scratch_operands = 0 : i64, tpu.core_type = #tpu.core_type<tc>} {
    %c0 = arith.constant 0 : index
    %c0_0 = arith.constant 0 : index
    %0 = vector.load %arg0[%c0, %c0_0] : memref<64x64xf32, #tpu.memory_space<vmem>>, vector<64x64xf32>
    %cst = arith.constant 5.000000e-01 : f32
    %1 = vector.broadcast %cst : f32 to vector<64x64xf32>
    %2 = arith.cmpf ogt, %0, %1 : vector<64x64xf32>
    %3 = arith.extui %2 : vector<64x64xi1> to vector<64x64xi32>
    %4 = arith.sitofp %3 : vector<64x64xi32> to vector<64x64xf32>
    %5 = arith.truncf %4 : vector<64x64xf32> to vector<64x64xbf16>
    %6 = arith.extui %2 : vector<64x64xi1> to vector<64x64xi32>
    %7 = arith.sitofp %6 : vector<64x64xi32> to vector<64x64xf32>
    %cst_1 = arith.constant dense<0.000000e+00> : vector<64xf32>
    %8 = vector.multi_reduction <add>, %7, %cst_1 [1] : vector<64x64xf32> to vector<64xf32>
    %9 = vector.shape_cast %8 : vector<64xf32> to vector<64x1xf32>
    %cst_2 = arith.constant 1.000000e+00 : f32
    %10 = vector.broadcast %cst_2 : f32 to vector<64x1xf32>
    %11 = arith.addf %9, %10 : vector<64x1xf32>
    %cst_3 = arith.constant 5.000000e-01 : f32
    %12 = vector.broadcast %cst_3 : f32 to vector<64x1xf32>
    %13 = arith.mulf %11, %12 : vector<64x1xf32>
    %14 = math.floor %13 : vector<64x1xf32>
    %cst_4 = arith.constant 5.000000e-01 : f32
    %15 = vector.broadcast %cst_4 : f32 to vector<64x1xf32>
    %16 = arith.cmpf ogt, %9, %15 : vector<64x1xf32>
    %c0_5 = arith.constant 0 : index
    %c0_6 = arith.constant 0 : index
    %17 = vector.load %arg1[%c0_5, %c0_6] : memref<64x32xf32, #tpu.memory_space<vmem>>, vector<64x32xf32>
    %c0_7 = arith.constant 0 : index
    %c0_8 = arith.constant 0 : index
    %18 = vector.load %arg2[%c0_7, %c0_8] : memref<32x16xf32, #tpu.memory_space<vmem>>, vector<32x16xf32>
    %cst_9 = arith.constant dense<0.000000e+00> : vector<64x16xf32>
    %19 = tpu.matmul %17, %18, %cst_9 {dimension_numbers = #tpu.dot_dimension_numbers<[1], [0], [0], [1], [0, 0, 1, 1], [], []>} : vector<64x32xf32>, vector<32x16xf32>, vector<64x16xf32> -> vector<64x16xf32>
    %c0_10 = arith.constant 0 : index
    %c0_11 = arith.constant 0 : index
    %20 = vector.load %arg3[%c0_10, %c0_11] : memref<1x16xf32, #tpu.memory_space<vmem>>, vector<1x16xf32>
    %21 = vector.broadcast %20 : vector<1x16xf32> to vector<64x16xf32>
    %22 = arith.addf %19, %21 : vector<64x16xf32>
    %cst_12 = arith.constant 0.000000e+00 : f32
    %23 = vector.broadcast %cst_12 : f32 to vector<64x112xf32>
    %24 = tpu.concatenate %22, %23 in 1 : vector<64x16xf32>, vector<64x112xf32> -> vector<64x128xf32>
    %25 = tpu.transpose %24, [1, 0] : vector<64x128xf32> -> vector<128x64xf32>
    %26 = vector.extract_strided_slice %22 {offsets = [0, 0], sizes = [64, 1], strides = [1, 1]} : vector<64x16xf32> to vector<64x1xf32>
    %27 = vector.extract_strided_slice %25 {offsets = [0, 0], sizes = [1, 64], strides = [1, 1]} : vector<128x64xf32> to vector<1x64xf32>
    %28 = vector.broadcast %26 : vector<64x1xf32> to vector<64x64xf32>
    %29 = vector.broadcast %27 : vector<1x64xf32> to vector<64x64xf32>
    %30 = arith.cmpf ole, %28, %29 : vector<64x64xf32>
    %31 = arith.extui %30 : vector<64x64xi1> to vector<64x64xi32>
    %32 = arith.sitofp %31 : vector<64x64xi32> to vector<64x64xf32>
    %33 = vector.extract_strided_slice %22 {offsets = [0, 1], sizes = [64, 1], strides = [1, 1]} : vector<64x16xf32> to vector<64x1xf32>
    %34 = vector.extract_strided_slice %25 {offsets = [1, 0], sizes = [1, 64], strides = [1, 1]} : vector<128x64xf32> to vector<1x64xf32>
    %35 = vector.broadcast %33 : vector<64x1xf32> to vector<64x64xf32>
    %36 = vector.broadcast %34 : vector<1x64xf32> to vector<64x64xf32>
    %37 = arith.cmpf ole, %35, %36 : vector<64x64xf32>
    %38 = arith.extui %37 : vector<64x64xi1> to vector<64x64xi32>
    %39 = arith.sitofp %38 : vector<64x64xi32> to vector<64x64xf32>
    %40 = vector.extract_strided_slice %22 {offsets = [0, 2], sizes = [64, 1], strides = [1, 1]} : vector<64x16xf32> to vector<64x1xf32>
    %41 = vector.extract_strided_slice %25 {offsets = [2, 0], sizes = [1, 64], strides = [1, 1]} : vector<128x64xf32> to vector<1x64xf32>
    %42 = vector.broadcast %40 : vector<64x1xf32> to vector<64x64xf32>
    %43 = vector.broadcast %41 : vector<1x64xf32> to vector<64x64xf32>
    %44 = arith.cmpf ole, %42, %43 : vector<64x64xf32>
    %45 = arith.extui %44 : vector<64x64xi1> to vector<64x64xi32>
    %46 = arith.sitofp %45 : vector<64x64xi32> to vector<64x64xf32>
    %47 = vector.extract_strided_slice %22 {offsets = [0, 3], sizes = [64, 1], strides = [1, 1]} : vector<64x16xf32> to vector<64x1xf32>
    %48 = vector.extract_strided_slice %25 {offsets = [3, 0], sizes = [1, 64], strides = [1, 1]} : vector<128x64xf32> to vector<1x64xf32>
    %49 = vector.broadcast %47 : vector<64x1xf32> to vector<64x64xf32>
    %50 = vector.broadcast %48 : vector<1x64xf32> to vector<64x64xf32>
    %51 = arith.cmpf ole, %49, %50 : vector<64x64xf32>
    %52 = arith.extui %51 : vector<64x64xi1> to vector<64x64xi32>
    %53 = arith.sitofp %52 : vector<64x64xi32> to vector<64x64xf32>
    %54 = vector.extract_strided_slice %22 {offsets = [0, 4], sizes = [64, 1], strides = [1, 1]} : vector<64x16xf32> to vector<64x1xf32>
    %55 = vector.extract_strided_slice %25 {offsets = [4, 0], sizes = [1, 64], strides = [1, 1]} : vector<128x64xf32> to vector<1x64xf32>
    %56 = vector.broadcast %54 : vector<64x1xf32> to vector<64x64xf32>
    %57 = vector.broadcast %55 : vector<1x64xf32> to vector<64x64xf32>
    %58 = arith.cmpf ole, %56, %57 : vector<64x64xf32>
    %59 = arith.extui %58 : vector<64x64xi1> to vector<64x64xi32>
    %60 = arith.sitofp %59 : vector<64x64xi32> to vector<64x64xf32>
    %61 = vector.extract_strided_slice %22 {offsets = [0, 5], sizes = [64, 1], strides = [1, 1]} : vector<64x16xf32> to vector<64x1xf32>
    %62 = vector.extract_strided_slice %25 {offsets = [5, 0], sizes = [1, 64], strides = [1, 1]} : vector<128x64xf32> to vector<1x64xf32>
    %63 = vector.broadcast %61 : vector<64x1xf32> to vector<64x64xf32>
    %64 = vector.broadcast %62 : vector<1x64xf32> to vector<64x64xf32>
    %65 = arith.cmpf ole, %63, %64 : vector<64x64xf32>
    %66 = arith.extui %65 : vector<64x64xi1> to vector<64x64xi32>
    %67 = arith.sitofp %66 : vector<64x64xi32> to vector<64x64xf32>
    %68 = vector.extract_strided_slice %22 {offsets = [0, 6], sizes = [64, 1], strides = [1, 1]} : vector<64x16xf32> to vector<64x1xf32>
    %69 = vector.extract_strided_slice %25 {offsets = [6, 0], sizes = [1, 64], strides = [1, 1]} : vector<128x64xf32> to vector<1x64xf32>
    %70 = vector.broadcast %68 : vector<64x1xf32> to vector<64x64xf32>
    %71 = vector.broadcast %69 : vector<1x64xf32> to vector<64x64xf32>
    %72 = arith.cmpf ole, %70, %71 : vector<64x64xf32>
    %73 = arith.extui %72 : vector<64x64xi1> to vector<64x64xi32>
    %74 = arith.sitofp %73 : vector<64x64xi32> to vector<64x64xf32>
    %75 = vector.extract_strided_slice %22 {offsets = [0, 7], sizes = [64, 1], strides = [1, 1]} : vector<64x16xf32> to vector<64x1xf32>
    %76 = vector.extract_strided_slice %25 {offsets = [7, 0], sizes = [1, 64], strides = [1, 1]} : vector<128x64xf32> to vector<1x64xf32>
    %77 = vector.broadcast %75 : vector<64x1xf32> to vector<64x64xf32>
    %78 = vector.broadcast %76 : vector<1x64xf32> to vector<64x64xf32>
    %79 = arith.cmpf ole, %77, %78 : vector<64x64xf32>
    %80 = arith.extui %79 : vector<64x64xi1> to vector<64x64xi32>
    %81 = arith.sitofp %80 : vector<64x64xi32> to vector<64x64xf32>
    %82 = vector.extract_strided_slice %22 {offsets = [0, 8], sizes = [64, 1], strides = [1, 1]} : vector<64x16xf32> to vector<64x1xf32>
    %83 = vector.extract_strided_slice %25 {offsets = [8, 0], sizes = [1, 64], strides = [1, 1]} : vector<128x64xf32> to vector<1x64xf32>
    %84 = vector.broadcast %82 : vector<64x1xf32> to vector<64x64xf32>
    %85 = vector.broadcast %83 : vector<1x64xf32> to vector<64x64xf32>
    %86 = arith.cmpf ole, %84, %85 : vector<64x64xf32>
    %87 = arith.extui %86 : vector<64x64xi1> to vector<64x64xi32>
    %88 = arith.sitofp %87 : vector<64x64xi32> to vector<64x64xf32>
    %89 = vector.extract_strided_slice %22 {offsets = [0, 9], sizes = [64, 1], strides = [1, 1]} : vector<64x16xf32> to vector<64x1xf32>
    %90 = vector.extract_strided_slice %25 {offsets = [9, 0], sizes = [1, 64], strides = [1, 1]} : vector<128x64xf32> to vector<1x64xf32>
    %91 = vector.broadcast %89 : vector<64x1xf32> to vector<64x64xf32>
    %92 = vector.broadcast %90 : vector<1x64xf32> to vector<64x64xf32>
    %93 = arith.cmpf ole, %91, %92 : vector<64x64xf32>
    %94 = arith.extui %93 : vector<64x64xi1> to vector<64x64xi32>
    %95 = arith.sitofp %94 : vector<64x64xi32> to vector<64x64xf32>
    %96 = vector.extract_strided_slice %22 {offsets = [0, 10], sizes = [64, 1], strides = [1, 1]} : vector<64x16xf32> to vector<64x1xf32>
    %97 = vector.extract_strided_slice %25 {offsets = [10, 0], sizes = [1, 64], strides = [1, 1]} : vector<128x64xf32> to vector<1x64xf32>
    %98 = vector.broadcast %96 : vector<64x1xf32> to vector<64x64xf32>
    %99 = vector.broadcast %97 : vector<1x64xf32> to vector<64x64xf32>
    %100 = arith.cmpf ole, %98, %99 : vector<64x64xf32>
    %101 = arith.extui %100 : vector<64x64xi1> to vector<64x64xi32>
    %102 = arith.sitofp %101 : vector<64x64xi32> to vector<64x64xf32>
    %103 = vector.extract_strided_slice %22 {offsets = [0, 11], sizes = [64, 1], strides = [1, 1]} : vector<64x16xf32> to vector<64x1xf32>
    %104 = vector.extract_strided_slice %25 {offsets = [11, 0], sizes = [1, 64], strides = [1, 1]} : vector<128x64xf32> to vector<1x64xf32>
    %105 = vector.broadcast %103 : vector<64x1xf32> to vector<64x64xf32>
    %106 = vector.broadcast %104 : vector<1x64xf32> to vector<64x64xf32>
    %107 = arith.cmpf ole, %105, %106 : vector<64x64xf32>
    %108 = arith.extui %107 : vector<64x64xi1> to vector<64x64xi32>
    %109 = arith.sitofp %108 : vector<64x64xi32> to vector<64x64xf32>
    %110 = vector.extract_strided_slice %22 {offsets = [0, 12], sizes = [64, 1], strides = [1, 1]} : vector<64x16xf32> to vector<64x1xf32>
    %111 = vector.extract_strided_slice %25 {offsets = [12, 0], sizes = [1, 64], strides = [1, 1]} : vector<128x64xf32> to vector<1x64xf32>
    %112 = vector.broadcast %110 : vector<64x1xf32> to vector<64x64xf32>
    %113 = vector.broadcast %111 : vector<1x64xf32> to vector<64x64xf32>
    %114 = arith.cmpf ole, %112, %113 : vector<64x64xf32>
    %115 = arith.extui %114 : vector<64x64xi1> to vector<64x64xi32>
    %116 = arith.sitofp %115 : vector<64x64xi32> to vector<64x64xf32>
    %117 = vector.extract_strided_slice %22 {offsets = [0, 13], sizes = [64, 1], strides = [1, 1]} : vector<64x16xf32> to vector<64x1xf32>
    %118 = vector.extract_strided_slice %25 {offsets = [13, 0], sizes = [1, 64], strides = [1, 1]} : vector<128x64xf32> to vector<1x64xf32>
    %119 = vector.broadcast %117 : vector<64x1xf32> to vector<64x64xf32>
    %120 = vector.broadcast %118 : vector<1x64xf32> to vector<64x64xf32>
    %121 = arith.cmpf ole, %119, %120 : vector<64x64xf32>
    %122 = arith.extui %121 : vector<64x64xi1> to vector<64x64xi32>
    %123 = arith.sitofp %122 : vector<64x64xi32> to vector<64x64xf32>
    %124 = vector.extract_strided_slice %22 {offsets = [0, 14], sizes = [64, 1], strides = [1, 1]} : vector<64x16xf32> to vector<64x1xf32>
    %125 = vector.extract_strided_slice %25 {offsets = [14, 0], sizes = [1, 64], strides = [1, 1]} : vector<128x64xf32> to vector<1x64xf32>
    %126 = vector.broadcast %124 : vector<64x1xf32> to vector<64x64xf32>
    %127 = vector.broadcast %125 : vector<1x64xf32> to vector<64x64xf32>
    %128 = arith.cmpf ole, %126, %127 : vector<64x64xf32>
    %129 = arith.extui %128 : vector<64x64xi1> to vector<64x64xi32>
    %130 = arith.sitofp %129 : vector<64x64xi32> to vector<64x64xf32>
    %131 = vector.extract_strided_slice %22 {offsets = [0, 15], sizes = [64, 1], strides = [1, 1]} : vector<64x16xf32> to vector<64x1xf32>
    %132 = vector.extract_strided_slice %25 {offsets = [15, 0], sizes = [1, 64], strides = [1, 1]} : vector<128x64xf32> to vector<1x64xf32>
    %133 = vector.broadcast %131 : vector<64x1xf32> to vector<64x64xf32>
    %134 = vector.broadcast %132 : vector<1x64xf32> to vector<64x64xf32>
    %135 = arith.cmpf ole, %133, %134 : vector<64x64xf32>
    %136 = arith.extui %135 : vector<64x64xi1> to vector<64x64xi32>
    %137 = arith.sitofp %136 : vector<64x64xi32> to vector<64x64xf32>
    %138 = tpu.concatenate %32, %39, %46, %53, %60, %67, %74, %81, %88, %95, %102, %109, %116, %123, %130, %137 in 1 : vector<64x64xf32>, vector<64x64xf32>, vector<64x64xf32>, vector<64x64xf32>, vector<64x64xf32>, vector<64x64xf32>, vector<64x64xf32>, vector<64x64xf32>, vector<64x64xf32>, vector<64x64xf32>, vector<64x64xf32>, vector<64x64xf32>, vector<64x64xf32>, vector<64x64xf32>, vector<64x64xf32>, vector<64x64xf32> -> vector<64x1024xf32>
    %139 = arith.truncf %138 : vector<64x1024xf32> to vector<64x1024xbf16>
    %cst_13 = arith.constant dense<0.000000e+00> : vector<64x1024xf32>
    %140 = tpu.matmul %5, %139, %cst_13 {dimension_numbers = #tpu.dot_dimension_numbers<[1], [0], [0], [1], [0, 0, 1, 1], [], []>} : vector<64x64xbf16>, vector<64x1024xbf16>, vector<64x1024xf32> -> vector<64x1024xf32>
    %141 = vector.extract_strided_slice %140 {offsets = [0, 0], sizes = [64, 64], strides = [1, 1]} : vector<64x1024xf32> to vector<64x64xf32>
    %142 = vector.broadcast %14 : vector<64x1xf32> to vector<64x64xf32>
    %143 = arith.cmpf oge, %141, %142 : vector<64x64xf32>
    %144 = arith.andi %2, %143 : vector<64x64xi1>
    %145 = vector.extract_strided_slice %25 {offsets = [0, 0], sizes = [1, 64], strides = [1, 1]} : vector<128x64xf32> to vector<1x64xf32>
    %cst_14 = arith.constant 0x7F800000 : f32
    %146 = vector.shape_cast %145 : vector<1x64xf32> to vector<1x64xf32>
    %147 = vector.broadcast %146 : vector<1x64xf32> to vector<64x64xf32>
    %148 = vector.broadcast %cst_14 : f32 to vector<64x64xf32>
    %149 = arith.select %144, %147, %148 : vector<64x64xi1>, vector<64x64xf32>
    %cst_15 = arith.constant dense<0x7F800000> : vector<64xf32>
    %150 = vector.multi_reduction <minimumf>, %149, %cst_15 [1] : vector<64x64xf32> to vector<64xf32>
    %151 = vector.shape_cast %150 : vector<64xf32> to vector<64x1xf32>
    %152 = vector.extract_strided_slice %140 {offsets = [0, 64], sizes = [64, 64], strides = [1, 1]} : vector<64x1024xf32> to vector<64x64xf32>
    %153 = vector.broadcast %14 : vector<64x1xf32> to vector<64x64xf32>
    %154 = arith.cmpf oge, %152, %153 : vector<64x64xf32>
    %155 = arith.andi %2, %154 : vector<64x64xi1>
    %156 = vector.extract_strided_slice %25 {offsets = [1, 0], sizes = [1, 64], strides = [1, 1]} : vector<128x64xf32> to vector<1x64xf32>
    %cst_16 = arith.constant 0x7F800000 : f32
    %157 = vector.shape_cast %156 : vector<1x64xf32> to vector<1x64xf32>
    %158 = vector.broadcast %157 : vector<1x64xf32> to vector<64x64xf32>
    %159 = vector.broadcast %cst_16 : f32 to vector<64x64xf32>
    %160 = arith.select %155, %158, %159 : vector<64x64xi1>, vector<64x64xf32>
    %cst_17 = arith.constant dense<0x7F800000> : vector<64xf32>
    %161 = vector.multi_reduction <minimumf>, %160, %cst_17 [1] : vector<64x64xf32> to vector<64xf32>
    %162 = vector.shape_cast %161 : vector<64xf32> to vector<64x1xf32>
    %163 = vector.extract_strided_slice %140 {offsets = [0, 128], sizes = [64, 64], strides = [1, 1]} : vector<64x1024xf32> to vector<64x64xf32>
    %164 = vector.broadcast %14 : vector<64x1xf32> to vector<64x64xf32>
    %165 = arith.cmpf oge, %163, %164 : vector<64x64xf32>
    %166 = arith.andi %2, %165 : vector<64x64xi1>
    %167 = vector.extract_strided_slice %25 {offsets = [2, 0], sizes = [1, 64], strides = [1, 1]} : vector<128x64xf32> to vector<1x64xf32>
    %cst_18 = arith.constant 0x7F800000 : f32
    %168 = vector.shape_cast %167 : vector<1x64xf32> to vector<1x64xf32>
    %169 = vector.broadcast %168 : vector<1x64xf32> to vector<64x64xf32>
    %170 = vector.broadcast %cst_18 : f32 to vector<64x64xf32>
    %171 = arith.select %166, %169, %170 : vector<64x64xi1>, vector<64x64xf32>
    %cst_19 = arith.constant dense<0x7F800000> : vector<64xf32>
    %172 = vector.multi_reduction <minimumf>, %171, %cst_19 [1] : vector<64x64xf32> to vector<64xf32>
    %173 = vector.shape_cast %172 : vector<64xf32> to vector<64x1xf32>
    %174 = vector.extract_strided_slice %140 {offsets = [0, 192], sizes = [64, 64], strides = [1, 1]} : vector<64x1024xf32> to vector<64x64xf32>
    %175 = vector.broadcast %14 : vector<64x1xf32> to vector<64x64xf32>
    %176 = arith.cmpf oge, %174, %175 : vector<64x64xf32>
    %177 = arith.andi %2, %176 : vector<64x64xi1>
    %178 = vector.extract_strided_slice %25 {offsets = [3, 0], sizes = [1, 64], strides = [1, 1]} : vector<128x64xf32> to vector<1x64xf32>
    %cst_20 = arith.constant 0x7F800000 : f32
    %179 = vector.shape_cast %178 : vector<1x64xf32> to vector<1x64xf32>
    %180 = vector.broadcast %179 : vector<1x64xf32> to vector<64x64xf32>
    %181 = vector.broadcast %cst_20 : f32 to vector<64x64xf32>
    %182 = arith.select %177, %180, %181 : vector<64x64xi1>, vector<64x64xf32>
    %cst_21 = arith.constant dense<0x7F800000> : vector<64xf32>
    %183 = vector.multi_reduction <minimumf>, %182, %cst_21 [1] : vector<64x64xf32> to vector<64xf32>
    %184 = vector.shape_cast %183 : vector<64xf32> to vector<64x1xf32>
    %185 = vector.extract_strided_slice %140 {offsets = [0, 256], sizes = [64, 64], strides = [1, 1]} : vector<64x1024xf32> to vector<64x64xf32>
    %186 = vector.broadcast %14 : vector<64x1xf32> to vector<64x64xf32>
    %187 = arith.cmpf oge, %185, %186 : vector<64x64xf32>
    %188 = arith.andi %2, %187 : vector<64x64xi1>
    %189 = vector.extract_strided_slice %25 {offsets = [4, 0], sizes = [1, 64], strides = [1, 1]} : vector<128x64xf32> to vector<1x64xf32>
    %cst_22 = arith.constant 0x7F800000 : f32
    %190 = vector.shape_cast %189 : vector<1x64xf32> to vector<1x64xf32>
    %191 = vector.broadcast %190 : vector<1x64xf32> to vector<64x64xf32>
    %192 = vector.broadcast %cst_22 : f32 to vector<64x64xf32>
    %193 = arith.select %188, %191, %192 : vector<64x64xi1>, vector<64x64xf32>
    %cst_23 = arith.constant dense<0x7F800000> : vector<64xf32>
    %194 = vector.multi_reduction <minimumf>, %193, %cst_23 [1] : vector<64x64xf32> to vector<64xf32>
    %195 = vector.shape_cast %194 : vector<64xf32> to vector<64x1xf32>
    %196 = vector.extract_strided_slice %140 {offsets = [0, 320], sizes = [64, 64], strides = [1, 1]} : vector<64x1024xf32> to vector<64x64xf32>
    %197 = vector.broadcast %14 : vector<64x1xf32> to vector<64x64xf32>
    %198 = arith.cmpf oge, %196, %197 : vector<64x64xf32>
    %199 = arith.andi %2, %198 : vector<64x64xi1>
    %200 = vector.extract_strided_slice %25 {offsets = [5, 0], sizes = [1, 64], strides = [1, 1]} : vector<128x64xf32> to vector<1x64xf32>
    %cst_24 = arith.constant 0x7F800000 : f32
    %201 = vector.shape_cast %200 : vector<1x64xf32> to vector<1x64xf32>
    %202 = vector.broadcast %201 : vector<1x64xf32> to vector<64x64xf32>
    %203 = vector.broadcast %cst_24 : f32 to vector<64x64xf32>
    %204 = arith.select %199, %202, %203 : vector<64x64xi1>, vector<64x64xf32>
    %cst_25 = arith.constant dense<0x7F800000> : vector<64xf32>
    %205 = vector.multi_reduction <minimumf>, %204, %cst_25 [1] : vector<64x64xf32> to vector<64xf32>
    %206 = vector.shape_cast %205 : vector<64xf32> to vector<64x1xf32>
    %207 = vector.extract_strided_slice %140 {offsets = [0, 384], sizes = [64, 64], strides = [1, 1]} : vector<64x1024xf32> to vector<64x64xf32>
    %208 = vector.broadcast %14 : vector<64x1xf32> to vector<64x64xf32>
    %209 = arith.cmpf oge, %207, %208 : vector<64x64xf32>
    %210 = arith.andi %2, %209 : vector<64x64xi1>
    %211 = vector.extract_strided_slice %25 {offsets = [6, 0], sizes = [1, 64], strides = [1, 1]} : vector<128x64xf32> to vector<1x64xf32>
    %cst_26 = arith.constant 0x7F800000 : f32
    %212 = vector.shape_cast %211 : vector<1x64xf32> to vector<1x64xf32>
    %213 = vector.broadcast %212 : vector<1x64xf32> to vector<64x64xf32>
    %214 = vector.broadcast %cst_26 : f32 to vector<64x64xf32>
    %215 = arith.select %210, %213, %214 : vector<64x64xi1>, vector<64x64xf32>
    %cst_27 = arith.constant dense<0x7F800000> : vector<64xf32>
    %216 = vector.multi_reduction <minimumf>, %215, %cst_27 [1] : vector<64x64xf32> to vector<64xf32>
    %217 = vector.shape_cast %216 : vector<64xf32> to vector<64x1xf32>
    %218 = vector.extract_strided_slice %140 {offsets = [0, 448], sizes = [64, 64], strides = [1, 1]} : vector<64x1024xf32> to vector<64x64xf32>
    %219 = vector.broadcast %14 : vector<64x1xf32> to vector<64x64xf32>
    %220 = arith.cmpf oge, %218, %219 : vector<64x64xf32>
    %221 = arith.andi %2, %220 : vector<64x64xi1>
    %222 = vector.extract_strided_slice %25 {offsets = [7, 0], sizes = [1, 64], strides = [1, 1]} : vector<128x64xf32> to vector<1x64xf32>
    %cst_28 = arith.constant 0x7F800000 : f32
    %223 = vector.shape_cast %222 : vector<1x64xf32> to vector<1x64xf32>
    %224 = vector.broadcast %223 : vector<1x64xf32> to vector<64x64xf32>
    %225 = vector.broadcast %cst_28 : f32 to vector<64x64xf32>
    %226 = arith.select %221, %224, %225 : vector<64x64xi1>, vector<64x64xf32>
    %cst_29 = arith.constant dense<0x7F800000> : vector<64xf32>
    %227 = vector.multi_reduction <minimumf>, %226, %cst_29 [1] : vector<64x64xf32> to vector<64xf32>
    %228 = vector.shape_cast %227 : vector<64xf32> to vector<64x1xf32>
    %229 = vector.extract_strided_slice %140 {offsets = [0, 512], sizes = [64, 64], strides = [1, 1]} : vector<64x1024xf32> to vector<64x64xf32>
    %230 = vector.broadcast %14 : vector<64x1xf32> to vector<64x64xf32>
    %231 = arith.cmpf oge, %229, %230 : vector<64x64xf32>
    %232 = arith.andi %2, %231 : vector<64x64xi1>
    %233 = vector.extract_strided_slice %25 {offsets = [8, 0], sizes = [1, 64], strides = [1, 1]} : vector<128x64xf32> to vector<1x64xf32>
    %cst_30 = arith.constant 0x7F800000 : f32
    %234 = vector.shape_cast %233 : vector<1x64xf32> to vector<1x64xf32>
    %235 = vector.broadcast %234 : vector<1x64xf32> to vector<64x64xf32>
    %236 = vector.broadcast %cst_30 : f32 to vector<64x64xf32>
    %237 = arith.select %232, %235, %236 : vector<64x64xi1>, vector<64x64xf32>
    %cst_31 = arith.constant dense<0x7F800000> : vector<64xf32>
    %238 = vector.multi_reduction <minimumf>, %237, %cst_31 [1] : vector<64x64xf32> to vector<64xf32>
    %239 = vector.shape_cast %238 : vector<64xf32> to vector<64x1xf32>
    %240 = vector.extract_strided_slice %140 {offsets = [0, 576], sizes = [64, 64], strides = [1, 1]} : vector<64x1024xf32> to vector<64x64xf32>
    %241 = vector.broadcast %14 : vector<64x1xf32> to vector<64x64xf32>
    %242 = arith.cmpf oge, %240, %241 : vector<64x64xf32>
    %243 = arith.andi %2, %242 : vector<64x64xi1>
    %244 = vector.extract_strided_slice %25 {offsets = [9, 0], sizes = [1, 64], strides = [1, 1]} : vector<128x64xf32> to vector<1x64xf32>
    %cst_32 = arith.constant 0x7F800000 : f32
    %245 = vector.shape_cast %244 : vector<1x64xf32> to vector<1x64xf32>
    %246 = vector.broadcast %245 : vector<1x64xf32> to vector<64x64xf32>
    %247 = vector.broadcast %cst_32 : f32 to vector<64x64xf32>
    %248 = arith.select %243, %246, %247 : vector<64x64xi1>, vector<64x64xf32>
    %cst_33 = arith.constant dense<0x7F800000> : vector<64xf32>
    %249 = vector.multi_reduction <minimumf>, %248, %cst_33 [1] : vector<64x64xf32> to vector<64xf32>
    %250 = vector.shape_cast %249 : vector<64xf32> to vector<64x1xf32>
    %251 = vector.extract_strided_slice %140 {offsets = [0, 640], sizes = [64, 64], strides = [1, 1]} : vector<64x1024xf32> to vector<64x64xf32>
    %252 = vector.broadcast %14 : vector<64x1xf32> to vector<64x64xf32>
    %253 = arith.cmpf oge, %251, %252 : vector<64x64xf32>
    %254 = arith.andi %2, %253 : vector<64x64xi1>
    %255 = vector.extract_strided_slice %25 {offsets = [10, 0], sizes = [1, 64], strides = [1, 1]} : vector<128x64xf32> to vector<1x64xf32>
    %cst_34 = arith.constant 0x7F800000 : f32
    %256 = vector.shape_cast %255 : vector<1x64xf32> to vector<1x64xf32>
    %257 = vector.broadcast %256 : vector<1x64xf32> to vector<64x64xf32>
    %258 = vector.broadcast %cst_34 : f32 to vector<64x64xf32>
    %259 = arith.select %254, %257, %258 : vector<64x64xi1>, vector<64x64xf32>
    %cst_35 = arith.constant dense<0x7F800000> : vector<64xf32>
    %260 = vector.multi_reduction <minimumf>, %259, %cst_35 [1] : vector<64x64xf32> to vector<64xf32>
    %261 = vector.shape_cast %260 : vector<64xf32> to vector<64x1xf32>
    %262 = vector.extract_strided_slice %140 {offsets = [0, 704], sizes = [64, 64], strides = [1, 1]} : vector<64x1024xf32> to vector<64x64xf32>
    %263 = vector.broadcast %14 : vector<64x1xf32> to vector<64x64xf32>
    %264 = arith.cmpf oge, %262, %263 : vector<64x64xf32>
    %265 = arith.andi %2, %264 : vector<64x64xi1>
    %266 = vector.extract_strided_slice %25 {offsets = [11, 0], sizes = [1, 64], strides = [1, 1]} : vector<128x64xf32> to vector<1x64xf32>
    %cst_36 = arith.constant 0x7F800000 : f32
    %267 = vector.shape_cast %266 : vector<1x64xf32> to vector<1x64xf32>
    %268 = vector.broadcast %267 : vector<1x64xf32> to vector<64x64xf32>
    %269 = vector.broadcast %cst_36 : f32 to vector<64x64xf32>
    %270 = arith.select %265, %268, %269 : vector<64x64xi1>, vector<64x64xf32>
    %cst_37 = arith.constant dense<0x7F800000> : vector<64xf32>
    %271 = vector.multi_reduction <minimumf>, %270, %cst_37 [1] : vector<64x64xf32> to vector<64xf32>
    %272 = vector.shape_cast %271 : vector<64xf32> to vector<64x1xf32>
    %273 = vector.extract_strided_slice %140 {offsets = [0, 768], sizes = [64, 64], strides = [1, 1]} : vector<64x1024xf32> to vector<64x64xf32>
    %274 = vector.broadcast %14 : vector<64x1xf32> to vector<64x64xf32>
    %275 = arith.cmpf oge, %273, %274 : vector<64x64xf32>
    %276 = arith.andi %2, %275 : vector<64x64xi1>
    %277 = vector.extract_strided_slice %25 {offsets = [12, 0], sizes = [1, 64], strides = [1, 1]} : vector<128x64xf32> to vector<1x64xf32>
    %cst_38 = arith.constant 0x7F800000 : f32
    %278 = vector.shape_cast %277 : vector<1x64xf32> to vector<1x64xf32>
    %279 = vector.broadcast %278 : vector<1x64xf32> to vector<64x64xf32>
    %280 = vector.broadcast %cst_38 : f32 to vector<64x64xf32>
    %281 = arith.select %276, %279, %280 : vector<64x64xi1>, vector<64x64xf32>
    %cst_39 = arith.constant dense<0x7F800000> : vector<64xf32>
    %282 = vector.multi_reduction <minimumf>, %281, %cst_39 [1] : vector<64x64xf32> to vector<64xf32>
    %283 = vector.shape_cast %282 : vector<64xf32> to vector<64x1xf32>
    %284 = vector.extract_strided_slice %140 {offsets = [0, 832], sizes = [64, 64], strides = [1, 1]} : vector<64x1024xf32> to vector<64x64xf32>
    %285 = vector.broadcast %14 : vector<64x1xf32> to vector<64x64xf32>
    %286 = arith.cmpf oge, %284, %285 : vector<64x64xf32>
    %287 = arith.andi %2, %286 : vector<64x64xi1>
    %288 = vector.extract_strided_slice %25 {offsets = [13, 0], sizes = [1, 64], strides = [1, 1]} : vector<128x64xf32> to vector<1x64xf32>
    %cst_40 = arith.constant 0x7F800000 : f32
    %289 = vector.shape_cast %288 : vector<1x64xf32> to vector<1x64xf32>
    %290 = vector.broadcast %289 : vector<1x64xf32> to vector<64x64xf32>
    %291 = vector.broadcast %cst_40 : f32 to vector<64x64xf32>
    %292 = arith.select %287, %290, %291 : vector<64x64xi1>, vector<64x64xf32>
    %cst_41 = arith.constant dense<0x7F800000> : vector<64xf32>
    %293 = vector.multi_reduction <minimumf>, %292, %cst_41 [1] : vector<64x64xf32> to vector<64xf32>
    %294 = vector.shape_cast %293 : vector<64xf32> to vector<64x1xf32>
    %295 = vector.extract_strided_slice %140 {offsets = [0, 896], sizes = [64, 64], strides = [1, 1]} : vector<64x1024xf32> to vector<64x64xf32>
    %296 = vector.broadcast %14 : vector<64x1xf32> to vector<64x64xf32>
    %297 = arith.cmpf oge, %295, %296 : vector<64x64xf32>
    %298 = arith.andi %2, %297 : vector<64x64xi1>
    %299 = vector.extract_strided_slice %25 {offsets = [14, 0], sizes = [1, 64], strides = [1, 1]} : vector<128x64xf32> to vector<1x64xf32>
    %cst_42 = arith.constant 0x7F800000 : f32
    %300 = vector.shape_cast %299 : vector<1x64xf32> to vector<1x64xf32>
    %301 = vector.broadcast %300 : vector<1x64xf32> to vector<64x64xf32>
    %302 = vector.broadcast %cst_42 : f32 to vector<64x64xf32>
    %303 = arith.select %298, %301, %302 : vector<64x64xi1>, vector<64x64xf32>
    %cst_43 = arith.constant dense<0x7F800000> : vector<64xf32>
    %304 = vector.multi_reduction <minimumf>, %303, %cst_43 [1] : vector<64x64xf32> to vector<64xf32>
    %305 = vector.shape_cast %304 : vector<64xf32> to vector<64x1xf32>
    %306 = vector.extract_strided_slice %140 {offsets = [0, 960], sizes = [64, 64], strides = [1, 1]} : vector<64x1024xf32> to vector<64x64xf32>
    %307 = vector.broadcast %14 : vector<64x1xf32> to vector<64x64xf32>
    %308 = arith.cmpf oge, %306, %307 : vector<64x64xf32>
    %309 = arith.andi %2, %308 : vector<64x64xi1>
    %310 = vector.extract_strided_slice %25 {offsets = [15, 0], sizes = [1, 64], strides = [1, 1]} : vector<128x64xf32> to vector<1x64xf32>
    %cst_44 = arith.constant 0x7F800000 : f32
    %311 = vector.shape_cast %310 : vector<1x64xf32> to vector<1x64xf32>
    %312 = vector.broadcast %311 : vector<1x64xf32> to vector<64x64xf32>
    %313 = vector.broadcast %cst_44 : f32 to vector<64x64xf32>
    %314 = arith.select %309, %312, %313 : vector<64x64xi1>, vector<64x64xf32>
    %cst_45 = arith.constant dense<0x7F800000> : vector<64xf32>
    %315 = vector.multi_reduction <minimumf>, %314, %cst_45 [1] : vector<64x64xf32> to vector<64xf32>
    %316 = vector.shape_cast %315 : vector<64xf32> to vector<64x1xf32>
    %317 = tpu.concatenate %151, %162, %173, %184, %195, %206, %217, %228, %239, %250, %261, %272, %283, %294, %305, %316 in 1 : vector<64x1xf32>, vector<64x1xf32>, vector<64x1xf32>, vector<64x1xf32>, vector<64x1xf32>, vector<64x1xf32>, vector<64x1xf32>, vector<64x1xf32>, vector<64x1xf32>, vector<64x1xf32>, vector<64x1xf32>, vector<64x1xf32>, vector<64x1xf32>, vector<64x1xf32>, vector<64x1xf32>, vector<64x1xf32> -> vector<64x16xf32>
    %cst_46 = arith.constant 0.000000e+00 : f32
    %318 = vector.shape_cast %16 : vector<64x1xi1> to vector<64x1xi1>
    %319 = vector.broadcast %318 : vector<64x1xi1> to vector<64x16xi1>
    %320 = vector.broadcast %cst_46 : f32 to vector<64x16xf32>
    %321 = arith.select %319, %317, %320 : vector<64x16xi1>, vector<64x16xf32>
    %cst_47 = arith.constant 0.000000e+00 : f32
    %322 = vector.broadcast %cst_47 : f32 to vector<64x16xf32>
    %323 = arith.maximumf %321, %322 : vector<64x16xf32>
    %c0_48 = arith.constant 0 : index
    %c0_49 = arith.constant 0 : index
    %324 = vector.load %arg4[%c0_48, %c0_49] : memref<16x8xf32, #tpu.memory_space<vmem>>, vector<16x8xf32>
    %cst_50 = arith.constant dense<0.000000e+00> : vector<64x8xf32>
    %325 = tpu.matmul %323, %324, %cst_50 {dimension_numbers = #tpu.dot_dimension_numbers<[1], [0], [0], [1], [0, 0, 1, 1], [], []>} : vector<64x16xf32>, vector<16x8xf32>, vector<64x8xf32> -> vector<64x8xf32>
    %c0_51 = arith.constant 0 : index
    %c0_52 = arith.constant 0 : index
    %326 = vector.load %arg5[%c0_51, %c0_52] : memref<1x8xf32, #tpu.memory_space<vmem>>, vector<1x8xf32>
    %327 = vector.broadcast %326 : vector<1x8xf32> to vector<64x8xf32>
    %328 = arith.addf %325, %327 : vector<64x8xf32>
    %cst_53 = arith.constant 0.000000e+00 : f32
    %329 = vector.broadcast %cst_53 : f32 to vector<64x120xf32>
    %330 = tpu.concatenate %328, %329 in 1 : vector<64x8xf32>, vector<64x120xf32> -> vector<64x128xf32>
    %331 = tpu.transpose %330, [1, 0] : vector<64x128xf32> -> vector<128x64xf32>
    %332 = vector.extract_strided_slice %328 {offsets = [0, 0], sizes = [64, 1], strides = [1, 1]} : vector<64x8xf32> to vector<64x1xf32>
    %333 = vector.extract_strided_slice %331 {offsets = [0, 0], sizes = [1, 64], strides = [1, 1]} : vector<128x64xf32> to vector<1x64xf32>
    %334 = vector.broadcast %332 : vector<64x1xf32> to vector<64x64xf32>
    %335 = vector.broadcast %333 : vector<1x64xf32> to vector<64x64xf32>
    %336 = arith.cmpf ole, %334, %335 : vector<64x64xf32>
    %337 = arith.extui %336 : vector<64x64xi1> to vector<64x64xi32>
    %338 = arith.sitofp %337 : vector<64x64xi32> to vector<64x64xf32>
    %339 = vector.extract_strided_slice %328 {offsets = [0, 1], sizes = [64, 1], strides = [1, 1]} : vector<64x8xf32> to vector<64x1xf32>
    %340 = vector.extract_strided_slice %331 {offsets = [1, 0], sizes = [1, 64], strides = [1, 1]} : vector<128x64xf32> to vector<1x64xf32>
    %341 = vector.broadcast %339 : vector<64x1xf32> to vector<64x64xf32>
    %342 = vector.broadcast %340 : vector<1x64xf32> to vector<64x64xf32>
    %343 = arith.cmpf ole, %341, %342 : vector<64x64xf32>
    %344 = arith.extui %343 : vector<64x64xi1> to vector<64x64xi32>
    %345 = arith.sitofp %344 : vector<64x64xi32> to vector<64x64xf32>
    %346 = vector.extract_strided_slice %328 {offsets = [0, 2], sizes = [64, 1], strides = [1, 1]} : vector<64x8xf32> to vector<64x1xf32>
    %347 = vector.extract_strided_slice %331 {offsets = [2, 0], sizes = [1, 64], strides = [1, 1]} : vector<128x64xf32> to vector<1x64xf32>
    %348 = vector.broadcast %346 : vector<64x1xf32> to vector<64x64xf32>
    %349 = vector.broadcast %347 : vector<1x64xf32> to vector<64x64xf32>
    %350 = arith.cmpf ole, %348, %349 : vector<64x64xf32>
    %351 = arith.extui %350 : vector<64x64xi1> to vector<64x64xi32>
    %352 = arith.sitofp %351 : vector<64x64xi32> to vector<64x64xf32>
    %353 = vector.extract_strided_slice %328 {offsets = [0, 3], sizes = [64, 1], strides = [1, 1]} : vector<64x8xf32> to vector<64x1xf32>
    %354 = vector.extract_strided_slice %331 {offsets = [3, 0], sizes = [1, 64], strides = [1, 1]} : vector<128x64xf32> to vector<1x64xf32>
    %355 = vector.broadcast %353 : vector<64x1xf32> to vector<64x64xf32>
    %356 = vector.broadcast %354 : vector<1x64xf32> to vector<64x64xf32>
    %357 = arith.cmpf ole, %355, %356 : vector<64x64xf32>
    %358 = arith.extui %357 : vector<64x64xi1> to vector<64x64xi32>
    %359 = arith.sitofp %358 : vector<64x64xi32> to vector<64x64xf32>
    %360 = vector.extract_strided_slice %328 {offsets = [0, 4], sizes = [64, 1], strides = [1, 1]} : vector<64x8xf32> to vector<64x1xf32>
    %361 = vector.extract_strided_slice %331 {offsets = [4, 0], sizes = [1, 64], strides = [1, 1]} : vector<128x64xf32> to vector<1x64xf32>
    %362 = vector.broadcast %360 : vector<64x1xf32> to vector<64x64xf32>
    %363 = vector.broadcast %361 : vector<1x64xf32> to vector<64x64xf32>
    %364 = arith.cmpf ole, %362, %363 : vector<64x64xf32>
    %365 = arith.extui %364 : vector<64x64xi1> to vector<64x64xi32>
    %366 = arith.sitofp %365 : vector<64x64xi32> to vector<64x64xf32>
    %367 = vector.extract_strided_slice %328 {offsets = [0, 5], sizes = [64, 1], strides = [1, 1]} : vector<64x8xf32> to vector<64x1xf32>
    %368 = vector.extract_strided_slice %331 {offsets = [5, 0], sizes = [1, 64], strides = [1, 1]} : vector<128x64xf32> to vector<1x64xf32>
    %369 = vector.broadcast %367 : vector<64x1xf32> to vector<64x64xf32>
    %370 = vector.broadcast %368 : vector<1x64xf32> to vector<64x64xf32>
    %371 = arith.cmpf ole, %369, %370 : vector<64x64xf32>
    %372 = arith.extui %371 : vector<64x64xi1> to vector<64x64xi32>
    %373 = arith.sitofp %372 : vector<64x64xi32> to vector<64x64xf32>
    %374 = vector.extract_strided_slice %328 {offsets = [0, 6], sizes = [64, 1], strides = [1, 1]} : vector<64x8xf32> to vector<64x1xf32>
    %375 = vector.extract_strided_slice %331 {offsets = [6, 0], sizes = [1, 64], strides = [1, 1]} : vector<128x64xf32> to vector<1x64xf32>
    %376 = vector.broadcast %374 : vector<64x1xf32> to vector<64x64xf32>
    %377 = vector.broadcast %375 : vector<1x64xf32> to vector<64x64xf32>
    %378 = arith.cmpf ole, %376, %377 : vector<64x64xf32>
    %379 = arith.extui %378 : vector<64x64xi1> to vector<64x64xi32>
    %380 = arith.sitofp %379 : vector<64x64xi32> to vector<64x64xf32>
    %381 = vector.extract_strided_slice %328 {offsets = [0, 7], sizes = [64, 1], strides = [1, 1]} : vector<64x8xf32> to vector<64x1xf32>
    %382 = vector.extract_strided_slice %331 {offsets = [7, 0], sizes = [1, 64], strides = [1, 1]} : vector<128x64xf32> to vector<1x64xf32>
    %383 = vector.broadcast %381 : vector<64x1xf32> to vector<64x64xf32>
    %384 = vector.broadcast %382 : vector<1x64xf32> to vector<64x64xf32>
    %385 = arith.cmpf ole, %383, %384 : vector<64x64xf32>
    %386 = arith.extui %385 : vector<64x64xi1> to vector<64x64xi32>
    %387 = arith.sitofp %386 : vector<64x64xi32> to vector<64x64xf32>
    %388 = tpu.concatenate %338, %345, %352, %359, %366, %373, %380, %387 in 1 : vector<64x64xf32>, vector<64x64xf32>, vector<64x64xf32>, vector<64x64xf32>, vector<64x64xf32>, vector<64x64xf32>, vector<64x64xf32>, vector<64x64xf32> -> vector<64x512xf32>
    %389 = arith.truncf %388 : vector<64x512xf32> to vector<64x512xbf16>
    %cst_54 = arith.constant dense<0.000000e+00> : vector<64x512xf32>
    %390 = tpu.matmul %5, %389, %cst_54 {dimension_numbers = #tpu.dot_dimension_numbers<[1], [0], [0], [1], [0, 0, 1, 1], [], []>} : vector<64x64xbf16>, vector<64x512xbf16>, vector<64x512xf32> -> vector<64x512xf32>
    %391 = vector.extract_strided_slice %390 {offsets = [0, 0], sizes = [64, 64], strides = [1, 1]} : vector<64x512xf32> to vector<64x64xf32>
    %392 = vector.broadcast %14 : vector<64x1xf32> to vector<64x64xf32>
    %393 = arith.cmpf oge, %391, %392 : vector<64x64xf32>
    %394 = arith.andi %2, %393 : vector<64x64xi1>
    %395 = vector.extract_strided_slice %331 {offsets = [0, 0], sizes = [1, 64], strides = [1, 1]} : vector<128x64xf32> to vector<1x64xf32>
    %cst_55 = arith.constant 0x7F800000 : f32
    %396 = vector.shape_cast %395 : vector<1x64xf32> to vector<1x64xf32>
    %397 = vector.broadcast %396 : vector<1x64xf32> to vector<64x64xf32>
    %398 = vector.broadcast %cst_55 : f32 to vector<64x64xf32>
    %399 = arith.select %394, %397, %398 : vector<64x64xi1>, vector<64x64xf32>
    %cst_56 = arith.constant dense<0x7F800000> : vector<64xf32>
    %400 = vector.multi_reduction <minimumf>, %399, %cst_56 [1] : vector<64x64xf32> to vector<64xf32>
    %401 = vector.shape_cast %400 : vector<64xf32> to vector<64x1xf32>
    %402 = vector.extract_strided_slice %390 {offsets = [0, 64], sizes = [64, 64], strides = [1, 1]} : vector<64x512xf32> to vector<64x64xf32>
    %403 = vector.broadcast %14 : vector<64x1xf32> to vector<64x64xf32>
    %404 = arith.cmpf oge, %402, %403 : vector<64x64xf32>
    %405 = arith.andi %2, %404 : vector<64x64xi1>
    %406 = vector.extract_strided_slice %331 {offsets = [1, 0], sizes = [1, 64], strides = [1, 1]} : vector<128x64xf32> to vector<1x64xf32>
    %cst_57 = arith.constant 0x7F800000 : f32
    %407 = vector.shape_cast %406 : vector<1x64xf32> to vector<1x64xf32>
    %408 = vector.broadcast %407 : vector<1x64xf32> to vector<64x64xf32>
    %409 = vector.broadcast %cst_57 : f32 to vector<64x64xf32>
    %410 = arith.select %405, %408, %409 : vector<64x64xi1>, vector<64x64xf32>
    %cst_58 = arith.constant dense<0x7F800000> : vector<64xf32>
    %411 = vector.multi_reduction <minimumf>, %410, %cst_58 [1] : vector<64x64xf32> to vector<64xf32>
    %412 = vector.shape_cast %411 : vector<64xf32> to vector<64x1xf32>
    %413 = vector.extract_strided_slice %390 {offsets = [0, 128], sizes = [64, 64], strides = [1, 1]} : vector<64x512xf32> to vector<64x64xf32>
    %414 = vector.broadcast %14 : vector<64x1xf32> to vector<64x64xf32>
    %415 = arith.cmpf oge, %413, %414 : vector<64x64xf32>
    %416 = arith.andi %2, %415 : vector<64x64xi1>
    %417 = vector.extract_strided_slice %331 {offsets = [2, 0], sizes = [1, 64], strides = [1, 1]} : vector<128x64xf32> to vector<1x64xf32>
    %cst_59 = arith.constant 0x7F800000 : f32
    %418 = vector.shape_cast %417 : vector<1x64xf32> to vector<1x64xf32>
    %419 = vector.broadcast %418 : vector<1x64xf32> to vector<64x64xf32>
    %420 = vector.broadcast %cst_59 : f32 to vector<64x64xf32>
    %421 = arith.select %416, %419, %420 : vector<64x64xi1>, vector<64x64xf32>
    %cst_60 = arith.constant dense<0x7F800000> : vector<64xf32>
    %422 = vector.multi_reduction <minimumf>, %421, %cst_60 [1] : vector<64x64xf32> to vector<64xf32>
    %423 = vector.shape_cast %422 : vector<64xf32> to vector<64x1xf32>
    %424 = vector.extract_strided_slice %390 {offsets = [0, 192], sizes = [64, 64], strides = [1, 1]} : vector<64x512xf32> to vector<64x64xf32>
    %425 = vector.broadcast %14 : vector<64x1xf32> to vector<64x64xf32>
    %426 = arith.cmpf oge, %424, %425 : vector<64x64xf32>
    %427 = arith.andi %2, %426 : vector<64x64xi1>
    %428 = vector.extract_strided_slice %331 {offsets = [3, 0], sizes = [1, 64], strides = [1, 1]} : vector<128x64xf32> to vector<1x64xf32>
    %cst_61 = arith.constant 0x7F800000 : f32
    %429 = vector.shape_cast %428 : vector<1x64xf32> to vector<1x64xf32>
    %430 = vector.broadcast %429 : vector<1x64xf32> to vector<64x64xf32>
    %431 = vector.broadcast %cst_61 : f32 to vector<64x64xf32>
    %432 = arith.select %427, %430, %431 : vector<64x64xi1>, vector<64x64xf32>
    %cst_62 = arith.constant dense<0x7F800000> : vector<64xf32>
    %433 = vector.multi_reduction <minimumf>, %432, %cst_62 [1] : vector<64x64xf32> to vector<64xf32>
    %434 = vector.shape_cast %433 : vector<64xf32> to vector<64x1xf32>
    %435 = vector.extract_strided_slice %390 {offsets = [0, 256], sizes = [64, 64], strides = [1, 1]} : vector<64x512xf32> to vector<64x64xf32>
    %436 = vector.broadcast %14 : vector<64x1xf32> to vector<64x64xf32>
    %437 = arith.cmpf oge, %435, %436 : vector<64x64xf32>
    %438 = arith.andi %2, %437 : vector<64x64xi1>
    %439 = vector.extract_strided_slice %331 {offsets = [4, 0], sizes = [1, 64], strides = [1, 1]} : vector<128x64xf32> to vector<1x64xf32>
    %cst_63 = arith.constant 0x7F800000 : f32
    %440 = vector.shape_cast %439 : vector<1x64xf32> to vector<1x64xf32>
    %441 = vector.broadcast %440 : vector<1x64xf32> to vector<64x64xf32>
    %442 = vector.broadcast %cst_63 : f32 to vector<64x64xf32>
    %443 = arith.select %438, %441, %442 : vector<64x64xi1>, vector<64x64xf32>
    %cst_64 = arith.constant dense<0x7F800000> : vector<64xf32>
    %444 = vector.multi_reduction <minimumf>, %443, %cst_64 [1] : vector<64x64xf32> to vector<64xf32>
    %445 = vector.shape_cast %444 : vector<64xf32> to vector<64x1xf32>
    %446 = vector.extract_strided_slice %390 {offsets = [0, 320], sizes = [64, 64], strides = [1, 1]} : vector<64x512xf32> to vector<64x64xf32>
    %447 = vector.broadcast %14 : vector<64x1xf32> to vector<64x64xf32>
    %448 = arith.cmpf oge, %446, %447 : vector<64x64xf32>
    %449 = arith.andi %2, %448 : vector<64x64xi1>
    %450 = vector.extract_strided_slice %331 {offsets = [5, 0], sizes = [1, 64], strides = [1, 1]} : vector<128x64xf32> to vector<1x64xf32>
    %cst_65 = arith.constant 0x7F800000 : f32
    %451 = vector.shape_cast %450 : vector<1x64xf32> to vector<1x64xf32>
    %452 = vector.broadcast %451 : vector<1x64xf32> to vector<64x64xf32>
    %453 = vector.broadcast %cst_65 : f32 to vector<64x64xf32>
    %454 = arith.select %449, %452, %453 : vector<64x64xi1>, vector<64x64xf32>
    %cst_66 = arith.constant dense<0x7F800000> : vector<64xf32>
    %455 = vector.multi_reduction <minimumf>, %454, %cst_66 [1] : vector<64x64xf32> to vector<64xf32>
    %456 = vector.shape_cast %455 : vector<64xf32> to vector<64x1xf32>
    %457 = vector.extract_strided_slice %390 {offsets = [0, 384], sizes = [64, 64], strides = [1, 1]} : vector<64x512xf32> to vector<64x64xf32>
    %458 = vector.broadcast %14 : vector<64x1xf32> to vector<64x64xf32>
    %459 = arith.cmpf oge, %457, %458 : vector<64x64xf32>
    %460 = arith.andi %2, %459 : vector<64x64xi1>
    %461 = vector.extract_strided_slice %331 {offsets = [6, 0], sizes = [1, 64], strides = [1, 1]} : vector<128x64xf32> to vector<1x64xf32>
    %cst_67 = arith.constant 0x7F800000 : f32
    %462 = vector.shape_cast %461 : vector<1x64xf32> to vector<1x64xf32>
    %463 = vector.broadcast %462 : vector<1x64xf32> to vector<64x64xf32>
    %464 = vector.broadcast %cst_67 : f32 to vector<64x64xf32>
    %465 = arith.select %460, %463, %464 : vector<64x64xi1>, vector<64x64xf32>
    %cst_68 = arith.constant dense<0x7F800000> : vector<64xf32>
    %466 = vector.multi_reduction <minimumf>, %465, %cst_68 [1] : vector<64x64xf32> to vector<64xf32>
    %467 = vector.shape_cast %466 : vector<64xf32> to vector<64x1xf32>
    %468 = vector.extract_strided_slice %390 {offsets = [0, 448], sizes = [64, 64], strides = [1, 1]} : vector<64x512xf32> to vector<64x64xf32>
    %469 = vector.broadcast %14 : vector<64x1xf32> to vector<64x64xf32>
    %470 = arith.cmpf oge, %468, %469 : vector<64x64xf32>
    %471 = arith.andi %2, %470 : vector<64x64xi1>
    %472 = vector.extract_strided_slice %331 {offsets = [7, 0], sizes = [1, 64], strides = [1, 1]} : vector<128x64xf32> to vector<1x64xf32>
    %cst_69 = arith.constant 0x7F800000 : f32
    %473 = vector.shape_cast %472 : vector<1x64xf32> to vector<1x64xf32>
    %474 = vector.broadcast %473 : vector<1x64xf32> to vector<64x64xf32>
    %475 = vector.broadcast %cst_69 : f32 to vector<64x64xf32>
    %476 = arith.select %471, %474, %475 : vector<64x64xi1>, vector<64x64xf32>
    %cst_70 = arith.constant dense<0x7F800000> : vector<64xf32>
    %477 = vector.multi_reduction <minimumf>, %476, %cst_70 [1] : vector<64x64xf32> to vector<64xf32>
    %478 = vector.shape_cast %477 : vector<64xf32> to vector<64x1xf32>
    %479 = tpu.concatenate %401, %412, %423, %434, %445, %456, %467, %478 in 1 : vector<64x1xf32>, vector<64x1xf32>, vector<64x1xf32>, vector<64x1xf32>, vector<64x1xf32>, vector<64x1xf32>, vector<64x1xf32>, vector<64x1xf32> -> vector<64x8xf32>
    %cst_71 = arith.constant 0.000000e+00 : f32
    %480 = vector.shape_cast %16 : vector<64x1xi1> to vector<64x1xi1>
    %481 = vector.broadcast %480 : vector<64x1xi1> to vector<64x8xi1>
    %482 = vector.broadcast %cst_71 : f32 to vector<64x8xf32>
    %483 = arith.select %481, %479, %482 : vector<64x8xi1>, vector<64x8xf32>
    %c0_72 = arith.constant 0 : index
    %c0_73 = arith.constant 0 : index
    %484 = vector.load %arg6[%c0_72, %c0_73] : memref<64x8xf32, #tpu.memory_space<vmem>>, vector<64x8xf32>
    tpu.vector_store %arg6[%c0_72, %c0_73], %483 {strides = array<i32>} : memref<64x8xf32, #tpu.memory_space<vmem>>, vector<64x8xf32>,
    return
  }
}

</mosaic_0001>

<bundles_post_ra>
// kernel: tpu_custom_call.1
= control target key start
LH: loop header
LB: loop body
LE: loop exit
PB: predicated region body
PF: predicated region fallthrough
CT: control target
= control target key end

     0   :  { %vm133_vm0 = vcmask 261120   ;;  %vm9404_vm1 = vcmask 523264   ;;  %v9305_v11 = vmov 0.0   ;;  %v9303_v41 = vmov 2   ;;  %s9288_s2 = inlined_call_operand.vmem [shape: f32[32,16], index: 2, kind: input, shape index: {}]   ;;  %s9289_s1 = inlined_call_operand.vmem [shape: f32[64,32], index: 1, kind: input, shape index: {}]   ;;  %s9290_s3 = inlined_call_operand.vmem [shape: f32[1,16], index: 3, kind: input, shape index: {}]   ;;  %s9291_s0 = inlined_call_operand.vmem [shape: f32[64,64], index: 0, kind: input, shape index: {}]   ;;  %s9292_s4 = inlined_call_operand.vmem [shape: f32[16,8], index: 4, kind: input, shape index: {}]   ;;  %s9293_s5 = inlined_call_operand.vmem [shape: f32[1,8], index: 5, kind: input, shape index: {}]   ;;  %s9294_s6 = inlined_call_operand.vmem [shape: f32[64,8], index: 6, kind: output, shape index: {}]  }
   0x1   :  { %v128_v0 = vld [vmem:[%s9288_s2 + $0x18] sm:$0xff]  ;;  %v127_v1 = vld [vmem:[%s9288_s2 + $0x10] sm:$0xff]  ;;  %v126_v2 = vld [vmem:[%s9288_s2 + $0x8] sm:$0xff]  ;;  %4597 = vset.pattern.permute.xlu1 %v9303_v41  ;;  %v9301_v42 = vmov 1   ;;  %v9295_v43 = vmov 5   ;;  %v9299_v51 = vmov 3  }
   0x2   :  { %170 = vmatpush.msra.mxu0 %v128_v0  ;;  %4570 = vmatpush.msra.mxu3 %v128_v0  ;;  %v125_v3 = vld [vmem:[%s9288_s2] sm:$0xff]  ;;  %v122_v5 = vld [vmem:[%s9289_s1 + $0x28] sm:$0xff]  ;;  %v4996_v6 = vld [vmem:[%s9291_s0 + $0x10] sm:$0xff]  ;;  %v9311_v54 = vmov 0   ;;  %v9309_v57 = vmov 6   ;;  %v9328_v60 = vmov 7  }
   0x3   :  { %v117_v4 = vld [vmem:[%s9289_s1] sm:$0xff]  ;;  %9428 = vst [vmem:[#allocation2_spill] sm:$0xff] %v4996_v6  ;;  %v5006_v8 = vld [vmem:[%s9291_s0 + $0x18] sm:$0xff]  ;;  %vm9380_vm2 = vcmp.gt.f32.partialorder %v4996_v6, 0.5  ;;  %v5019_v10 = vld [vmem:[%s9291_s0 + $0x8] sm:$0xff]  ;;  %4596 = vset.pattern.permute.xlu0 %v9301_v42  ;;  %4622 = vset.pattern.permute.xlu2 %v9295_v43  ;;  %v9315_v63 = vmov 8  }
   0x4   :  { %171 = vmatpush.msra.mxu0 %v127_v1  ;;  %4571 = vmatpush.msra.mxu3 %v127_v1  ;;  %v5001_v7 = vld [vmem:[%s9291_s0] sm:$0xff]  ;;  %9430 = vst [vmem:[#allocation4_spill] sm:$0xff] %v5006_v8  ;;  %vm9387_vm4 = vcmp.gt.f32.partialorder %v5006_v8, 0.5  ;;  %v4308_v12 = vsel %vm9380_vm2, 1.0, %v9305_v11  ;;  %v5034_v15 = vld [vmem:[%s9291_s0 + $0x38] sm:$0xff]  ;;  %v5039_v16 = vld [vmem:[%s9291_s0 + $0x28] sm:$0xff] }
   0x5   :  { %9429 = vst [vmem:[#allocation3_spill] sm:$0xff] %v5001_v7  ;;  %vm9403_vm3 = vcmp.gt.f32.partialorder %v5001_v7, 0.5  ;;  %v5014_v9 = vld [vmem:[%s9291_s0 + $0x20] sm:$0xff]  ;;  %v4309_v14 = vsel %vm9387_vm4, 1.0, %v9305_v11  ;;  %v67_v17 = vsel %vm9404_vm1, %v4308_v12, 0.0  ;;  %vm9386_vm6 = vcmp.gt.f32.partialorder %v5019_v10, 0.5 }
   0x6   :  { %172 = vmatpush.msra.mxu0 %v126_v2  ;;  %4572 = vmatpush.msra.mxu3 %v126_v2  ;;  %9431 = vst [vmem:[#allocation5_spill] sm:$0xff] %v5014_v9  ;;  %v4306_v13 = vsel %vm9403_vm3, 1.0, %v9305_v11  ;;  %vm9378_vm5 = vcmp.gt.f32.partialorder %v5014_v9, 0.5  ;;  %v5043_v19 = vpack.c.bf16 %v4309_v14, %v4308_v12  ;;  %vm9379_vm7 = vcmp.gt.f32.partialorder %v5039_v16, 0.5  ;;  %v5053_v21 = vld [vmem:[%s9291_s0 + $0x30] sm:$0xff]  ;;  %v118_v22 = vld [vmem:[%s9289_s1 + $0x8] sm:$0xff] }
   0x7   :  { %9432 = vst [vmem:[#allocation6_spill] sm:$0xff] %v5019_v10  ;;  %v61_v18 = vsel %vm9404_vm1, %v4306_v13, 0.0  ;;  %68 = vadd.xlane.f32.xlu1 %v67_v17  ;;  %v4310_v20 = vsel %vm9378_vm5, 1.0, %v9305_v11  ;;  %v123_v23 = vld [vmem:[%s9289_s1 + $0x30] sm:$0xff]  ;;  %v4307_v25 = vsel %vm9386_vm6, 1.0, %v9305_v11  ;;  %vm9377_vm8 = vcmp.gt.f32.partialorder %v5034_v15, 0.5 }
   0x8   :  { %173 = vmatpush.msra.mxu0 %v125_v3  ;;  %4573 = vmatpush.msra.mxu3 %v125_v3  ;;  %9433 = vst [vmem:[#allocation7_spill] sm:$0xff] %v5034_v15  ;;  %v73_v24 = vsel %vm9404_vm1, %v4310_v20, 0.0  ;;  %v5066_v26 = vpack.c.bf16 %v4307_v25, %v4306_v13  ;;  %v4311_v27 = vsel %vm9379_vm7, 1.0, %v9305_v11  ;;  %vm9402_vm9 = vcmp.gt.f32.partialorder %v5053_v21, 0.5  ;;  %v119_v35 = vld [vmem:[%s9289_s1 + $0x10] sm:$0xff]  ;;  %v124_v36 = vld [vmem:[%s9289_s1 + $0x38] sm:$0xff] }
   0x9   :  { %4314 = vmatmul.msk.f32.vlgmr.msra.gmra.mxu0 %vm133_vm0, %v117_v4  ;;  %4319 = vmatmul.msk.f32.vlgmr.msra.gmra.mxu3 %vm133_vm0, %v122_v5  ;;  %9434 = vst [vmem:[#allocation8_spill] sm:$0xff] %v5039_v16  ;;  %v5071_v28 = vpack.c.bf16 %v4311_v27, %v4310_v20  ;;  %v4313_v29 = vsel %vm9377_vm8, 1.0, %v9305_v11  ;;  %v4312_v30 = vsel %vm9402_vm9, 1.0, %v9305_v11  ;;  %v70_v31 = vsel %vm9404_vm1, %v4309_v14, 0.0  ;;  %v120_v39 = vld [vmem:[%s9289_s1 + $0x18] sm:$0xff]  ;;  %v121_v40 = vld [vmem:[%s9289_s1 + $0x20] sm:$0xff] }
   0xa   :  { %9435 = vst [vmem:[#allocation9_spill] sm:$0xff] %v5043_v19  ;;  %62 = vadd.xlane.f32.xlu0 %v61_v18  ;;  %74 = vadd.xlane.f32.xlu2 %v73_v24  ;;  %v64_v32 = vsel %vm9404_vm1, %v4307_v25, 0.0  ;;  %v5084_v33 = vpack.c.bf16 %v4313_v29, %v4312_v30  ;;  %v76_v34 = vsel %vm9404_vm1, %v4311_v27, 0.0  ;;  %v82_v37 = vsel %vm9404_vm1, %v4313_v29, 0.0  ;;  %v4918_v44 = vld [vmem:[%s9290_s3] ss:$0 sm:$0xff] }
   0xb   :  { %9436 = vst [vmem:[#allocation10_spill] sm:$0xff] %v5053_v21  ;;  %v79_v38 = vsel %vm9404_vm1, %v4312_v30, 0.0  ;;  %v9297_v0 = vmov 4   ;;  %vm9376_vm10 = vcmask 130048   ;;  %v9346_v9 = vmov 14   ;;  %s4937_s1 = smov 64  }
   0xc   :  { %9437 = vst [vmem:[#allocation11_spill] sm:$0xff] %v5066_v26 }
   0xd   :  { %9438 = vst [vmem:[#allocation12_spill] sm:$0xff] %v5071_v28 }
   0xe   :  { %9439 = vst [vmem:[#allocation13_spill] sm:$0xff] %v5084_v33 }
   0xf   :  { %71 = vadd.xlane.f32.xlu1 %v70_v31 }
  0x11   :  { %4315 = vmatmul.msk.f32.gmra.mxu0 %vm133_vm0, %v118_v22  ;;  %4320 = vmatmul.msk.f32.gmra.mxu3 %vm133_vm0, %v123_v23 }
  0x12   :  { %65 = vadd.xlane.f32.xlu0 %v64_v32  ;;  %77 = vadd.xlane.f32.xlu2 %v76_v34 }
  0x17   :  { %83 = vadd.xlane.f32.xlu1 %v82_v37 }
  0x19   :  { %4316 = vmatmul.msk.f32.gmra.mxu0 %vm133_vm0, %v119_v35  ;;  %4321 = vmatmul.msk.f32.gmra.mxu3 %vm133_vm0, %v124_v36 }
  0x1a   :  { %80 = vadd.xlane.f32.xlu0 %v79_v38 }
  0x21   :  { %4317 = vmatmul.msk.f32.gmra.mxu0 %vm133_vm0, %v120_v39 }
  0x29   :  { %4318 = vmatmul.msk.f32.gmra.mxu0 %vm133_vm0, %v121_v40 }
  0x7a   :  { %v5176_v3 = vpop.xlane.xlu1 %68 }
  0x7b   :  { %9440 = vst [vmem:[#allocation14_spill] sm:$0xff] %v5176_v3 }
  0x7d   :  { %v5179_v4 = vpop.xlane.xlu0 %62 }
  0x7e   :  { %9441 = vst [vmem:[#allocation15_spill] sm:$0xff] %v5179_v4  ;;  %v9471_v4 = vmov 9  }
  0x82   :  { %v5187_v5 = vpop.xlane.xlu1 %71 }
  0x83   :  { %9442 = vst [vmem:[#allocation16_spill] sm:$0xff] %v5187_v5 }
  0x85   :  { %v5189_v12 = vpop.xlane.xlu0 %65 }
  0x86   :  { %v175_v45 = vpop.f32.mrf.mxu0  ;;  %9443 = vst [vmem:[#allocation17_spill] sm:$0xff] %v5189_v12 }
  0x87   :  { %v5111_v46 = vadd.f32 %v4918_v44, %v175_v45 }
  0x89   :  { %363 = vperm.xlu1 %4597, %v5111_v46   ;;  %306 = vperm.xlu0 %4596, %v5111_v46   ;;  %v200_v24 = vsel %vm9376_vm10, %v5111_v46, 0.0 }
  0x8a   :  { %v5195_v13 = vpop.xlane.xlu1 %83 }
  0x8b   :  { %9444 = vst [vmem:[#allocation18_spill] sm:$0xff] %v5195_v13 }
  0x8c   :  { %v190_v47 = vpop.f32.mrf.mxu3 }
  0x8d   :  { %v5115_v49 = vadd.f32 %v4918_v44, %v190_v47  ;;  %v5198_v14 = vpop.xlane.xlu0 %80 }
  0x8e   :  { %v178_v48 = vpop.f32.mrf.mxu0  ;;  %9445 = vst [vmem:[#allocation19_spill] sm:$0xff] %v5198_v14  ;;  %v9465_v14 = vmov 8  }
  0x8f   :  { %v5117_v50 = vadd.f32 %v4918_v44, %v178_v48 }
  0x91   :  { %538 = vperm.xlu2 %4622, %v5117_v50   ;;  %4598 = vset.pattern.permute.xlu1 %v9299_v51  ;;  %v201_v27 = vsel %vm9376_vm10, %v5117_v50, 0.0 }
  0x92   :  { %326 = vperm.xlu0 %4596, %v5115_v49   ;;  %420 = vperm.xlu1 %4598, %v5111_v46  }
  0x94   :  { %v193_v52 = vpop.f32.mrf.mxu3 }
  0x95   :  { %v5123_v53 = vadd.f32 %v4918_v44, %v193_v52 }
  0x96   :  { %v181_v55 = vpop.f32.mrf.mxu0 }
  0x97   :  { %v5130_v56 = vadd.f32 %v4918_v44, %v181_v55  ;;  %v206_v48 = vsel %vm9376_vm10, %v5123_v53, 0.0 }
  0x99   :  { %558 = vperm.xlu2 %4622, %v5123_v53   ;;  %v202_v31 = vsel %vm9376_vm10, %v5130_v56, 0.0 }
  0x9a   :  { %4600 = vset.pattern.permute.xlu0 %v9303_v41  ;;  %4599 = vset.pattern.permute.xlu1 %v9311_v54 }
  0x9b   :  { %383 = vperm.xlu0 %4600, %v5115_v49   ;;  %267 = vperm.xlu1 %4599, %v5115_v49  }
  0x9c   :  { %v196_v58 = vpop.f32.mrf.mxu3 }
  0x9d   :  { %v5137_v59 = vadd.f32 %v4918_v44, %v196_v58  ;;  %v9313_v58 = vmov 9  }
  0x9e   :  { %v184_v61 = vpop.f32.mrf.mxu0 }
  0x9f   :  { %v5150_v62 = vadd.f32 %v4918_v44, %v184_v61  ;;  %v207_v61 = vsel %vm9376_vm10, %v5137_v59, 0.0 }
  0xa1   :  { %4625 = vset.pattern.permute.xlu2 %v9309_v57  ;;  %v203_v35 = vsel %vm9376_vm10, %v5150_v62, 0.0 }
  0xa2   :  { %595 = vperm.xlu2 %4625, %v5117_v50  }
  0xa3   :  { %371 = vperm.xlu0 %4600, %v5130_v56   ;;  %4601 = vset.pattern.permute.xlu1 %v9299_v51 }
  0xa4   :  { %440 = vperm.xlu1 %4601, %v5115_v49  }
  0xa6   :  { %v187_v1 = vpop.f32.mrf.mxu0 }
  0xa7   :  { %v5162_v2 = vadd.f32 %v4918_v44, %v187_v1  ;;  %v205_v44 = vsel %vm9376_vm10, %v5115_v49, 0.0  ;;  %v5282_v1 = vpop.xlane.xlu2 %74 }
  0xa8   :  { %9456 = vst [vmem:[#allocation30_spill] sm:$0xff] %v5282_v1 }
  0xa9   :  { %v204_v38 = vsel %vm9376_vm10, %v5162_v2, 0.0 }
  0xaa   :  { %615 = vperm.xlu2 %4625, %v5123_v53  }
  0xab   :  { %4609 = vset.pattern.permute.xlu0 %v9301_v42 }
  0xac   :  { %334 = vperm.xlu0 %4609, %v5137_v59   ;;  %4602 = vset.pattern.permute.xlu1 %v9311_v54 }
  0xad   :  { %247 = vperm.xlu1 %4602, %v5117_v50  }
  0xb2   :  { %4628 = vset.pattern.permute.xlu2 %v9328_v60 }
  0xb3   :  { %652 = vperm.xlu2 %4628, %v5117_v50  }
  0xb4   :  { %4610 = vset.pattern.permute.xlu0 %v9303_v41 }
  0xb5   :  { %391 = vperm.xlu0 %4610, %v5137_v59   ;;  %4603 = vset.pattern.permute.xlu1 %v9301_v42 }
  0xb6   :  { %310 = vperm.xlu1 %4603, %v5117_v50  }
  0xbb   :  { %672 = vperm.xlu2 %4628, %v5123_v53  }
  0xbd   :  { %4611 = vset.pattern.permute.xlu0 %v9301_v42 }
  0xbe   :  { %318 = vperm.xlu0 %4611, %v5150_v62   ;;  %330 = vperm.xlu1 %4603, %v5123_v53  }
  0xc3   :  { %4631 = vset.pattern.permute.xlu2 %v9315_v63 }
  0xc4   :  { %709 = vperm.xlu2 %4631, %v5117_v50  }
  0xc6   :  { %4617 = vset.pattern.permute.xlu0 %v9297_v0  ;;  %4604 = vset.pattern.permute.xlu1 %v9303_v41 }
  0xc7   :  { %477 = vperm.xlu0 %4617, %v5111_v46   ;;  %387 = vperm.xlu1 %4604, %v5123_v53  }
  0xcc   :  { %4633 = vset.pattern.permute.xlu2 %v9295_v43 }
  0xcd   :  { %550 = vperm.xlu2 %4633, %v5162_v2  }
  0xcf   :  { %489 = vperm.xlu0 %4617, %v5150_v62   ;;  %4605 = vset.pattern.permute.xlu1 %v9311_v54 }
  0xd0   :  { %252 = vperm.xlu1 %4605, %v5130_v56  }
  0xd5   :  { %4634 = vset.pattern.permute.xlu2 %v9309_v57 }
  0xd6   :  { %607 = vperm.xlu2 %4634, %v5162_v2  }
  0xd7   :  { %4619 = vset.pattern.permute.xlu0 %v9299_v51 }
  0xd8   :  { %424 = vperm.xlu0 %4619, %v5117_v50   ;;  %4606 = vset.pattern.permute.xlu1 %v9301_v42 }
  0xd9   :  { %314 = vperm.xlu1 %4606, %v5130_v56  }
  0xde   :  { %4635 = vset.pattern.permute.xlu2 %v9328_v60 }
  0xdf   :  { %664 = vperm.xlu2 %4635, %v5162_v2  }
  0xe0   :  { %444 = vperm.xlu0 %4619, %v5123_v53  }
  0xe1   :  { %4607 = vset.pattern.permute.xlu1 %v9299_v51 }
  0xe2   :  { %428 = vperm.xlu1 %4607, %v5130_v56  }
  0xe7   :  { %4636 = vset.pattern.permute.xlu2 %v9315_v63 }
  0xe8   :  { %436 = vperm.xlu0 %4619, %v5162_v2   ;;  %721 = vperm.xlu2 %4636, %v5162_v2  }
  0xea   :  { %4608 = vset.pattern.permute.xlu1 %v9311_v54 }
  0xeb   :  { %277 = vperm.xlu1 %4608, %v5137_v59  }
  0xf0   :  { %4620 = vset.pattern.permute.xlu0 %v9297_v0 }
  0xf1   :  { %497 = vperm.xlu0 %4620, %v5115_v49  }
  0xf3   :  { %257 = vperm.xlu1 %4608, %v5150_v62  }
  0xf9   :  { %505 = vperm.xlu0 %4620, %v5137_v59  }
  0xfb   :  { %4612 = vset.pattern.permute.xlu1 %v9303_v41  ;;  %v5202_v17 = vpop.permute.xlu1 %363  ;;  %v5205_v18 = vpop.permute.xlu0 %306 }
  0xfc   :  { %9446 = vst [vmem:[#allocation20_spill] sm:$0xff] %v5202_v17  ;;  %375 = vperm.xlu1 %4612, %v5150_v62  }
 0x101   :  { %4623 = vset.pattern.permute.xlu0 %v9295_v43 }
 0x102   :  { %542 = vperm.xlu0 %4623, %v5130_v56  }
 0x104   :  { %4613 = vset.pattern.permute.xlu1 %v9299_v51  ;;  %v5210_v20 = vpop.permute.xlu1 %420  ;;  %v5213_v22 = vpop.permute.xlu0 %326 }
 0x105   :  { %432 = vperm.xlu1 %4613, %v5150_v62  }
 0x10a   :  { %562 = vperm.xlu0 %4623, %v5137_v59  }
 0x10d   :  { %4614 = vset.pattern.permute.xlu1 %v9301_v42  ;;  %v5217_v23 = vpop.permute.xlu1 %267  ;;  %v5221_v25 = vpop.permute.xlu0 %383 }
 0x10e   :  { %9447 = vst [vmem:[#allocation21_spill] sm:$0xff] %v5217_v23  ;;  %208 = vxpose.xlu2.b32.start [1/8] (short) (narrow) %v200_v24, 16  ;;  %322 = vperm.xlu1 %4614, %v5162_v2  }
 0x10f   :  { %9448 = vst [vmem:[#allocation22_spill] sm:$0xff] %v5221_v25 }
 0x112   :  { %4626 = vset.pattern.permute.xlu0 %v9309_v57 }
 0x113   :  { %599 = vperm.xlu0 %4626, %v5130_v56  }
 0x115   :  { %v5231_v30 = vpop.permute.xlu0 %371 }
 0x116   :  { %209 = vxpose.xlu2.b32.cont [2/8] (short) (narrow) %v201_v27, 16  ;;  %4615 = vset.pattern.permute.xlu1 %v9303_v41  ;;  %v5229_v29 = vpop.permute.xlu1 %440  ;;  %9449 = vst [vmem:[#allocation23_spill] sm:$0xff] %v5231_v30  ;;  %v9316_v41 = vmov 11  }
 0x117   :  { %379 = vperm.xlu1 %4615, %v5162_v2  }
 0x11b   :  { %619 = vperm.xlu0 %4626, %v5137_v59  }
 0x11e   :  { %210 = vxpose.xlu2.b32.cont [3/8] (short) (narrow) %v202_v31, 16  ;;  %v5237_v32 = vpop.permute.xlu0 %334  ;;  %v5291_v31 = vpop.xlane.xlu2 %77 }
 0x11f   :  { %4616 = vset.pattern.permute.xlu1 %v9299_v51  ;;  %v5240_v34 = vpop.permute.xlu1 %247  ;;  %9457 = vst [vmem:[#allocation31_spill] sm:$0xff] %v5291_v31 }
 0x120   :  { %9450 = vst [vmem:[#allocation24_spill] sm:$0xff] %v5240_v34  ;;  %448 = vperm.xlu1 %4616, %v5137_v59  }
 0x123   :  { %4629 = vset.pattern.permute.xlu0 %v9328_v60 }
 0x124   :  { %656 = vperm.xlu0 %4629, %v5130_v56  }
 0x126   :  { %211 = vxpose.xlu2.b32.cont [4/8] (short) (narrow) %v203_v35, 16 }
 0x127   :  { %v5247_v36 = vpop.permute.xlu0 %391 }
 0x128   :  { %9451 = vst [vmem:[#allocation25_spill] sm:$0xff] %v5247_v36  ;;  %4618 = vset.pattern.permute.xlu1 %v9297_v0  ;;  %v5250_v37 = vpop.permute.xlu1 %310 }
 0x129   :  { %481 = vperm.xlu1 %4618, %v5117_v50  }
 0x12c   :  { %676 = vperm.xlu0 %4629, %v5137_v59  }
 0x12e   :  { %212 = vxpose.xlu2.b32.cont [5/8] (short) (narrow) %v204_v38, 16 }
 0x130   :  { %v5256_v39 = vpop.permute.xlu1 %330  ;;  %v5258_v40 = vpop.permute.xlu0 %318 }
 0x131   :  { %485 = vperm.xlu1 %4618, %v5130_v56  }
 0x134   :  { %4632 = vset.pattern.permute.xlu0 %v9315_v63  ;;  %v9324_v63 = vmov 12  }
 0x135   :  { %713 = vperm.xlu0 %4632, %v5130_v56  }
 0x136   :  { %213 = vxpose.xlu2.b32.cont [6/8] (short) (narrow) %v205_v44, 16  ;;  %v9307_v44 = vmov 10  }
 0x139   :  { %v5265_v45 = vpop.permute.xlu0 %477  ;;  %493 = vperm.xlu1 %4618, %v5162_v2   ;;  %v5268_v47 = vpop.permute.xlu1 %387 }
 0x13a   :  { %9452 = vst [vmem:[#allocation26_spill] sm:$0xff] %v5265_v45 }
 0x13b   :  { %9453 = vst [vmem:[#allocation27_spill] sm:$0xff] %v5268_v47 }
 0x13d   :  { %733 = vperm.xlu0 %4632, %v5137_v59  }
 0x13e   :  { %214 = vxpose.xlu2.b32.cont [7/8] (short) (narrow) %v206_v48, 16 }
 0x141   :  { %501 = vperm.xlu1 %4618, %v5123_v53   ;;  %v5274_v52 = vpop.permute.xlu0 %489 }
 0x142   :  { %9454 = vst [vmem:[#allocation28_spill] sm:$0xff] %v5274_v52  ;;  %v5276_v55 = vpop.permute.xlu1 %252 }
 0x143   :  { %9455 = vst [vmem:[#allocation29_spill] sm:$0xff] %v5276_v55 }
 0x145   :  { %4639 = vset.pattern.permute.xlu0 %v9313_v58 }
 0x146   :  { %770 = vperm.xlu0 %4639, %v5130_v56   ;;  %215 = vxpose.xlu2.b32.end [8/8] (short) (narrow) %v207_v61, 16  ;;  %v5303_v61 = vpop.permute.xlu2 %538 }
 0x149   :  { %4621 = vset.pattern.permute.xlu1 %v9295_v43 }
 0x14a   :  { %v5285_v24 = vpop.permute.xlu0 %424  ;;  %534 = vperm.xlu1 %4621, %v5111_v46  }
 0x14b   :  { %v5288_v27 = vpop.permute.xlu1 %314 }
 0x14e   :  { %790 = vperm.xlu0 %4639, %v5137_v59   ;;  %v5314_v42 = vpop.permute.xlu2 %558 }
 0x152   :  { %v5293_v35 = vpop.permute.xlu0 %444  ;;  %546 = vperm.xlu1 %4621, %v5150_v62  }
 0x154   :  { %v5296_v38 = vpop.permute.xlu1 %428 }
 0x156   :  { %4642 = vset.pattern.permute.xlu0 %v9307_v44 }
 0x157   :  { %827 = vperm.xlu0 %4642, %v5130_v56  }
 0x15a   :  { %554 = vperm.xlu1 %4621, %v5115_v49   ;;  %v5301_v48 = vpop.permute.xlu0 %436 }
 0x15d   :  { %v5305_v43 = vpop.permute.xlu1 %277 }
 0x15f   :  { %847 = vperm.xlu0 %4642, %v5137_v59  }
 0x162   :  { %4624 = vset.pattern.permute.xlu1 %v9309_v57  ;;  %v5323_v57 = vpop.permute.xlu2 %595 }
 0x163   :  { %v5309_v0 = vpop.permute.xlu0 %497  ;;  %591 = vperm.xlu1 %4624, %v5111_v46   ;;  %9460 = vst [vmem:[#allocation34_spill] sm:$0xff] %v5323_v57 }
 0x165   :  { %v5312_v51 = vpop.permute.xlu1 %257 }
 0x166   :  { %9458 = vst [vmem:[#allocation32_spill] sm:$0xff] %v5312_v51 }
 0x167   :  { %4645 = vset.pattern.permute.xlu0 %v9316_v41 }
 0x168   :  { %884 = vperm.xlu0 %4645, %v5130_v56  }
 0x16a   :  { %v5333_v41 = vpop.permute.xlu2 %615 }
 0x16b   :  { %v5318_v11 = vpop.permute.xlu0 %505  ;;  %603 = vperm.xlu1 %4624, %v5150_v62   ;;  %9461 = vst [vmem:[#allocation35_spill] sm:$0xff] %v5333_v41 }
 0x16e   :  { %v5321_v44 = vpop.permute.xlu1 %375 }
 0x16f   :  { %9459 = vst [vmem:[#allocation33_spill] sm:$0xff] %v5321_v44 }
 0x170   :  { %904 = vperm.xlu0 %4645, %v5137_v59  }
 0x172   :  { %v5342_v21 = vpop.permute.xlu2 %652 }
 0x173   :  { %611 = vperm.xlu1 %4624, %v5115_v49  }
 0x174   :  { %v5327_v54 = vpop.permute.xlu0 %542 }
 0x177   :  { %v5329_v58 = vpop.permute.xlu1 %432 }
 0x178   :  { %4648 = vset.pattern.permute.xlu0 %v9324_v63  ;;  %v9335_v63 = vmov 13  }
 0x179   :  { %941 = vperm.xlu0 %4648, %v5130_v56  }
 0x17a   :  { %v5354_v13 = vpop.permute.xlu2 %672 }
 0x17b   :  { %4627 = vset.pattern.permute.xlu1 %v9328_v60 }
 0x17c   :  { %v5336_v17 = vpop.permute.xlu0 %562  ;;  %648 = vperm.xlu1 %4627, %v5111_v46  }
 0x180   :  { %v5339_v15 = vpop.permute.xlu1 %322 }
 0x181   :  { %961 = vperm.xlu0 %4648, %v5137_v59  }
 0x184   :  { %660 = vperm.xlu1 %4627, %v5150_v62  }
 0x185   :  { %v5345_v8 = vpop.permute.xlu0 %599 }
 0x186   :  { %9462 = vst [vmem:[#allocation36_spill] sm:$0xff] %v5345_v8 }
 0x189   :  { %4651 = vset.pattern.permute.xlu0 %v9335_v63  ;;  %v5348_v16 = vpop.permute.xlu1 %379  ;;  %v5363_v63 = vpop.permute.xlu2 %709 }
 0x18a   :  { %9463 = vst [vmem:[#allocation37_spill] sm:$0xff] %v5348_v16  ;;  %998 = vperm.xlu0 %4651, %v5130_v56  }
 0x18b   :  { %9466 = vst [vmem:[#allocation39_spill] sm:$0xff] %v5363_v63 }
 0x18c   :  { %668 = vperm.xlu1 %4627, %v5115_v49  }
 0x18d   :  { %v5352_v60 = vpop.permute.xlu0 %619 }
 0x18e   :  { %9464 = vst [vmem:[#allocation38_spill] sm:$0xff] %v5352_v60 }
 0x191   :  { %v5372_v3 = vpop.permute.xlu2 %550 }
 0x192   :  { %1018 = vperm.xlu0 %4651, %v5137_v59   ;;  %v5357_v6 = vpop.permute.xlu1 %448 }
 0x194   :  { %4630 = vset.pattern.permute.xlu1 %v9465_v14 }
 0x195   :  { %705 = vperm.xlu1 %4630, %v5111_v46  }
 0x196   :  { %v5361_v5 = vpop.permute.xlu0 %656 }
 0x199   :  { %v5380_v1 = vpop.permute.xlu2 %607 }
 0x19a   :  { %4654 = vset.pattern.permute.xlu0 %v9346_v9  ;;  %9470 = vst [vmem:[#allocation43_spill] sm:$0xff] %v5380_v1  ;;  %v9353_v9 = vmov 15   ;;  %v9475_v1 = vmov 10  }
 0x19b   :  { %1055 = vperm.xlu0 %4654, %v5130_v56   ;;  %v5367_v10 = vpop.permute.xlu1 %481 }
 0x19c   :  { %9467 = vst [vmem:[#allocation40_spill] sm:$0xff] %v5367_v10 }
 0x19d   :  { %717 = vperm.xlu1 %4630, %v5150_v62  }
 0x19e   :  { %v5370_v31 = vpop.permute.xlu0 %676 }
 0x1a3   :  { %1075 = vperm.xlu0 %4654, %v5137_v59   ;;  %v5375_v14 = vpop.permute.xlu1 %485 }
 0x1a4   :  { %9468 = vst [vmem:[#allocation41_spill] sm:$0xff] %v5375_v14  ;;  %v9493_v14 = vmov 14  }
 0x1a5   :  { %725 = vperm.xlu1 %4630, %v5115_v49  }
 0x1a7   :  { %v5378_v7 = vpop.permute.xlu0 %713 }
 0x1a8   :  { %9469 = vst [vmem:[#allocation42_spill] sm:$0xff] %v5378_v7  ;;  %v5393_v7 = vpop.permute.xlu2 %664 }
 0x1ab   :  { %4657 = vset.pattern.permute.xlu0 %v9353_v9  ;;  %v5383_v12 = vpop.permute.xlu1 %493 }
 0x1ac   :  { %1112 = vperm.xlu0 %4657, %v5130_v56   ;;  %v9473_v56 = vmov 0  }
 0x1ad   :  { %4637 = vset.pattern.permute.xlu1 %v9471_v4 }
 0x1ae   :  { %762 = vperm.xlu1 %4637, %v5111_v46  }
 0x1af   :  { %v5388_v63 = vpop.permute.xlu0 %733  ;;  %729 = vperm.xlu2 %4636, %v5123_v53  }
 0x1b0   :  { %9472 = vst [vmem:[#allocation44_spill] sm:$0xff] %v5388_v63  ;;  %v5403_v57 = vpop.permute.xlu2 %721  ;;  %v9477_v63 = vmov 0.0  }
 0x1b1   :  { %9474 = vst [vmem:[#allocation45_spill] sm:$0xff] %v5403_v57 }
 0x1b3   :  { %v5391_v33 = vpop.permute.xlu1 %501 }
 0x1b4   :  { %1132 = vperm.xlu0 %4657, %v5137_v59  }
 0x1b6   :  { %774 = vperm.xlu1 %4637, %v5150_v62  }
 0x1b7   :  { %4638 = vset.pattern.permute.xlu2 %v9471_v4 }
 0x1b8   :  { %v5398_v9 = vpop.permute.xlu0 %770  ;;  %766 = vperm.xlu2 %4638, %v5117_v50   ;;  %v5412_v4 = vpop.trf.xlu2 }
 0x1b9   :  { %v5418_v57 = vperm.slane %v5412_v4, 1 }
 0x1bb   :  { %vm342_vm11 = vcmp.le.f32.partialorder %v5339_v15, %v5418_v57  ;;  %vm343_vm12 = vcmp.le.f32.partialorder %v5213_v22, %v5418_v57 }
 0x1bc   :  { %4658 = vset.pattern.permute.xlu0 %v9473_v56  ;;  %v535_v19 = vpop.permute.xlu1 %534  ;;  %v4334_v28 = vsel %vm342_vm11, 1.0, %v9477_v63  ;;  %v4335_v26 = vsel %vm343_vm12, 1.0, %v9477_v63 }
 0x1bd   :  { %242 = vperm.xlu0 %4658, %v5111_v46   ;;  %v4669_v30 = vpack.i.bf16 %v4335_v26, %v4334_v28  ;;  %v5453_v28 = vperm.slane %v5412_v4, 5 }
 0x1be   :  { %782 = vperm.xlu1 %4637, %v5115_v49  }
 0x1bf   :  { %vm566_vm15 = vcmp.le.f32.partialorder %v535_v19, %v5453_v28  ;;  %vm567_vm0 = vcmp.le.f32.partialorder %v5303_v61, %v5453_v28  ;;  %vm572_vm11 = vcmp.le.f32.partialorder %v5314_v42, %v5453_v28  ;;  %vm573_vm12 = vcmp.le.f32.partialorder %v5336_v17, %v5453_v28 }
 0x1c0   :  { %v5406_v8 = vpop.permute.xlu0 %790  ;;  %778 = vperm.xlu2 %4638, %v5162_v2   ;;  %v4368_v61 = vsel %vm572_vm11, 1.0, %v9477_v63 }
 0x1c4   :  { %v5409_v59 = vpop.permute.xlu1 %546 }
 0x1c5   :  { %262 = vperm.xlu0 %4658, %v5162_v2  }
 0x1c6   :  { %4640 = vset.pattern.permute.xlu1 %v9475_v1 }
 0x1c7   :  { %819 = vperm.xlu1 %4640, %v5111_v46  }
 0x1c8   :  { %786 = vperm.xlu2 %4638, %v5123_v53  }
 0x1c9   :  { %v5420_v60 = vpop.permute.xlu0 %827 }
 0x1ca   :  { %9476 = vst [vmem:[#allocation46_spill] sm:$0xff] %v5420_v60  ;;  %v5434_v60 = vperm.slane %v5412_v4, 3 }
 0x1cc   :  { %v5422_v41 = vpop.permute.xlu1 %554  ;;  %vm454_vm13 = vcmp.le.f32.partialorder %v5296_v38, %v5434_v60  ;;  %vm455_vm14 = vcmp.le.f32.partialorder %v5329_v58, %v5434_v60  ;;  %v9481_v58 = vmov 11  }
 0x1cd   :  { %272 = vperm.xlu0 %4658, %v5123_v53   ;;  %v4348_v22 = vsel %vm454_vm13, 1.0, %v9477_v63 }
 0x1cf   :  { %831 = vperm.xlu1 %4640, %v5150_v62  }
 0x1d0   :  { %4641 = vset.pattern.permute.xlu2 %v9475_v1  ;;  %v4349_v1 = vsel %vm455_vm14, 1.0, %v9477_v63 }
 0x1d1   :  { %v5436_v44 = vpop.permute.xlu0 %847  ;;  %823 = vperm.xlu2 %4641, %v5117_v50  }
 0x1d2   :  { %9478 = vst [vmem:[#allocation47_spill] sm:$0xff] %v5436_v44  ;;  %v4362_v44 = vsel %vm566_vm15, 1.0, %v9477_v63 }
 0x1d5   :  { %4670 = vrot.lane.b32.xlu0 %v4669_v30, %s4937_s1  ;;  %v5440_v15 = vpop.permute.xlu1 %591  ;;  %v4684_v30 = vpack.i.bf16 %v4349_v1, %v4348_v22 }
 0x1d6   :  { %9479 = vst [vmem:[#allocation48_spill] sm:$0xff] %v5440_v15  ;;  %v4363_v15 = vsel %vm567_vm0, 1.0, %v9477_v63 }
 0x1d7   :  { %839 = vperm.xlu1 %4640, %v5115_v49   ;;  %v4699_v19 = vpack.i.bf16 %v4363_v15, %v4362_v44 }
 0x1d9   :  { %835 = vperm.xlu2 %4641, %v5162_v2  }
 0x1da   :  { %v5450_v26 = vpop.permute.xlu0 %884 }
 0x1dd   :  { %4685 = vrot.lane.b32.xlu0 %v4684_v30, %s4937_s1  ;;  %v5457_v38 = vpop.permute.xlu1 %603  ;;  %v4369_v30 = vsel %vm573_vm12, 1.0, %v9477_v63 }
 0x1de   :  { %9480 = vst [vmem:[#allocation49_spill] sm:$0xff] %v5457_v38  ;;  %v4714_v15 = vpack.i.bf16 %v4369_v30, %v4368_v61  ;;  %v9485_v38 = vmov 12  }
 0x1df   :  { %4643 = vset.pattern.permute.xlu1 %v9481_v58 }
 0x1e0   :  { %876 = vperm.xlu1 %4643, %v5111_v46  }
 0x1e1   :  { %843 = vperm.xlu2 %4641, %v5123_v53  }
 0x1e2   :  { %v5466_v22 = vpop.permute.xlu0 %904 }
 0x1e5   :  { %4700 = vrot.lane.b32.xlu0 %v4699_v19, %s4937_s1  ;;  %v5469_v1 = vpop.permute.xlu1 %611 }
 0x1e6   :  { %9482 = vst [vmem:[#allocation50_spill] sm:$0xff] %v5469_v1 }
 0x1e8   :  { %888 = vperm.xlu1 %4643, %v5150_v62  }
 0x1e9   :  { %4644 = vset.pattern.permute.xlu2 %v9481_v58  ;;  %v5493_v58 = vperm.slane %v5412_v4, 7 }
 0x1ea   :  { %880 = vperm.xlu2 %4644, %v5117_v50  }
 0x1eb   :  { %v5480_v44 = vpop.permute.xlu0 %941  ;;  %vm684_vm13 = vcmp.le.f32.partialorder %v5393_v7, %v5493_v58 }
 0x1ec   :  { %9483 = vst [vmem:[#allocation51_spill] sm:$0xff] %v5480_v44 }
 0x1ed   :  { %4715 = vrot.lane.b32.xlu0 %v4714_v15, %s4937_s1  ;;  %v4382_v15 = vsel %vm684_vm13, 1.0, %v9477_v63  ;;  %vm338_vm13 = vcmp.le.f32.partialorder %v5205_v18, %v5418_v57 }
 0x1ee   :  { %v5483_v19 = vpop.permute.xlu1 %648 }
 0x1f0   :  { %896 = vperm.xlu1 %4643, %v5115_v49  }
 0x1f2   :  { %892 = vperm.xlu2 %4644, %v5162_v2  }
 0x1f3   :  { %v5487_v42 = vpop.permute.xlu0 %961 }
 0x1f4   :  { %9484 = vst [vmem:[#allocation52_spill] sm:$0xff] %v5487_v42  ;;  %v5504_v42 = vpop.trf.xlu2 }
 0x1f6   :  { %v5489_v17 = vpop.permute.xlu1 %660 }
 0x1f8   :  { %4646 = vset.pattern.permute.xlu1 %v9485_v38 }
 0x1f9   :  { %933 = vperm.xlu1 %4646, %v5111_v46  }
 0x1fa   :  { %900 = vperm.xlu2 %4644, %v5123_v53  }
 0x1fc   :  { %v5497_v61 = vpop.permute.xlu0 %998 }
 0x1fe   :  { %v669_v30 = vpop.permute.xlu1 %668 }
 0x1ff   :  { %vm685_vm14 = vcmp.le.f32.partialorder %v669_v30, %v5493_v58 }
 0x200   :  { %v4383_v44 = vsel %vm685_vm14, 1.0, %v9477_v63  ;;  %vm339_vm14 = vcmp.le.f32.partialorder %v5250_v37, %v5418_v57 }
 0x201   :  { %v4729_v1 = vpack.i.bf16 %v4383_v44, %v4382_v15  ;;  %945 = vperm.xlu1 %4646, %v5150_v62   ;;  %v9490_v15 = vmov 13  }
 0x202   :  { %4647 = vset.pattern.permute.xlu2 %v9485_v38 }
 0x203   :  { %937 = vperm.xlu2 %4647, %v5117_v50   ;;  %4730 = vrot.lane.b32.xlu0 %v4729_v1, %s4937_s1 }
 0x204   :  { %v5510_v10 = vpop.permute.xlu0 %1018 }
 0x207   :  { %v5512_v7 = vpop.permute.xlu1 %705 }
 0x208   :  { %9486 = vst [vmem:[#allocation53_spill] sm:$0xff] %v5512_v7 }
 0x209   :  { %v5514_v30 = vpop.permute.xlu2 %729  ;;  %953 = vperm.xlu1 %4646, %v5115_v49  }
 0x20a   :  { %9487 = vst [vmem:[#allocation54_spill] sm:$0xff] %v5514_v30 }
 0x20b   :  { %949 = vperm.xlu2 %4647, %v5162_v2  }
 0x20d   :  { %v5518_v45 = vpop.permute.xlu0 %1055 }
 0x20e   :  { %9488 = vst [vmem:[#allocation55_spill] sm:$0xff] %v5518_v45 }
 0x20f   :  { %v5520_v44 = vpop.permute.xlu1 %717 }
 0x210   :  { %9489 = vst [vmem:[#allocation56_spill] sm:$0xff] %v5520_v44 }
 0x211   :  { %4649 = vset.pattern.permute.xlu1 %v9490_v15 }
 0x212   :  { %v5523_v38 = vpop.permute.xlu2 %766  ;;  %990 = vperm.xlu1 %4649, %v5111_v46  }
 0x213   :  { %957 = vperm.xlu2 %4647, %v5123_v53  }
 0x215   :  { %v5527_v1 = vpop.permute.xlu0 %1075 }
 0x216   :  { %9491 = vst [vmem:[#allocation57_spill] sm:$0xff] %v5527_v1  ;;  %v5544_v1 = vperm.slane %v5504_v42, 1 }
 0x217   :  { %v5529_v7 = vpop.permute.xlu1 %725 }
 0x218   :  { %9492 = vst [vmem:[#allocation58_spill] sm:$0xff] %v5529_v7  ;;  %vm796_vm15 = vcmp.le.f32.partialorder %v5398_v9, %v5544_v1 }
 0x219   :  { %v4396_v16 = vsel %vm796_vm15, 1.0, %v9477_v63 }
 0x21a   :  { %v5531_v30 = vpop.permute.xlu2 %778  ;;  %1002 = vperm.xlu1 %4649, %v5150_v62  }
 0x21b   :  { %4650 = vset.pattern.permute.xlu2 %v9490_v15 }
 0x21c   :  { %994 = vperm.xlu2 %4650, %v5117_v50  }
 0x21e   :  { %v5536_v45 = vpop.permute.xlu0 %1112 }
 0x220   :  { %v5538_v44 = vpop.permute.xlu1 %762 }
 0x222   :  { %v5540_v25 = vpop.permute.xlu2 %786  ;;  %1010 = vperm.xlu1 %4649, %v5115_v49  }
 0x224   :  { %1006 = vperm.xlu2 %4650, %v5162_v2  }
 0x226   :  { %v5547_v7 = vpop.permute.xlu0 %1132 }
 0x228   :  { %v775_v15 = vpop.permute.xlu1 %774 }
 0x229   :  { %vm797_vm0 = vcmp.le.f32.partialorder %v775_v15, %v5544_v1 }
 0x22a   :  { %v4397_v52 = vsel %vm797_vm0, 1.0, %v9477_v63  ;;  %4652 = vset.pattern.permute.xlu1 %v9493_v14 }
 0x22b   :  { %v4744_v36 = vpack.i.bf16 %v4397_v52, %v4396_v16  ;;  %v5555_v47 = vpop.permute.xlu2 %823  ;;  %1047 = vperm.xlu1 %4652, %v5111_v46  }
 0x22c   :  { %9494 = vst [vmem:[#allocation59_spill] sm:$0xff] %v5555_v47  ;;  %1014 = vperm.xlu2 %4650, %v5123_v53  }
 0x22d   :  { %4745 = vrot.lane.b32.xlu0 %v4744_v36, %s4937_s1 }
 0x22f   :  { %v5560_v34 = vpop.permute.xlu0 %242 }
 0x230   :  { %9495 = vst [vmem:[#allocation60_spill] sm:$0xff] %v5560_v34  ;;  %v5562_v9 = vpop.permute.xlu1 %782 }
 0x233   :  { %v5564_v15 = vpop.permute.xlu2 %835  ;;  %1059 = vperm.xlu1 %4652, %v5150_v62  }
 0x234   :  { %9496 = vst [vmem:[#allocation61_spill] sm:$0xff] %v5564_v15  ;;  %4653 = vset.pattern.permute.xlu2 %v9493_v14  ;;  %v9500_v15 = vmov 15  }
 0x235   :  { %1051 = vperm.xlu2 %4653, %v5117_v50  }
 0x237   :  { %v5569_v16 = vpop.permute.xlu0 %262 }
 0x239   :  { %v5571_v52 = vpop.permute.xlu1 %819 }
 0x23a   :  { %9497 = vst [vmem:[#allocation62_spill] sm:$0xff] %v5571_v52 }
 0x23b   :  { %v5573_v47 = vpop.permute.xlu2 %843  ;;  %1067 = vperm.xlu1 %4652, %v5115_v49  }
 0x23c   :  { %9498 = vst [vmem:[#allocation63_spill] sm:$0xff] %v5573_v47 }
 0x23d   :  { %1063 = vperm.xlu2 %4653, %v5162_v2  }
 0x23f   :  { %v5577_v36 = vpop.permute.xlu0 %272 }
 0x241   :  { %v5579_v34 = vpop.permute.xlu1 %831 }
 0x242   :  { %9499 = vst [vmem:[#allocation64_spill] sm:$0xff] %v5579_v34  ;;  %v5594_v34 = vperm.slane %v5504_v42, 3 }
 0x243   :  { %4655 = vset.pattern.permute.xlu1 %v9500_v15 }
 0x244   :  { %v881_v51 = vpop.permute.xlu2 %880  ;;  %1104 = vperm.xlu1 %4655, %v5111_v46   ;;  %vm915_vm0 = vcmp.le.f32.partialorder %v5466_v22, %v5594_v34 }
 0x245   :  { %1071 = vperm.xlu2 %4653, %v5123_v53   ;;  %vm909_vm11 = vcmp.le.f32.partialorder %v881_v51, %v5594_v34 }
 0x247   :  { %v5584_v14 = vpop.permute.xlu0 %4670 }
 0x248   :  { %9501 = vst [vmem:[#allocation65_spill] sm:$0xff] %v5584_v14 }
 0x249   :  { %v5586_v52 = vpop.permute.xlu1 %839 }
 0x24a   :  { %9502 = vst [vmem:[#allocation66_spill] sm:$0xff] %v5586_v52  ;;  %v4411_v52 = vsel %vm909_vm11, 1.0, %v9477_v63  ;;  %vm344_vm11 = vcmp.le.f32.partialorder %v5256_v39, %v5418_v57 }
 0x24b   :  { %v4336_v39 = vsel %vm344_vm11, 1.0, %v9477_v63  ;;  %vm456_vm11 = vcmp.le.f32.partialorder %v5301_v48, %v5434_v60 }
 0x24c   :  { %v5588_v47 = vpop.permute.xlu2 %892  ;;  %1116 = vperm.xlu1 %4655, %v5150_v62  }
 0x24d   :  { %4656 = vset.pattern.permute.xlu2 %v9500_v15  ;;  %v4330_v15 = vsel %vm338_vm13, 1.0, %v9477_v63 }
 0x24e   :  { %1108 = vperm.xlu2 %4656, %v5117_v50  }
 0x24f   :  { %v5596_v55 = vpop.permute.xlu0 %4685 }
 0x252   :  { %v877_v46 = vpop.permute.xlu1 %876 }
 0x253   :  { %vm908_vm12 = vcmp.le.f32.partialorder %v877_v46, %v5594_v34  ;;  %v4331_v46 = vsel %vm339_vm14, 1.0, %v9477_v63 }
 0x254   :  { %v4410_v14 = vsel %vm908_vm12, 1.0, %v9477_v63  ;;  %v901_v23 = vpop.permute.xlu2 %900  ;;  %1124 = vperm.xlu1 %4655, %v5115_v49   ;;  %v5617_v49 = vperm.slane %v5412_v4, 4  ;;  %vm345_vm12 = vcmp.le.f32.partialorder %v5237_v32, %v5418_v57 }
 0x255   :  { %v4759_v62 = vpack.i.bf16 %v4411_v52, %v4410_v14  ;;  %vm914_vm15 = vcmp.le.f32.partialorder %v901_v23, %v5594_v34  ;;  %v4417_v23 = vsel %vm915_vm0, 1.0, %v9477_v63  ;;  %vm341_vm0 = vcmp.le.f32.partialorder %v5258_v40, %v5418_v57 }
 0x256   :  { %1120 = vperm.xlu2 %4656, %v5162_v2   ;;  %v4416_v18 = vsel %vm914_vm15, 1.0, %v9477_v63  ;;  %v4659_v2 = vpack.i.bf16 %v4331_v46, %v4330_v15  ;;  %vm515_vm13 = vcmp.le.f32.partialorder %v5391_v33, %v5617_v49  ;;  %vm516_vm14 = vcmp.le.f32.partialorder %v5318_v11, %v5617_v49 }
 0x257   :  { %v5609_v51 = vpop.permute.xlu0 %4700  ;;  %4760 = vrot.lane.b32.xlu0 %v4759_v62, %s4937_s1  ;;  %v4774_v52 = vpack.i.bf16 %v4417_v23, %v4416_v18  ;;  %vm340_vm15 = vcmp.le.f32.partialorder %v5288_v27, %v5418_v57  ;;  %v4337_v14 = vsel %vm345_vm12, 1.0, %v9477_v63  ;;  %v4361_v15 = vsel %vm516_vm14, 1.0, %v9477_v63 }
 0x258   :  { %v4332_v11 = vsel %vm340_vm15, 1.0, %v9477_v63  ;;  %v4333_v27 = vsel %vm341_vm0, 1.0, %v9477_v63  ;;  %v4674_v40 = vpack.i.bf16 %v4337_v14, %v4336_v39  ;;  %vm457_vm12 = vcmp.le.f32.partialorder %v5229_v29, %v5434_v60 }
 0x259   :  { %vm453_vm14 = vcmp.le.f32.partialorder %v5285_v24, %v5434_v60  ;;  %v4350_v39 = vsel %vm456_vm11, 1.0, %v9477_v63  ;;  %v4351_v14 = vsel %vm457_vm12, 1.0, %v9477_v63  ;;  %vm569_vm15 = vcmp.le.f32.partialorder %v5409_v59, %v5453_v28 }
 0x25a   :  { %v5620_v37 = vpop.permute.xlu1 %888  ;;  %v4347_v29 = vsel %vm453_vm14, 1.0, %v9477_v63  ;;  %vm568_vm0 = vcmp.le.f32.partialorder %v5327_v54, %v5453_v28  ;;  %vm458_vm11 = vcmp.le.f32.partialorder %v5293_v35, %v5434_v60  ;;  %vm459_vm12 = vcmp.le.f32.partialorder %v5357_v6, %v5434_v60 }
 0x25b   :  { %v4364_v59 = vsel %vm568_vm0, 1.0, %v9477_v63  ;;  %vm571_vm14 = vcmp.le.f32.partialorder %v5422_v41, %v5453_v28  ;;  %vm570_vm0 = vcmp.le.f32.partialorder %v5372_v3, %v5453_v28 }
 0x25c   :  { %4660 = vrot.lane.b32.xlu1 %v4659_v2, %s4937_s1 }
 0x25d   :  { %v5628_v22 = vpop.permute.xlu2 %937  ;;  %4820 = vset.pattern.permute.xlu1 %v9473_v56 }
 0x25e   :  { %1128 = vperm.xlu2 %4656, %v5123_v53   ;;  %v4360_v53 = vsel %vm515_vm13, 1.0, %v9477_v63  ;;  %vm452_vm13 = vcmp.le.f32.partialorder %v5210_v20, %v5434_v60 }
 0x25f   :  { %v4716_v32 = vpop.permute.xlu0 %4715  ;;  %4775 = vrot.lane.b32.xlu0 %v4774_v52, %s4937_s1  ;;  %v4664_v52 = vpack.i.bf16 %v4333_v27, %v4332_v11  ;;  %v4346_v48 = vsel %vm452_vm13, 1.0, %v9477_v63  ;;  %v4352_v11 = vsel %vm458_vm11, 1.0, %v9477_v63  ;;  %v4353_v27 = vsel %vm459_vm12, 1.0, %v9477_v63 }
 0x260   :  { %v4718_v62 = vunpack.i.h.bf16 %v4716_v32  ;;  %v4717_v33 = vunpack.i.l.bf16 %v4716_v32  ;;  %v4679_v20 = vpack.i.bf16 %v4347_v29, %v4346_v48  ;;  %vm680_vm13 = vcmp.le.f32.partialorder %v5483_v19, %v5493_v58 }
 0x261   :  { %v4694_v54 = vpack.i.bf16 %v4353_v27, %v4352_v11  ;;  %v4378_v35 = vsel %vm680_vm13, 1.0, %v9477_v63  ;;  %v4367_v19 = vsel %vm571_vm14, 1.0, %v9477_v63  ;;  %vm686_vm11 = vcmp.le.f32.partialorder %v5354_v13, %v5493_v58 }
 0x262   :  { %v5647_v46 = vpop.permute.xlu1 %896  ;;  %v1438_v18 = vsel %vm9404_vm1, %v4360_v53, %v4717_v33  ;;  %v1439_v2 = vsel %vm9404_vm1, %v4361_v15, %v4718_v62  ;;  %v9503_v62 = vmov 2   ;;  %v4689_v33 = vpack.i.bf16 %v4351_v14, %v4350_v39 }
 0x263   :  { %v1506_v23 = vpack.c.bf16 %v1439_v2, %v1438_v18  ;;  %v4365_v15 = vsel %vm569_vm15, 1.0, %v9477_v63  ;;  %vm681_vm15 = vcmp.le.f32.partialorder %v5342_v21, %v5493_v58  ;;  %vm687_vm12 = vcmp.le.f32.partialorder %v5370_v31, %v5493_v58 }
 0x264   :  { %4675 = vrot.lane.b32.xlu1 %v4674_v40, %s4937_s1  ;;  %v4704_v40 = vpack.i.bf16 %v4365_v15, %v4364_v59  ;;  %v4379_v2 = vsel %vm681_vm15, 1.0, %v9477_v63  ;;  %vm683_vm13 = vcmp.le.f32.partialorder %v5489_v17, %v5493_v58  ;;  %v4384_v3 = vsel %vm686_vm11, 1.0, %v9477_v63 }
 0x265   :  { %1586 = vmatpush.bf16.msrb.mxu3 %v1506_v23  ;;  %v5656_v32 = vpop.permute.xlu2 %949  ;;  %v4719_v23 = vpack.i.bf16 %v4379_v2, %v4378_v35  ;;  %v4385_v14 = vsel %vm687_vm12, 1.0, %v9477_v63  ;;  %vm682_vm14 = vcmp.le.f32.partialorder %v5361_v5, %v5493_v58  ;;  %v4381_v48 = vsel %vm683_vm13, 1.0, %v9477_v63 }
 0x266   :  { %4665 = vrot.lane.b32.xlu2 %v4664_v52, %s4937_s1  ;;  %v4366_v52 = vsel %vm570_vm0, 1.0, %v9477_v63  ;;  %v4734_v29 = vpack.i.bf16 %v4385_v14, %v4384_v3  ;;  %v4380_v13 = vsel %vm682_vm14, 1.0, %v9477_v63  ;;  %vm799_vm15 = vcmp.le.f32.partialorder %v5562_v9, %v5544_v1 }
 0x267   :  { %4819 = vset.pattern.permute.xlu2 %v9503_v62  ;;  %v4709_v39 = vpack.i.bf16 %v4367_v19, %v4366_v52  ;;  %vm798_vm0 = vcmp.le.f32.partialorder %v5531_v30, %v5544_v1  ;;  %vm794_vm11 = vcmp.le.f32.partialorder %v5538_v44, %v5544_v1  ;;  %v4399_v5 = vsel %vm799_vm15, 1.0, %v9477_v63 }
 0x268   :  { %vm795_vm12 = vcmp.le.f32.partialorder %v5523_v38, %v5544_v1  ;;  %v4394_v9 = vsel %vm794_vm11, 1.0, %v9477_v63  ;;  %vm911_vm13 = vcmp.le.f32.partialorder %v5620_v37, %v5594_v34  ;;  %vm910_vm14 = vcmp.le.f32.partialorder %v5450_v26, %v5594_v34 }
 0x269   :  { %v4395_v59 = vsel %vm795_vm12, 1.0, %v9477_v63  ;;  %vm800_vm15 = vcmp.le.f32.partialorder %v5540_v25, %v5544_v1  ;;  %v4413_v44 = vsel %vm911_vm13, 1.0, %v9477_v63  ;;  %v5748_v37 = vperm.slane %v5504_v42, 5 }
 0x26a   :  { %v4739_v11 = vpack.i.bf16 %v4395_v59, %v4394_v9  ;;  %v4412_v27 = vsel %vm910_vm14, 1.0, %v9477_v63  ;;  %vm913_vm10 = vcmp.le.f32.partialorder %v5647_v46, %v5594_v34 }
 0x26b   :  { %v5668_v53 = vpop.permute.xlu1 %933  ;;  %v4764_v26 = vpack.i.bf16 %v4413_v44, %v4412_v27 }
 0x26c   :  { %4690 = vrot.lane.b32.xlu1 %v4689_v33, %s4937_s1  ;;  %v4724_v33 = vpack.i.bf16 %v4381_v48, %v4380_v13 }
 0x26d   :  { %v5673_v24 = vpop.permute.xlu2 %957 }
 0x26e   :  { %4680 = vrot.lane.b32.xlu2 %v4679_v20, %s4937_s1  ;;  %v4398_v20 = vsel %vm798_vm0, 1.0, %v9477_v63  ;;  %vm801_vm0 = vcmp.le.f32.partialorder %v5406_v8, %v5544_v1 }
 0x26f   :  { %v4749_v15 = vpack.i.bf16 %v4399_v5, %v4398_v20 }
 0x273   :  { %v5686_v18 = vpop.permute.xlu1 %945 }
 0x274   :  { %4705 = vrot.lane.b32.xlu1 %v4704_v40, %s4937_s1  ;;  %v4400_v40 = vsel %vm800_vm15, 1.0, %v9477_v63  ;;  %vm912_vm15 = vcmp.le.f32.partialorder %v5588_v47, %v5594_v34 }
 0x276   :  { %v5695_v6 = vpop.permute.xlu2 %994  ;;  %4695 = vrot.lane.b32.xlu2 %v4694_v54, %s4937_s1  ;;  %v4401_v54 = vsel %vm801_vm0, 1.0, %v9477_v63 }
 0x277   :  { %v4754_v25 = vpack.i.bf16 %v4401_v54, %v4400_v40  ;;  %vm1023_vm14 = vcmp.le.f32.partialorder %v5695_v6, %v5748_v37 }
 0x278   :  { %v4427_v46 = vsel %vm1023_vm14, 1.0, %v9477_v63 }
 0x27b   :  { %v5704_v41 = vpop.permute.xlu1 %953 }
 0x27c   :  { %4720 = vrot.lane.b32.xlu1 %v4719_v23, %s4937_s1 }
 0x27e   :  { %v1007_v21 = vpop.permute.xlu2 %1006  ;;  %4710 = vrot.lane.b32.xlu2 %v4709_v39, %s4937_s1  ;;  %v4415_v39 = vsel %vm913_vm10, 1.0, %v9477_v63  ;;  %vm1024_vm10 = vcmp.le.f32.partialorder %v5497_v61, %v5748_v37  ;;  %v5796_v61 = vperm.slane %v5504_v42, 7 }
 0x27f   :  { %vm1026_vm11 = vcmp.le.f32.partialorder %v1007_v21, %v5748_v37  ;;  %v4414_v21 = vsel %vm912_vm15, 1.0, %v9477_v63 }
 0x280   :  { %v4430_v8 = vsel %vm1026_vm11, 1.0, %v9477_v63  ;;  %v4769_v3 = vpack.i.bf16 %v4415_v39, %v4414_v21  ;;  %vm1029_vm11 = vcmp.le.f32.partialorder %v5510_v10, %v5748_v37 }
 0x284   :  { %v991_v31 = vpop.permute.xlu1 %990  ;;  %4735 = vrot.lane.b32.xlu1 %v4734_v29, %s4937_s1  ;;  %v4433_v29 = vsel %vm1029_vm11, 1.0, %v9477_v63  ;;  %vm1143_vm11 = vcmp.le.f32.partialorder %v5547_v7, %v5796_v61 }
 0x285   :  { %vm1022_vm12 = vcmp.le.f32.partialorder %v991_v31, %v5748_v37  ;;  %v4428_v31 = vsel %vm1024_vm10, 1.0, %v9477_v63  ;;  %v4449_v54 = vsel %vm1143_vm11, 1.0, %v9477_v63 }
 0x286   :  { %v1015_v17 = vpop.permute.xlu2 %1014  ;;  %4725 = vrot.lane.b32.xlu2 %v4724_v33, %s4937_s1  ;;  %v4426_v2 = vsel %vm1022_vm12, 1.0, %v9477_v63 }
 0x287   :  { %v4779_v6 = vpack.i.bf16 %v4427_v46, %v4426_v2  ;;  %vm1028_vm0 = vcmp.le.f32.partialorder %v1015_v17, %v5748_v37 }
 0x288   :  { %v4432_v47 = vsel %vm1028_vm0, 1.0, %v9477_v63  ;;  %vm1138_vm0 = vcmp.le.f32.partialorder %v5536_v45, %v5796_v61 }
 0x289   :  { %v4794_v33 = vpack.i.bf16 %v4433_v29, %v4432_v47  ;;  %v5844_v47 = vperm.slane %v5412_v4, 2  ;;  %v9505_v29 = vld [vmem:[#allocation65_spill] sm:$0xff] }
 0x28c   :  { %v1003_v30 = vpop.permute.xlu1 %1002  ;;  %4750 = vrot.lane.b32.xlu1 %v4749_v15, %s4937_s1 }
 0x28d   :  { %vm1025_vm12 = vcmp.le.f32.partialorder %v1003_v30, %v5748_v37 }
 0x28e   :  { %4740 = vrot.lane.b32.xlu2 %v4739_v11, %s4937_s1  ;;  %v4429_v13 = vsel %vm1025_vm12, 1.0, %v9477_v63 }
 0x28f   :  { %v5743_v38 = vpop.permute.xlu2 %1051  ;;  %v4784_v17 = vpack.i.bf16 %v4429_v13, %v4428_v31  ;;  %v4673_v13 = vunpack.i.h.bf16 %v9505_v29 }
 0x294   :  { %v1011_v35 = vpop.permute.xlu1 %1010  ;;  %4765 = vrot.lane.b32.xlu1 %v4764_v26, %s4937_s1  ;;  %v4444_v26 = vsel %vm1138_vm0, 1.0, %v9477_v63  ;;  %vm514_vm0 = vcmp.le.f32.partialorder %v5309_v0, %v5617_v49 }
 0x295   :  { %vm1027_vm13 = vcmp.le.f32.partialorder %v1011_v35, %v5748_v37 }
 0x296   :  { %v4431_v19 = vsel %vm1027_vm13, 1.0, %v9477_v63  ;;  %4755 = vrot.lane.b32.xlu2 %v4754_v25, %s4937_s1 }
 0x297   :  { %v4789_v23 = vpack.i.bf16 %v4431_v19, %v4430_v8  ;;  %v5765_v52 = vpop.permute.xlu2 %1063 }
 0x299   :  { %4790 = vrot.lane.b32.xlu0 %v4789_v23, %s4937_s1 }
 0x29c   :  { %4780 = vrot.lane.b32.xlu1 %v4779_v6, %s4937_s1  ;;  %v5827_v6 = vperm.slane %v5412_v4, 0 }
 0x29d   :  { %v5775_v14 = vpop.permute.xlu1 %1047 }
 0x29e   :  { %4770 = vrot.lane.b32.xlu2 %v4769_v3, %s4937_s1  ;;  %vm285_vm11 = vcmp.le.f32.partialorder %v5569_v16, %v5827_v6  ;;  %v9504_v3 = vld [vmem:[#allocation21_spill] sm:$0xff] }
 0x29f   :  { %v5782_v48 = vpop.permute.xlu2 %1071 }
 0x2a4   :  { %4795 = vrot.lane.b32.xlu1 %v4794_v33, %s4937_s1 }
 0x2a5   :  { %v5790_v10 = vpop.permute.xlu1 %1059 }
 0x2a6   :  { %4785 = vrot.lane.b32.xlu2 %v4784_v17, %s4937_s1  ;;  %v4359_v17 = vsel %vm514_vm0, 1.0, %v9477_v63 }
 0x2a8   :  { %v1109_v5 = vpop.permute.xlu2 %1108 }
 0x2a9   :  { %vm1137_vm13 = vcmp.le.f32.partialorder %v1109_v5, %v5796_v61 }
 0x2aa   :  { %v4443_v59 = vsel %vm1137_vm13, 1.0, %v9477_v63 }
 0x2ad   :  { %v5793_v20 = vpop.permute.xlu1 %1067 }
 0x2b0   :  { %v1121_v9 = vpop.permute.xlu2 %1120 }
 0x2b1   :  { %vm1140_vm10 = vcmp.le.f32.partialorder %v1121_v9, %v5796_v61 }
 0x2b2   :  { %v4446_v7 = vsel %vm1140_vm10, 1.0, %v9477_v63  ;;  %vm286_vm10 = vcmp.le.f32.partialorder %v9504_v3, %v5827_v6  ;;  %v9508_v3 = vld [vmem:[#allocation24_spill] sm:$0xff] }
 0x2b6   :  { %v1105_v15 = vpop.permute.xlu1 %1104 }
 0x2b7   :  { %vm1136_vm14 = vcmp.le.f32.partialorder %v1105_v15, %v5796_v61  ;;  %v4327_v15 = vsel %vm286_vm10, 1.0, %v9477_v63 }
 0x2b8   :  { %v4442_v11 = vsel %vm1136_vm14, 1.0, %v9477_v63  ;;  %v1129_v30 = vpop.permute.xlu2 %1128  ;;  %vm513_vm14 = vcmp.le.f32.partialorder %v5383_v12, %v5617_v49 }
 0x2b9   :  { %v4799_v44 = vpack.i.bf16 %v4443_v59, %v4442_v11  ;;  %vm1142_vm15 = vcmp.le.f32.partialorder %v1129_v30, %v5796_v61  ;;  %v4358_v12 = vsel %vm513_vm14, 1.0, %v9477_v63  ;;  %v9506_v59 = vld [vmem:[#allocation29_spill] sm:$0xff] }
 0x2ba   :  { %v4448_v27 = vsel %vm1142_vm15, 1.0, %v9477_v63  ;;  %vm288_vm15 = vcmp.le.f32.partialorder %v5305_v43, %v5827_v6  ;;  %v4672_v43 = vunpack.i.l.bf16 %v9505_v29  ;;  %v9509_v29 = vld [vmem:[#allocation27_spill] sm:$0xff] }
 0x2bb   :  { %4800 = vrot.lane.b32.xlu2 %v4799_v44, %s4937_s1  ;;  %v4814_v8 = vpack.i.bf16 %v4449_v54, %v4448_v27  ;;  %v4329_v16 = vsel %vm288_vm15, 1.0, %v9477_v63  ;;  %v1421_v54 = vsel %vm9404_vm1, %v4327_v15, %v4673_v13  ;;  %vm282_vm15 = vcmp.le.f32.partialorder %v9508_v3, %v5827_v6  ;;  %v9512_v15 = vld [vmem:[#allocation41_spill] sm:$0xff] }
 0x2bc   :  { %vm401_vm0 = vcmp.le.f32.partialorder %v9509_v29, %v5844_v47  ;;  %vm511_vm10 = vcmp.le.f32.partialorder %v9512_v15, %v5617_v49  ;;  %v9516_v29 = vld [vmem:[#allocation26_spill] sm:$0xff]  ;;  %v4687_v15 = vunpack.i.l.bf16 %v5596_v55 }
 0x2be   :  { %v1117_v40 = vpop.permute.xlu1 %1116 }
 0x2bf   :  { %vm1139_vm12 = vcmp.le.f32.partialorder %v1117_v40, %v5796_v61 }
 0x2c0   :  { %v4445_v25 = vsel %vm1139_vm12, 1.0, %v9477_v63  ;;  %v5813_v35 = vpop.permute.xlu2 %4665  ;;  %vm287_vm12 = vcmp.le.f32.partialorder %v5577_v36, %v5827_v6  ;;  %v4326_v36 = vsel %vm285_vm11, 1.0, %v9477_v63 }
 0x2c1   :  { %v4804_v19 = vpack.i.bf16 %v4445_v25, %v4444_v26  ;;  %v4328_v5 = vsel %vm287_vm12, 1.0, %v9477_v63  ;;  %v1420_v26 = vsel %vm9404_vm1, %v4326_v36, %v4672_v43  ;;  %v9507_v25 = vld [vmem:[#allocation32_spill] sm:$0xff] }
 0x2c2   :  { %vm284_vm14 = vcmp.le.f32.partialorder %v9507_v25, %v5827_v6  ;;  %v1496_v13 = vpack.c.bf16 %v1421_v54, %v1420_v26  ;;  %v4356_v25 = vsel %vm511_vm10, 1.0, %v9477_v63 }
 0x2c3   :  { %4805 = vrot.lane.b32.xlu0 %v4804_v19, %s4937_s1  ;;  %4815 = vrot.lane.b32.xlu2 %v4814_v8, %s4937_s1  ;;  %v4668_v8 = vunpack.i.h.bf16 %v5813_v35  ;;  %v4667_v19 = vunpack.i.l.bf16 %v5813_v35  ;;  %v9510_v35 = vld [vmem:[#allocation60_spill] sm:$0xff]  ;;  %v4325_v43 = vsel %vm284_vm14, 1.0, %v9477_v63 }
 0x2c4   :  { %vm281_vm11 = vcmp.le.f32.partialorder %v9510_v35, %v5827_v6  ;;  %v9517_v35 = vld [vmem:[#allocation40_spill] sm:$0xff] }
 0x2c6   :  { %v1125_v45 = vpop.permute.xlu1 %1124 }
 0x2c7   :  { %vm1141_vm13 = vcmp.le.f32.partialorder %v1125_v45, %v5796_v61 }
 0x2c8   :  { %v4447_v2 = vsel %vm1141_vm13, 1.0, %v9477_v63  ;;  %v5821_v23 = vpop.permute.xlu2 %4680  ;;  %vm283_vm13 = vcmp.le.f32.partialorder %v9506_v59, %v5827_v6  ;;  %v9513_v59 = vld [vmem:[#allocation28_spill] sm:$0xff] }
 0x2c9   :  { %v4809_v39 = vpack.i.bf16 %v4447_v2, %v4446_v7 }
 0x2cb   :  { %4810 = vrot.lane.b32.xlu1 %v4809_v39, %s4937_s1  ;;  %v4324_v39 = vsel %vm283_vm13, 1.0, %v9477_v63  ;;  %vm512_vm13 = vcmp.le.f32.partialorder %v9513_v59, %v5617_v49 }
 0x2ce   :  { %v5824_v46 = vpop.permute.xlu1 %4660 }
 0x2d0   :  { %v5829_v21 = vpop.permute.xlu2 %4695 }
 0x2d1   :  { %v4698_v36 = vunpack.i.h.bf16 %v5829_v21 }
 0x2d6   :  { %v4676_v33 = vpop.permute.xlu1 %4675 }
 0x2d7   :  { %v4678_v0 = vunpack.i.h.bf16 %v4676_v33  ;;  %v4677_v31 = vunpack.i.l.bf16 %v4676_v33  ;;  %v9511_v33 = vld [vmem:[#allocation25_spill] sm:$0xff] }
 0x2d8   :  { %v4711_v9 = vpop.permute.xlu2 %4710  ;;  %vm402_vm12 = vcmp.le.f32.partialorder %v9511_v33, %v5844_v47  ;;  %v9518_v33 = vld [vmem:[#allocation23_spill] sm:$0xff] }
 0x2d9   :  { %v4713_v11 = vunpack.i.h.bf16 %v4711_v9  ;;  %v4712_v30 = vunpack.i.l.bf16 %v4711_v9  ;;  %v1422_v44 = vsel %vm9404_vm1, %v4328_v5, %v4677_v31  ;;  %v1423_v27 = vsel %vm9404_vm1, %v4329_v16, %v4678_v0 }
 0x2da   :  { %v1504_v40 = vpack.c.bf16 %v1423_v27, %v1422_v44  ;;  %v4663_v0 = vunpack.i.h.bf16 %v5824_v46  ;;  %v4662_v31 = vunpack.i.l.bf16 %v5824_v46  ;;  %v1418_v16 = vsel %vm9404_vm1, %v4324_v39, %v4667_v19  ;;  %v9514_v27 = vld [vmem:[#allocation37_spill] sm:$0xff] }
 0x2db   :  { %v1436_v45 = vsel %vm9404_vm1, %v4358_v12, %v4712_v30  ;;  %v1437_v7 = vsel %vm9404_vm1, %v4359_v17, %v4713_v11  ;;  %v1419_v17 = vsel %vm9404_vm1, %v4325_v43, %v4668_v8  ;;  %v4697_v5 = vunpack.i.l.bf16 %v5829_v21 }
 0x2dc   :  { %1528 = vmatpush.bf16.msra.mxu1 %v1504_v40  ;;  %4574 = vmatpush.bf16.msra.mxu2 %v1504_v40  ;;  %v1498_v2 = vpack.c.bf16 %v1437_v7, %v1436_v45  ;;  %v4323_v46 = vsel %vm282_vm15, 1.0, %v9477_v63  ;;  %v4344_v21 = vsel %vm401_vm0, 1.0, %v9477_v63  ;;  %v4345_v11 = vsel %vm402_vm12, 1.0, %v9477_v63  ;;  %v9515_v40 = vld [vmem:[#allocation22_spill] sm:$0xff] }
 0x2dd   :  { %v4322_v30 = vsel %vm281_vm11, 1.0, %v9477_v63  ;;  %v1488_v44 = vpack.c.bf16 %v1419_v17, %v1418_v16  ;;  %vm399_vm14 = vcmp.le.f32.partialorder %v9514_v27, %v5844_v47  ;;  %vm400_vm8 = vcmp.le.f32.partialorder %v9515_v40, %v5844_v47 }
 0x2de   :  { %v4691_v12 = vpop.permute.xlu1 %4690  ;;  %1587 = vmatpush.bf16.msrb.mxu3 %v1498_v2  ;;  %v1416_v26 = vsel %vm9404_vm1, %v4322_v30, %v4662_v31  ;;  %v1417_v54 = vsel %vm9404_vm1, %v4323_v46, %v4663_v0  ;;  %v4357_v8 = vsel %vm512_vm13, 1.0, %v9477_v63  ;;  %v1430_v7 = vsel %vm9404_vm1, %v4344_v21, %v4697_v5  ;;  %v9519_v0 = vld [vmem:[#allocation33_spill] sm:$0xff] }
 0x2df   :  { %v4693_v19 = vunpack.i.h.bf16 %v4691_v12  ;;  %v4692_v45 = vunpack.i.l.bf16 %v4691_v12  ;;  %v1431_v2 = vsel %vm9404_vm1, %v4345_v11, %v4698_v36  ;;  %v4342_v39 = vsel %vm399_vm14, 1.0, %v9477_v63 }
 0x2e0   :  { %v5885_v9 = vpop.permute.xlu2 %4725  ;;  %1529 = vmatpush.bf16.msra.mxu1 %v1496_v13  ;;  %4575 = vmatpush.bf16.msra.mxu2 %v1496_v13  ;;  %v4343_v3 = vsel %vm400_vm8, 1.0, %v9477_v63  ;;  %vm509_vm15 = vcmp.le.f32.partialorder %v9516_v29, %v5617_v49  ;;  %vm510_vm0 = vcmp.le.f32.partialorder %v9517_v35, %v5617_v49  ;;  %v4703_v13 = vunpack.i.h.bf16 %v5609_v51  ;;  %v9522_v35 = vld [vmem:[#allocation54_spill] sm:$0xff] }
 0x2e1   :  { %v1480_v12 = vpack.c.bf16 %v1417_v54, %v1416_v26  ;;  %vm397_vm11 = vcmp.le.f32.partialorder %v9518_v33, %v5844_v47  ;;  %vm398_vm12 = vcmp.le.f32.partialorder %v9519_v0, %v5844_v47  ;;  %v4702_v31 = vunpack.i.l.bf16 %v5609_v51  ;;  %v9520_v26 = vld [vmem:[#allocation11_spill] sm:$0xff]  ;;  %v9521_v54 = vld [vmem:[#allocation12_spill] sm:$0xff] }
 0x2e2   :  { %v1505_v36 = vpack.c.bf16 %v1431_v2, %v1430_v7  ;;  %v4688_v5 = vunpack.i.h.bf16 %v5596_v55  ;;  %v1428_v46 = vsel %vm9404_vm1, %v4342_v39, %v4692_v45  ;;  %v1429_v21 = vsel %vm9404_vm1, %v4343_v3, %v4693_v19 }
 0x2e3   :  { %v5933_v11 = vperm.slane %v5504_v42, 0  ;;  %v4354_v55 = vsel %vm509_vm15, 1.0, %v9477_v63  ;;  %v4355_v27 = vsel %vm510_vm0, 1.0, %v9477_v63  ;;  %v4340_v40 = vsel %vm397_vm11, 1.0, %v9477_v63 }
 0x2e4   :  { %1530 = vmatpush.bf16.msra.mxu1 %v1488_v44  ;;  %4576 = vmatpush.bf16.msra.mxu2 %v1488_v44  ;;  %v1433_v19 = vsel %vm9404_vm1, %v4355_v27, %v4703_v13  ;;  %v4341_v45 = vsel %vm398_vm12, 1.0, %v9477_v63  ;;  %v1426_v7 = vsel %vm9404_vm1, %v4340_v40, %v4687_v15  ;;  %v5964_v29 = vperm.slane %v5412_v4, 6 }
 0x2e5   :  { %v1427_v2 = vsel %vm9404_vm1, %v4341_v45, %v4688_v5  ;;  %vm743_vm8 = vcmp.le.f32.partialorder %v9522_v35, %v5933_v11  ;;  %v9524_v5 = vld [vmem:[#allocation35_spill] sm:$0xff]  ;;  %v9528_v45 = vld [vmem:[#allocation49_spill] sm:$0xff] }
 0x2e6   :  { %v4706_v43 = vpop.permute.xlu1 %4705  ;;  %v1489_v13 = vpack.c.bf16 %v1427_v2, %v1426_v7  ;;  %vm629_vm13 = vcmp.le.f32.partialorder %v9524_v5, %v5964_v29  ;;  %vm626_vm11 = vcmp.le.f32.partialorder %v9528_v45, %v5964_v29  ;;  %v9529_v7 = vld [vmem:[#allocation36_spill] sm:$0xff]  ;;  %v9530_v2 = vld [vmem:[#allocation45_spill] sm:$0xff] }
 0x2e7   :  { %v4708_v16 = vunpack.i.h.bf16 %v4706_v43  ;;  %v4707_v17 = vunpack.i.l.bf16 %v4706_v43  ;;  %v9523_v43 = vld [vmem:[#allocation44_spill] sm:$0xff]  ;;  %v4376_v27 = vsel %vm629_vm13, 1.0, %v9477_v63  ;;  %vm625_vm12 = vcmp.le.f32.partialorder %v9529_v7, %v5964_v29 }
 0x2e8   :  { %v5928_v59 = vpop.permute.xlu2 %4740  ;;  %1531 = vmatpush.bf16.msra.mxu1 %v1480_v12  ;;  %4577 = vmatpush.bf16.msra.mxu2 %v1480_v12  ;;  %vm744_vm10 = vcmp.le.f32.partialorder %v9523_v43, %v5933_v11  ;;  %v4372_v5 = vsel %vm625_vm12, 1.0, %v9477_v63 }
 0x2e9   :  { %v1434_v51 = vsel %vm9404_vm1, %v4356_v25, %v4707_v17  ;;  %v1435_v30 = vsel %vm9404_vm1, %v4357_v8, %v4708_v16  ;;  %v1497_v25 = vpack.c.bf16 %v1429_v21, %v1428_v46  ;;  %v1432_v8 = vsel %vm9404_vm1, %v4354_v55, %v4702_v31  ;;  %v4731_v16 = vpop.permute.xlu0 %4730  ;;  %v9525_v46 = vld [vmem:[#allocation38_spill] sm:$0xff]  ;;  %v9526_v21 = vld [vmem:[#allocation43_spill] sm:$0xff] }
 0x2ea   :  { %v1490_v44 = vpack.c.bf16 %v1435_v30, %v1434_v51  ;;  %v1482_v3 = vpack.c.bf16 %v1433_v19, %v1432_v8  ;;  %v4392_v31 = vsel %vm743_vm8, 1.0, %v9477_v63  ;;  %v4393_v17 = vsel %vm744_vm10, 1.0, %v9477_v63  ;;  %v9527_v30 = vld [vmem:[#allocation50_spill] sm:$0xff] }
 0x2eb   :  { %4450 = vmatmul.msk.bf16.vlgmr.msra.gmra.mxu1 %vm9404_vm1, %v9520_v26  ;;  %4452 = vmatmul.msk.bf16.vlgmr.msra.gmra.mxu2 %vm9404_vm1, %v9521_v54  ;;  %vm630_vm14 = vcmp.le.f32.partialorder %v9525_v46, %v5964_v29  ;;  %vm627_vm15 = vcmp.le.f32.partialorder %v9526_v21, %v5964_v29  ;;  %v4732_v51 = vunpack.i.l.bf16 %v4731_v16  ;;  %vm628_vm0 = vcmp.le.f32.partialorder %v9527_v30, %v5964_v29  ;;  %v9535_v21 = vld [vmem:[#allocation42_spill] sm:$0xff]  ;;  %v9536_v30 = vld [vmem:[#allocation56_spill] sm:$0xff] }
 0x2ec   :  { %1557 = vmatpush.bf16.msrb.mxu2 %v1505_v36  ;;  %1588 = vmatpush.bf16.msrb.mxu3 %v1490_v44  ;;  %v4733_v44 = vunpack.i.h.bf16 %v4731_v16  ;;  %v4377_v8 = vsel %vm630_vm14, 1.0, %v9477_v63  ;;  %v4374_v19 = vsel %vm627_vm15, 1.0, %v9477_v63  ;;  %vm741_vm8 = vcmp.le.f32.partialorder %v9530_v2, %v5933_v11 }
 0x2ed   :  { %v4375_v35 = vsel %vm628_vm0, 1.0, %v9477_v63  ;;  %vm739_vm14 = vcmp.le.f32.partialorder %v9535_v21, %v5933_v11  ;;  %vm740_vm15 = vcmp.le.f32.partialorder %v9536_v30, %v5933_v11 }
 0x2ee   :  { %v5961_v39 = vpop.permute.xlu1 %4720 }
 0x2ef   :  { %v4723_v7 = vunpack.i.h.bf16 %v5961_v39  ;;  %v4722_v2 = vunpack.i.l.bf16 %v5961_v39  ;;  %v9539_v39 = vld [vmem:[#allocation53_spill] sm:$0xff] }
 0x2f0   :  { %1558 = vmatpush.bf16.msrb.mxu2 %v1497_v25  ;;  %v4756_v12 = vpop.permute.xlu2 %4755  ;;  %1589 = vmatpush.bf16.msrb.mxu3 %v1482_v3  ;;  %v9531_v3 = vld [vmem:[#allocation34_spill] sm:$0xff]  ;;  %vm737_vm12 = vcmp.le.f32.partialorder %v9539_v39, %v5933_v11  ;;  %v6092_v39 = vperm.slane %v5504_v42, 6 }
 0x2f1   :  { %v4758_v33 = vunpack.i.h.bf16 %v4756_v12  ;;  %v4757_v0 = vunpack.i.l.bf16 %v4756_v12  ;;  %vm624_vm10 = vcmp.le.f32.partialorder %v9531_v3, %v5964_v29  ;;  %v1444_v12 = vsel %vm9404_vm1, %v4374_v19, %v4732_v51 }
 0x2f2   :  { %v4371_v46 = vsel %vm624_vm10, 1.0, %v9477_v63  ;;  %v4373_v51 = vsel %vm626_vm11, 1.0, %v9477_v63 }
 0x2f3   :  { %4458 = vmatmul.msk.bf16.vlgmr.msrb.gmra.mxu3 %vm9404_vm1, %v9520_v26  ;;  %v1454_v4 = vsel %vm9404_vm1, %v4392_v31, %v4757_v0  ;;  %v1455_v36 = vsel %vm9404_vm1, %v4393_v17, %v4758_v33  ;;  %v4746_v33 = vpop.permute.xlu0 %4745  ;;  %v4728_v0 = vunpack.i.h.bf16 %v5885_v9  ;;  %v4727_v31 = vunpack.i.l.bf16 %v5885_v9 }
 0x2f4   :  { %1559 = vmatpush.bf16.msrb.mxu2 %v1489_v13  ;;  %v1508_v15 = vpack.c.bf16 %v1455_v36, %v1454_v4  ;;  %v1445_v17 = vsel %vm9404_vm1, %v4375_v35, %v4733_v44  ;;  %v9532_v4 = vld [vmem:[#allocation9_spill] sm:$0xff]  ;;  %v4390_v9 = vsel %vm741_vm8, 1.0, %v9477_v63  ;;  %v9537_v44 = vld [vmem:[#allocation58_spill] sm:$0xff]  ;;  %v1441_v30 = vsel %vm9404_vm1, %v4371_v46, %v4723_v7 }
 0x2f5   :  { %v9533_v36 = vld [vmem:[#allocation13_spill] sm:$0xff]  ;;  %vm742_vm0 = vcmp.le.f32.partialorder %v9537_v44, %v5933_v11  ;;  %v1443_v19 = vsel %vm9404_vm1, %v4373_v51, %v4728_v0  ;;  %v4743_v51 = vunpack.i.h.bf16 %v5928_v59  ;;  %v4742_v44 = vunpack.i.l.bf16 %v5928_v59 }
 0x2f6   :  { %v4736_v55 = vpop.permute.xlu1 %4735  ;;  %1644 = vmatpush.bf16.msrb.mxu1 %v1508_v15  ;;  %v9534_v15 = vld [vmem:[#allocation48_spill] sm:$0xff] }
 0x2f7   :  { %v4738_v40 = vunpack.i.h.bf16 %v4736_v55  ;;  %v4737_v25 = vunpack.i.l.bf16 %v4736_v55  ;;  %vm623_vm13 = vcmp.le.f32.partialorder %v9534_v15, %v5964_v29  ;;  %v1499_v55 = vpack.c.bf16 %v1445_v17, %v1444_v12  ;;  %v9538_v12 = vld [vmem:[#allocation39_spill] sm:$0xff] }
 0x2f8   :  { %v4370_v35 = vsel %vm623_vm13, 1.0, %v9477_v63  ;;  %vm738_vm11 = vcmp.le.f32.partialorder %v9538_v12, %v5933_v11 }
 0x2f9   :  { %v1446_v13 = vsel %vm9404_vm1, %v4376_v27, %v4737_v25  ;;  %v1447_v43 = vsel %vm9404_vm1, %v4377_v8, %v4738_v40  ;;  %v4748_v27 = vunpack.i.h.bf16 %v4746_v33  ;;  %v4747_v40 = vunpack.i.l.bf16 %v4746_v33 }
 0x2fa   :  { %v1507_v16 = vpack.c.bf16 %v1447_v43, %v1446_v13  ;;  %v1442_v8 = vsel %vm9404_vm1, %v4372_v5, %v4727_v31  ;;  %v4391_v13 = vsel %vm742_vm0, 1.0, %v9477_v63  ;;  %v4388_v43 = vsel %vm739_vm14, 1.0, %v9477_v63 }
 0x2fb   :  { %4451 = vmatmul.msk.bf16.gmra.mxu1 %vm9404_vm1, %v9532_v4  ;;  %4453 = vmatmul.msk.bf16.gmra.mxu2 %vm9404_vm1, %v9533_v36  ;;  %v4389_v33 = vsel %vm740_vm15, 1.0, %v9477_v63  ;;  %v1491_v17 = vpack.c.bf16 %v1443_v19, %v1442_v8  ;;  %v1450_v15 = vsel %vm9404_vm1, %v4388_v43, %v4747_v40  ;;  %v4387_v8 = vsel %vm738_vm11, 1.0, %v9477_v63  ;;  %v9540_v43 = vld [vmem:[#allocation52_spill] sm:$0xff] }
 0x2fc   :  { %1615 = vmatpush.bf16.msrb.mxu0 %v1507_v16  ;;  %v6050_v16 = vpop.permute.xlu0 %4760  ;;  %v1451_v21 = vsel %vm9404_vm1, %v4389_v33, %v4748_v27  ;;  %v4386_v27 = vsel %vm737_vm12, 1.0, %v9477_v63  ;;  %v1449_v46 = vsel %vm9404_vm1, %v4387_v8, %v4743_v51  ;;  %v9542_v51 = vld [vmem:[#allocation57_spill] sm:$0xff]  ;;  %vm1085_vm12 = vcmp.le.f32.partialorder %v5782_v48, %v6092_v39 }
 0x2fd   :  { %v1492_v59 = vpack.c.bf16 %v1451_v21, %v1450_v15  ;;  %v1448_v19 = vsel %vm9404_vm1, %v4386_v27, %v4742_v44  ;;  %v9541_v15 = vld [vmem:[#allocation51_spill] sm:$0xff]  ;;  %vm1086_vm0 = vcmp.le.f32.partialorder %v9542_v51, %v6092_v39 }
 0x2fe   :  { %v4751_v25 = vpop.permute.xlu1 %4750  ;;  %v1484_v7 = vpack.c.bf16 %v1449_v46, %v1448_v19  ;;  %v4441_v19 = vsel %vm1086_vm0, 1.0, %v9477_v63  ;;  %vm1082_vm0 = vcmp.le.f32.partialorder %v5790_v10, %v6092_v39 }
 0x2ff   :  { %v4753_v45 = vunpack.i.h.bf16 %v4751_v25  ;;  %v4752_v3 = vunpack.i.l.bf16 %v4751_v25  ;;  %v4437_v10 = vsel %vm1082_vm0, 1.0, %v9477_v63 }
 0x300   :  { %1616 = vmatpush.bf16.msrb.mxu0 %v1499_v55  ;;  %v6056_v55 = vpop.permute.xlu2 %4770 }
 0x301   :  { %v1452_v0 = vsel %vm9404_vm1, %v4390_v9, %v4752_v3  ;;  %v1453_v31 = vsel %vm9404_vm1, %v4391_v13, %v4753_v45  ;;  %v1440_v9 = vsel %vm9404_vm1, %v4370_v35, %v4722_v2  ;;  %v6081_v35 = vperm.slane %v5504_v42, 4 }
 0x302   :  { %v1500_v5 = vpack.c.bf16 %v1453_v31, %v1452_v0  ;;  %v1483_v25 = vpack.c.bf16 %v1441_v30, %v1440_v9 }
 0x303   :  { %4459 = vmatmul.msk.bf16.gmra.mxu3 %vm9404_vm1, %v9532_v4  ;;  %vm972_vm8 = vcmp.le.f32.partialorder %v9540_v43, %v6081_v35  ;;  %vm971_vm10 = vcmp.le.f32.partialorder %v5673_v24, %v6081_v35  ;;  %vm969_vm13 = vcmp.le.f32.partialorder %v5656_v32, %v6081_v35  ;;  %vm970_vm14 = vcmp.le.f32.partialorder %v5704_v41, %v6081_v35 }
 0x304   :  { %1617 = vmatpush.bf16.msrb.mxu0 %v1491_v17  ;;  %1645 = vmatpush.bf16.msrb.mxu1 %v1500_v5  ;;  %v6076_v2 = vpop.permute.xlu0 %4775  ;;  %vm967_vm15 = vcmp.le.f32.partialorder %v9541_v15, %v6081_v35  ;;  %v4425_v24 = vsel %vm972_vm8, 1.0, %v9477_v63  ;;  %v4424_v21 = vsel %vm971_vm10, 1.0, %v9477_v63  ;;  %v4422_v32 = vsel %vm969_vm13, 1.0, %v9477_v63 }
 0x305   :  { %vm968_vm11 = vcmp.le.f32.partialorder %v5686_v18, %v6081_v35  ;;  %v4423_v9 = vsel %vm970_vm14, 1.0, %v9477_v63  ;;  %v4420_v18 = vsel %vm967_vm15, 1.0, %v9477_v63  ;;  %vm966_vm8 = vcmp.le.f32.partialorder %v5628_v22, %v6081_v35 }
 0x306   :  { %v6066_v40 = vpop.permute.xlu1 %4765  ;;  %vm965_vm10 = vcmp.le.f32.partialorder %v5668_v53, %v6081_v35  ;;  %v4421_v48 = vsel %vm968_vm11, 1.0, %v9477_v63  ;;  %vm1083_vm13 = vcmp.le.f32.partialorder %v5765_v52, %v6092_v39  ;;  %vm1084_vm14 = vcmp.le.f32.partialorder %v5793_v20, %v6092_v39  ;;  %v9543_v53 = vld [vmem:[#allocation55_spill] sm:$0xff] }
 0x307   :  { %vm1081_vm15 = vcmp.le.f32.partialorder %v9543_v53, %v6092_v39  ;;  %vm1080_vm11 = vcmp.le.f32.partialorder %v5743_v38, %v6092_v39 }
 0x308   :  { %1618 = vmatpush.bf16.msrb.mxu0 %v1483_v25  ;;  %1646 = vmatpush.bf16.msrb.mxu1 %v1492_v59  ;;  %v4786_v45 = vpop.permute.xlu2 %4785  ;;  %v4436_v52 = vsel %vm1081_vm15, 1.0, %v9477_v63  ;;  %v4435_v38 = vsel %vm1080_vm11, 1.0, %v9477_v63 }
 0x309   :  { %v4788_v27 = vunpack.i.h.bf16 %v4786_v45  ;;  %v4787_v25 = vunpack.i.l.bf16 %v4786_v45 }
 0x30b   :  { %4462 = vmatmul.msk.bf16.vlgmr.msrb.gmra.mxu0 %vm9404_vm1, %v9520_v26 }
 0x30c   :  { %1647 = vmatpush.bf16.msrb.mxu1 %v1484_v7  ;;  %v4791_v13 = vpop.permute.xlu0 %4790  ;;  %v4440_v7 = vsel %vm1085_vm12, 1.0, %v9477_v63  ;;  %vm1079_vm12 = vcmp.le.f32.partialorder %v5775_v14, %v6092_v39 }
 0x30d   :  { %v4793_v0 = vunpack.i.h.bf16 %v4791_v13  ;;  %v4792_v31 = vunpack.i.l.bf16 %v4791_v13 }
 0x30e   :  { %v4781_v3 = vpop.permute.xlu1 %4780 }
 0x30f   :  { %4466 = vmatmul.msk.bf16.vlgmr.msrb.gmra.mxu1 %vm9404_vm1, %v9520_v26  ;;  %v1468_v59 = vsel %vm9404_vm1, %v4422_v32, %v4792_v31  ;;  %v1469_v8 = vsel %vm9404_vm1, %v4423_v9, %v4793_v0  ;;  %v4782_v0 = vunpack.i.l.bf16 %v4781_v3  ;;  %v1466_v31 = vsel %vm9404_vm1, %v4420_v18, %v4787_v25 }
 0x310   :  { %v1502_v43 = vpack.c.bf16 %v1469_v8, %v1468_v59  ;;  %v4438_v8 = vsel %vm1083_vm13, 1.0, %v9477_v63  ;;  %v4439_v18 = vsel %vm1084_vm14, 1.0, %v9477_v63 }
 0x313   :  { %4460 = vmatmul.msk.bf16.gmra.mxu3 %vm9404_vm1, %v9521_v54 }
 0x315   :  { %v6089_v12 = vpop.permute.xlu2 %4800 }
 0x316   :  { %v4796_v33 = vpop.permute.xlu1 %4795 }
 0x317   :  { %v4798_v17 = vunpack.i.h.bf16 %v4796_v33  ;;  %v4797_v5 = vunpack.i.l.bf16 %v4796_v33  ;;  %v4783_v33 = vunpack.i.h.bf16 %v4781_v3  ;;  %v4418_v3 = vsel %vm965_vm10, 1.0, %v9477_v63 }
 0x318   :  { %v1464_v32 = vsel %vm9404_vm1, %v4418_v3, %v4782_v0 }
 0x319   :  { %v1471_v44 = vsel %vm9404_vm1, %v4425_v24, %v4798_v17  ;;  %v1470_v41 = vsel %vm9404_vm1, %v4424_v21, %v4797_v5  ;;  %v1467_v17 = vsel %vm9404_vm1, %v4421_v48, %v4788_v27  ;;  %v4419_v21 = vsel %vm966_vm8, 1.0, %v9477_v63 }
 0x31a   :  { %v1510_v30 = vpack.c.bf16 %v1471_v44, %v1470_v41  ;;  %v1494_v51 = vpack.c.bf16 %v1467_v17, %v1466_v31  ;;  %v1465_v44 = vsel %vm9404_vm1, %v4419_v21, %v4783_v33 }
 0x31b   :  { %4463 = vmatmul.msk.bf16.gmra.mxu0 %vm9404_vm1, %v9532_v4  ;;  %v1486_v41 = vpack.c.bf16 %v1465_v44, %v1464_v32  ;;  %v9547_v44 = vld [vmem:[#allocation3_spill] sm:$0xff] }
 0x31c   :  { %1702 = vmatpush.bf16.msra.mxu3 %v1510_v30 }
 0x31d   :  { %v4816_v46 = vpop.permute.xlu2 %4815 }
 0x31e   :  { %v4818_v45 = vunpack.i.h.bf16 %v4816_v46  ;;  %v4817_v13 = vunpack.i.l.bf16 %v4816_v46  ;;  %v4803_v46 = vunpack.i.h.bf16 %v6089_v12 }
 0x31f   :  { %4467 = vmatmul.msk.bf16.gmra.mxu1 %vm9404_vm1, %v9532_v4 }
 0x320   :  { %v1479_v5 = vsel %vm9404_vm1, %v4441_v19, %v4818_v45  ;;  %v1478_v15 = vsel %vm9404_vm1, %v4440_v7, %v4817_v13  ;;  %1703 = vmatpush.bf16.msra.mxu3 %v1502_v43  ;;  %v4802_v7 = vunpack.i.l.bf16 %v6089_v12  ;;  %v4434_v43 = vsel %vm1079_vm12, 1.0, %v9477_v63  ;;  %v9544_v12 = vld [vmem:[#allocation15_spill] sm:$0xff] }
 0x321   :  { %v1511_v24 = vpack.c.bf16 %v1479_v5, %v1478_v15  ;;  %v1473_v0 = vsel %vm9404_vm1, %v4435_v38, %v4803_v46  ;;  %v85_v17 = vadd.f32 1.0, %v9544_v12 }
 0x322   :  { %v1472_v33 = vsel %vm9404_vm1, %v4434_v43, %v4802_v7  ;;  %v9554_v43 = vld [vmem:[#allocation16_spill] sm:$0xff] }
 0x323   :  { %4461 = vmatmul.msk.bf16.gmra.mxu3 %vm9404_vm1, %v9533_v36  ;;  %1731 = vmatpush.bf16.msra.mxu0 %v1511_v24  ;;  %v1487_v31 = vpack.c.bf16 %v1473_v0, %v1472_v33  ;;  %v93_v5 = vmul.f32 0.5, %v85_v17  ;;  %v9545_v24 = vld [vmem:[#allocation17_spill] sm:$0xff] }
 0x324   :  { %1704 = vmatpush.bf16.msra.mxu3 %v1494_v51  ;;  %v86_v21 = vadd.f32 1.0, %v9545_v24  ;;  %v9546_v51 = vld [vmem:[#allocation30_spill] sm:$0xff] }
 0x325   :  { %v6192_v15 = vfloor.f32 %v93_v5  ;;  %v89_v32 = vadd.f32 1.0, %v9546_v51  ;;  %v4772_v51 = vunpack.i.l.bf16 %v6056_v55 }
 0x328   :  { %1705 = vmatpush.bf16.msra.mxu3 %v1486_v41  ;;  %v94_v41 = vmul.f32 0.5, %v86_v21  ;;  %v9557_v21 = vld [vmem:[#allocation2_spill] sm:$0xff] }
 0x32b   :  { %4464 = vmatmul.msk.bf16.gmra.mxu0 %vm9404_vm1, %v9521_v54 }
 0x32f   :  { %4468 = vmatmul.msk.bf16.gmra.mxu1 %vm9404_vm1, %v9521_v54 }
 0x333   :  { %4474 = vmatmul.msk.bf16.vlgmr.msra.gmra.mxu3 %vm9404_vm1, %v9520_v26 }
 0x335   :  { %v4806_v22 = vpop.permute.xlu0 %4805 }
 0x336   :  { %v4808_v30 = vunpack.i.h.bf16 %v4806_v22  ;;  %v4807_v27 = vunpack.i.l.bf16 %v4806_v22 }
 0x338   :  { %v1474_v45 = vsel %vm9404_vm1, %v4436_v52, %v4807_v27  ;;  %v1475_v13 = vsel %vm9404_vm1, %v4437_v10, %v4808_v30  ;;  %v9548_v27 = vld [vmem:[#allocation14_spill] sm:$0xff]  ;;  %v9550_v52 = vld [vmem:[#allocation31_spill] sm:$0xff] }
 0x339   :  { %v1495_v14 = vpack.c.bf16 %v1475_v13, %v1474_v45  ;;  %v9552_v45 = vld [vmem:[#allocation5_spill] sm:$0xff] }
 0x33b   :  { %4465 = vmatmul.msk.bf16.gmra.mxu0 %vm9404_vm1, %v9533_v36 }
 0x33d   :  { %v4811_v9 = vpop.permute.xlu1 %4810 }
 0x33e   :  { %v4813_v25 = vunpack.i.h.bf16 %v4811_v9  ;;  %v4812_v59 = vunpack.i.l.bf16 %v4811_v9  ;;  %v97_v9 = vmul.f32 0.5, %v89_v32 }
 0x33f   :  { %4469 = vmatmul.msk.bf16.gmra.mxu1 %vm9404_vm1, %v9533_v36 }
 0x340   :  { %v1476_v20 = vsel %vm9404_vm1, %v4438_v8, %v4812_v59  ;;  %v1477_v19 = vsel %vm9404_vm1, %v4439_v18, %v4813_v25  ;;  %v87_v25 = vadd.f32 1.0, %v9548_v27  ;;  %v6212_v59 = vfloor.f32 %v94_v41 }
 0x341   :  { %v1503_v48 = vpack.c.bf16 %v1477_v19, %v1476_v20  ;;  %v6214_v18 = vfloor.f32 %v97_v9  ;;  %v90_v20 = vadd.f32 1.0, %v9550_v52  ;;  %v9551_v19 = vld [vmem:[#allocation6_spill] sm:$0xff]  ;;  %v4773_v52 = vunpack.i.h.bf16 %v6056_v55 }
 0x342   :  { %v95_v10 = vmul.f32 0.5, %v87_v25  ;;  %v9558_v9 = vld [vmem:[#allocation18_spill] sm:$0xff] }
 0x343   :  { %4475 = vmatmul.msk.bf16.gmra.mxu3 %vm9404_vm1, %v9532_v4  ;;  %1732 = vmatpush.bf16.msra.mxu0 %v1503_v48  ;;  %9549 = vst [vmem:[#allocation21_spill] sm:$0xff] %v6214_v18  ;;  %v98_v7 = vmul.f32 0.5, %v90_v20  ;;  %v92_v25 = vadd.f32 1.0, %v9558_v9  ;;  %v9565_v9 = vld [vmem:[#allocation7_spill] sm:$0xff] }
 0x344   :  { %v6231_v38 = vfloor.f32 %v95_v10  ;;  %v9559_v10 = vld [vmem:[#allocation8_spill] sm:$0xff] }
 0x345   :  { %v6234_v0 = vfloor.f32 %v98_v7 }
 0x346   :  { %9553 = vst [vmem:[#allocation65_spill] sm:$0xff] %v6231_v38 }
 0x347   :  { %1733 = vmatpush.bf16.msra.mxu0 %v1495_v14  ;;  %v88_v14 = vadd.f32 1.0, %v9554_v43  ;;  %9555 = vst [vmem:[#allocation29_spill] sm:$0xff] %v6234_v0 }
 0x349   :  { %v96_v32 = vmul.f32 0.5, %v88_v14  ;;  %v100_v14 = vmul.f32 0.5, %v92_v25 }
 0x34b   :  { %1734 = vmatpush.bf16.msra.mxu0 %v1487_v31  ;;  %v9556_v31 = vld [vmem:[#allocation19_spill] sm:$0xff]  ;;  %v6268_v25 = vfloor.f32 %v100_v14 }
 0x34c   :  { %v91_v17 = vadd.f32 1.0, %v9556_v31 }
 0x34d   :  { %9563 = vst [vmem:[#allocation27_spill] sm:$0xff] %v6268_v25 }
 0x34e   :  { %4478 = vmatmul.msk.bf16.vlgmr.msra.gmra.mxu0 %vm9404_vm1, %v9520_v26  ;;  %v99_v20 = vmul.f32 0.5, %v91_v17 }
 0x353   :  { %4476 = vmatmul.msk.bf16.gmra.mxu3 %vm9404_vm1, %v9521_v54 }
 0x35e   :  { %4479 = vmatmul.msk.bf16.gmra.mxu0 %vm9404_vm1, %v9532_v4 }
 0x363   :  { %4477 = vmatmul.msk.bf16.gmra.mxu3 %vm9404_vm1, %v9533_v36 }
 0x368   :  { %v6195_v3 = vpop.f32.mrf.mxu1 }
 0x369   :  { %vm1756_vm8 = vcmp.ge.f32.partialorder %v6195_v3, %v6192_v15 }
 0x36a   :  { %vm1764_vm10 = vmand %vm9403_vm3, %vm1756_vm8 }
 0x36b   :  { %v1772_v22 = vsel %vm1764_vm10, %v5827_v6, inf }
 0x36c   :  { %v1780_v53 = vsel %vm9404_vm1, %v1772_v22, inf }
 0x36d   :  { %1781 = vmin.xlane.f32.xlu0 %v1780_v53 }
 0x36e   :  { %v6207_v30 = vpop.f32.mrf.mxu2  ;;  %4480 = vmatmul.msk.bf16.gmra.mxu0 %vm9404_vm1, %v9521_v54 }
 0x36f   :  { %vm1760_vm15 = vcmp.ge.f32.partialorder %v6207_v30, %v6214_v18 }
 0x370   :  { %v1535_v8 = vpop.f32.mrf.mxu1  ;;  %vm1768_vm0 = vmand %vm9378_vm5, %vm1760_vm15 }
 0x371   :  { %vm1757_vm13 = vcmp.ge.f32.partialorder %v1535_v8, %v6212_v59  ;;  %v1776_v5 = vsel %vm1768_vm0, %v5827_v6, inf }
 0x372   :  { %vm1765_vm14 = vmand %vm9386_vm6, %vm1757_vm13  ;;  %v1792_v22 = vsel %vm9404_vm1, %v1776_v5, inf  ;;  %v6256_v5 = vfloor.f32 %v99_v20  ;;  %v9564_v20 = vld [vmem:[#allocation10_spill] sm:$0xff] }
 0x373   :  { %v1773_v48 = vsel %vm1765_vm14, %v5827_v6, inf }
 0x374   :  { %v1783_v46 = vsel %vm9404_vm1, %v1773_v48, inf  ;;  %9561 = vst [vmem:[#allocation24_spill] sm:$0xff] %v6256_v5 }
 0x375   :  { %1784 = vmin.xlane.f32.xlu1 %v1783_v46  ;;  %v6254_v46 = vfloor.f32 %v96_v32 }
 0x376   :  { %v1545_v13 = vpop.f32.mrf.mxu2 }
 0x377   :  { %vm1761_vm10 = vcmp.ge.f32.partialorder %v1545_v13, %v6234_v0  ;;  %9560 = vst [vmem:[#allocation32_spill] sm:$0xff] %v6254_v46  ;;  %v4778_v13 = vunpack.i.h.bf16 %v6076_v2 }
 0x378   :  { %v1538_v33 = vpop.f32.mrf.mxu1  ;;  %vm1769_vm14 = vmand %vm9379_vm7, %vm1761_vm10  ;;  %v1809_v30 = vsel %vm1761_vm10, 1, %v9473_v56 }
 0x379   :  { %vm1758_vm11 = vcmp.ge.f32.partialorder %v1538_v33, %v6231_v38  ;;  %v1777_v17 = vsel %vm1769_vm14, %v5827_v6, inf }
 0x37a   :  { %vm1766_vm12 = vmand %vm9380_vm2, %vm1758_vm11  ;;  %v1795_v32 = vsel %vm9404_vm1, %v1777_v17, inf  ;;  %v1806_v31 = vsel %vm1758_vm11, 1, %v9473_v56 }
 0x37b   :  { %v1774_v41 = vsel %vm1766_vm12, %v5827_v6, inf }
 0x37c   :  { %v1786_v53 = vsel %vm9404_vm1, %v1774_v41, inf  ;;  %v9562_v41 = vld [vmem:[#allocation4_spill] sm:$0xff] }
 0x37d   :  { %1793 = vmin.xlane.f32.xlu1 %v1792_v22  ;;  %1787 = vmin.xlane.f32.xlu2 %v1786_v53 }
 0x37e   :  { %v1548_v48 = vpop.f32.mrf.mxu2  ;;  %4481 = vmatmul.msk.bf16.gmra.mxu0 %vm9404_vm1, %v9533_v36 }
 0x37f   :  { %vm1762_vm5 = vcmp.ge.f32.partialorder %v1548_v48, %v6256_v5 }
 0x380   :  { %v1540_v7 = vpop.f32.mrf.mxu1  ;;  %vm1770_vm14 = vmand %vm9402_vm9, %vm1762_vm5  ;;  %v1810_v8 = vsel %vm1762_vm5, 1, %v9473_v56 }
 0x381   :  { %vm1759_vm0 = vcmp.ge.f32.partialorder %v1540_v7, %v6254_v46  ;;  %v1778_v17 = vsel %vm1770_vm14, %v5827_v6, inf }
 0x382   :  { %vm1767_vm12 = vmand %vm9387_vm4, %vm1759_vm0  ;;  %v1807_v3 = vsel %vm1759_vm0, 1, %v9473_v56 }
 0x383   :  { %v1775_v22 = vsel %vm1767_vm12, %v5827_v6, inf  ;;  %vm9566_vm12 = vcmp.gt.f32.partialorder %v9565_v9, 0.5 }
 0x384   :  { %v1789_v53 = vsel %vm9404_vm1, %v1775_v22, inf }
 0x385   :  { %1796 = vmin.xlane.f32.xlu2 %v1795_v32  ;;  %1790 = vmin.xlane.f32.xlu0 %v1789_v53  ;;  %v1798_v32 = vsel %vm9404_vm1, %v1778_v17, inf  ;;  %v1805_v53 = vsel %vm1757_vm13, 1, %v9473_v56  ;;  %v6325_v17 = vperm.slane %v5504_v42, 2 }
 0x386   :  { %v1550_v62 = vpop.f32.mrf.mxu2 }
 0x387   :  { %vm1763_vm7 = vcmp.ge.f32.partialorder %v1550_v62, %v6268_v25  ;;  %v9568_v62 = vld [vmem:[#allocation47_spill] sm:$0xff] }
 0x388   :  { %vm1771_vm2 = vmand %vm9566_vm12, %vm1763_vm7  ;;  %v1811_v33 = vsel %vm1763_vm7, 1, %v9473_v56 }
 0x389   :  { %v1779_v14 = vsel %vm1771_vm2, %v5827_v6, inf  ;;  %v1804_v6 = vsel %vm1756_vm8, 1, %v9473_v56  ;;  %vm858_vm2 = vcmp.le.f32.partialorder %v9568_v62, %v6325_v17  ;;  %v4683_v62 = vunpack.i.h.bf16 %v5821_v23 }
 0x38a   :  { %v1801_v22 = vsel %vm9404_vm1, %v1779_v14, inf  ;;  %v4409_v42 = vsel %vm858_vm2, 1.0, %v9477_v63 }
 0x38b   :  { %1802 = vmin.xlane.f32.xlu1 %v1801_v22  ;;  %v9569_v22 = vld [vmem:[#allocation63_spill] sm:$0xff] }
 0x38c   :  { %vm857_vm5 = vcmp.le.f32.partialorder %v9569_v22, %v6325_v17  ;;  %v1463_v22 = vsel %vm9404_vm1, %v4409_v42, %v4778_v13 }
 0x38d   :  { %1799 = vmin.xlane.f32.xlu0 %v1798_v32  ;;  %v9570_v32 = vld [vmem:[#allocation20_spill] sm:$0xff] }
 0x38e   :  { %vm395_vm7 = vcmp.le.f32.partialorder %v9570_v32, %v5844_v47 }
 0x39d   :  { %367 = vperm.xlu2 %4819, %v5117_v50   ;;  %v1808_v50 = vsel %vm1760_vm15, 1, %v9473_v56 }
 0x3a1   :  { %1814 = vrot.lane.b32.xlu0 %v1805_v53, %s4937_s1  ;;  %v4777_v53 = vunpack.i.l.bf16 %v6076_v2 }
 0x3a4   :  { %1816 = vrot.lane.b32.xlu1 %v1806_v31, %s4937_s1 }
 0x3a5   :  { %1812 = vrot.lane.b32.xlu2 %v1804_v6, %s4937_s1  ;;  %v4682_v6 = vunpack.i.l.bf16 %v5821_v23  ;;  %v9574_v23 = vld [vmem:[#allocation46_spill] sm:$0xff] }
 0x3a6   :  { %vm853_vm11 = vcmp.le.f32.partialorder %v9574_v23, %v6325_v17 }
 0x3a9   :  { %1820 = vrot.lane.b32.xlu0 %v1808_v50, %s4937_s1  ;;  %v9571_v50 = vld [vmem:[#allocation61_spill] sm:$0xff] }
 0x3aa   :  { %vm855_vm8 = vcmp.le.f32.partialorder %v9571_v50, %v6325_v17  ;;  %v4404_v50 = vsel %vm853_vm11, 1.0, %v9477_v63  ;;  %vm9581_vm11 = vcmp.gt.f32.partialorder %v9557_v21, 0.5 }
 0x3ab   :  { %v4406_v42 = vsel %vm855_vm8, 1.0, %v9477_v63 }
 0x3ac   :  { %1824 = vrot.lane.b32.xlu1 %v1810_v8, %s4937_s1  ;;  %v4408_v8 = vsel %vm857_vm5, 1.0, %v9477_v63 }
 0x3ad   :  { %1818 = vrot.lane.b32.xlu2 %v1807_v3, %s4937_s1  ;;  %v1462_v32 = vsel %vm9404_vm1, %v4408_v8, %v4777_v53  ;;  %v9575_v53 = vld [vmem:[#allocation64_spill] sm:$0xff] }
 0x3ae   :  { %vm854_vm10 = vcmp.le.f32.partialorder %v9575_v53, %v6325_v17  ;;  %v1509_v8 = vpack.c.bf16 %v1463_v22, %v1462_v32  ;;  %v9578_v22 = vld [vmem:[#allocation62_spill] sm:$0xff] }
 0x3af   :  { %vm851_vm14 = vcmp.le.f32.partialorder %v9578_v22, %v6325_v17  ;;  %v4405_v32 = vsel %vm854_vm10, 1.0, %v9477_v63 }
 0x3b1   :  { %1826 = vrot.lane.b32.xlu0 %v1811_v33, %s4937_s1  ;;  %v4338_v33 = vsel %vm395_vm7, 1.0, %v9477_v63 }
 0x3b2   :  { %v1424_v43 = vsel %vm9404_vm1, %v4338_v33, %v4682_v6  ;;  %v4767_v6 = vunpack.i.l.bf16 %v6066_v40 }
 0x3b4   :  { %v1458_v23 = vsel %vm9404_vm1, %v4404_v50, %v4767_v6 }
 0x3b5   :  { %1822 = vrot.lane.b32.xlu2 %v1809_v30, %s4937_s1  ;;  %v9572_v30 = vld [vmem:[#allocation66_spill] sm:$0xff] }
 0x3b6   :  { %vm856_vm13 = vcmp.le.f32.partialorder %v9572_v30, %v6325_v17 }
 0x3b7   :  { %v4407_v55 = vsel %vm856_vm13, 1.0, %v9477_v63 }
 0x3b8   :  { %v1461_v33 = vsel %vm9404_vm1, %v4407_v55, %v4773_v52  ;;  %v4762_v52 = vunpack.i.l.bf16 %v6050_v16 }
 0x3e0   :  { %v6322_v7 = vpop.xlane.xlu0 %1781 }
 0x3e8   :  { %v6327_v14 = vpop.xlane.xlu1 %1784 }
 0x3f0   :  { %v6318_v31 = vpop.xlane.xlu2 %1787 }
 0x3f8   :  { %v6320_v48 = vpop.xlane.xlu2 %1796  ;;  %v6347_v2 = vpop.xlane.xlu0 %1790 }
 0x3f9   :  { %9567 = vst [vmem:[#allocation60_spill] sm:$0xff] %v6320_v48 }
 0x3fa   :  { %9573 = vst [vmem:[#allocation25_spill] sm:$0xff] %v6347_v2 }
 0x400   :  { %v368_v3 = vpop.permute.xlu2 %367 }
 0x401   :  { %vm396_vm15 = vcmp.le.f32.partialorder %v368_v3, %v5844_v47  ;;  %v4768_v3 = vunpack.i.h.bf16 %v6066_v40 }
 0x402   :  { %v4339_v48 = vsel %vm396_vm15, 1.0, %v9477_v63 }
 0x403   :  { %v1425_v30 = vsel %vm9404_vm1, %v4339_v48, %v4683_v62  ;;  %v6367_v48 = vpop.xlane.xlu1 %1793  ;;  %v9577_v62 = vld [vmem:[#allocation59_spill] sm:$0xff] }
 0x404   :  { %v1481_v13 = vpack.c.bf16 %v1425_v30, %v1424_v43  ;;  %9576 = vst [vmem:[#allocation41_spill] sm:$0xff] %v6367_v48  ;;  %v1460_v43 = vsel %vm9404_vm1, %v4406_v42, %v4772_v51  ;;  %vm852_vm0 = vcmp.le.f32.partialorder %v9577_v62, %v6325_v17  ;;  %v4763_v51 = vunpack.i.h.bf16 %v6050_v16  ;;  %v6385_v42 = vpop.xlane.xlu0 %1799 }
 0x405   :  { %v1501_v40 = vpack.c.bf16 %v1461_v33, %v1460_v43  ;;  %9579 = vst [vmem:[#allocation28_spill] sm:$0xff] %v6385_v42  ;;  %v4402_v16 = vsel %vm851_vm14, 1.0, %v9477_v63  ;;  %vm9582_vm14 = vcmp.gt.f32.partialorder %v9559_v10, 0.5 }
 0x406   :  { %1560 = vmatpush.bf16.msrb.mxu2 %v1481_v13  ;;  %v1459_v13 = vsel %vm9404_vm1, %v4405_v32, %v4768_v3  ;;  %v1456_v3 = vsel %vm9404_vm1, %v4402_v16, %v4762_v52 }
 0x407   :  { %v1493_v43 = vpack.c.bf16 %v1459_v13, %v1458_v23 }
 0x408   :  { %v1813_v30 = vpop.permute.xlu2 %1812 }
 0x409   :  { %vm1828_vm12 = vcmp.ne.s32.totalorder %v1813_v30, 0  ;;  %4454 = vmatmul.msk.bf16.vlgmr.msrb.gmra.mxu2 %vm9404_vm1, %v9520_v26 }
 0x40a   :  { %1673 = vmatpush.bf16.msra.mxu2 %v1509_v8  ;;  %vm1836_vm2 = vmand %vm9403_vm3, %vm1828_vm12  ;;  %v4403_v8 = vsel %vm852_vm0, 1.0, %v9477_v63 }
 0x40b   :  { %v1844_v53 = vsel %vm1836_vm2, %v5418_v57, inf  ;;  %v6394_v33 = vpop.xlane.xlu1 %1802  ;;  %v1457_v6 = vsel %vm9404_vm1, %v4403_v8, %v4763_v51 }
 0x40c   :  { %v1852_v55 = vsel %vm9404_vm1, %v1844_v53, inf  ;;  %9580 = vst [vmem:[#allocation37_spill] sm:$0xff] %v6394_v33  ;;  %v1485_v30 = vpack.c.bf16 %v1457_v6, %v1456_v3 }
 0x40d   :  { %1853 = vmin.xlane.f32.xlu2 %v1852_v55 }
 0x40e   :  { %1674 = vmatpush.bf16.msra.mxu2 %v1501_v40 }
 0x410   :  { %v1819_v50 = vpop.permute.xlu2 %1818 }
 0x411   :  { %vm1831_vm5 = vcmp.ne.s32.totalorder %v1819_v50, 0 }
 0x412   :  { %1675 = vmatpush.bf16.msra.mxu2 %v1493_v43  ;;  %vm1839_vm7 = vmand %vm9387_vm4, %vm1831_vm5  ;;  %vm9583_vm5 = vcmp.gt.f32.partialorder %v9552_v45, 0.5 }
 0x413   :  { %v1815_v62 = vpop.permute.xlu0 %1814  ;;  %v1847_v22 = vsel %vm1839_vm7, %v5418_v57, inf }
 0x414   :  { %vm1829_vm8 = vcmp.ne.s32.totalorder %v1815_v62, 0  ;;  %v1861_v32 = vsel %vm9404_vm1, %v1847_v22, inf }
 0x415   :  { %vm1837_vm13 = vmand %vm9386_vm6, %vm1829_vm8  ;;  %1862 = vmin.xlane.f32.xlu2 %v1861_v32 }
 0x416   :  { %1676 = vmatpush.bf16.msra.mxu2 %v1485_v30  ;;  %v1817_v40 = vpop.permute.xlu1 %1816  ;;  %v1845_v51 = vsel %vm1837_vm13, %v5418_v57, inf }
 0x417   :  { %vm1830_vm15 = vcmp.ne.s32.totalorder %v1817_v40, 0  ;;  %v1855_v52 = vsel %vm9404_vm1, %v1845_v51, inf }
 0x418   :  { %vm1838_vm10 = vmand %vm9581_vm11, %vm1830_vm15  ;;  %v1823_v23 = vpop.permute.xlu2 %1822  ;;  %1856 = vmin.xlane.f32.xlu1 %v1855_v52  ;;  %vm9584_vm11 = vcmp.gt.f32.partialorder %v9565_v9, 0.5 }
 0x419   :  { %vm1833_vm0 = vcmp.ne.s32.totalorder %v1823_v23, 0  ;;  %4455 = vmatmul.msk.bf16.gmra.mxu2 %vm9404_vm1, %v9532_v4  ;;  %v1846_v13 = vsel %vm1838_vm10, %v5418_v57, inf }
 0x41a   :  { %v1858_v53 = vsel %vm9404_vm1, %v1846_v13, inf  ;;  %vm1841_vm12 = vmand %vm9582_vm14, %vm1833_vm0 }
 0x41b   :  { %1859 = vmin.xlane.f32.xlu0 %v1858_v53  ;;  %v1821_v55 = vpop.permute.xlu0 %1820  ;;  %v1849_v3 = vsel %vm1841_vm12, %v5418_v57, inf }
 0x41c   :  { %vm1832_vm2 = vcmp.ne.s32.totalorder %v1821_v55, 0  ;;  %v1867_v30 = vsel %vm9404_vm1, %v1849_v3, inf }
 0x41d   :  { %vm1840_vm7 = vmand %vm9583_vm5, %vm1832_vm2 }
 0x41e   :  { %v1825_v8 = vpop.permute.xlu1 %1824  ;;  %v1848_v16 = vsel %vm1840_vm7, %v5418_v57, inf  ;;  %vm9585_vm7 = vcmp.gt.f32.partialorder %v9557_v21, 0.5 }
 0x41f   :  { %vm1834_vm8 = vcmp.ne.s32.totalorder %v1825_v8, 0  ;;  %v1864_v43 = vsel %vm9404_vm1, %v1848_v16, inf }
 0x420   :  { %vm1842_vm13 = vmand %vm9402_vm9, %vm1834_vm8  ;;  %1865 = vmin.xlane.f32.xlu1 %v1864_v43 }
 0x421   :  { %v1850_v6 = vsel %vm1842_vm13, %v5418_v57, inf }
 0x422   :  { %v1870_v50 = vsel %vm9404_vm1, %v1850_v6, inf }
 0x423   :  { %1871 = vmin.xlane.f32.xlu2 %v1870_v50  ;;  %1868 = vmin.xlane.f32.xlu0 %v1867_v30  ;;  %v1827_v62 = vpop.permute.xlu0 %1826 }
 0x424   :  { %vm1835_vm15 = vcmp.ne.s32.totalorder %v1827_v62, 0 }
 0x425   :  { %vm1843_vm10 = vmand %vm9584_vm11, %vm1835_vm15 }
 0x426   :  { %v1851_v22 = vsel %vm1843_vm10, %v5418_v57, inf  ;;  %vm9586_vm10 = vcmp.gt.f32.partialorder %v9552_v45, 0.5 }
 0x427   :  { %v1873_v32 = vsel %vm9404_vm1, %v1851_v22, inf }
 0x428   :  { %1874 = vmin.xlane.f32.xlu1 %v1873_v32 }
 0x429   :  { %4456 = vmatmul.msk.bf16.gmra.mxu2 %vm9404_vm1, %v9521_v54 }
 0x439   :  { %4457 = vmatmul.msk.bf16.gmra.mxu2 %vm9404_vm1, %v9533_v36 }
 0x449   :  { %4470 = vmatmul.msk.bf16.vlgmr.msra.gmra.mxu2 %vm9404_vm1, %v9520_v26 }
 0x459   :  { %4471 = vmatmul.msk.bf16.gmra.mxu2 %vm9404_vm1, %v9532_v4 }
 0x469   :  { %4472 = vmatmul.msk.bf16.gmra.mxu2 %vm9404_vm1, %v9521_v54 }
 0x479   :  { %4473 = vmatmul.msk.bf16.gmra.mxu2 %vm9404_vm1, %v9533_v36 }
 0x48c   :  { %v1562_v57 = vpop.f32.mrf.mxu2 }
 0x48d   :  { %vm1876_vm0 = vcmp.ge.f32.partialorder %v1562_v57, %v6192_v15 }
 0x48e   :  { %vm1884_vm14 = vmand %vm9403_vm3, %vm1876_vm0 }
 0x48f   :  { %v1892_v40 = vsel %vm1884_vm14, %v5844_v47, inf }
 0x490   :  { %v1900_v51 = vsel %vm9404_vm1, %v1892_v40, inf }
 0x491   :  { %1901 = vmin.xlane.f32.xlu0 %v1900_v51 }
 0x494   :  { %v1564_v52 = vpop.f32.mrf.mxu2 }
 0x495   :  { %vm1877_vm12 = vcmp.ge.f32.partialorder %v1564_v52, %v6212_v59 }
 0x496   :  { %vm1885_vm2 = vmand %vm9386_vm6, %vm1877_vm12 }
 0x497   :  { %v1893_v23 = vsel %vm1885_vm2, %v5844_v47, inf }
 0x498   :  { %v1903_v13 = vsel %vm9404_vm1, %v1893_v23, inf }
 0x499   :  { %1904 = vmin.xlane.f32.xlu2 %v1903_v13 }
 0x49c   :  { %v1567_v53 = vpop.f32.mrf.mxu2 }
 0x49d   :  { %vm1878_vm5 = vcmp.ge.f32.partialorder %v1567_v53, %v6231_v38  ;;  %v6524_v53 = vpop.xlane.xlu2 %1853 }
 0x49e   :  { %vm1886_vm8 = vmand %vm9585_vm7, %vm1878_vm5  ;;  %vm9587_vm7 = vcmp.gt.f32.partialorder %v9559_v10, 0.5  ;;  %v1926_v57 = vsel %vm1878_vm5, 1, %v9473_v56  ;;  %vm9599_vm5 = vcmp.gt.f32.partialorder %v9557_v21, 0.5 }
 0x49f   :  { %v1894_v55 = vsel %vm1886_vm8, %v5844_v47, inf }
 0x4a0   :  { %v1906_v8 = vsel %vm9404_vm1, %v1894_v55, inf }
 0x4a1   :  { %1907 = vmin.xlane.f32.xlu1 %v1906_v8 }
 0x4a4   :  { %v1569_v16 = vpop.f32.mrf.mxu2 }
 0x4a5   :  { %vm1879_vm13 = vcmp.ge.f32.partialorder %v1569_v16, %v6254_v46 }
 0x4a6   :  { %vm1887_vm15 = vmand %vm9387_vm4, %vm1879_vm13 }
 0x4a7   :  { %v1895_v43 = vsel %vm1887_vm15, %v5844_v47, inf }
 0x4a8   :  { %v1909_v3 = vsel %vm9404_vm1, %v1895_v43, inf  ;;  %v1924_v43 = vsel %vm1876_vm0, 1, %v9473_v56 }
 0x4a9   :  { %1910 = vmin.xlane.f32.xlu0 %v1909_v3  ;;  %v1925_v3 = vsel %vm1877_vm12, 1, %v9473_v56 }
 0x4ac   :  { %v1572_v6 = vpop.f32.mrf.mxu2 }
 0x4ad   :  { %vm1880_vm11 = vcmp.ge.f32.partialorder %v1572_v6, %v6214_v18 }
 0x4ae   :  { %vm1888_vm14 = vmand %vm9586_vm10, %vm1880_vm11 }
 0x4af   :  { %v1896_v50 = vsel %vm1888_vm14, %v5844_v47, inf }
 0x4b0   :  { %v1912_v30 = vsel %vm9404_vm1, %v1896_v50, inf  ;;  %v1928_v50 = vsel %vm1880_vm11, 1, %v9473_v56 }
 0x4b1   :  { %1913 = vmin.xlane.f32.xlu2 %v1912_v30  ;;  %v6526_v30 = vpop.xlane.xlu1 %1856 }
 0x4b4   :  { %v1574_v62 = vpop.f32.mrf.mxu2 }
 0x4b5   :  { %vm1881_vm2 = vcmp.ge.f32.partialorder %v1574_v62, %v6234_v0 }
 0x4b6   :  { %vm1889_vm8 = vmand %vm9587_vm7, %vm1881_vm2  ;;  %vm9588_vm7 = vcmp.gt.f32.partialorder %v9565_v9, 0.5  ;;  %v1929_v6 = vsel %vm1881_vm2, 1, %v9473_v56 }
 0x4b7   :  { %v1897_v22 = vsel %vm1889_vm8, %v5844_v47, inf }
 0x4b8   :  { %v1915_v32 = vsel %vm9404_vm1, %v1897_v22, inf  ;;  %v6528_v22 = vpop.xlane.xlu2 %1862 }
 0x4b9   :  { %1916 = vmin.xlane.f32.xlu1 %v1915_v32  ;;  %9589 = vst [vmem:[#allocation22_spill] sm:$0xff] %v6528_v22  ;;  %v6530_v32 = vpop.xlane.xlu0 %1859  ;;  %v6534_v62 = vpop.xlane.xlu1 %1865 }
 0x4ba   :  { %9590 = vst [vmem:[#allocation26_spill] sm:$0xff] %v6534_v62 }
 0x4bc   :  { %v1577_v40 = vpop.f32.mrf.mxu2 }
 0x4bd   :  { %vm1882_vm15 = vcmp.ge.f32.partialorder %v1577_v40, %v6256_v5 }
 0x4be   :  { %vm1890_vm10 = vmand %vm9402_vm9, %vm1882_vm15  ;;  %v1930_v16 = vsel %vm1882_vm15, 1, %v9473_v56 }
 0x4bf   :  { %v1898_v51 = vsel %vm1890_vm10, %v5844_v47, inf }
 0x4c0   :  { %v1918_v23 = vsel %vm9404_vm1, %v1898_v51, inf  ;;  %v6532_v51 = vpop.f32.mrf.mxu3 }
 0x4c1   :  { %1919 = vmin.xlane.f32.xlu0 %v1918_v23  ;;  %v6536_v23 = vpop.xlane.xlu2 %1871 }
 0x4c2   :  { %9591 = vst [vmem:[#allocation40_spill] sm:$0xff] %v6536_v23 }
 0x4c4   :  { %v1579_v13 = vpop.f32.mrf.mxu2 }
 0x4c5   :  { %vm1883_vm14 = vcmp.ge.f32.partialorder %v1579_v13, %v6268_v25  ;;  %v6538_v13 = vpop.xlane.xlu0 %1868 }
 0x4c6   :  { %vm1891_vm8 = vmand %vm9588_vm7, %vm1883_vm14  ;;  %v1931_v52 = vsel %vm1883_vm14, 1, %v9473_v56  ;;  %9592 = vst [vmem:[#allocation23_spill] sm:$0xff] %v6538_v13  ;;  %vm9600_vm14 = vcmp.gt.f32.partialorder %v9552_v45, 0.5 }
 0x4c7   :  { %v1899_v55 = vsel %vm1891_vm8, %v5844_v47, inf  ;;  %v1927_v47 = vsel %vm1879_vm13, 1, %v9473_v56 }
 0x4c8   :  { %v1921_v8 = vsel %vm9404_vm1, %v1899_v55, inf  ;;  %v6540_v40 = vpop.f32.mrf.mxu3  ;;  %v6542_v55 = vpop.xlane.xlu1 %1874 }
 0x4c9   :  { %1922 = vmin.xlane.f32.xlu2 %v1921_v8  ;;  %9593 = vst [vmem:[#allocation33_spill] sm:$0xff] %v6542_v55 }
 0x4d2   :  { %1932 = vrot.lane.b32.xlu1 %v1924_v43, %s4937_s1 }
 0x4d5   :  { %1934 = vrot.lane.b32.xlu0 %v1925_v3, %s4937_s1 }
 0x4da   :  { %1940 = vrot.lane.b32.xlu1 %v1928_v50, %s4937_s1 }
 0x4dd   :  { %1938 = vrot.lane.b32.xlu0 %v1927_v47, %s4937_s1  ;;  %v6552_v47 = vpop.f32.mrf.mxu3 }
 0x4e1   :  { %1936 = vrot.lane.b32.xlu2 %v1926_v57, %s4937_s1 }
 0x4e2   :  { %1946 = vrot.lane.b32.xlu1 %v1931_v52, %s4937_s1 }
 0x4e5   :  { %1942 = vrot.lane.b32.xlu0 %v1929_v6, %s4937_s1 }
 0x4e9   :  { %1944 = vrot.lane.b32.xlu2 %v1930_v16, %s4937_s1  ;;  %v6560_v16 = vpop.f32.mrf.mxu3 }
 0x4f1   :  { %v6571_v55 = vpop.f32.mrf.mxu3 }
 0x504   :  { %v6546_v43 = vpop.xlane.xlu0 %1901 }
 0x50c   :  { %v6544_v8 = vpop.xlane.xlu2 %1904 }
 0x514   :  { %v6548_v3 = vpop.xlane.xlu1 %1907 }
 0x51c   :  { %v6554_v57 = vpop.xlane.xlu0 %1910 }
 0x51d   :  { %9595 = vst [vmem:[#allocation44_spill] sm:$0xff] %v6554_v57 }
 0x524   :  { %v6550_v50 = vpop.xlane.xlu2 %1913 }
 0x525   :  { %9594 = vst [vmem:[#allocation54_spill] sm:$0xff] %v6550_v50 }
 0x52c   :  { %v6556_v52 = vpop.xlane.xlu1 %1916 }
 0x52d   :  { %9596 = vst [vmem:[#allocation35_spill] sm:$0xff] %v6556_v52 }
 0x534   :  { %v6562_v36 = vpop.xlane.xlu0 %1919 }
 0x535   :  { %9598 = vst [vmem:[#allocation43_spill] sm:$0xff] %v6562_v36 }
 0x53c   :  { %v6558_v6 = vpop.xlane.xlu2 %1922 }
 0x53d   :  { %9597 = vst [vmem:[#allocation38_spill] sm:$0xff] %v6558_v6 }
 0x544   :  { %v1937_v54 = vpop.permute.xlu2 %1936  ;;  %v1933_v4 = vpop.permute.xlu1 %1932 }
 0x545   :  { %vm1950_vm0 = vcmp.ne.s32.totalorder %v1937_v54, 0  ;;  %vm1948_vm12 = vcmp.ne.s32.totalorder %v1933_v4, 0 }
 0x546   :  { %vm1958_vm13 = vmand %vm9599_vm5, %vm1950_vm0 }
 0x547   :  { %vm1956_vm11 = vmand %vm9403_vm3, %vm1948_vm12  ;;  %v1935_v26 = vpop.permute.xlu0 %1934  ;;  %v1966_v63 = vsel %vm1958_vm13, %v5434_v60, inf }
 0x548   :  { %vm1949_vm2 = vcmp.ne.s32.totalorder %v1935_v26, 0  ;;  %v1978_v6 = vsel %vm9404_vm1, %v1966_v63, inf  ;;  %v1964_v33 = vsel %vm1956_vm11, %v5434_v60, inf  ;;  %vm9603_vm11 = vcmp.gt.f32.partialorder %v9565_v9, 0.5 }
 0x549   :  { %vm1957_vm15 = vmand %vm9386_vm6, %vm1949_vm2  ;;  %1979 = vmin.xlane.f32.xlu1 %v1978_v6  ;;  %v1972_v54 = vsel %vm9404_vm1, %v1964_v33, inf }
 0x54a   :  { %1973 = vmin.xlane.f32.xlu0 %v1972_v54  ;;  %v1965_v4 = vsel %vm1957_vm15, %v5434_v60, inf  ;;  %v6585_v54 = vpop.f32.mrf.mxu3  ;;  %vm1998_vm15 = vcmp.ge.f32.partialorder %v6552_v47, %v6231_v38 }
 0x54b   :  { %v1975_v36 = vsel %vm9404_vm1, %v1965_v4, inf }
 0x54c   :  { %v1941_v42 = vpop.permute.xlu1 %1940  ;;  %1976 = vmin.xlane.f32.xlu2 %v1975_v36  ;;  %v1945_v26 = vpop.permute.xlu2 %1944 }
 0x54d   :  { %vm1952_vm10 = vcmp.ne.s32.totalorder %v1941_v42, 0  ;;  %vm1954_vm12 = vcmp.ne.s32.totalorder %v1945_v26, 0 }
 0x54e   :  { %vm1960_vm7 = vmand %vm9600_vm14, %vm1952_vm10  ;;  %vm1996_vm14 = vcmp.ge.f32.partialorder %v6532_v51, %v6192_v15 }
 0x54f   :  { %v1939_v63 = vpop.permute.xlu0 %1938  ;;  %v1968_v23 = vsel %vm1960_vm7, %v5434_v60, inf  ;;  %vm6590_vm5 = vmand %vm9402_vm9, %vm1954_vm12  ;;  %vm9604_vm7 = vcmp.gt.f32.partialorder %v9559_v10, 0.5  ;;  %vm9605_vm12 = vcmp.gt.f32.partialorder %v9557_v21, 0.5 }
 0x550   :  { %vm1951_vm8 = vcmp.ne.s32.totalorder %v1939_v63, 0  ;;  %v1984_v33 = vsel %vm9404_vm1, %v1968_v23, inf }
 0x551   :  { %vm1959_vm0 = vmand %vm9387_vm4, %vm1951_vm8 }
 0x552   :  { %1985 = vmin.xlane.f32.xlu0 %v1984_v33  ;;  %v1967_v6 = vsel %vm1959_vm0, %v5434_v60, inf  ;;  %v1970_v33 = vsel %vm6590_vm5, %v5434_v60, inf  ;;  %vm1997_vm0 = vcmp.ge.f32.partialorder %v6540_v40, %v6212_v59  ;;  %vm6622_vm5 = vmand %vm9403_vm3, %vm1996_vm14 }
 0x553   :  { %v1981_v36 = vsel %vm9404_vm1, %v1967_v6, inf  ;;  %v2045_v51 = vsel %vm1997_vm0, 1, %v9473_v56 }
 0x554   :  { %v1947_v42 = vpop.permute.xlu1 %1946  ;;  %1982 = vmin.xlane.f32.xlu2 %v1981_v36  ;;  %v1990_v36 = vsel %vm9404_vm1, %v1970_v33, inf }
 0x555   :  { %vm1955_vm13 = vcmp.ne.s32.totalorder %v1947_v42, 0 }
 0x556   :  { %vm1963_vm2 = vmand %vm9603_vm11, %vm1955_vm13 }
 0x557   :  { %v1943_v23 = vpop.permute.xlu0 %1942  ;;  %v1971_v26 = vsel %vm1963_vm2, %v5434_v60, inf  ;;  %vm2006_vm13 = vmand %vm9605_vm12, %vm1998_vm15  ;;  %vm2001_vm2 = vcmp.ge.f32.partialorder %v6585_v54, %v6234_v0 }
 0x558   :  { %vm1953_vm10 = vcmp.ne.s32.totalorder %v1943_v23, 0  ;;  %v1993_v63 = vsel %vm9404_vm1, %v1971_v26, inf  ;;  %vm2005_vm11 = vmand %vm9386_vm6, %vm1997_vm0  ;;  %v2014_v23 = vsel %vm2006_vm13, %v5617_v49, inf  ;;  %v2012_v26 = vsel %vm6622_vm5, %v5617_v49, inf }
 0x559   :  { %vm1961_vm8 = vmand %vm9604_vm7, %vm1953_vm10  ;;  %vm1999_vm10 = vcmp.ge.f32.partialorder %v6560_v16, %v6254_v46  ;;  %v2026_v33 = vsel %vm9404_vm1, %v2014_v23, inf  ;;  %vm2000_vm7 = vcmp.ge.f32.partialorder %v6571_v55, %v6214_v18  ;;  %vm9609_vm5 = vcmp.gt.f32.partialorder %v9552_v45, 0.5 }
 0x55a   :  { %1994 = vmin.xlane.f32.xlu0 %v1993_v63  ;;  %v1969_v6 = vsel %vm1961_vm8, %v5434_v60, inf  ;;  %v1606_v60 = vpop.f32.mrf.mxu3  ;;  %v2013_v63 = vsel %vm2005_vm11, %v5617_v49, inf  ;;  %vm9608_vm8 = vcmp.gt.f32.partialorder %v9559_v10, 0.5  ;;  %vm2007_vm13 = vmand %vm9387_vm4, %vm1999_vm10  ;;  %v2048_v16 = vsel %vm2000_vm7, 1, %v9473_v56 }
 0x55b   :  { %v1987_v42 = vsel %vm9404_vm1, %v1969_v6, inf  ;;  %vm2009_vm12 = vmand %vm9608_vm8, %vm2001_vm2  ;;  %v2023_v6 = vsel %vm9404_vm1, %v2013_v63, inf  ;;  %v2015_v23 = vsel %vm2007_vm13, %v5617_v49, inf  ;;  %vm2002_vm8 = vcmp.ge.f32.partialorder %v1606_v60, %v6256_v5 }
 0x55c   :  { %1991 = vmin.xlane.f32.xlu2 %v1990_v36  ;;  %1988 = vmin.xlane.f32.xlu1 %v1987_v42  ;;  %v2020_v36 = vsel %vm9404_vm1, %v2012_v26, inf  ;;  %vm2008_vm11 = vmand %vm9609_vm5, %vm2000_vm7  ;;  %v2017_v42 = vsel %vm2009_vm12, %v5617_v49, inf  ;;  %vm9610_vm13 = vcmp.gt.f32.partialorder %v9565_v9, 0.5  ;;  %v2050_v47 = vsel %vm2002_vm8, 1, %v9473_v56 }
 0x55d   :  { %v2016_v26 = vsel %vm2008_vm11, %v5617_v49, inf  ;;  %v2035_v63 = vsel %vm9404_vm1, %v2017_v42, inf  ;;  %vm2010_vm12 = vmand %vm9402_vm9, %vm2002_vm8  ;;  %v2049_v40 = vsel %vm2001_vm2, 1, %v9473_v56 }
 0x562   :  { %2027 = vmin.xlane.f32.xlu0 %v2026_v33  ;;  %v1608_v4 = vpop.f32.mrf.mxu3  ;;  %v2032_v33 = vsel %vm9404_vm1, %v2016_v26, inf }
 0x563   :  { %vm2003_vm6 = vcmp.ge.f32.partialorder %v1608_v4, %v6268_v25 }
 0x564   :  { %2024 = vmin.xlane.f32.xlu2 %v2023_v6  ;;  %2021 = vmin.xlane.f32.xlu1 %v2020_v36  ;;  %v2029_v6 = vsel %vm9404_vm1, %v2015_v23, inf  ;;  %vm2011_vm5 = vmand %vm9610_vm13, %vm2003_vm6  ;;  %v2018_v36 = vsel %vm2010_vm12, %v5617_v49, inf  ;;  %v2051_v55 = vsel %vm2003_vm6, 1, %v9473_v56  ;;  %vm9622_vm13 = vcmp.gt.f32.partialorder %v9551_v19, 0.5 }
 0x565   :  { %v2019_v42 = vsel %vm2011_vm5, %v5617_v49, inf  ;;  %v2038_v23 = vsel %vm9404_vm1, %v2018_v36, inf  ;;  %v2046_v49 = vsel %vm1998_vm15, 1, %v9473_v56  ;;  %vm9620_vm15 = vcmp.gt.f32.partialorder %v9557_v21, 0.5 }
 0x566   :  { %v2041_v26 = vsel %vm9404_vm1, %v2019_v42, inf  ;;  %v6724_v42 = vpop.f32.mrf.mxu0 }
 0x56a   :  { %2036 = vmin.xlane.f32.xlu0 %v2035_v63  ;;  %v2044_v63 = vsel %vm1996_vm14, 1, %v9473_v56 }
 0x56c   :  { %2033 = vmin.xlane.f32.xlu2 %v2032_v33  ;;  %2030 = vmin.xlane.f32.xlu1 %v2029_v6  ;;  %v2047_v33 = vsel %vm1999_vm10, 1, %v9473_v56 }
 0x56e   :  { %v6732_v4 = vpop.f32.mrf.mxu0 }
 0x574   :  { %2042 = vmin.xlane.f32.xlu2 %v2041_v26  ;;  %2039 = vmin.xlane.f32.xlu1 %v2038_v23 }
 0x57e   :  { %2052 = vrot.lane.b32.xlu0 %v2044_v63, %s4937_s1 }
 0x586   :  { %2058 = vrot.lane.b32.xlu0 %v2047_v33, %s4937_s1 }
 0x58c   :  { %2056 = vrot.lane.b32.xlu2 %v2046_v49, %s4937_s1 }
 0x58d   :  { %2054 = vrot.lane.b32.xlu1 %v2045_v51, %s4937_s1  ;;  %v6740_v51 = vpop.f32.mrf.mxu0 }
 0x58e   :  { %2060 = vrot.lane.b32.xlu0 %v2048_v16, %s4937_s1 }
 0x594   :  { %2064 = vrot.lane.b32.xlu2 %v2050_v47, %s4937_s1 }
 0x595   :  { %2062 = vrot.lane.b32.xlu1 %v2049_v40, %s4937_s1 }
 0x596   :  { %2066 = vrot.lane.b32.xlu0 %v2051_v55, %s4937_s1 }
 0x5bc   :  { %v6730_v23 = vpop.xlane.xlu1 %1979 }
 0x5bd   :  { %v6720_v36 = vpop.xlane.xlu0 %1973 }
 0x5bf   :  { %v6718_v6 = vpop.xlane.xlu2 %1976 }
 0x5c5   :  { %v6726_v54 = vpop.xlane.xlu0 %1985 }
 0x5c6   :  { %9612 = vst [vmem:[#allocation49_spill] sm:$0xff] %v6726_v54 }
 0x5c7   :  { %v6722_v60 = vpop.xlane.xlu2 %1982 }
 0x5c8   :  { %9611 = vst [vmem:[#allocation50_spill] sm:$0xff] %v6722_v60 }
 0x5cd   :  { %v6734_v63 = vpop.xlane.xlu0 %1994 }
 0x5ce   :  { %9614 = vst [vmem:[#allocation45_spill] sm:$0xff] %v6734_v63 }
 0x5cf   :  { %v6728_v26 = vpop.xlane.xlu2 %1991  ;;  %v6738_v49 = vpop.xlane.xlu1 %1988 }
 0x5d0   :  { %9613 = vst [vmem:[#allocation36_spill] sm:$0xff] %v6728_v26  ;;  %v6750_v26 = vpop.f32.mrf.mxu0 }
 0x5d1   :  { %9615 = vst [vmem:[#allocation34_spill] sm:$0xff] %v6738_v49 }
 0x5d5   :  { %v6742_v16 = vpop.xlane.xlu0 %2027 }
 0x5d7   :  { %v6736_v33 = vpop.xlane.xlu2 %2024  ;;  %v6746_v40 = vpop.xlane.xlu1 %2021 }
 0x5d8   :  { %v6758_v49 = vpop.f32.mrf.mxu0 }
 0x5dd   :  { %v6752_v52 = vpop.xlane.xlu0 %2036 }
 0x5de   :  { %9618 = vst [vmem:[#allocation56_spill] sm:$0xff] %v6752_v52 }
 0x5df   :  { %v6744_v47 = vpop.xlane.xlu2 %2033  ;;  %v6754_v13 = vpop.xlane.xlu1 %2030 }
 0x5e0   :  { %9616 = vst [vmem:[#allocation48_spill] sm:$0xff] %v6744_v47  ;;  %v6771_v62 = vpop.f32.mrf.mxu0 }
 0x5e1   :  { %9619 = vst [vmem:[#allocation58_spill] sm:$0xff] %v6754_v13 }
 0x5e7   :  { %v6748_v55 = vpop.xlane.xlu2 %2042 }
 0x5e8   :  { %9617 = vst [vmem:[#allocation42_spill] sm:$0xff] %v6748_v55 }
 0x5ef   :  { %v2057_v63 = vpop.permute.xlu2 %2056 }
 0x5f0   :  { %vm2070_vm6 = vcmp.ne.s32.totalorder %v2057_v63, 0  ;;  %v2053_v54 = vpop.permute.xlu0 %2052  ;;  %v6766_v63 = vpop.xlane.xlu1 %2039 }
 0x5f1   :  { %vm2078_vm14 = vmand %vm9620_vm15, %vm2070_vm6  ;;  %vm2068_vm0 = vcmp.ne.s32.totalorder %v2053_v54, 0  ;;  %9621 = vst [vmem:[#allocation39_spill] sm:$0xff] %v6766_v63  ;;  %vm2117_vm15 = vcmp.ge.f32.partialorder %v6732_v4, %v6212_v59 }
 0x5f2   :  { %vm2076_vm2 = vmand %vm9403_vm3, %vm2068_vm0  ;;  %v2086_v55 = vsel %vm2078_vm14, %v5453_v28, inf  ;;  %vm9623_vm14 = vcmp.gt.f32.partialorder %v9552_v45, 0.5 }
 0x5f3   :  { %v2098_v47 = vsel %vm9404_vm1, %v2086_v55, inf  ;;  %v2084_v52 = vsel %vm2076_vm2, %v5453_v28, inf  ;;  %vm9626_vm2 = vmmov %vm9622_vm13 }
 0x5f4   :  { %2099 = vmin.xlane.f32.xlu0 %v2098_v47  ;;  %v2092_v27 = vsel %vm9404_vm1, %v2084_v52, inf }
 0x5f5   :  { %2093 = vmin.xlane.f32.xlu1 %v2092_v27 }
 0x5f7   :  { %v2065_v50 = vpop.permute.xlu2 %2064 }
 0x5f8   :  { %v2059_v48 = vpop.permute.xlu0 %2058  ;;  %vm2074_vm11 = vcmp.ne.s32.totalorder %v2065_v50, 0 }
 0x5f9   :  { %vm2071_vm10 = vcmp.ne.s32.totalorder %v2059_v48, 0  ;;  %vm2082_vm8 = vmand %vm9402_vm9, %vm2074_vm11  ;;  %vm2116_vm11 = vcmp.ge.f32.partialorder %v6724_v42, %v6192_v15 }
 0x5fa   :  { %vm2079_vm7 = vmand %vm9387_vm4, %vm2071_vm10  ;;  %v2090_v48 = vsel %vm2082_vm8, %v5453_v28, inf  ;;  %vm9629_vm8 = vcmp.gt.f32.partialorder %v9559_v10, 0.5 }
 0x5fb   :  { %v2087_v54 = vsel %vm2079_vm7, %v5453_v28, inf  ;;  %vm6795_vm10 = vmand %vm9626_vm2, %vm2117_vm15  ;;  %vm9631_vm2 = vcmp.gt.f32.partialorder %v9552_v45, 0.5 }
 0x5fc   :  { %v2101_v55 = vsel %vm9404_vm1, %v2087_v54, inf  ;;  %v2110_v54 = vsel %vm9404_vm1, %v2090_v48, inf }
 0x5fd   :  { %2102 = vmin.xlane.f32.xlu1 %v2101_v55 }
 0x5ff   :  { %v2055_v27 = vpop.permute.xlu1 %2054 }
 0x600   :  { %vm2069_vm12 = vcmp.ne.s32.totalorder %v2055_v27, 0  ;;  %v2061_v52 = vpop.permute.xlu0 %2060 }
 0x601   :  { %vm2077_vm5 = vmand %vm9622_vm13, %vm2069_vm12  ;;  %vm2072_vm6 = vcmp.ne.s32.totalorder %v2061_v52, 0  ;;  %v6799_v52 = vpop.f32.mrf.mxu0 }
 0x602   :  { %v2085_v50 = vsel %vm2077_vm5, %v5453_v28, inf  ;;  %vm6786_vm0 = vmand %vm9623_vm14, %vm2072_vm6  ;;  %vm2120_vm5 = vcmp.ge.f32.partialorder %v6758_v49, %v6214_v18  ;;  %vm9630_vm14 = vcmp.gt.f32.partialorder %v9565_v9, 0.5 }
 0x603   :  { %v2095_v47 = vsel %vm9404_vm1, %v2085_v50, inf  ;;  %vm2124_vm6 = vmand %vm9403_vm3, %vm2116_vm11  ;;  %v2168_v4 = vsel %vm2120_vm5, 1, %v9473_v56 }
 0x604   :  { %2096 = vmin.xlane.f32.xlu2 %v2095_v47  ;;  %v2088_v47 = vsel %vm6786_vm0, %v5453_v28, inf }
 0x605   :  { %2111 = vmin.xlane.f32.xlu1 %v2110_v54  ;;  %v2133_v54 = vsel %vm6795_vm10, %v5964_v29, inf  ;;  %v2104_v55 = vsel %vm9404_vm1, %v2088_v47, inf  ;;  %vm2128_vm10 = vmand %vm9631_vm2, %vm2120_vm5 }
 0x606   :  { %v2143_v27 = vsel %vm9404_vm1, %v2133_v54, inf  ;;  %v2136_v54 = vsel %vm2128_vm10, %v5964_v29, inf  ;;  %vm2121_vm10 = vcmp.ge.f32.partialorder %v6771_v62, %v6234_v0 }
 0x607   :  { %v2063_v50 = vpop.permute.xlu1 %2062 }
 0x608   :  { %vm2073_vm7 = vcmp.ne.s32.totalorder %v2063_v50, 0  ;;  %v2067_v48 = vpop.permute.xlu0 %2066 }
 0x609   :  { %vm2081_vm12 = vmand %vm9629_vm8, %vm2073_vm7  ;;  %vm2075_vm13 = vcmp.ne.s32.totalorder %v2067_v48, 0  ;;  %v1637_v48 = vpop.f32.mrf.mxu0  ;;  %vm2118_vm7 = vcmp.ge.f32.partialorder %v6740_v51, %v6231_v38  ;;  %vm2119_vm8 = vcmp.ge.f32.partialorder %v6750_v26, %v6254_v46 }
 0x60a   :  { %v2089_v63 = vsel %vm2081_vm12, %v5453_v28, inf  ;;  %vm2083_vm0 = vmand %vm9630_vm14, %vm2075_vm13  ;;  %vm2123_vm12 = vcmp.ge.f32.partialorder %v1637_v48, %v6268_v25  ;;  %vm9632_vm13 = vcmp.gt.f32.partialorder %v9557_v21, 0.5  ;;  %v2167_v42 = vsel %vm2119_vm8, 1, %v9473_v56 }
 0x60b   :  { %v2107_v50 = vsel %vm9404_vm1, %v2089_v63, inf  ;;  %v2132_v63 = vsel %vm2124_vm6, %v5964_v29, inf  ;;  %v2091_v47 = vsel %vm2083_vm0, %v5453_v28, inf  ;;  %vm2126_vm6 = vmand %vm9632_vm13, %vm2118_vm7  ;;  %v2152_v28 = vsel %vm9404_vm1, %v2136_v54, inf }
 0x60c   :  { %2108 = vmin.xlane.f32.xlu0 %v2107_v50  ;;  %2105 = vmin.xlane.f32.xlu2 %v2104_v55  ;;  %v2140_v50 = vsel %vm9404_vm1, %v2132_v63, inf  ;;  %v2113_v55 = vsel %vm9404_vm1, %v2091_v47, inf  ;;  %vm2127_vm14 = vmand %vm9387_vm4, %vm2119_vm8  ;;  %vm9633_vm0 = vcmp.gt.f32.partialorder %v9565_v9, 0.5  ;;  %vm2122_vm13 = vcmp.ge.f32.partialorder %v6799_v52, %v6256_v5 }
 0x60d   :  { %2144 = vmin.xlane.f32.xlu1 %v2143_v27  ;;  %vm2131_vm2 = vmand %vm9633_vm0, %vm2123_vm12  ;;  %v2134_v27 = vsel %vm2126_vm6, %v5964_v29, inf  ;;  %v2135_v63 = vsel %vm2127_vm14, %v5964_v29, inf  ;;  %vm9634_vm0 = vcmp.gt.f32.partialorder %v9559_v10, 0.5  ;;  %v2171_v62 = vsel %vm2123_vm12, 1, %v9473_v56 }
 0x60e   :  { %v2139_v47 = vsel %vm2131_vm2, %v5964_v29, inf  ;;  %v2149_v54 = vsel %vm9404_vm1, %v2135_v63, inf  ;;  %vm2129_vm6 = vmand %vm9634_vm0, %vm2121_vm10  ;;  %v2170_v49 = vsel %vm2122_vm13, 1, %v9473_v56  ;;  %vm9647_vm12 = vcmp.gt.f32.partialorder %v9557_v21, 0.5 }
 0x60f   :  { %vm2130_vm14 = vmand %vm9402_vm9, %vm2122_vm13  ;;  %vm9648_vm13 = vcmp.gt.f32.partialorder %v9551_v19, 0.5 }
 0x614   :  { %2141 = vmin.xlane.f32.xlu0 %v2140_v50  ;;  %2114 = vmin.xlane.f32.xlu2 %v2113_v55  ;;  %v2146_v50 = vsel %vm9404_vm1, %v2134_v27, inf  ;;  %v2161_v55 = vsel %vm9404_vm1, %v2139_v47, inf  ;;  %v2138_v27 = vsel %vm2130_vm14, %v5964_v29, inf  ;;  %v2166_v47 = vsel %vm2118_vm7, 1, %v9473_v56 }
 0x615   :  { %2153 = vmin.xlane.f32.xlu1 %v2152_v28  ;;  %v2137_v28 = vsel %vm2129_vm6, %v5964_v29, inf  ;;  %v2158_v63 = vsel %vm9404_vm1, %v2138_v27, inf  ;;  %v2164_v29 = vsel %vm2116_vm11, 1, %v9473_v56 }
 0x616   :  { %v2155_v13 = vsel %vm9404_vm1, %v2137_v28, inf }
 0x61c   :  { %2150 = vmin.xlane.f32.xlu0 %v2149_v54  ;;  %2147 = vmin.xlane.f32.xlu2 %v2146_v50  ;;  %v2165_v54 = vsel %vm2117_vm15, 1, %v9473_v56 }
 0x61d   :  { %2162 = vmin.xlane.f32.xlu1 %v2161_v55  ;;  %v6923_v55 = vpop.f32.mrf.mxu1 }
 0x624   :  { %2159 = vmin.xlane.f32.xlu0 %v2158_v63  ;;  %2156 = vmin.xlane.f32.xlu2 %v2155_v13  ;;  %v2169_v13 = vsel %vm2121_vm10, 1, %v9473_v56 }
 0x625   :  { %v6931_v63 = vpop.f32.mrf.mxu1 }
 0x636   :  { %2176 = vrot.lane.b32.xlu1 %v2166_v47, %s4937_s1 }
 0x638   :  { %2174 = vrot.lane.b32.xlu0 %v2165_v54, %s4937_s1 }
 0x63c   :  { %2172 = vrot.lane.b32.xlu2 %v2164_v29, %s4937_s1  ;;  %v6939_v29 = vpop.f32.mrf.mxu1 }
 0x63e   :  { %2182 = vrot.lane.b32.xlu1 %v2169_v13, %s4937_s1 }
 0x640   :  { %2180 = vrot.lane.b32.xlu0 %v2168_v4, %s4937_s1 }
 0x644   :  { %2178 = vrot.lane.b32.xlu2 %v2167_v42, %s4937_s1 }
 0x648   :  { %2186 = vrot.lane.b32.xlu0 %v2171_v62, %s4937_s1  ;;  %v6947_v62 = vpop.f32.mrf.mxu1 }
 0x64c   :  { %2184 = vrot.lane.b32.xlu2 %v2170_v49, %s4937_s1 }
 0x667   :  { %v6925_v28 = vpop.xlane.xlu0 %2099 }
 0x668   :  { %v6917_v51 = vpop.xlane.xlu1 %2093  ;;  %9636 = vst [vmem:[#allocation52_spill] sm:$0xff] %v6925_v28 }
 0x670   :  { %v6921_v26 = vpop.xlane.xlu1 %2102 }
 0x671   :  { %9635 = vst [vmem:[#allocation53_spill] sm:$0xff] %v6921_v26 }
 0x677   :  { %v6919_v50 = vpop.xlane.xlu2 %2096 }
 0x678   :  { %v6929_v27 = vpop.xlane.xlu1 %2111 }
 0x679   :  { %9638 = vst [vmem:[#allocation57_spill] sm:$0xff] %v6929_v27 }
 0x67f   :  { %v6927_v48 = vpop.xlane.xlu2 %2105  ;;  %v6933_v52 = vpop.xlane.xlu0 %2108 }
 0x680   :  { %9637 = vst [vmem:[#allocation51_spill] sm:$0xff] %v6927_v48  ;;  %v6937_v54 = vpop.xlane.xlu1 %2144 }
 0x681   :  { %9639 = vst [vmem:[#allocation55_spill] sm:$0xff] %v6933_v52 }
 0x687   :  { %v6935_v47 = vpop.xlane.xlu2 %2114  ;;  %v6941_v13 = vpop.xlane.xlu0 %2141 }
 0x688   :  { %9640 = vst [vmem:[#allocation3_spill] sm:$0xff] %v6935_v47  ;;  %v6945_v42 = vpop.xlane.xlu1 %2153  ;;  %v6955_v47 = vpop.f32.mrf.mxu1 }
 0x689   :  { %9642 = vst [vmem:[#allocation2_spill] sm:$0xff] %v6945_v42 }
 0x68f   :  { %v6943_v4 = vpop.xlane.xlu2 %2147  ;;  %v6951_v27 = vpop.xlane.xlu0 %2150 }
 0x690   :  { %9641 = vst [vmem:[#allocation6_spill] sm:$0xff] %v6943_v4  ;;  %v6953_v52 = vpop.xlane.xlu1 %2162 }
 0x691   :  { %9644 = vst [vmem:[#allocation4_spill] sm:$0xff] %v6951_v27  ;;  %v6968_v27 = vpop.f32.mrf.mxu1 }
 0x692   :  { %9645 = vst [vmem:[#allocation10_spill] sm:$0xff] %v6953_v52 }
 0x697   :  { %v6949_v49 = vpop.xlane.xlu2 %2156  ;;  %v6959_v26 = vpop.xlane.xlu0 %2159 }
 0x698   :  { %9643 = vst [vmem:[#allocation8_spill] sm:$0xff] %v6949_v49 }
 0x699   :  { %9646 = vst [vmem:[#allocation7_spill] sm:$0xff] %v6959_v26 }
 0x69f   :  { %v2173_v48 = vpop.permute.xlu2 %2172 }
 0x6a0   :  { %vm2188_vm15 = vcmp.ne.s32.totalorder %v2173_v48, 0 }
 0x6a1   :  { %vm2196_vm11 = vmand %vm9403_vm3, %vm2188_vm15 }
 0x6a2   :  { %v2204_v60 = vsel %vm2196_vm11, %v5493_v58, inf  ;;  %vm2237_vm11 = vcmp.ge.f32.partialorder %v6931_v63, %v6212_v59 }
 0x6a3   :  { %v2212_v42 = vsel %vm9404_vm1, %v2204_v60, inf }
 0x6a4   :  { %2213 = vmin.xlane.f32.xlu1 %v2212_v42 }
 0x6a7   :  { %v2179_v24 = vpop.permute.xlu2 %2178 }
 0x6a8   :  { %v2177_v49 = vpop.permute.xlu1 %2176  ;;  %vm2191_vm5 = vcmp.ne.s32.totalorder %v2179_v24, 0 }
 0x6a9   :  { %vm2190_vm7 = vcmp.ne.s32.totalorder %v2177_v49, 0  ;;  %vm2199_vm8 = vmand %vm9387_vm4, %vm2191_vm5  ;;  %vm9649_vm5 = vcmp.gt.f32.partialorder %v9559_v10, 0.5 }
 0x6aa   :  { %vm2198_vm2 = vmand %vm9647_vm12, %vm2190_vm7  ;;  %v2175_v48 = vpop.permute.xlu0 %2174  ;;  %v2207_v52 = vsel %vm2199_vm8, %v5493_v58, inf  ;;  %vm2236_vm8 = vcmp.ge.f32.partialorder %v6923_v55, %v6192_v15 }
 0x6ab   :  { %vm2189_vm10 = vcmp.ne.s32.totalorder %v2175_v48, 0  ;;  %v2206_v26 = vsel %vm2198_vm2, %v5493_v58, inf  ;;  %v2221_v60 = vsel %vm9404_vm1, %v2207_v52, inf  ;;  %vm9650_vm2 = vcmp.gt.f32.partialorder %v9552_v45, 0.5 }
 0x6ac   :  { %vm2197_vm0 = vmand %vm9648_vm13, %vm2189_vm10  ;;  %v2218_v24 = vsel %vm9404_vm1, %v2206_v26, inf  ;;  %2222 = vmin.xlane.f32.xlu1 %v2221_v60  ;;  %v6996_v60 = vpop.f32.mrf.mxu1 }
 0x6ad   :  { %2219 = vmin.xlane.f32.xlu0 %v2218_v24  ;;  %v2205_v42 = vsel %vm2197_vm0, %v5493_v58, inf  ;;  %vm2245_vm0 = vmand %vm9648_vm13, %vm2237_vm11 }
 0x6ae   :  { %v2215_v49 = vsel %vm9404_vm1, %v2205_v42, inf }
 0x6af   :  { %v2185_v57 = vpop.permute.xlu2 %2184  ;;  %2216 = vmin.xlane.f32.xlu2 %v2215_v49  ;;  %v2253_v49 = vsel %vm2245_vm0, %v5933_v11, inf }
 0x6b0   :  { %v2183_v2 = vpop.permute.xlu1 %2182  ;;  %vm2194_vm6 = vcmp.ne.s32.totalorder %v2185_v57, 0 }
 0x6b1   :  { %vm2193_vm14 = vcmp.ne.s32.totalorder %v2183_v2, 0  ;;  %vm2202_vm15 = vmand %vm9402_vm9, %vm2194_vm6 }
 0x6b2   :  { %vm2201_vm7 = vmand %vm9649_vm5, %vm2193_vm14  ;;  %v2181_v26 = vpop.permute.xlu0 %2180  ;;  %v2210_v52 = vsel %vm2202_vm15, %v5493_v58, inf  ;;  %vm2240_vm14 = vcmp.ge.f32.partialorder %v6955_v47, %v6214_v18  ;;  %vm2239_vm15 = vcmp.ge.f32.partialorder %v6947_v62, %v6254_v46 }
 0x6b3   :  { %vm2192_vm12 = vcmp.ne.s32.totalorder %v2181_v26, 0  ;;  %v2209_v48 = vsel %vm2201_vm7, %v5493_v58, inf  ;;  %v2230_v2 = vsel %vm9404_vm1, %v2210_v52, inf  ;;  %vm2244_vm6 = vmand %vm9403_vm3, %vm2236_vm8  ;;  %vm9651_vm7 = vcmp.gt.f32.partialorder %v9565_v9, 0.5 }
 0x6b4   :  { %vm2200_vm10 = vmand %vm9650_vm2, %vm2192_vm12  ;;  %v2227_v57 = vsel %vm9404_vm1, %v2209_v48, inf  ;;  %2231 = vmin.xlane.f32.xlu1 %v2230_v2  ;;  %v2252_v26 = vsel %vm2244_vm6, %v5933_v11, inf  ;;  %v2263_v48 = vsel %vm9404_vm1, %v2253_v49, inf  ;;  %vm2238_vm2 = vcmp.ge.f32.partialorder %v6939_v29, %v6231_v38 }
 0x6b5   :  { %2228 = vmin.xlane.f32.xlu0 %v2227_v57  ;;  %v2208_v24 = vsel %vm2200_vm10, %v5493_v58, inf  ;;  %v2260_v2 = vsel %vm9404_vm1, %v2252_v26, inf  ;;  %vm9652_vm10 = vcmp.gt.f32.partialorder %v9552_v45, 0.5  ;;  %vm2247_vm0 = vmand %vm9387_vm4, %vm2239_vm15  ;;  %vm9653_vm6 = vcmp.gt.f32.partialorder %v9557_v21, 0.5 }
 0x6b6   :  { %v2224_v42 = vsel %vm9404_vm1, %v2208_v24, inf  ;;  %vm2248_vm13 = vmand %vm9652_vm10, %vm2240_vm14  ;;  %vm2241_vm10 = vcmp.ge.f32.partialorder %v6968_v27, %v6234_v0  ;;  %v2287_v63 = vsel %vm2239_vm15, 1, %v9473_v56  ;;  %v2288_v55 = vsel %vm2240_vm14, 1, %v9473_v56  ;;  %v7114_v27 = vpop.f32.mrf.mxu2 }
 0x6b7   :  { %2225 = vmin.xlane.f32.xlu2 %v2224_v42  ;;  %v1666_v42 = vpop.f32.mrf.mxu1  ;;  %v2256_v49 = vsel %vm2248_vm13, %v5933_v11, inf  ;;  %vm9654_vm13 = vcmp.gt.f32.partialorder %v9565_v9, 0.5  ;;  %v2289_v62 = vsel %vm2241_vm10, 1, %v9473_v56  ;;  %vm9668_vm15 = vcmp.gt.f32.partialorder %v9551_v19, 0.5 }
 0x6ba   :  { %v2187_v52 = vpop.permute.xlu0 %2186 }
 0x6bb   :  { %vm2195_vm5 = vcmp.ne.s32.totalorder %v2187_v52, 0  ;;  %v2272_v52 = vsel %vm9404_vm1, %v2256_v49, inf }
 0x6bc   :  { %vm2203_vm12 = vmand %vm9651_vm7, %vm2195_vm5  ;;  %2264 = vmin.xlane.f32.xlu1 %v2263_v48  ;;  %vm2243_vm7 = vcmp.ge.f32.partialorder %v1666_v42, %v6268_v25 }
 0x6bd   :  { %2261 = vmin.xlane.f32.xlu0 %v2260_v2  ;;  %v2211_v57 = vsel %vm2203_vm12, %v5493_v58, inf  ;;  %vm2246_vm5 = vmand %vm9653_vm6, %vm2238_vm2  ;;  %v2255_v58 = vsel %vm2247_vm0, %v5933_v11, inf  ;;  %vm2242_vm12 = vcmp.ge.f32.partialorder %v6996_v60, %v6256_v5  ;;  %v2291_v29 = vsel %vm2243_vm7, 1, %v9473_v56 }
 0x6be   :  { %v2233_v24 = vsel %vm9404_vm1, %v2211_v57, inf  ;;  %v2254_v26 = vsel %vm2246_vm5, %v5933_v11, inf  ;;  %v2269_v48 = vsel %vm9404_vm1, %v2255_v58, inf  ;;  %vm2251_vm0 = vmand %vm9654_vm13, %vm2243_vm7  ;;  %vm9655_vm5 = vcmp.gt.f32.partialorder %v9559_v10, 0.5 }
 0x6bf   :  { %2234 = vmin.xlane.f32.xlu2 %v2233_v24  ;;  %vm2250_vm6 = vmand %vm9402_vm9, %vm2242_vm12  ;;  %v2266_v2 = vsel %vm9404_vm1, %v2254_v26, inf  ;;  %v2259_v57 = vsel %vm2251_vm0, %v5933_v11, inf  ;;  %v2290_v42 = vsel %vm2242_vm12, 1, %v9473_v56  ;;  %vm9669_vm7 = vcmp.gt.f32.partialorder %v9552_v45, 0.5 }
 0x6c0   :  { %vm2249_vm4 = vmand %vm9655_vm5, %vm2241_vm10  ;;  %v2258_v24 = vsel %vm2250_vm6, %v5933_v11, inf  ;;  %v2281_v58 = vsel %vm9404_vm1, %v2259_v57, inf  ;;  %vm9672_vm13 = vcmp.gt.f32.partialorder %v9557_v21, 0.5  ;;  %vm9673_vm5 = vcmp.gt.f32.partialorder %v9562_v41, 0.5 }
 0x6c1   :  { %v2257_v49 = vsel %vm2249_vm4, %v5933_v11, inf  ;;  %v2286_v11 = vsel %vm2238_vm2, 1, %v9473_v56 }
 0x6c2   :  { %v2275_v26 = vsel %vm9404_vm1, %v2257_v49, inf }
 0x6c4   :  { %2273 = vmin.xlane.f32.xlu1 %v2272_v52  ;;  %v2278_v52 = vsel %vm9404_vm1, %v2258_v24, inf }
 0x6c5   :  { %2270 = vmin.xlane.f32.xlu0 %v2269_v48  ;;  %v2285_v48 = vsel %vm2237_vm11, 1, %v9473_v56 }
 0x6c7   :  { %2267 = vmin.xlane.f32.xlu2 %v2266_v2  ;;  %v2284_v2 = vsel %vm2236_vm8, 1, %v9473_v56 }
 0x6cc   :  { %2282 = vmin.xlane.f32.xlu1 %v2281_v58 }
 0x6cd   :  { %2279 = vmin.xlane.f32.xlu0 %v2278_v52 }
 0x6cf   :  { %2276 = vmin.xlane.f32.xlu2 %v2275_v26 }
 0x6e1   :  { %2294 = vrot.lane.b32.xlu0 %v2285_v48, %s4937_s1  ;;  %v7122_v48 = vpop.f32.mrf.mxu2 }
 0x6e5   :  { %2296 = vrot.lane.b32.xlu1 %v2286_v11, %s4937_s1 }
 0x6e7   :  { %2292 = vrot.lane.b32.xlu2 %v2284_v2, %s4937_s1 }
 0x6e9   :  { %2298 = vrot.lane.b32.xlu0 %v2287_v63, %s4937_s1 }
 0x6ed   :  { %2306 = vrot.lane.b32.xlu1 %v2291_v29, %s4937_s1  ;;  %v7130_v29 = vpop.f32.mrf.mxu2 }
 0x6ef   :  { %2300 = vrot.lane.b32.xlu2 %v2288_v55, %s4937_s1 }
 0x6f1   :  { %2302 = vrot.lane.b32.xlu0 %v2289_v62, %s4937_s1 }
 0x6f7   :  { %2304 = vrot.lane.b32.xlu2 %v2290_v42, %s4937_s1 }
 0x717   :  { %v7104_v57 = vpop.xlane.xlu1 %2213 }
 0x71f   :  { %v7110_v49 = vpop.xlane.xlu1 %2222 }
 0x720   :  { %v7108_v24 = vpop.xlane.xlu0 %2219  ;;  %9657 = vst [vmem:[#allocation63_spill] sm:$0xff] %v7110_v49 }
 0x721   :  { %9656 = vst [vmem:[#allocation47_spill] sm:$0xff] %v7108_v24 }
 0x722   :  { %v7106_v47 = vpop.xlane.xlu2 %2216 }
 0x727   :  { %v7118_v26 = vpop.xlane.xlu1 %2231 }
 0x728   :  { %v7116_v52 = vpop.xlane.xlu0 %2228  ;;  %9660 = vst [vmem:[#allocation66_spill] sm:$0xff] %v7118_v26  ;;  %v7138_v26 = vpop.f32.mrf.mxu2 }
 0x729   :  { %9659 = vst [vmem:[#allocation61_spill] sm:$0xff] %v7116_v52 }
 0x72a   :  { %v7112_v58 = vpop.xlane.xlu2 %2225 }
 0x72b   :  { %9658 = vst [vmem:[#allocation20_spill] sm:$0xff] %v7112_v58 }
 0x72f   :  { %v7128_v63 = vpop.xlane.xlu1 %2264 }
 0x730   :  { %v7124_v11 = vpop.xlane.xlu0 %2261 }
 0x732   :  { %v7120_v60 = vpop.xlane.xlu2 %2234 }
 0x733   :  { %9661 = vst [vmem:[#allocation46_spill] sm:$0xff] %v7120_v60 }
 0x737   :  { %v7136_v42 = vpop.xlane.xlu1 %2273 }
 0x738   :  { %v7132_v55 = vpop.xlane.xlu0 %2270  ;;  %9665 = vst [vmem:[#allocation67_spill] sm:$0xff] %v7136_v42  ;;  %v7148_v42 = vpop.f32.mrf.mxu2 }
 0x739   :  { %9663 = vst [vmem:[#allocation59_spill] sm:$0xff] %v7132_v55 }
 0x73a   :  { %v7126_v2 = vpop.xlane.xlu2 %2267 }
 0x73b   :  { %9662 = vst [vmem:[#allocation64_spill] sm:$0xff] %v7126_v2 }
 0x73f   :  { %v7146_v22 = vpop.xlane.xlu1 %2282 }
 0x740   :  { %v7140_v60 = vpop.xlane.xlu0 %2279  ;;  %9667 = vst [vmem:[#allocation69_spill] sm:$0xff] %v7146_v22 }
 0x741   :  { %9666 = vst [vmem:[#allocation68_spill] sm:$0xff] %v7140_v60 }
 0x742   :  { %v7134_v62 = vpop.xlane.xlu2 %2276 }
 0x743   :  { %9664 = vst [vmem:[#allocation62_spill] sm:$0xff] %v7134_v62 }
 0x74a   :  { %v2293_v52 = vpop.permute.xlu2 %2292 }
 0x74b   :  { %vm2308_vm4 = vcmp.ne.s32.totalorder %v2293_v52, 0 }
 0x74c   :  { %vm2316_vm11 = vmand %vm9403_vm3, %vm2308_vm4 }
 0x74d   :  { %v2324_v58 = vsel %vm2316_vm11, %v5544_v1, inf }
 0x74e   :  { %v2332_v49 = vsel %vm9404_vm1, %v2324_v58, inf }
 0x74f   :  { %2333 = vmin.xlane.f32.xlu0 %v2332_v49 }
 0x752   :  { %v2301_v55 = vpop.permute.xlu2 %2300 }
 0x753   :  { %v2295_v62 = vpop.permute.xlu0 %2294  ;;  %vm2312_vm14 = vcmp.ne.s32.totalorder %v2301_v55, 0 }
 0x754   :  { %vm2309_vm8 = vcmp.ne.s32.totalorder %v2295_v62, 0  ;;  %vm7156_vm12 = vmand %vm9669_vm7, %vm2312_vm14 }
 0x755   :  { %vm2317_vm2 = vmand %vm9668_vm15, %vm2309_vm8  ;;  %vm9674_vm15 = vcmp.gt.f32.partialorder %v9565_v9, 0.5 }
 0x756   :  { %v2325_v52 = vsel %vm2317_vm2, %v5544_v1, inf }
 0x757   :  { %v2335_v60 = vsel %vm9404_vm1, %v2325_v52, inf  ;;  %v2297_v2 = vpop.permute.xlu1 %2296  ;;  %v2328_v52 = vsel %vm7156_vm12, %v5544_v1, inf  ;;  %vm2356_vm12 = vcmp.ge.f32.partialorder %v7114_v27, %v6192_v15 }
 0x758   :  { %2336 = vmin.xlane.f32.xlu2 %v2335_v60  ;;  %vm2310_vm10 = vcmp.ne.s32.totalorder %v2297_v2, 0  ;;  %v7170_v2 = vpop.f32.mrf.mxu2  ;;  %v2344_v24 = vsel %vm9404_vm1, %v2328_v52, inf }
 0x759   :  { %vm2318_vm0 = vmand %vm9672_vm13, %vm2310_vm10  ;;  %vm9677_vm10 = vcmp.gt.f32.partialorder %v9559_v10, 0.5 }
 0x75a   :  { %v2326_v49 = vsel %vm2318_vm0, %v5544_v1, inf  ;;  %v2305_v55 = vpop.permute.xlu2 %2304  ;;  %vm2357_vm0 = vcmp.ge.f32.partialorder %v7122_v48, %v6212_v59 }
 0x75b   :  { %v2299_v62 = vpop.permute.xlu0 %2298  ;;  %v2338_v22 = vsel %vm9404_vm1, %v2326_v49, inf  ;;  %vm2314_vm11 = vcmp.ne.s32.totalorder %v2305_v55, 0 }
 0x75c   :  { %vm2311_vm6 = vcmp.ne.s32.totalorder %v2299_v62, 0  ;;  %2339 = vmin.xlane.f32.xlu1 %v2338_v22  ;;  %vm2322_vm14 = vmand %vm9402_vm9, %vm2314_vm11 }
 0x75d   :  { %vm2319_vm4 = vmand %vm9673_vm5, %vm2311_vm6  ;;  %v2330_v49 = vsel %vm2322_vm14, %v5544_v1, inf  ;;  %vm2358_vm6 = vcmp.ge.f32.partialorder %v7130_v29, %v6231_v38 }
 0x75e   :  { %v2327_v60 = vsel %vm2319_vm4, %v5544_v1, inf  ;;  %vm7202_vm5 = vmand %vm9403_vm3, %vm2356_vm12  ;;  %vm9680_vm4 = vcmp.gt.f32.partialorder %v9551_v19, 0.5 }
 0x75f   :  { %v2341_v4 = vsel %vm9404_vm1, %v2327_v60, inf  ;;  %v2307_v28 = vpop.permute.xlu1 %2306  ;;  %vm2365_vm11 = vmand %vm9680_vm4, %vm2357_vm0  ;;  %v2372_v60 = vsel %vm7202_vm5, %v6325_v17, inf  ;;  %vm9683_vm5 = vcmp.gt.f32.partialorder %v9552_v45, 0.5 }
 0x760   :  { %2345 = vmin.xlane.f32.xlu2 %v2344_v24  ;;  %2342 = vmin.xlane.f32.xlu0 %v2341_v4  ;;  %vm2315_vm8 = vcmp.ne.s32.totalorder %v2307_v28, 0  ;;  %v2350_v24 = vsel %vm9404_vm1, %v2330_v49, inf  ;;  %v1693_v52 = vpop.f32.mrf.mxu2  ;;  %v2373_v22 = vsel %vm2365_vm11, %v6325_v17, inf  ;;  %vm9684_vm11 = vcmp.gt.f32.partialorder %v9559_v10, 0.5 }
 0x761   :  { %vm7178_vm2 = vmand %vm9674_vm15, %vm2315_vm8  ;;  %vm9681_vm8 = vcmp.gt.f32.partialorder %v9557_v21, 0.5  ;;  %vm2359_vm15 = vcmp.ge.f32.partialorder %v7138_v26, %v6254_v46  ;;  %v2383_v49 = vsel %vm9404_vm1, %v2373_v22, inf }
 0x762   :  { %v2331_v28 = vsel %vm7178_vm2, %v5544_v1, inf  ;;  %vm2366_vm14 = vmand %vm9681_vm8, %vm2358_vm6  ;;  %vm2360_vm2 = vcmp.ge.f32.partialorder %v7148_v42, %v6214_v18  ;;  %v2407_v27 = vsel %vm2359_vm15, 1, %v9473_v56 }
 0x763   :  { %v2303_v58 = vpop.permute.xlu0 %2302  ;;  %vm2368_vm4 = vmand %vm9683_vm5, %vm2360_vm2  ;;  %v2408_v48 = vsel %vm2360_vm2, 1, %v9473_v56 }
 0x764   :  { %vm2313_vm7 = vcmp.ne.s32.totalorder %v2303_v58, 0  ;;  %v2374_v58 = vsel %vm2366_vm14, %v6325_v17, inf  ;;  %v2376_v62 = vsel %vm2368_vm4, %v6325_v17, inf  ;;  %vm2362_vm14 = vcmp.ge.f32.partialorder %v1693_v52, %v6256_v5 }
 0x765   :  { %vm2321_vm13 = vmand %vm9677_vm10, %vm2313_vm7  ;;  %vm2361_vm7 = vcmp.ge.f32.partialorder %v7170_v2, %v6234_v0  ;;  %vm9682_vm10 = vcmp.gt.f32.partialorder %v9562_v41, 0.5  ;;  %v2410_v26 = vsel %vm2362_vm14, 1, %v9473_v56 }
 0x766   :  { %v2329_v4 = vsel %vm2321_vm13, %v5544_v1, inf  ;;  %v2353_v1 = vsel %vm9404_vm1, %v2331_v28, inf  ;;  %v2380_v28 = vsel %vm9404_vm1, %v2372_v60, inf  ;;  %vm2367_vm13 = vmand %vm9682_vm10, %vm2359_vm15  ;;  %v2392_v60 = vsel %vm9404_vm1, %v2376_v62, inf }
 0x767   :  { %v2347_v55 = vsel %vm9404_vm1, %v2329_v4, inf  ;;  %v2386_v4 = vsel %vm9404_vm1, %v2374_v58, inf  ;;  %vm2369_vm8 = vmand %vm9684_vm11, %vm2361_vm7  ;;  %v2404_v62 = vsel %vm2356_vm12, 1, %v9473_v56  ;;  %v2409_v29 = vsel %vm2361_vm7, 1, %v9473_v56 }
 0x768   :  { %2351 = vmin.xlane.f32.xlu0 %v2350_v24  ;;  %2348 = vmin.xlane.f32.xlu1 %v2347_v55  ;;  %v1695_v24 = vpop.f32.mrf.mxu2  ;;  %v2375_v55 = vsel %vm2367_vm13, %v6325_v17, inf  ;;  %vm2370_vm5 = vmand %vm9402_vm9, %vm2362_vm14  ;;  %vm9685_vm13 = vcmp.gt.f32.partialorder %v9565_v9, 0.5  ;;  %vm9698_vm15 = vcmp.gt.f32.partialorder %v9562_v41, 0.5 }
 0x769   :  { %2354 = vmin.xlane.f32.xlu2 %v2353_v1  ;;  %v2377_v1 = vsel %vm2369_vm8, %v6325_v17, inf  ;;  %vm2363_vm10 = vcmp.ge.f32.partialorder %v1695_v24, %v6268_v25  ;;  %v2389_v22 = vsel %vm9404_vm1, %v2375_v55, inf }
 0x76a   :  { %v2395_v58 = vsel %vm9404_vm1, %v2377_v1, inf  ;;  %vm2371_vm4 = vmand %vm9685_vm13, %vm2363_vm10  ;;  %v2406_v1 = vsel %vm2358_vm6, 1, %v9473_v56  ;;  %v2411_v2 = vsel %vm2363_vm10, 1, %v9473_v56  ;;  %vm9700_vm10 = vcmp.gt.f32.partialorder %v9557_v21, 0.5 }
 0x76b   :  { %vm9701_vm13 = vcmp.gt.f32.partialorder %v9551_v19, 0.5 }
 0x770   :  { %2384 = vmin.xlane.f32.xlu0 %v2383_v49  ;;  %2381 = vmin.xlane.f32.xlu1 %v2380_v28  ;;  %v2378_v49 = vsel %vm2370_vm5, %v6325_v17, inf  ;;  %v2379_v28 = vsel %vm2371_vm4, %v6325_v17, inf  ;;  %v2405_v17 = vsel %vm2357_vm0, 1, %v9473_v56 }
 0x771   :  { %2387 = vmin.xlane.f32.xlu2 %v2386_v4  ;;  %v2401_v4 = vsel %vm9404_vm1, %v2379_v28, inf  ;;  %v2398_v55 = vsel %vm9404_vm1, %v2378_v49, inf }
 0x778   :  { %2393 = vmin.xlane.f32.xlu0 %v2392_v60  ;;  %2390 = vmin.xlane.f32.xlu1 %v2389_v22  ;;  %v7306_v22 = vpop.f32.mrf.mxu3 }
 0x779   :  { %2396 = vmin.xlane.f32.xlu2 %v2395_v58 }
 0x780   :  { %2402 = vmin.xlane.f32.xlu0 %v2401_v4  ;;  %2399 = vmin.xlane.f32.xlu1 %v2398_v55  ;;  %v7314_v49 = vpop.f32.mrf.mxu3 }
 0x781   :  { %vm2477_vm8 = vcmp.ge.f32.partialorder %v7314_v49, %v6212_v59 }
 0x782   :  { %vm2485_vm4 = vmand %vm9701_vm13, %vm2477_vm8 }
 0x788   :  { %v7322_v55 = vpop.f32.mrf.mxu3 }
 0x791   :  { %2412 = vrot.lane.b32.xlu2 %v2404_v62, %s4937_s1 }
 0x794   :  { %2416 = vrot.lane.b32.xlu0 %v2406_v1, %s4937_s1 }
 0x799   :  { %2418 = vrot.lane.b32.xlu2 %v2407_v27, %s4937_s1  ;;  %2414 = vrot.lane.b32.xlu1 %v2405_v17, %s4937_s1  ;;  %v7330_v27 = vpop.f32.mrf.mxu3 }
 0x79c   :  { %2422 = vrot.lane.b32.xlu0 %v2409_v29, %s4937_s1 }
 0x7a1   :  { %2424 = vrot.lane.b32.xlu2 %v2410_v26, %s4937_s1  ;;  %2420 = vrot.lane.b32.xlu1 %v2408_v48, %s4937_s1 }
 0x7a9   :  { %2426 = vrot.lane.b32.xlu1 %v2411_v2, %s4937_s1 }
 0x7c2   :  { %v7308_v42 = vpop.xlane.xlu0 %2333 }
 0x7cb   :  { %v7304_v60 = vpop.xlane.xlu2 %2336 }
 0x7cf   :  { %v7318_v4 = vpop.xlane.xlu1 %2339 }
 0x7d0   :  { %9689 = vst [vmem:[#allocation73_spill] sm:$0xff] %v7318_v4 }
 0x7d3   :  { %v7310_v58 = vpop.xlane.xlu2 %2345  ;;  %v7312_v52 = vpop.xlane.xlu0 %2342 }
 0x7d4   :  { %9686 = vst [vmem:[#allocation70_spill] sm:$0xff] %v7310_v58 }
 0x7d5   :  { %9687 = vst [vmem:[#allocation71_spill] sm:$0xff] %v7312_v52 }
 0x7db   :  { %v7320_v24 = vpop.xlane.xlu0 %2351  ;;  %v7326_v1 = vpop.xlane.xlu1 %2348 }
 0x7dc   :  { %v7316_v28 = vpop.xlane.xlu2 %2354  ;;  %9690 = vst [vmem:[#allocation74_spill] sm:$0xff] %v7320_v24 }
 0x7dd   :  { %9688 = vst [vmem:[#allocation72_spill] sm:$0xff] %v7316_v28  ;;  %v7338_v28 = vpop.f32.mrf.mxu3 }
 0x7de   :  { %9692 = vst [vmem:[#allocation76_spill] sm:$0xff] %v7326_v1 }
 0x7e3   :  { %v7328_v17 = vpop.xlane.xlu0 %2384  ;;  %v7334_v48 = vpop.xlane.xlu1 %2381 }
 0x7e4   :  { %v7324_v62 = vpop.xlane.xlu2 %2387  ;;  %9693 = vst [vmem:[#allocation77_spill] sm:$0xff] %v7328_v17 }
 0x7e5   :  { %9691 = vst [vmem:[#allocation75_spill] sm:$0xff] %v7324_v62 }
 0x7eb   :  { %v7336_v26 = vpop.xlane.xlu0 %2393  ;;  %v7344_v58 = vpop.xlane.xlu1 %2390 }
 0x7ec   :  { %v7332_v29 = vpop.xlane.xlu2 %2396  ;;  %9695 = vst [vmem:[#allocation79_spill] sm:$0xff] %v7336_v26  ;;  %v7351_v26 = vpop.f32.mrf.mxu3 }
 0x7ed   :  { %9694 = vst [vmem:[#allocation78_spill] sm:$0xff] %v7332_v29 }
 0x7ee   :  { %9696 = vst [vmem:[#allocation80_spill] sm:$0xff] %v7344_v58 }
 0x7f3   :  { %v7346_v29 = vpop.xlane.xlu0 %2402  ;;  %v7354_v4 = vpop.xlane.xlu1 %2399 }
 0x7f4   :  { %v2413_v2 = vpop.permute.xlu2 %2412  ;;  %9697 = vst [vmem:[#allocation81_spill] sm:$0xff] %v7346_v29 }
 0x7f5   :  { %vm2428_vm12 = vcmp.ne.s32.totalorder %v2413_v2, 0  ;;  %9699 = vst [vmem:[#allocation82_spill] sm:$0xff] %v7354_v4  ;;  %v2493_v4 = vsel %vm2485_vm4, %v6081_v35, inf }
 0x7f6   :  { %vm2436_vm0 = vmand %vm9403_vm3, %vm2428_vm12 }
 0x7f7   :  { %v2444_v24 = vsel %vm2436_vm0, %v5594_v34, inf  ;;  %vm9702_vm0 = vmmov %vm9701_vm13 }
 0x7f8   :  { %v2452_v1 = vsel %vm9404_vm1, %v2444_v24, inf }
 0x7f9   :  { %2453 = vmin.xlane.f32.xlu0 %v2452_v1 }
 0x7fc   :  { %v2419_v52 = vpop.permute.xlu2 %2418 }
 0x7fd   :  { %vm2431_vm6 = vcmp.ne.s32.totalorder %v2419_v52, 0 }
 0x7fe   :  { %vm2439_vm2 = vmand %vm9698_vm15, %vm2431_vm6  ;;  %vm2480_vm15 = vcmp.ge.f32.partialorder %v7338_v28, %v6214_v18 }
 0x7ff   :  { %v2447_v2 = vsel %vm2439_vm2, %v5594_v34, inf }
 0x800   :  { %v2461_v62 = vsel %vm9404_vm1, %v2447_v2, inf }
 0x801   :  { %2462 = vmin.xlane.f32.xlu0 %v2461_v62 }
 0x804   :  { %v2425_v24 = vpop.permute.xlu2 %2424 }
 0x805   :  { %vm2434_vm7 = vcmp.ne.s32.totalorder %v2425_v24, 0  ;;  %v7370_v24 = vpop.f32.mrf.mxu3 }
 0x806   :  { %vm2442_vm11 = vmand %vm9402_vm9, %vm2434_vm7  ;;  %v2417_v52 = vpop.permute.xlu0 %2416  ;;  %vm9703_vm7 = vcmp.gt.f32.partialorder %v9559_v10, 0.5 }
 0x807   :  { %vm2430_vm14 = vcmp.ne.s32.totalorder %v2417_v52, 0  ;;  %v2450_v1 = vsel %vm2442_vm11, %v5594_v34, inf }
 0x808   :  { %vm2438_vm5 = vmand %vm9700_vm10, %vm2430_vm14  ;;  %v2470_v2 = vsel %vm9404_vm1, %v2450_v1, inf  ;;  %vm2476_vm14 = vcmp.ge.f32.partialorder %v7306_v22, %v6192_v15  ;;  %vm9704_vm10 = vcmp.gt.f32.partialorder %v9552_v45, 0.5 }
 0x809   :  { %2471 = vmin.xlane.f32.xlu0 %v2470_v2  ;;  %v2446_v62 = vsel %vm2438_vm5, %v5594_v34, inf  ;;  %vm2488_vm5 = vmand %vm9704_vm10, %vm2480_vm15  ;;  %v2524_v28 = vsel %vm2476_vm14, 1, %v9473_v56 }
 0x80a   :  { %v2458_v52 = vsel %vm9404_vm1, %v2446_v62, inf  ;;  %v2503_v62 = vsel %vm9404_vm1, %v2493_v4, inf  ;;  %vm2484_vm13 = vmand %vm9403_vm3, %vm2476_vm14  ;;  %v2496_v4 = vsel %vm2488_vm5, %v6081_v35, inf }
 0x80b   :  { %2459 = vmin.xlane.f32.xlu1 %v2458_v52  ;;  %v2415_v29 = vpop.permute.xlu1 %2414 }
 0x80c   :  { %vm2429_vm12 = vcmp.ne.s32.totalorder %v2415_v29, 0 }
 0x80d   :  { %vm2437_vm6 = vmand %vm9702_vm0, %vm2429_vm12 }
 0x80e   :  { %v2423_v1 = vpop.permute.xlu0 %2422  ;;  %v2445_v2 = vsel %vm2437_vm6, %v5594_v34, inf  ;;  %vm9705_vm12 = vmmov %vm9704_vm10  ;;  %vm9707_vm10 = vcmp.gt.f32.partialorder %v9562_v41, 0.5 }
 0x80f   :  { %vm2433_vm2 = vcmp.ne.s32.totalorder %v2423_v1, 0  ;;  %v2455_v58 = vsel %vm9404_vm1, %v2445_v2, inf }
 0x810   :  { %vm2441_vm11 = vmand %vm9703_vm7, %vm2433_vm2  ;;  %2456 = vmin.xlane.f32.xlu2 %v2455_v58  ;;  %v1724_v58 = vpop.f32.mrf.mxu3  ;;  %vm2479_vm2 = vcmp.ge.f32.partialorder %v7330_v27, %v6254_v46  ;;  %vm9706_vm7 = vcmp.gt.f32.partialorder %v9565_v9, 0.5 }
 0x811   :  { %2504 = vmin.xlane.f32.xlu0 %v2503_v62  ;;  %v2449_v29 = vsel %vm2441_vm11, %v5594_v34, inf  ;;  %v2492_v62 = vsel %vm2484_vm13, %v6081_v35, inf  ;;  %vm2483_vm6 = vcmp.ge.f32.partialorder %v1724_v58, %v6268_v25  ;;  %vm2487_vm5 = vmand %vm9707_vm10, %vm2479_vm2  ;;  %vm2482_vm10 = vcmp.ge.f32.partialorder %v7370_v24, %v6256_v5 }
 0x812   :  { %v2467_v52 = vsel %vm9404_vm1, %v2449_v29, inf  ;;  %vm2491_vm11 = vmand %vm9706_vm7, %vm2483_vm6  ;;  %v2530_v22 = vsel %vm2482_vm10, 1, %v9473_v56 }
 0x813   :  { %2468 = vmin.xlane.f32.xlu1 %v2467_v52  ;;  %v2421_v1 = vpop.permute.xlu1 %2420  ;;  %v2512_v52 = vsel %vm9404_vm1, %v2496_v4, inf  ;;  %v2499_v4 = vsel %vm2491_vm11, %v6081_v35, inf }
 0x814   :  { %vm2432_vm4 = vcmp.ne.s32.totalorder %v2421_v1, 0  ;;  %v2500_v1 = vsel %vm9404_vm1, %v2492_v62, inf  ;;  %v2495_v62 = vsel %vm2487_vm5, %v6081_v35, inf  ;;  %vm2490_vm5 = vmand %vm9402_vm9, %vm2482_vm10 }
 0x815   :  { %vm2440_vm0 = vmand %vm9705_vm12, %vm2432_vm4 }
 0x816   :  { %v2448_v2 = vsel %vm2440_vm0, %v5594_v34, inf  ;;  %vm9708_vm4 = vmmov %vm9706_vm7  ;;  %vm2478_vm0 = vcmp.ge.f32.partialorder %v7322_v55, %v6231_v38  ;;  %vm9709_vm7 = vcmp.gt.f32.partialorder %v9557_v21, 0.5  ;;  %v2527_v55 = vsel %vm2479_vm2, 1, %v9473_v56 }
 0x817   :  { %v2464_v29 = vsel %vm9404_vm1, %v2448_v2, inf  ;;  %vm2486_vm11 = vmand %vm9709_vm7, %vm2478_vm0 }
 0x818   :  { %2465 = vmin.xlane.f32.xlu2 %v2464_v29 }
 0x819   :  { %2513 = vmin.xlane.f32.xlu0 %v2512_v52  ;;  %v2521_v52 = vsel %vm9404_vm1, %v2499_v4, inf }
 0x81b   :  { %2501 = vmin.xlane.f32.xlu1 %v2500_v1  ;;  %v2427_v17 = vpop.permute.xlu1 %2426  ;;  %v2498_v1 = vsel %vm2490_vm5, %v6081_v35, inf  ;;  %vm9727_vm5 = vcmp.gt.f32.partialorder %v9551_v19, 0.5 }
 0x81c   :  { %vm2435_vm13 = vcmp.ne.s32.totalorder %v2427_v17, 0  ;;  %v2509_v17 = vsel %vm9404_vm1, %v2495_v62, inf }
 0x81d   :  { %vm2443_vm12 = vmand %vm9708_vm4, %vm2435_vm13  ;;  %vm2481_vm13 = vcmp.ge.f32.partialorder %v7351_v26, %v6234_v0  ;;  %vm9710_vm4 = vcmp.gt.f32.partialorder %v9559_v10, 0.5 }
 0x81e   :  { %v2451_v2 = vsel %vm2443_vm12, %v5594_v34, inf  ;;  %v2494_v34 = vsel %vm2486_vm11, %v6081_v35, inf  ;;  %vm2489_vm12 = vmand %vm9710_vm4, %vm2481_vm13  ;;  %v2529_v49 = vsel %vm2481_vm13, 1, %v9473_v56 }
 0x81f   :  { %v2473_v29 = vsel %vm9404_vm1, %v2451_v2, inf  ;;  %v2506_v4 = vsel %vm9404_vm1, %v2494_v34, inf  ;;  %v2518_v2 = vsel %vm9404_vm1, %v2498_v1, inf  ;;  %v2497_v62 = vsel %vm2489_vm12, %v6081_v35, inf }
 0x820   :  { %2474 = vmin.xlane.f32.xlu2 %v2473_v29  ;;  %v2515_v29 = vsel %vm9404_vm1, %v2497_v62, inf  ;;  %v2525_v35 = vsel %vm2477_vm8, 1, %v9473_v56  ;;  %v2531_v34 = vsel %vm2483_vm6, 1, %v9473_v56  ;;  %vm9728_vm12 = vcmp.gt.f32.partialorder %v9552_v45, 0.5 }
 0x821   :  { %2522 = vmin.xlane.f32.xlu0 %v2521_v52  ;;  %v2526_v52 = vsel %vm2478_vm0, 1, %v9473_v56 }
 0x823   :  { %2510 = vmin.xlane.f32.xlu1 %v2509_v17  ;;  %v2528_v17 = vsel %vm2480_vm15, 1, %v9473_v56  ;;  %vm9724_vm15 = vmmov %vm9709_vm7  ;;  %vm9726_vm7 = vcmp.gt.f32.partialorder %v9562_v41, 0.5 }
 0x828   :  { %2507 = vmin.xlane.f32.xlu2 %v2506_v4 }
 0x82b   :  { %2519 = vmin.xlane.f32.xlu1 %v2518_v2  ;;  %v7499_v2 = vpop.f32.mrf.mxu0 }
 0x830   :  { %2516 = vmin.xlane.f32.xlu2 %v2515_v29 }
 0x833   :  { %v7507_v24 = vpop.f32.mrf.mxu0 }
 0x835   :  { %2536 = vrot.lane.b32.xlu0 %v2526_v52, %s4937_s1 }
 0x83d   :  { %2540 = vrot.lane.b32.xlu0 %v2528_v17, %s4937_s1 }
 0x844   :  { %2534 = vrot.lane.b32.xlu1 %v2525_v35, %s4937_s1 }
 0x845   :  { %2546 = vrot.lane.b32.xlu0 %v2531_v34, %s4937_s1  ;;  %v7515_v34 = vpop.f32.mrf.mxu0 }
 0x848   :  { %2532 = vrot.lane.b32.xlu2 %v2524_v28, %s4937_s1 }
 0x84c   :  { %2542 = vrot.lane.b32.xlu1 %v2529_v49, %s4937_s1 }
 0x850   :  { %2538 = vrot.lane.b32.xlu2 %v2527_v55, %s4937_s1 }
 0x858   :  { %2544 = vrot.lane.b32.xlu2 %v2530_v22, %s4937_s1  ;;  %v7523_v22 = vpop.f32.mrf.mxu0 }
 0x86c   :  { %v7491_v58 = vpop.xlane.xlu0 %2453 }
 0x874   :  { %v7493_v26 = vpop.xlane.xlu0 %2462 }
 0x875   :  { %9711 = vst [vmem:[#allocation83_spill] sm:$0xff] %v7493_v26 }
 0x87c   :  { %v7495_v1 = vpop.xlane.xlu0 %2471 }
 0x87d   :  { %9712 = vst [vmem:[#allocation84_spill] sm:$0xff] %v7495_v1 }
 0x87e   :  { %v7501_v27 = vpop.xlane.xlu1 %2459 }
 0x87f   :  { %9714 = vst [vmem:[#allocation86_spill] sm:$0xff] %v7501_v27 }
 0x883   :  { %v7497_v4 = vpop.xlane.xlu2 %2456 }
 0x884   :  { %9713 = vst [vmem:[#allocation85_spill] sm:$0xff] %v7497_v4  ;;  %v7503_v62 = vpop.xlane.xlu0 %2504 }
 0x885   :  { %9715 = vst [vmem:[#allocation87_spill] sm:$0xff] %v7503_v62 }
 0x886   :  { %v7509_v52 = vpop.xlane.xlu1 %2468 }
 0x887   :  { %9717 = vst [vmem:[#allocation89_spill] sm:$0xff] %v7509_v52 }
 0x88b   :  { %v7505_v29 = vpop.xlane.xlu2 %2465 }
 0x88c   :  { %9716 = vst [vmem:[#allocation88_spill] sm:$0xff] %v7505_v29  ;;  %v7513_v35 = vpop.xlane.xlu0 %2513 }
 0x88d   :  { %9719 = vst [vmem:[#allocation91_spill] sm:$0xff] %v7513_v35 }
 0x88e   :  { %v7517_v28 = vpop.xlane.xlu1 %2501 }
 0x893   :  { %v7511_v17 = vpop.xlane.xlu2 %2474 }
 0x894   :  { %9718 = vst [vmem:[#allocation90_spill] sm:$0xff] %v7511_v17  ;;  %v7521_v55 = vpop.xlane.xlu0 %2522 }
 0x895   :  { %9721 = vst [vmem:[#allocation93_spill] sm:$0xff] %v7521_v55 }
 0x896   :  { %v7527_v29 = vpop.xlane.xlu1 %2510 }
 0x897   :  { %9723 = vst [vmem:[#allocation95_spill] sm:$0xff] %v7527_v29 }
 0x89b   :  { %v7519_v49 = vpop.xlane.xlu2 %2507 }
 0x89c   :  { %9720 = vst [vmem:[#allocation92_spill] sm:$0xff] %v7519_v49  ;;  %v7533_v49 = vpop.f32.mrf.mxu0 }
 0x89e   :  { %v7537_v55 = vpop.xlane.xlu1 %2519 }
 0x89f   :  { %9725 = vst [vmem:[#allocation96_spill] sm:$0xff] %v7537_v55 }
 0x8a3   :  { %v7525_v1 = vpop.xlane.xlu2 %2516 }
 0x8a4   :  { %9722 = vst [vmem:[#allocation94_spill] sm:$0xff] %v7525_v1 }
 0x8a7   :  { %v2537_v26 = vpop.permute.xlu0 %2536 }
 0x8a8   :  { %vm2550_vm8 = vcmp.ne.s32.totalorder %v2537_v26, 0 }
 0x8a9   :  { %vm2558_vm14 = vmand %vm9724_vm15, %vm2550_vm8 }
 0x8aa   :  { %v2566_v17 = vsel %vm2558_vm14, %v5748_v37, inf }
 0x8ab   :  { %v2578_v52 = vsel %vm9404_vm1, %v2566_v17, inf  ;;  %v2533_v35 = vpop.permute.xlu2 %2532 }
 0x8ac   :  { %2579 = vmin.xlane.f32.xlu0 %v2578_v52  ;;  %vm2548_vm6 = vcmp.ne.s32.totalorder %v2533_v35, 0  ;;  %v7544_v35 = vpop.f32.mrf.mxu0 }
 0x8ad   :  { %vm2556_vm2 = vmand %vm9403_vm3, %vm2548_vm6  ;;  %vm2597_vm6 = vcmp.ge.f32.partialorder %v7507_v24, %v6212_v59 }
 0x8ae   :  { %v2564_v1 = vsel %vm2556_vm2, %v5748_v37, inf }
 0x8af   :  { %v2572_v26 = vsel %vm9404_vm1, %v2564_v1, inf  ;;  %v2541_v27 = vpop.permute.xlu0 %2540 }
 0x8b0   :  { %2573 = vmin.xlane.f32.xlu1 %v2572_v26  ;;  %vm2552_vm4 = vcmp.ne.s32.totalorder %v2541_v27, 0 }
 0x8b1   :  { %vm7553_vm8 = vmand %vm9728_vm12, %vm2552_vm4  ;;  %vm9733_vm12 = vcmp.gt.f32.partialorder %v9565_v9, 0.5 }
 0x8b3   :  { %v2539_v29 = vpop.permute.xlu2 %2538 }
 0x8b4   :  { %vm2551_vm0 = vcmp.ne.s32.totalorder %v2539_v29, 0 }
 0x8b5   :  { %vm2559_vm11 = vmand %vm9726_vm7, %vm2551_vm0  ;;  %vm2596_vm0 = vcmp.ge.f32.partialorder %v7499_v2, %v6192_v15  ;;  %vm9731_vm7 = vcmp.gt.f32.partialorder %v9559_v10, 0.5 }
 0x8b6   :  { %v2535_v52 = vpop.permute.xlu1 %2534  ;;  %v2567_v17 = vsel %vm2559_vm11, %v5748_v37, inf  ;;  %vm2604_vm4 = vmand %vm9403_vm3, %vm2596_vm0 }
 0x8b7   :  { %vm2549_vm10 = vcmp.ne.s32.totalorder %v2535_v52, 0  ;;  %v2581_v62 = vsel %vm9404_vm1, %v2567_v17, inf  ;;  %v2547_v27 = vpop.permute.xlu0 %2546 }
 0x8b8   :  { %vm2557_vm13 = vmand %vm9727_vm5, %vm2549_vm10  ;;  %2582 = vmin.xlane.f32.xlu1 %v2581_v62 }
 0x8b9   :  { %v2565_v1 = vsel %vm2557_vm13, %v5748_v37, inf  ;;  %vm9732_vm10 = vmmov %vm9727_vm5  ;;  %vm2555_vm13 = vcmp.ne.s32.totalorder %v2547_v27, 0  ;;  %v2612_v27 = vsel %vm2604_vm4, %v6092_v39, inf }
 0x8ba   :  { %v2575_v29 = vsel %vm9404_vm1, %v2565_v1, inf  ;;  %v2568_v1 = vsel %vm7553_vm8, %v5748_v37, inf  ;;  %vm2605_vm5 = vmand %vm9732_vm10, %vm2597_vm6  ;;  %vm9735_vm10 = vcmp.gt.f32.partialorder %v9557_v21, 0.5 }
 0x8bb   :  { %v2545_v26 = vpop.permute.xlu2 %2544  ;;  %2576 = vmin.xlane.f32.xlu2 %v2575_v29  ;;  %v1751_v29 = vpop.f32.mrf.mxu0  ;;  %v2584_v55 = vsel %vm9404_vm1, %v2568_v1, inf  ;;  %vm2563_vm8 = vmand %vm9733_vm12, %vm2555_vm13  ;;  %vm9736_vm13 = vcmp.gt.f32.partialorder %v9562_v41, 0.5 }
 0x8bc   :  { %vm2554_vm15 = vcmp.ne.s32.totalorder %v2545_v26, 0  ;;  %v2571_v1 = vsel %vm2563_vm8, %v5748_v37, inf  ;;  %vm2601_vm8 = vcmp.ge.f32.partialorder %v7544_v35, %v6234_v0 }
 0x8bd   :  { %vm2562_vm14 = vmand %vm9402_vm9, %vm2554_vm15  ;;  %vm2600_vm15 = vcmp.ge.f32.partialorder %v7533_v49, %v6214_v18 }
 0x8be   :  { %v2543_v62 = vpop.permute.xlu1 %2542  ;;  %v2570_v52 = vsel %vm2562_vm14, %v5748_v37, inf  ;;  %vm2598_vm14 = vcmp.ge.f32.partialorder %v7515_v34, %v6231_v38  ;;  %v2648_v2 = vsel %vm2600_vm15, 1, %v9473_v56  ;;  %v2649_v34 = vsel %vm2601_vm8, 1, %v9473_v56 }
 0x8bf   :  { %vm2553_vm2 = vcmp.ne.s32.totalorder %v2543_v62, 0  ;;  %v2590_v17 = vsel %vm9404_vm1, %v2570_v52, inf  ;;  %v2613_v52 = vsel %vm2605_vm5, %v6092_v39, inf  ;;  %vm2606_vm5 = vmand %vm9735_vm10, %vm2598_vm14  ;;  %vm9737_vm10 = vcmp.gt.f32.partialorder %v9565_v9, 0.5 }
 0x8c0   :  { %vm2561_vm11 = vmand %vm9731_vm7, %vm2553_vm2  ;;  %2591 = vmin.xlane.f32.xlu1 %v2590_v17  ;;  %v2623_v17 = vsel %vm9404_vm1, %v2613_v52, inf  ;;  %vm2599_vm2 = vcmp.ge.f32.partialorder %v7523_v22, %v6254_v46  ;;  %vm9734_vm7 = vcmp.gt.f32.partialorder %v9552_v45, 0.5  ;;  %v2614_v52 = vsel %vm2606_vm5, %v6092_v39, inf }
 0x8c1   :  { %v2569_v26 = vsel %vm2561_vm11, %v5748_v37, inf  ;;  %vm2608_vm11 = vmand %vm9734_vm7, %vm2600_vm15  ;;  %vm2602_vm7 = vcmp.ge.f32.partialorder %v1751_v29, %v6256_v5 }
 0x8c2   :  { %v2587_v62 = vsel %vm9404_vm1, %v2569_v26, inf  ;;  %v2593_v26 = vsel %vm9404_vm1, %v2571_v1, inf  ;;  %vm2607_vm4 = vmand %vm9736_vm13, %vm2599_vm2  ;;  %v2626_v1 = vsel %vm9404_vm1, %v2614_v52, inf  ;;  %v2650_v24 = vsel %vm2602_vm7, 1, %v9473_v56 }
 0x8c3   :  { %2585 = vmin.xlane.f32.xlu2 %v2584_v55  ;;  %2588 = vmin.xlane.f32.xlu0 %v2587_v62  ;;  %v2620_v55 = vsel %vm9404_vm1, %v2612_v27, inf  ;;  %v1753_v37 = vpop.f32.mrf.mxu0  ;;  %v2616_v62 = vsel %vm2608_vm11, %v6092_v39, inf  ;;  %v2615_v27 = vsel %vm2607_vm4, %v6092_v39, inf  ;;  %vm9738_vm11 = vcmp.gt.f32.partialorder %v9559_v10, 0.5  ;;  %vm2610_vm4 = vmand %vm9402_vm9, %vm2602_vm7 }
 0x8c4   :  { %vm2603_vm12 = vcmp.ge.f32.partialorder %v1753_v37, %v6268_v25  ;;  %vm2609_vm5 = vmand %vm9738_vm11, %vm2601_vm8  ;;  %v2618_v52 = vsel %vm2610_vm4, %v6092_v39, inf  ;;  %vm9740_vm7 = vcmp.gt.f32.partialorder %v9557_v21, 0.5  ;;  %vm9742_vm4 = vcmp.gt.f32.partialorder %v9562_v41, 0.5 }
 0x8c5   :  { %vm2611_vm13 = vmand %vm9737_vm10, %vm2603_vm12  ;;  %v2638_v4 = vsel %vm9404_vm1, %v2618_v52, inf  ;;  %v2651_v22 = vsel %vm2603_vm12, 1, %v9473_v56 }
 0x8c8   :  { %2624 = vmin.xlane.f32.xlu1 %v2623_v17  ;;  %v2632_v17 = vsel %vm9404_vm1, %v2616_v62, inf  ;;  %v2617_v62 = vsel %vm2609_vm5, %v6092_v39, inf }
 0x8cb   :  { %2594 = vmin.xlane.f32.xlu2 %v2593_v26  ;;  %2621 = vmin.xlane.f32.xlu0 %v2620_v55  ;;  %v2629_v26 = vsel %vm9404_vm1, %v2615_v27, inf  ;;  %v2619_v55 = vsel %vm2611_vm13, %v6092_v39, inf  ;;  %v2646_v39 = vsel %vm2598_vm14, 1, %v9473_v56  ;;  %vm9739_vm14 = vcmp.gt.f32.partialorder %v9551_v19, 0.5 }
 0x8cc   :  { %v2641_v27 = vsel %vm9404_vm1, %v2619_v55, inf  ;;  %vm9741_vm13 = vcmp.gt.f32.partialorder %v9552_v45, 0.5 }
 0x8d0   :  { %2633 = vmin.xlane.f32.xlu1 %v2632_v17  ;;  %v2635_v17 = vsel %vm9404_vm1, %v2617_v62, inf }
 0x8d3   :  { %2627 = vmin.xlane.f32.xlu2 %v2626_v1  ;;  %2630 = vmin.xlane.f32.xlu0 %v2629_v26  ;;  %v2645_v1 = vsel %vm2597_vm6, 1, %v9473_v56  ;;  %v2644_v26 = vsel %vm2596_vm0, 1, %v9473_v56 }
 0x8d8   :  { %2642 = vmin.xlane.f32.xlu1 %v2641_v27 }
 0x8db   :  { %2636 = vmin.xlane.f32.xlu2 %v2635_v17  ;;  %2639 = vmin.xlane.f32.xlu0 %v2638_v4  ;;  %v2647_v4 = vsel %vm2599_vm2, 1, %v9473_v56 }
 0x8ef   :  { %2654 = vrot.lane.b32.xlu0 %v2645_v1, %s4937_s1 }
 0x8f1   :  { %2656 = vrot.lane.b32.xlu1 %v2646_v39, %s4937_s1 }
 0x8f3   :  { %2652 = vrot.lane.b32.xlu2 %v2644_v26, %s4937_s1 }
 0x8f7   :  { %2658 = vrot.lane.b32.xlu0 %v2647_v4, %s4937_s1 }
 0x8f9   :  { %2664 = vrot.lane.b32.xlu1 %v2650_v24, %s4937_s1 }
 0x8fb   :  { %2660 = vrot.lane.b32.xlu2 %v2648_v2, %s4937_s1 }
 0x8ff   :  { %2662 = vrot.lane.b32.xlu0 %v2649_v34, %s4937_s1  ;;  %v2884_v34 = vld [vmem:[%s9292_s4 + $0x8] sm:$0xff] }
 0x900   :  { %2927 = vmatpush.msra.mxu1 %v2884_v34 }
 0x903   :  { %2666 = vrot.lane.b32.xlu2 %v2651_v22, %s4937_s1 }
 0x91f   :  { %v7683_v49 = vpop.xlane.xlu0 %2579 }
 0x923   :  { %v7679_v29 = vpop.xlane.xlu1 %2573 }
 0x92b   :  { %v7685_v62 = vpop.xlane.xlu1 %2582 }
 0x92e   :  { %v7681_v55 = vpop.xlane.xlu2 %2576 }
 0x933   :  { %v7691_v27 = vpop.xlane.xlu1 %2591 }
 0x936   :  { %v7687_v52 = vpop.xlane.xlu2 %2585  ;;  %v7689_v35 = vpop.xlane.xlu0 %2588 }
 0x93b   :  { %v7699_v39 = vpop.xlane.xlu1 %2624 }
 0x93e   :  { %v7693_v17 = vpop.xlane.xlu2 %2594  ;;  %v7695_v37 = vpop.xlane.xlu0 %2621 }
 0x943   :  { %v7705_v24 = vpop.xlane.xlu1 %2633 }
 0x946   :  { %v7697_v1 = vpop.xlane.xlu2 %2627  ;;  %v7703_v4 = vpop.xlane.xlu0 %2630 }
 0x94b   :  { %v7716_v5 = vpop.xlane.xlu1 %2642 }
 0x94e   :  { %v7701_v26 = vpop.xlane.xlu2 %2636  ;;  %v7712_v22 = vpop.xlane.xlu0 %2639 }
 0x956   :  { %v2653_v2 = vpop.permute.xlu2 %2652 }
 0x957   :  { %vm2668_vm6 = vcmp.ne.s32.totalorder %v2653_v2, 0 }
 0x958   :  { %vm2676_vm0 = vmand %vm9403_vm3, %vm2668_vm6  ;;  %vm2833_vm3 = vcmask 113664  }
 0x959   :  { %v2684_v56 = vsel %vm2676_vm0, %v5796_v61, inf }
 0x95a   :  { %v2692_v25 = vsel %vm9404_vm1, %v2684_v56, inf }
 0x95b   :  { %2693 = vmin.xlane.f32.xlu0 %v2692_v25 }
 0x95e   :  { %v2661_v0 = vpop.permute.xlu2 %2660 }
 0x95f   :  { %vm2672_vm12 = vcmp.ne.s32.totalorder %v2661_v0, 0 }
 0x960   :  { %vm2680_vm11 = vmand %vm9741_vm13, %vm2672_vm12  ;;  %vm2716_vm13 = vcmask 7168  }
 0x961   :  { %v2655_v18 = vpop.permute.xlu0 %2654  ;;  %v2688_v0 = vsel %vm2680_vm11, %v5796_v61, inf  ;;  %vm9427_vm11 = vcmask 15360  }
 0x962   :  { %vm2669_vm15 = vcmp.ne.s32.totalorder %v2655_v18, 0 }
 0x963   :  { %vm2677_vm2 = vmand %vm9739_vm14, %vm2669_vm15  ;;  %v2657_v2 = vpop.permute.xlu1 %2656  ;;  %vm9743_vm14 = vcmp.gt.f32.partialorder %v9565_v9, 0.5 }
 0x964   :  { %vm2670_vm8 = vcmp.ne.s32.totalorder %v2657_v2, 0  ;;  %v2685_v34 = vsel %vm2677_vm2, %v5796_v61, inf }
 0x965   :  { %vm2678_vm10 = vmand %vm9740_vm7, %vm2670_vm8  ;;  %v2695_v46 = vsel %vm9404_vm1, %v2685_v34, inf  ;;  %v2704_v34 = vsel %vm9404_vm1, %v2688_v0, inf  ;;  %vm9744_vm7 = vcmp.gt.f32.partialorder %v9559_v10, 0.5 }
 0x966   :  { %2696 = vmin.xlane.f32.xlu1 %v2695_v46  ;;  %v2686_v56 = vsel %vm2678_vm10, %v5796_v61, inf  ;;  %v2667_v25 = vpop.permute.xlu2 %2666 }
 0x967   :  { %v2698_v18 = vsel %vm9404_vm1, %v2686_v56, inf  ;;  %vm2675_vm0 = vcmp.ne.s32.totalorder %v2667_v25, 0 }
 0x968   :  { %2699 = vmin.xlane.f32.xlu2 %v2698_v18  ;;  %vm2683_vm2 = vmand %vm9743_vm14, %vm2675_vm0  ;;  %vm9409_vm0 = vcmask 56320   ;;  %vm9423_vm14 = vcmask 64512  }
 0x969   :  { %v2659_v38 = vpop.permute.xlu0 %2658  ;;  %v2691_v56 = vsel %vm2683_vm2, %v5796_v61, inf  ;;  %vm2788_vm2 = vcmask 72704  }
 0x96a   :  { %vm2671_vm5 = vcmp.ne.s32.totalorder %v2659_v38, 0  ;;  %v2713_v0 = vsel %vm9404_vm1, %v2691_v56, inf }
 0x96b   :  { %vm2679_vm6 = vmand %vm9742_vm4, %vm2671_vm5  ;;  %v2665_v2 = vpop.permute.xlu1 %2664  ;;  %vm9426_vm5 = vcmask 23552   ;;  %vm9411_vm4 = vcmask 39936  }
 0x96c   :  { %v2687_v46 = vsel %vm2679_vm6, %v5796_v61, inf  ;;  %vm2674_vm15 = vcmp.ne.s32.totalorder %v2665_v2, 0  ;;  %vm9425_vm6 = vcmask 31744  }
 0x96d   :  { %v2701_v45 = vsel %vm9404_vm1, %v2687_v46, inf  ;;  %vm2682_vm12 = vmand %vm9402_vm9, %vm2674_vm15  ;;  %v2883_v46 = vld [vmem:[%s9292_s4] sm:$0xff]  ;;  %vm9424_vm15 = vcmask 48128   ;;  %vm2842_vm9 = vcmask 121856  }
 0x96e   :  { %2705 = vmin.xlane.f32.xlu1 %v2704_v34  ;;  %2702 = vmin.xlane.f32.xlu0 %v2701_v45  ;;  %v2690_v18 = vsel %vm2682_vm12, %v5796_v61, inf  ;;  %vm2797_vm12 = vcmask 80896  }
 0x96f   :  { %v2710_v2 = vsel %vm9404_vm1, %v2690_v18, inf  ;;  %2928 = vmatpush.msra.mxu1 %v2883_v46  ;;  %v9748_v46 = vld [vmem:[#allocation85_spill] sm:$0xff] }
 0x971   :  { %v2663_v38 = vpop.permute.xlu0 %2662 }
 0x972   :  { %vm2673_vm8 = vcmp.ne.s32.totalorder %v2663_v38, 0 }
 0x973   :  { %vm2681_vm10 = vmand %vm9744_vm7, %vm2673_vm8  ;;  %vm2806_vm8 = vcmask 89088   ;;  %vm2815_vm7 = vcmask 97280  }
 0x974   :  { %v2689_v25 = vsel %vm2681_vm10, %v5796_v61, inf  ;;  %v2717_v61 = vsel %vm2716_vm13, %v6322_v7, %v6524_v53  ;;  %vm9407_vm10 = vcmask 105472  }
 0x975   :  { %v2707_v45 = vsel %vm9404_vm1, %v2689_v25, inf  ;;  %v2726_v34 = vsel %vm9427_vm11, %v2717_v61, %v6546_v43  ;;  %vm9405_vm1 = vcmp.gt.f32.partialorder %v9544_v12, 0.5  ;;  %v9749_v61 = vld [vmem:[#allocation6_spill] sm:$0xff] }
 0x976   :  { %2714 = vmin.xlane.f32.xlu1 %v2713_v0  ;;  %2708 = vmin.xlane.f32.xlu2 %v2707_v45  ;;  %v2735_v38 = vsel %vm9426_vm5, %v2726_v34, %v6720_v36  ;;  %v9750_v34 = vld [vmem:[#allocation47_spill] sm:$0xff] }
 0x977   :  { %2711 = vmin.xlane.f32.xlu0 %v2710_v2  ;;  %v2744_v56 = vsel %vm9425_vm6, %v2735_v38, %v6746_v40  ;;  %v2718_v40 = vsel %vm2716_vm13, %v6327_v14, %v6526_v30  ;;  %v9747_v2 = vld [vmem:[#allocation52_spill] sm:$0xff] }
 0x978   :  { %v2753_v18 = vsel %vm9411_vm4, %v2744_v56, %v6917_v51  ;;  %v9751_v38 = vld [vmem:[#allocation64_spill] sm:$0xff]  ;;  %v9752_v56 = vld [vmem:[#allocation87_spill] sm:$0xff] }
 0x979   :  { %v2762_v7 = vsel %vm9424_vm15, %v2753_v18, %v6941_v13  ;;  %v2727_v13 = vsel %vm9427_vm11, %v2718_v40, %v6544_v8 }
 0x97a   :  { %v2771_v53 = vsel %vm9409_vm0, %v2762_v7, %v7104_v57  ;;  %v9753_v7 = vld [vmem:[#allocation22_spill] sm:$0xff] }
 0x97b   :  { %v2780_v43 = vsel %vm9423_vm14, %v2771_v53, %v7124_v11  ;;  %v2736_v11 = vsel %vm9426_vm5, %v2727_v13, %v6718_v6  ;;  %v9754_v53 = vld [vmem:[#allocation25_spill] sm:$0xff]  ;;  %v9756_v13 = vld [vmem:[#allocation44_spill] sm:$0xff] }
 0x97c   :  { %v2789_v36 = vsel %vm2788_vm2, %v2780_v43, %v7308_v42  ;;  %v2745_v14 = vsel %vm9425_vm6, %v2736_v11, %v6736_v33  ;;  %v2719_v33 = vsel %vm2716_vm13, %v6318_v31, %v6530_v32  ;;  %v9745_v32 = vld [vmem:[#allocation77_spill] sm:$0xff]  ;;  %v2720_v43 = vsel %vm2716_vm13, %v9754_v53, %v9753_v7  ;;  %v9757_v11 = vld [vmem:[#allocation75_spill] sm:$0xff] }
 0x97d   :  { %v2798_v51 = vsel %vm2797_vm12, %v2789_v36, %v7334_v48  ;;  %v2754_v8 = vsel %vm9411_vm4, %v2745_v14, %v6919_v50  ;;  %v9755_v36 = vld [vmem:[#allocation73_spill] sm:$0xff]  ;;  %v9773_v7 = vld [vmem:[#allocation71_spill] sm:$0xff] }
 0x97e   :  { %v2807_v57 = vsel %vm2806_vm8, %v2798_v51, %v7491_v58  ;;  %v2763_v6 = vsel %vm9424_vm15, %v2754_v8, %v6937_v54  ;;  %v9758_v8 = vld [vmem:[#allocation17_spill] sm:$0xff] }
 0x97f   :  { %v2816_v42 = vsel %vm2815_vm7, %v2807_v57, %v7517_v28  ;;  %v2729_v57 = vsel %vm9427_vm11, %v2720_v43, %v9756_v13  ;;  %v9774_v43 = vld [vmem:[#allocation48_spill] sm:$0xff] }
 0x980   :  { %v2825_v30 = vsel %vm9407_vm10, %v2816_v42, %v7679_v29  ;;  %v2772_v29 = vsel %vm9409_vm0, %v2763_v6, %v7106_v47  ;;  %v9760_v6 = vld [vmem:[#allocation86_spill] sm:$0xff] }
 0x981   :  { %v2834_v48 = vsel %vm2833_vm3, %v2825_v30, %v7695_v37  ;;  %v2728_v37 = vsel %vm9427_vm11, %v2719_v33, %v6548_v3  ;;  %v2781_v25 = vsel %vm9423_vm14, %v2772_v29, %v7128_v63  ;;  %v9761_v33 = vld [vmem:[#allocation58_spill] sm:$0xff] }
 0x982   :  { %v2737_v54 = vsel %vm9426_vm5, %v2728_v37, %v6730_v23  ;;  %v2790_v45 = vsel %vm2788_vm2, %v2781_v25, %v7304_v60 }
 0x983   :  { %v2746_v31 = vsel %vm9425_vm6, %v2737_v54, %v6742_v16  ;;  %v2799_v47 = vsel %vm2797_vm12, %v2790_v45, %v9745_v32  ;;  %v9764_v32 = vld [vmem:[#allocation4_spill] sm:$0xff] }
 0x984   :  { %v2755_v3 = vsel %vm9411_vm4, %v2746_v31, %v9747_v2  ;;  %v2808_v63 = vsel %vm2806_vm8, %v2799_v47, %v9748_v46  ;;  %v9766_v46 = vld [vmem:[#allocation41_spill] sm:$0xff] }
 0x985   :  { %v2764_v23 = vsel %vm9424_vm15, %v2755_v3, %v9749_v61  ;;  %v2817_v18 = vsel %vm2815_vm7, %v2808_v63, %v9752_v56  ;;  %v9765_v3 = vld [vmem:[#allocation26_spill] sm:$0xff]  ;;  %v9767_v61 = vld [vmem:[#allocation63_spill] sm:$0xff] }
 0x986   :  { %v2773_v60 = vsel %vm9409_vm0, %v2764_v23, %v9750_v34  ;;  %v2826_v51 = vsel %vm9407_vm10, %v2817_v18, %v7681_v55  ;;  %v2721_v63 = vsel %vm2716_vm13, %v9766_v46, %v9765_v3  ;;  %v9771_v56 = vld [vmem:[#allocation14_spill] sm:$0xff]  ;;  %v9789_v46 = vld [vmem:[#allocation88_spill] sm:$0xff] }
 0x987   :  { %v2782_v16 = vsel %vm9423_vm14, %v2773_v60, %v9751_v38  ;;  %v2835_v14 = vsel %vm2833_vm3, %v2826_v51, %v7699_v39  ;;  %v9769_v60 = vld [vmem:[#allocation54_spill] sm:$0xff]  ;;  %v9770_v38 = vld [vmem:[#allocation59_spill] sm:$0xff] }
 0x988   :  { %v2791_v40 = vsel %vm2788_vm2, %v2782_v16, %v9755_v36 }
 0x989   :  { %v2800_v42 = vsel %vm2797_vm12, %v2791_v40, %v9757_v11  ;;  %v9775_v40 = vld [vmem:[#allocation80_spill] sm:$0xff] }
 0x9ce   :  { %v2694_v58 = vpop.xlane.xlu0 %2693 }
 0x9cf   :  { %v2843_v28 = vsel %vm2842_vm9, %v2834_v48, %v2694_v58  ;;  %v9759_v48 = vld [vmem:[#allocation50_spill] sm:$0xff] }
 0x9d0   :  { %v2867_v50 = vsel %vm9405_vm1, %v2843_v28, 0.0  ;;  %vm9746_vm1 = vcmask 130048   ;;  %v2738_v58 = vsel %vm9426_vm5, %v2729_v57, %v9759_v48  ;;  %v2809_v28 = vsel %vm2806_vm8, %v2800_v42, %v9760_v6  ;;  %v9776_v57 = vld [vmem:[#allocation51_spill] sm:$0xff] }
 0x9d1   :  { %v2875_v0 = vmax.f32 %v2867_v50, 0.0  ;;  %v2747_v29 = vsel %vm9425_vm6, %v2738_v58, %v9761_v33  ;;  %v9762_v50 = vld [vmem:[#allocation92_spill] sm:$0xff]  ;;  %v9777_v42 = vld [vmem:[#allocation83_spill] sm:$0xff] }
 0x9d2   :  { %v2818_v37 = vsel %vm2815_vm7, %v2809_v28, %v9762_v50  ;;  %v9779_v58 = vld [vmem:[#allocation95_spill] sm:$0xff] }
 0x9d3   :  { %4482 = vmatmul.msk.f32.vlgmr.msra.gmra.mxu1 %vm9746_vm1, %v2875_v0  ;;  %vm9406_vm1 = vcmp.gt.f32.partialorder %v9758_v8, 0.5  ;;  %v9763_v0 = vld [vmem:[#allocation53_spill] sm:$0xff]  ;;  %v2827_v45 = vsel %vm9407_vm10, %v2818_v37, %v7683_v49  ;;  %v2730_v49 = vsel %vm9427_vm11, %v2721_v63, %v9769_v60  ;;  %vm9408_vm10 = vcmp.gt.f32.partialorder %v9771_v56, 0.5  ;;  %v9782_v37 = vld [vmem:[#allocation67_spill] sm:$0xff] }
 0x9d4   :  { %v2756_v54 = vsel %vm9411_vm4, %v2747_v29, %v9763_v0  ;;  %v2836_v2 = vsel %vm2833_vm3, %v2827_v45, %v7697_v1  ;;  %v9772_v1 = vld [vmem:[#allocation49_spill] sm:$0xff]  ;;  %v9783_v0 = vld [vmem:[#allocation70_spill] sm:$0xff] }
 0x9d5   :  { %v2765_v47 = vsel %vm9424_vm15, %v2756_v54, %v9764_v32  ;;  %v2739_v18 = vsel %vm9426_vm5, %v2730_v49, %v9772_v1  ;;  %v9792_v49 = vld [vmem:[#allocation56_spill] sm:$0xff] }
 0x9d6   :  { %v2774_v23 = vsel %vm9409_vm0, %v2765_v47, %v9767_v61  ;;  %v2748_v36 = vsel %vm9425_vm6, %v2739_v18, %v9774_v43  ;;  %v9786_v47 = vld [vmem:[#allocation16_spill] sm:$0xff] }
 0x9d7   :  { %v2783_v16 = vsel %vm9423_vm14, %v2774_v23, %v9770_v38  ;;  %v2757_v11 = vsel %vm9411_vm4, %v2748_v36, %v9776_v57  ;;  %v9797_v57 = vld [vmem:[#allocation61_spill] sm:$0xff] }
 0x9d8   :  { %v2792_v53 = vsel %vm2788_vm2, %v2783_v16, %v9773_v7  ;;  %v9793_v16 = vld [vmem:[#allocation91_spill] sm:$0xff] }
 0x9d9   :  { %v2697_v30 = vpop.xlane.xlu1 %2696  ;;  %v2801_v51 = vsel %vm2797_vm12, %v2792_v53, %v9775_v40  ;;  %v9794_v7 = vld [vmem:[#allocation55_spill] sm:$0xff]  ;;  %v9796_v40 = vld [vmem:[#allocation8_spill] sm:$0xff] }
 0x9da   :  { %v2844_v55 = vsel %vm2842_vm9, %v2835_v14, %v2697_v30  ;;  %v2810_v14 = vsel %vm2806_vm8, %v2801_v51, %v9777_v42  ;;  %v9778_v30 = vld [vmem:[#allocation2_spill] sm:$0xff] }
 0x9db   :  { %v2868_v39 = vsel %vm9406_vm1, %v2844_v55, 0.0  ;;  %v2700_v25 = vpop.xlane.xlu2 %2699  ;;  %vm9768_vm1 = vcmask 130048   ;;  %v2766_v48 = vsel %vm9424_vm15, %v2757_v11, %v9778_v30  ;;  %v2819_v6 = vsel %vm2815_vm7, %v2810_v14, %v9779_v58  ;;  %v9780_v55 = vld [vmem:[#allocation20_spill] sm:$0xff]  ;;  %v9800_v14 = vld [vmem:[#allocation62_spill] sm:$0xff] }
 0x9dc   :  { %v2876_v31 = vmax.f32 %v2868_v39, 0.0  ;;  %v2845_v34 = vsel %vm2842_vm9, %v2836_v2, %v2700_v25  ;;  %v2775_v33 = vsel %vm9409_vm0, %v2766_v48, %v9780_v55  ;;  %vm9410_vm0 = vcmp.gt.f32.partialorder %v9786_v47, 0.5  ;;  %v9788_v2 = vld [vmem:[#allocation60_spill] sm:$0xff]  ;;  %v9801_v48 = vld [vmem:[#allocation30_spill] sm:$0xff] }
 0x9dd   :  { %v2869_v13 = vsel %vm9408_vm10, %v2845_v34, 0.0  ;;  %v2784_v39 = vsel %vm9423_vm14, %v2775_v33, %v9782_v37  ;;  %vm9784_vm10 = vcmask 130048   ;;  %v9791_v34 = vld [vmem:[#allocation34_spill] sm:$0xff]  ;;  %v9803_v58 = vld [vmem:[#allocation28_spill] sm:$0xff] }
 0x9de   :  { %4483 = vmatmul.msk.f32.gmra.mxu1 %vm9768_vm1, %v2876_v31  ;;  %vm9781_vm1 = vcmask 105472   ;;  %v2877_v50 = vmax.f32 %v2869_v13, 0.0  ;;  %v2793_v54 = vsel %vm2788_vm2, %v2784_v39, %v9783_v0  ;;  %v9785_v31 = vld [vmem:[#allocation79_spill] sm:$0xff]  ;;  %v9807_v39 = vld [vmem:[#allocation36_spill] sm:$0xff]  ;;  %v9808_v0 = vld [vmem:[#allocation89_spill] sm:$0xff] }
 0x9df   :  { %v2828_v29 = vsel %vm9781_vm1, %v2819_v6, %v7685_v62  ;;  %v2802_v32 = vsel %vm2797_vm12, %v2793_v54, %v9785_v31  ;;  %v9787_v62 = vld [vmem:[#allocation23_spill] sm:$0xff] }
 0x9e0   :  { %v2837_v25 = vsel %vm2833_vm3, %v2828_v29, %v7703_v4  ;;  %v2722_v3 = vsel %vm2716_vm13, %v9788_v2, %v9787_v62  ;;  %v2811_v63 = vsel %vm2806_vm8, %v2802_v32, %v9789_v46  ;;  %v9790_v4 = vld [vmem:[#allocation35_spill] sm:$0xff]  ;;  %v9806_v29 = vld [vmem:[#allocation78_spill] sm:$0xff] }
 0x9e1   :  { %v2703_v28 = vpop.xlane.xlu0 %2702  ;;  %v2731_v61 = vsel %vm9427_vm11, %v2722_v3, %v9790_v4  ;;  %v2820_v1 = vsel %vm2815_vm7, %v2811_v63, %v9793_v16  ;;  %v2706_v18 = vpop.xlane.xlu1 %2705  ;;  %v9810_v32 = vld [vmem:[#allocation94_spill] sm:$0xff]  ;;  %v9811_v3 = vld [vmem:[#allocation57_spill] sm:$0xff] }
 0x9e2   :  { %v2846_v45 = vsel %vm2842_vm9, %v2837_v25, %v2703_v28  ;;  %v2740_v60 = vsel %vm9426_vm5, %v2731_v61, %v9791_v34  ;;  %v9804_v28 = vld [vmem:[#allocation76_spill] sm:$0xff]  ;;  %v9813_v61 = vld [vmem:[#allocation7_spill] sm:$0xff]  ;;  %v9816_v16 = vld [vmem:[#allocation66_spill] sm:$0xff] }
 0x9e3   :  { %v2870_v23 = vsel %vm9410_vm0, %v2846_v45, 0.0  ;;  %v2749_v38 = vsel %vm9425_vm6, %v2740_v60, %v9792_v49  ;;  %vm9799_vm0 = vcmask 130048   ;;  %v9809_v45 = vld [vmem:[#allocation39_spill] sm:$0xff]  ;;  %v9814_v60 = vld [vmem:[#allocation33_spill] sm:$0xff] }
 0x9e4   :  { %v2758_v53 = vsel %vm9411_vm4, %v2749_v38, %v9794_v7  ;;  %v2878_v36 = vmax.f32 %v2870_v23, 0.0  ;;  %vm9412_vm4 = vcmp.gt.f32.partialorder %v9801_v48, 0.5  ;;  %v9815_v49 = vld [vmem:[#allocation37_spill] sm:$0xff]  ;;  %v9818_v7 = vld [vmem:[#allocation38_spill] sm:$0xff] }
 0x9e5   :  { %v2767_v51 = vsel %vm9424_vm15, %v2758_v53, %v9796_v40  ;;  %v2724_v38 = vsel %vm2716_vm13, %v9815_v49, %v9814_v60  ;;  %v9819_v53 = vld [vmem:[#allocation68_spill] sm:$0xff] }
 0x9e6   :  { %4484 = vmatmul.msk.f32.gmra.mxu1 %vm9784_vm10, %v2877_v50  ;;  %vm9795_vm10 = vmmov %vm9781_vm1  ;;  %vm9798_vm1 = vcmask 56320  }
 0x9e7   :  { %v2829_v43 = vsel %vm9795_vm10, %v2820_v1, %v7687_v52  ;;  %v2776_v11 = vsel %vm9798_vm1, %v2767_v51, %v9797_v57  ;;  %v9802_v52 = vld [vmem:[#allocation40_spill] sm:$0xff]  ;;  %v9822_v51 = vld [vmem:[#allocation74_spill] sm:$0xff] }
 0x9e8   :  { %v2838_v13 = vsel %vm2833_vm3, %v2829_v43, %v7705_v24  ;;  %v2785_v30 = vsel %vm9423_vm14, %v2776_v11, %v9800_v14  ;;  %v2723_v6 = vsel %vm2716_vm13, %v9803_v58, %v9802_v52  ;;  %v9805_v24 = vld [vmem:[#allocation43_spill] sm:$0xff]  ;;  %v9823_v57 = vld [vmem:[#allocation42_spill] sm:$0xff] }
 0x9e9   :  { %v2847_v42 = vsel %vm2842_vm9, %v2838_v13, %v2706_v18  ;;  %v2794_v55 = vsel %vm2788_vm2, %v2785_v30, %v9804_v28  ;;  %v2732_v33 = vsel %vm9427_vm11, %v2723_v6, %v9805_v24  ;;  %v2709_v2 = vpop.xlane.xlu2 %2708  ;;  %v9825_v52 = vld [vmem:[#allocation3_spill] sm:$0xff]  ;;  %v9827_v6 = vld [vmem:[#allocation84_spill] sm:$0xff] }
 0x9ea   :  { %v2803_v50 = vsel %vm2797_vm12, %v2794_v55, %v9806_v29  ;;  %v2871_v37 = vsel %vm9412_vm4, %v2847_v42, 0.0  ;;  %v2741_v25 = vsel %vm9426_vm5, %v2732_v33, %v9807_v39  ;;  %v9824_v42 = vld [vmem:[#allocation82_spill] sm:$0xff]  ;;  %v9829_v33 = vld [vmem:[#allocation96_spill] sm:$0xff]  ;;  %vm9832_vm4 = vcmask 105472  }
 0x9eb   :  { %v2812_v54 = vsel %vm2806_vm8, %v2803_v50, %v9808_v0  ;;  %v2750_v31 = vsel %vm9425_vm6, %v2741_v25, %v9809_v45  ;;  %v2879_v4 = vmax.f32 %v2871_v37, 0.0  ;;  %v9828_v55 = vld [vmem:[#allocation10_spill] sm:$0xff]  ;;  %v2712_v50 = vpop.xlane.xlu0 %2711 }
 0x9ec   :  { %v2821_v62 = vsel %vm2815_vm7, %v2812_v54, %v9810_v32  ;;  %v9830_v37 = vld [vmem:[#allocation46_spill] sm:$0xff]  ;;  %v9833_v54 = vld [vmem:[#allocation69_spill] sm:$0xff]  ;;  %v9834_v32 = vld [vmem:[#allocation72_spill] sm:$0xff] }
 0x9ed   :  { %v2830_v63 = vsel %vm9795_vm10, %v2821_v62, %v7689_v35  ;;  %v2733_v35 = vsel %vm9427_vm11, %v2724_v38, %v9818_v7 }
 0x9ee   :  { %4485 = vmatmul.msk.f32.gmra.mxu1 %vm9799_vm0, %v2878_v36  ;;  %vm9812_vm0 = vcmask 39936   ;;  %v2839_v34 = vsel %vm2833_vm3, %v2830_v63, %v7701_v26  ;;  %v9820_v36 = vld [vmem:[#allocation31_spill] sm:$0xff]  ;;  %v9821_v26 = vld [vmem:[#allocation45_spill] sm:$0xff] }
 0x9ef   :  { %v2759_v46 = vsel %vm9812_vm0, %v2750_v31, %v9811_v3  ;;  %v2848_v18 = vsel %vm2842_vm9, %v2839_v34, %v2709_v2  ;;  %vm9817_vm0 = vcmask 130048   ;;  %vm9422_vm10 = vcmp.gt.f32.partialorder %v9820_v36, 0.5  ;;  %v9836_v3 = vld [vmem:[#allocation81_spill] sm:$0xff]  ;;  %v9837_v63 = vld [vmem:[#allocation19_spill] sm:$0xff]  ;;  %v2715_v34 = vpop.xlane.xlu1 %2714 }
 0x9f0   :  { %v2768_v23 = vsel %vm9424_vm15, %v2759_v46, %v9813_v61  ;;  %v2742_v40 = vsel %vm9426_vm5, %v2733_v35, %v9821_v26  ;;  %v2872_v30 = vsel %vm9422_vm10, %v2848_v18, 0.0 }
 0x9f1   :  { %v2777_v1 = vsel %vm9798_vm1, %v2768_v23, %v9816_v16  ;;  %v2751_v11 = vsel %vm9425_vm6, %v2742_v40, %v9823_v57  ;;  %vm9826_vm1 = vcmask 39936   ;;  %v2880_v0 = vmax.f32 %v2872_v30, 0.0  ;;  %v9839_v23 = vld [vmem:[#allocation93_spill] sm:$0xff] }
 0x9f2   :  { %v2786_v43 = vsel %vm9423_vm14, %v2777_v1, %v9819_v53  ;;  %v2760_v58 = vsel %vm9826_vm1, %v2751_v11, %v9825_v52  ;;  %vm9835_vm1 = vcmask 130048   ;;  %v9841_v1 = vld [vmem:[#allocation18_spill] sm:$0xff] }
 0x9f3   :  { %v2795_v13 = vsel %vm2788_vm2, %v2786_v43, %v9822_v51  ;;  %v2769_v24 = vsel %vm9424_vm15, %v2760_v58, %v9828_v55 }
 0x9f4   :  { %v2804_v14 = vsel %vm2797_vm12, %v2795_v13, %v9824_v42 }
 0x9f5   :  { %v2813_v28 = vsel %vm2806_vm8, %v2804_v14, %v9827_v6 }
 0x9f6   :  { %4486 = vmatmul.msk.f32.gmra.mxu1 %vm9817_vm0, %v2879_v4  ;;  %v2822_v29 = vsel %vm2815_vm7, %v2813_v28, %v9829_v33  ;;  %vm9831_vm0 = vcmask 56320  }
 0x9f7   :  { %v2778_v39 = vsel %vm9831_vm0, %v2769_v24, %v9830_v37  ;;  %v2831_v25 = vsel %vm9832_vm4, %v2822_v29, %v7691_v27  ;;  %vm9420_vm0 = vcmp.gt.f32.partialorder %v9837_v63, 0.5  ;;  %v9838_v27 = vld [vmem:[#allocation90_spill] sm:$0xff] }
 0x9f8   :  { %v2787_v45 = vsel %vm9423_vm14, %v2778_v39, %v9833_v54  ;;  %v2840_v31 = vsel %vm2833_vm3, %v2831_v25, %v7712_v22  ;;  %v9843_v39 = vmov 1   ;;  %v9845_v54 = vmov 3  }
 0x9f9   :  { %v2796_v62 = vsel %vm2788_vm2, %v2787_v45, %v9834_v32  ;;  %v2849_v2 = vsel %vm2842_vm9, %v2840_v31, %v2712_v50  ;;  %vm9840_vm2 = vmmov %vm9835_vm1  ;;  %v9846_v31 = vmov 4  }
 0x9fa   :  { %v2805_v46 = vsel %vm2797_vm12, %v2796_v62, %v9836_v3  ;;  %v2873_v61 = vsel %vm9420_vm0, %v2849_v2, 0.0  ;;  %vm9421_vm12 = vcmp.gt.f32.partialorder %v9841_v1, 0.5  ;;  %vm9853_vm0 = vcmask 523264  }
 0x9fb   :  { %v2814_v4 = vsel %vm2806_vm8, %v2805_v46, %v9838_v27  ;;  %v2881_v49 = vmax.f32 %v2873_v61, 0.0  ;;  %vm9842_vm8 = vmmov %vm9835_vm1 }
 0x9fc   :  { %v2823_v22 = vsel %vm2815_vm7, %v2814_v4, %v9839_v23  ;;  %v9847_v4 = vmov 5  }
 0x9fd   :  { %v2832_v60 = vsel %vm9832_vm4, %v2823_v22, %v7693_v17  ;;  %v4919_v17 = vld [vmem:[%s9293_s5] ss:$0 sm:$0xff] }
 0x9fe   :  { %4487 = vmatmul.msk.f32.gmra.mxu1 %vm9835_vm1, %v2880_v0  ;;  %v2841_v38 = vsel %vm2833_vm3, %v2832_v60, %v7716_v5  ;;  %v9844_v0 = vmov 2  }
 0x9ff   :  { %v2850_v16 = vsel %vm2842_vm9, %v2841_v38, %v2715_v34 }
 0xa00   :  { %v2874_v18 = vsel %vm9421_vm12, %v2850_v16, 0.0  ;;  %vm9854_vm12 = vmmov %vm9853_vm0 }
 0xa01   :  { %v2882_v7 = vmax.f32 %v2874_v18, 0.0 }
 0xa06   :  { %4488 = vmatmul.msk.f32.gmra.mxu1 %vm9840_vm2, %v2881_v49  ;;  %v9848_v49 = vmov 6  }
 0xa0e   :  { %4489 = vmatmul.msk.f32.gmra.mxu1 %vm9842_vm8, %v2882_v7 }
 0xa50   :  { %v2930_v35 = vpop.f32.mrf.mxu1 }
 0xa51   :  { %v8024_v53 = vadd.f32 %v4919_v17, %v2930_v35 }
 0xa53   :  { %2996 = vperm.xlu0 %4658, %v8024_v53   ;;  %v2954_v5 = vsel %vm9423_vm14, %v8024_v53, 0.0 }
 0xa54   :  { %2962 = vxpose.xlu2.b32.start [1/8] (short) (narrow) %v2954_v5, 8 }
 0xa5b   :  { %v2933_v43 = vpop.f32.mrf.mxu1 }
 0xa5c   :  { %v8029_v26 = vadd.f32 %v4919_v17, %v2933_v43 }
 0xa5e   :  { %3001 = vperm.xlu1 %4820, %v8029_v26   ;;  %v2955_v40 = vsel %vm9423_vm14, %v8029_v26, 0.0 }
 0xa5f   :  { %2963 = vxpose.xlu2.b32.cont [2/8] (short) (narrow) %v2955_v40, 8 }
 0xa63   :  { %v2936_v51 = vpop.f32.mrf.mxu1 }
 0xa64   :  { %v8034_v13 = vadd.f32 %v4919_v17, %v2936_v51  ;;  %v9850_v51 = vmov 0.0  }
 0xa66   :  { %3006 = vperm.xlu1 %4820, %v8034_v13   ;;  %v2956_v57 = vsel %vm9423_vm14, %v8034_v13, 0.0 }
 0xa67   :  { %2964 = vxpose.xlu2.b32.cont [3/8] (short) (narrow) %v2956_v57, 8 }
 0xa6b   :  { %v2939_v11 = vpop.f32.mrf.mxu1 }
 0xa6c   :  { %v8039_v42 = vadd.f32 %v4919_v17, %v2939_v11 }
 0xa6e   :  { %3011 = vperm.xlu1 %4820, %v8039_v42   ;;  %v2957_v14 = vsel %vm9423_vm14, %v8039_v42, 0.0 }
 0xa6f   :  { %2965 = vxpose.xlu2.b32.cont [4/8] (short) (narrow) %v2957_v14, 8 }
 0xa73   :  { %v2942_v30 = vpop.f32.mrf.mxu1 }
 0xa74   :  { %v8044_v52 = vadd.f32 %v4919_v17, %v2942_v30 }
 0xa76   :  { %3016 = vperm.xlu0 %4658, %v8044_v52   ;;  %v2958_v58 = vsel %vm9423_vm14, %v8044_v52, 0.0 }
 0xa77   :  { %2966 = vxpose.xlu2.b32.cont [5/8] (short) (narrow) %v2958_v58, 8 }
 0xa7b   :  { %v2945_v6 = vpop.f32.mrf.mxu1 }
 0xa7c   :  { %v8049_v28 = vadd.f32 %v4919_v17, %v2945_v6 }
 0xa7e   :  { %3021 = vperm.xlu1 %4820, %v8049_v28   ;;  %v2959_v55 = vsel %vm9423_vm14, %v8049_v28, 0.0 }
 0xa7f   :  { %2967 = vxpose.xlu2.b32.cont [6/8] (short) (narrow) %v2959_v55, 8 }
 0xa83   :  { %v2948_v24 = vpop.f32.mrf.mxu1 }
 0xa84   :  { %v8054_v33 = vadd.f32 %v4919_v17, %v2948_v24 }
 0xa86   :  { %3026 = vperm.xlu0 %4658, %v8054_v33   ;;  %v2960_v29 = vsel %vm9423_vm14, %v8054_v33, 0.0 }
 0xa87   :  { %2968 = vxpose.xlu2.b32.cont [7/8] (short) (narrow) %v2960_v29, 8 }
 0xa8b   :  { %v2951_v50 = vpop.f32.mrf.mxu1 }
 0xa8c   :  { %v8059_v37 = vadd.f32 %v4919_v17, %v2951_v50  ;;  %v9849_v17 = vmov 7  }
 0xa8e   :  { %4821 = vset.pattern.permute.xlu0 %v9843_v39  ;;  %3031 = vperm.xlu1 %4820, %v8059_v37   ;;  %v2961_v25 = vsel %vm9423_vm14, %v8059_v37, 0.0 }
 0xa8f   :  { %3060 = vperm.xlu0 %4821, %v8024_v53   ;;  %2969 = vxpose.xlu2.b32.end [8/8] (short) (narrow) %v2961_v25, 8 }
 0xa96   :  { %4822 = vset.pattern.permute.xlu1 %v9843_v39 }
 0xa97   :  { %3072 = vperm.xlu0 %4821, %v8039_v42   ;;  %3064 = vperm.xlu1 %4822, %v8029_v26  }
 0xa9f   :  { %3080 = vperm.xlu0 %4821, %v8049_v28   ;;  %3068 = vperm.xlu1 %4822, %v8034_v13  }
 0xaa7   :  { %3088 = vperm.xlu0 %4821, %v8059_v37   ;;  %3076 = vperm.xlu1 %4822, %v8044_v52  }
 0xaaf   :  { %4824 = vset.pattern.permute.xlu0 %v9844_v0  ;;  %3084 = vperm.xlu1 %4822, %v8054_v33  }
 0xab0   :  { %3125 = vperm.xlu0 %4824, %v8034_v13  }
 0xab7   :  { %4823 = vset.pattern.permute.xlu1 %v9844_v0 }
 0xab8   :  { %3137 = vperm.xlu0 %4824, %v8049_v28   ;;  %3117 = vperm.xlu1 %4823, %v8024_v53  }
 0xac0   :  { %3145 = vperm.xlu0 %4824, %v8059_v37   ;;  %3129 = vperm.xlu1 %4823, %v8039_v42  }
 0xac5   :  { %v8096_v62 = vpop.permute.xlu0 %2996 }
 0xac8   :  { %4826 = vset.pattern.permute.xlu0 %v9845_v54  ;;  %3133 = vperm.xlu1 %4823, %v8044_v52  }
 0xac9   :  { %3178 = vperm.xlu0 %4826, %v8029_v26  }
 0xad0   :  { %3141 = vperm.xlu1 %4823, %v8054_v33   ;;  %v8089_v45 = vpop.permute.xlu1 %3001 }
 0xad1   :  { %3190 = vperm.xlu0 %4826, %v8044_v52  }
 0xad8   :  { %4825 = vset.pattern.permute.xlu1 %v9845_v54  ;;  %v8094_v32 = vpop.permute.xlu1 %3006 }
 0xad9   :  { %3198 = vperm.xlu0 %4826, %v8054_v33   ;;  %3174 = vperm.xlu1 %4825, %v8024_v53  }
 0xae0   :  { %v8100_v2 = vpop.permute.xlu1 %3011 }
 0xae1   :  { %4827 = vset.pattern.permute.xlu0 %v9846_v31  ;;  %3182 = vperm.xlu1 %4825, %v8034_v13  }
 0xae2   :  { %3231 = vperm.xlu0 %4827, %v8024_v53  }
 0xae8   :  { %v8102_v3 = vpop.permute.xlu0 %3016 }
 0xae9   :  { %3186 = vperm.xlu1 %4825, %v8039_v42  }
 0xaea   :  { %3243 = vperm.xlu0 %4827, %v8039_v42  }
 0xaf0   :  { %v8106_v46 = vpop.permute.xlu1 %3021  ;;  %v8147_v5 = vpop.trf.xlu2 }
 0xaf1   :  { %3194 = vperm.xlu1 %4825, %v8049_v28   ;;  %v8153_v40 = vperm.slane %v8147_v5, 1 }
 0xaf2   :  { %3251 = vperm.xlu0 %4827, %v8049_v28  }
 0xaf8   :  { %v8108_v27 = vpop.permute.xlu0 %3026  ;;  %3121 = vperm.xlu2 %4819, %v8029_v26  }
 0xaf9   :  { %3202 = vperm.xlu1 %4825, %v8059_v37  }
 0xafa   :  { %3259 = vperm.xlu0 %4827, %v8059_v37  }
 0xb00   :  { %4830 = vset.pattern.permute.xlu2 %v9847_v4  ;;  %v8114_v61 = vpop.permute.xlu1 %3031 }
 0xb01   :  { %v8116_v23 = vpop.permute.xlu0 %3060  ;;  %4828 = vset.pattern.permute.xlu1 %v9846_v31  ;;  %3292 = vperm.xlu2 %4830, %v8029_v26  }
 0xb02   :  { %4831 = vset.pattern.permute.xlu0 %v9847_v4  ;;  %3235 = vperm.xlu1 %4828, %v8029_v26  }
 0xb03   :  { %3296 = vperm.xlu0 %4831, %v8034_v13  }
 0xb09   :  { %3304 = vperm.xlu2 %4830, %v8044_v52   ;;  %v8124_v22 = vpop.permute.xlu1 %3064  ;;  %v3073_v34 = vpop.permute.xlu0 %3072 }
 0xb0a   :  { %3239 = vperm.xlu1 %4828, %v8034_v13   ;;  %vm3095_vm1 = vcmp.le.f32.partialorder %v3073_v34, %v8153_v40 }
 0xb0b   :  { %3316 = vperm.xlu0 %4831, %v8059_v37   ;;  %v4501_v29 = vsel %vm3095_vm1, 1.0, %v9850_v51 }
 0xb11   :  { %3312 = vperm.xlu2 %4830, %v8054_v33   ;;  %v3069_v60 = vpop.permute.xlu1 %3068  ;;  %v3081_v38 = vpop.permute.xlu0 %3080 }
 0xb12   :  { %3247 = vperm.xlu1 %4828, %v8044_v52   ;;  %vm3097_vm9 = vcmp.le.f32.partialorder %v3081_v38, %v8153_v40  ;;  %vm3094_vm7 = vcmp.le.f32.partialorder %v3069_v60, %v8153_v40 }
 0xb13   :  { %4834 = vset.pattern.permute.xlu0 %v9848_v49  ;;  %v4503_v57 = vsel %vm3097_vm9, 1.0, %v9850_v51  ;;  %vm3093_vm9 = vcmp.le.f32.partialorder %v8124_v22, %v8153_v40 }
 0xb14   :  { %3353 = vperm.xlu0 %4834, %v8034_v13  }
 0xb19   :  { %4833 = vset.pattern.permute.xlu2 %v9848_v49  ;;  %v3077_v16 = vpop.permute.xlu1 %3076  ;;  %v8136_v18 = vpop.permute.xlu0 %3088 }
 0xb1a   :  { %3255 = vperm.xlu1 %4828, %v8054_v33   ;;  %3349 = vperm.xlu2 %4833, %v8029_v26   ;;  %vm3096_vm3 = vcmp.le.f32.partialorder %v3077_v16, %v8153_v40 }
 0xb1c   :  { %3373 = vperm.xlu0 %4834, %v8059_v37  }
 0xb21   :  { %v8138_v7 = vpop.permute.xlu1 %3084 }
 0xb22   :  { %4829 = vset.pattern.permute.xlu1 %v9847_v4  ;;  %3361 = vperm.xlu2 %4833, %v8044_v52   ;;  %v8145_v35 = vpop.permute.xlu0 %3125 }
 0xb23   :  { %3288 = vperm.xlu1 %4829, %v8024_v53  }
 0xb24   :  { %4837 = vset.pattern.permute.xlu0 %v9849_v17 }
 0xb25   :  { %3410 = vperm.xlu0 %4837, %v8034_v13   ;;  %v4502_v13 = vsel %vm3096_vm3, 1.0, %v9850_v51 }
 0xb26   :  { %v4848_v14 = vpack.i.bf16 %v4503_v57, %v4502_v13 }
 0xb2a   :  { %3369 = vperm.xlu2 %4833, %v8054_v33   ;;  %v8150_v43 = vpop.permute.xlu1 %3117  ;;  %v8164_v30 = vpop.permute.xlu0 %3137 }
 0xb2b   :  { %3300 = vperm.xlu1 %4829, %v8039_v42  }
 0xb2d   :  { %3430 = vperm.xlu0 %4837, %v8059_v37  }
 0xb32   :  { %4836 = vset.pattern.permute.xlu2 %v9849_v17  ;;  %v8162_v11 = vpop.permute.xlu1 %3129  ;;  %v8174_v6 = vpop.permute.xlu0 %3145 }
 0xb33   :  { %3308 = vperm.xlu1 %4829, %v8049_v28   ;;  %3406 = vperm.xlu2 %4836, %v8029_v26   ;;  %v4500_v26 = vsel %vm3094_vm7, 1.0, %v9850_v51  ;;  %vm3092_vm7 = vcmp.le.f32.partialorder %v8116_v23, %v8153_v40 }
 0xb34   :  { %v4843_v50 = vpack.i.bf16 %v4501_v29, %v4500_v26 }
 0xb35   :  { %4849 = vrot.lane.b32.xlu0 %v4848_v14, %s4937_s1 }
 0xb3a   :  { %v8169_v58 = vpop.permute.xlu1 %3133 }
 0xb3b   :  { %4832 = vset.pattern.permute.xlu1 %v9848_v49  ;;  %3418 = vperm.xlu2 %4836, %v8044_v52   ;;  %v3179_v24 = vpop.permute.xlu0 %3178  ;;  %v8185_v52 = vperm.slane %v8147_v5, 3 }
 0xb3c   :  { %3345 = vperm.xlu1 %4832, %v8024_v53  }
 0xb3d   :  { %vm3207_vm2 = vcmp.le.f32.partialorder %v3179_v24, %v8185_v52 }
 0xb3e   :  { %v4515_v39 = vsel %vm3207_vm2, 1.0, %v9850_v51  ;;  %vm3098_vm2 = vcmp.le.f32.partialorder %v8138_v7, %v8153_v40 }
 0xb3f   :  { %v4504_v29 = vsel %vm3098_vm2, 1.0, %v9850_v51 }
 0xb42   :  { %v8176_v55 = vpop.permute.xlu1 %3141 }
 0xb43   :  { %3426 = vperm.xlu2 %4836, %v8054_v33   ;;  %v3191_v25 = vpop.permute.xlu0 %3190 }
 0xb44   :  { %3357 = vperm.xlu1 %4832, %v8039_v42  }
 0xb4b   :  { %4844 = vrot.lane.b32.xlu2 %v4843_v50, %s4937_s1  ;;  %v3175_v37 = vpop.permute.xlu1 %3174  ;;  %v3199_v4 = vpop.permute.xlu0 %3198 }
 0xb4c   :  { %vm3206_vm4 = vcmp.le.f32.partialorder %v3175_v37, %v8185_v52  ;;  %3365 = vperm.xlu1 %4832, %v8049_v28   ;;  %vm3212_vm1 = vcmp.le.f32.partialorder %v3199_v4, %v8185_v52 }
 0xb4d   :  { %v4514_v33 = vsel %vm3206_vm4, 1.0, %v9850_v51 }
 0xb4e   :  { %v4858_v0 = vpack.i.bf16 %v4515_v39, %v4514_v33 }
 0xb52   :  { %v8194_v31 = vpop.permute.xlu2 %3121 }
 0xb53   :  { %4859 = vrot.lane.b32.xlu2 %v4858_v0, %s4937_s1  ;;  %v3183_v54 = vpop.permute.xlu1 %3182 }
 0xb54   :  { %4835 = vset.pattern.permute.xlu1 %v9849_v17  ;;  %vm3208_vm8 = vcmp.le.f32.partialorder %v3183_v54, %v8185_v52  ;;  %v4499_v17 = vsel %vm3093_vm9, 1.0, %v9850_v51  ;;  %vm3210_vm9 = vcmp.le.f32.partialorder %v3191_v25, %v8185_v52 }
 0xb55   :  { %3402 = vperm.xlu1 %4835, %v8024_v53   ;;  %v4516_v60 = vsel %vm3208_vm8, 1.0, %v9850_v51  ;;  %v8206_v53 = vpop.permute.xlu0 %3231  ;;  %vm3099_vm8 = vcmp.le.f32.partialorder %v8136_v18, %v8153_v40  ;;  %v4518_v0 = vsel %vm3210_vm9, 1.0, %v9850_v51 }
 0xb56   :  { %v4505_v50 = vsel %vm3099_vm8, 1.0, %v9850_v51 }
 0xb57   :  { %v4853_v7 = vpack.i.bf16 %v4505_v50, %v4504_v29 }
 0xb5b   :  { %v3187_v34 = vpop.permute.xlu1 %3186  ;;  %v3293_v38 = vpop.permute.xlu2 %3292 }
 0xb5c   :  { %vm3209_vm3 = vcmp.le.f32.partialorder %v3187_v34, %v8185_v52 }
 0xb5d   :  { %v4517_v49 = vsel %vm3209_vm3, 1.0, %v9850_v51  ;;  %3414 = vperm.xlu1 %4835, %v8039_v42   ;;  %v4498_v42 = vsel %vm3092_vm7, 1.0, %v9850_v51  ;;  %v8224_v24 = vpop.permute.xlu0 %3243 }
 0xb5e   :  { %v4863_v16 = vpack.i.bf16 %v4517_v49, %v4516_v60  ;;  %v4838_v14 = vpack.i.bf16 %v4499_v17, %v4498_v42  ;;  %v8252_v17 = vperm.slane %v8147_v5, 5 }
 0xb60   :  { %4864 = vrot.lane.b32.xlu0 %v4863_v16, %s4937_s1  ;;  %vm3321_vm7 = vcmp.le.f32.partialorder %v3293_v38, %v8252_v17 }
 0xb63   :  { %v3195_v13 = vpop.permute.xlu1 %3194  ;;  %v8212_v57 = vpop.permute.xlu2 %3304 }
 0xb64   :  { %vm3211_vm3 = vcmp.le.f32.partialorder %v3195_v13, %v8185_v52  ;;  %vm3324_vm9 = vcmp.le.f32.partialorder %v8212_v57, %v8252_v17 }
 0xb65   :  { %3422 = vperm.xlu1 %4835, %v8049_v28   ;;  %v4520_v28 = vsel %vm3212_vm1, 1.0, %v9850_v51  ;;  %v4519_v18 = vsel %vm3211_vm3, 1.0, %v9850_v51  ;;  %v8235_v39 = vpop.permute.xlu0 %3251 }
 0xb66   :  { %v4868_v54 = vpack.i.bf16 %v4519_v18, %v4518_v0 }
 0xb6b   :  { %v3203_v26 = vpop.permute.xlu1 %3202  ;;  %v3313_v37 = vpop.permute.xlu2 %3312 }
 0xb6c   :  { %vm3213_vm4 = vcmp.le.f32.partialorder %v3203_v26, %v8185_v52  ;;  %v4531_v26 = vsel %vm3321_vm7, 1.0, %v9850_v51  ;;  %vm3326_vm2 = vcmp.le.f32.partialorder %v3313_v37, %v8252_v17 }
 0xb6d   :  { %v4521_v22 = vsel %vm3213_vm4, 1.0, %v9850_v51  ;;  %4839 = vrot.lane.b32.xlu1 %v4838_v14, %s4937_s1  ;;  %v8243_v60 = vpop.permute.xlu0 %3259 }
 0xb6e   :  { %v4873_v23 = vpack.i.bf16 %v4521_v22, %v4520_v28 }
 0xb70   :  { %4874 = vrot.lane.b32.xlu2 %v4873_v23, %s4937_s1 }
 0xb74   :  { %v8229_v33 = vpop.permute.xlu1 %3235  ;;  %v8238_v4 = vpop.permute.xlu2 %3349 }
 0xb75   :  { %4854 = vrot.lane.b32.xlu1 %v4853_v7, %s4937_s1  ;;  %v3297_v13 = vpop.permute.xlu0 %3296  ;;  %v4536_v7 = vsel %vm3326_vm2, 1.0, %v9850_v51 }
 0xb76   :  { %vm3322_vm8 = vcmp.le.f32.partialorder %v3297_v13, %v8252_v17 }
 0xb77   :  { %v4532_v18 = vsel %vm3322_vm8, 1.0, %v9850_v51 }
 0xb7c   :  { %v8240_v34 = vpop.permute.xlu1 %3239  ;;  %v8247_v16 = vpop.permute.xlu2 %3361 }
 0xb7d   :  { %4869 = vrot.lane.b32.xlu1 %v4868_v54, %s4937_s1  ;;  %v3317_v28 = vpop.permute.xlu0 %3316 }
 0xb7e   :  { %vm3327_vm4 = vcmp.le.f32.partialorder %v3317_v28, %v8252_v17 }
 0xb7f   :  { %v4537_v38 = vsel %vm3327_vm4, 1.0, %v9850_v51 }
 0xb80   :  { %v4893_v54 = vpack.i.bf16 %v4537_v38, %v4536_v7 }
 0xb84   :  { %v8245_v49 = vpop.permute.xlu1 %3247  ;;  %v8254_v42 = vpop.permute.xlu2 %3369 }
 0xb8c   :  { %v8249_v25 = vpop.permute.xlu1 %3255 }
 0xb8d   :  { %v3407_v29 = vpop.permute.xlu2 %3406 }
 0xb95   :  { %v3289_v14 = vpop.permute.xlu1 %3288  ;;  %v3419_v37 = vpop.permute.xlu2 %3418 }
 0xb96   :  { %vm3320_vm1 = vcmp.le.f32.partialorder %v3289_v14, %v8252_v17 }
 0xb97   :  { %v4530_v22 = vsel %vm3320_vm1, 1.0, %v9850_v51 }
 0xb98   :  { %v4878_v23 = vpack.i.bf16 %v4531_v26, %v4530_v22  ;;  %v4534_v26 = vsel %vm3324_vm9, 1.0, %v9850_v51  ;;  %vm9851_vm9 = vcmask 523264  }
 0xb9a   :  { %4879 = vrot.lane.b32.xlu0 %v4878_v23, %s4937_s1  ;;  %v8277_v23 = vpop.permute.xlu0 %3353 }
 0xb9d   :  { %v3301_v50 = vpop.permute.xlu1 %3300  ;;  %v3427_v38 = vpop.permute.xlu2 %3426 }
 0xb9e   :  { %vm3323_vm3 = vcmp.le.f32.partialorder %v3301_v50, %v8252_v17 }
 0xb9f   :  { %v4533_v0 = vsel %vm3323_vm3, 1.0, %v9850_v51 }
 0xba0   :  { %v4883_v14 = vpack.i.bf16 %v4533_v0, %v4532_v18 }
 0xba2   :  { %4894 = vrot.lane.b32.xlu0 %v4893_v54, %s4937_s1  ;;  %4884 = vrot.lane.b32.xlu1 %v4883_v14, %s4937_s1  ;;  %v8281_v7 = vpop.permute.xlu0 %3373 }
 0xba5   :  { %v3309_v13 = vpop.permute.xlu1 %3308  ;;  %v8285_v57 = vpop.permute.xlu2 %4844 }
 0xba6   :  { %vm3325_vm7 = vcmp.le.f32.partialorder %v3309_v13, %v8252_v17  ;;  %v8292_v13 = vperm.slane %v8147_v5, 7 }
 0xba7   :  { %v4535_v28 = vsel %vm3325_vm7, 1.0, %v9850_v51  ;;  %vm9852_vm7 = vmmov %vm9851_vm9 }
 0xba8   :  { %v4888_v22 = vpack.i.bf16 %v4535_v28, %v4534_v26  ;;  %vm3435_vm1 = vcmp.le.f32.partialorder %v3407_v29, %v8292_v13  ;;  %v8296_v26 = vperm.slane %v8147_v5, 2 }
 0xbaa   :  { %4889 = vrot.lane.b32.xlu2 %v4888_v22, %s4937_s1  ;;  %v3411_v54 = vpop.permute.xlu0 %3410  ;;  %vm3156_vm2 = vcmp.le.f32.partialorder %v8174_v6, %v8296_v26  ;;  %vm3155_vm8 = vcmp.le.f32.partialorder %v8176_v55, %v8296_v26  ;;  %v4547_v22 = vsel %vm3435_vm1, 1.0, %v9850_v51 }
 0xbab   :  { %v4513_v12 = vsel %vm3156_vm2, 1.0, %v9850_v51  ;;  %v4512_v56 = vsel %vm3155_vm8, 1.0, %v9850_v51  ;;  %vm3436_vm1 = vcmp.le.f32.partialorder %v3411_v54, %v8292_v13  ;;  %vm3438_vm8 = vcmp.le.f32.partialorder %v3419_v37, %v8292_v13 }
 0xbad   :  { %v8289_v14 = vpop.permute.xlu2 %4859 }
 0xbae   :  { %v8279_v50 = vpop.permute.xlu1 %3345 }
 0xbb2   :  { %v3431_v63 = vpop.permute.xlu0 %3430 }
 0xbb3   :  { %vm3441_vm3 = vcmp.le.f32.partialorder %v3431_v63, %v8292_v13 }
 0xbb6   :  { %v8283_v18 = vpop.permute.xlu1 %3357 }
 0xbbe   :  { %v8287_v0 = vpop.permute.xlu1 %3365 }
 0xbc7   :  { %v3403_v28 = vpop.permute.xlu1 %3402 }
 0xbc8   :  { %vm3434_vm4 = vcmp.le.f32.partialorder %v3403_v28, %v8292_v13  ;;  %v4553_v28 = vsel %vm3441_vm3, 1.0, %v9850_v51 }
 0xbc9   :  { %v4546_v1 = vsel %vm3434_vm4, 1.0, %v9850_v51  ;;  %vm3440_vm4 = vcmp.le.f32.partialorder %v3427_v38, %v8292_v13 }
 0xbca   :  { %v4898_v47 = vpack.i.bf16 %v4547_v22, %v4546_v1  ;;  %v4875_v36 = vpop.permute.xlu2 %4874  ;;  %v4548_v22 = vsel %vm3436_vm1, 1.0, %v9850_v51  ;;  %v4552_v63 = vsel %vm3440_vm4, 1.0, %v9850_v51 }
 0xbcb   :  { %v4877_v29 = vunpack.i.h.bf16 %v4875_v36  ;;  %v4876_v48 = vunpack.i.l.bf16 %v4875_v36 }
 0xbcc   :  { %4899 = vrot.lane.b32.xlu1 %v4898_v47, %s4937_s1 }
 0xbcd   :  { %v3601_v6 = vsel %vm9851_vm9, %v4513_v12, %v4877_v29  ;;  %v3600_v55 = vsel %vm9852_vm7, %v4512_v56, %v4876_v48  ;;  %v4913_v12 = vpack.i.bf16 %v4553_v28, %v4552_v63  ;;  %v4550_v48 = vsel %vm3438_vm8, 1.0, %v9850_v51 }
 0xbce   :  { %v3631_v1 = vpack.c.bf16 %v3601_v6, %v3600_v55  ;;  %v8328_v55 = vperm.slane %v8147_v5, 0 }
 0xbcf   :  { %v3415_v36 = vpop.permute.xlu1 %3414 }
 0xbd0   :  { %vm3437_vm2 = vcmp.le.f32.partialorder %v3415_v36, %v8292_v13  ;;  %3667 = vmatpush.bf16.msrb.mxu3 %v3631_v1  ;;  %v4850_v1 = vpop.permute.xlu0 %4849  ;;  %vm3041_vm9 = vcmp.le.f32.partialorder %v8108_v27, %v8328_v55  ;;  %vm3042_vm7 = vcmp.le.f32.partialorder %v8114_v61, %v8328_v55  ;;  %vm3040_vm1 = vcmp.le.f32.partialorder %v8106_v46, %v8328_v55 }
 0xbd1   :  { %v4549_v47 = vsel %vm3437_vm2, 1.0, %v9850_v51  ;;  %vm3039_vm4 = vcmp.le.f32.partialorder %v8102_v3, %v8328_v55  ;;  %vm3037_vm2 = vcmp.le.f32.partialorder %v8094_v32, %v8328_v55  ;;  %v4852_v28 = vunpack.i.h.bf16 %v4850_v1 }
 0xbd2   :  { %v4903_v29 = vpack.i.bf16 %v4549_v47, %v4548_v22  ;;  %v4851_v36 = vunpack.i.l.bf16 %v4850_v1  ;;  %v4496_v47 = vsel %vm3041_vm9, 1.0, %v9850_v51  ;;  %v4497_v27 = vsel %vm3042_vm7, 1.0, %v9850_v51 }
 0xbd3   :  { %vm3038_vm8 = vcmp.le.f32.partialorder %v8100_v2, %v8328_v55  ;;  %v4846_v61 = vunpack.i.l.bf16 %v8285_v57  ;;  %vm3036_vm10 = vcmp.le.f32.partialorder %v8089_v45, %v8328_v55  ;;  %v4492_v45 = vsel %vm3037_vm2, 1.0, %v9850_v51  ;;  %vm9856_vm2 = vmmov %vm9853_vm0 }
 0xbd4   :  { %4914 = vrot.lane.b32.xlu1 %v4913_v12, %s4937_s1  ;;  %4904 = vrot.lane.b32.xlu2 %v4903_v29, %s4937_s1  ;;  %vm3151_vm9 = vcmp.le.f32.partialorder %v8145_v35, %v8296_v26  ;;  %v4493_v3 = vsel %vm3038_vm8, 1.0, %v9850_v51  ;;  %vm3154_vm7 = vcmp.le.f32.partialorder %v8164_v30, %v8296_v26  ;;  %vm9857_vm8 = vmmov %vm9853_vm0 }
 0xbd5   :  { %v3588_v32 = vsel %vm9856_vm2, %v4492_v45, %v4846_v61  ;;  %vm9863_vm2 = vmmov %vm9853_vm0 }
 0xbd7   :  { %v3423_v56 = vpop.permute.xlu1 %3422 }
 0xbd8   :  { %vm3439_vm3 = vcmp.le.f32.partialorder %v3423_v56, %v8292_v13  ;;  %v4495_v56 = vsel %vm3040_vm1, 1.0, %v9850_v51  ;;  %v4865_v1 = vpop.permute.xlu0 %4864  ;;  %vm3152_vm1 = vcmp.le.f32.partialorder %v8162_v11, %v8296_v26 }
 0xbd9   :  { %v4551_v38 = vsel %vm3439_vm3, 1.0, %v9850_v51  ;;  %vm3035_vm3 = vcmp.le.f32.partialorder %v8096_v62, %v8328_v55  ;;  %v4867_v2 = vunpack.i.h.bf16 %v4865_v1 }
 0xbda   :  { %v4908_v54 = vpack.i.bf16 %v4551_v38, %v4550_v48  ;;  %v4847_v48 = vunpack.i.h.bf16 %v8285_v57  ;;  %v4490_v46 = vsel %vm3035_vm3, 1.0, %v9850_v51  ;;  %v4491_v57 = vsel %vm3036_vm10, 1.0, %v9850_v51 }
 0xbdb   :  { %vm3149_vm10 = vcmp.le.f32.partialorder %v8150_v43, %v8296_v26  ;;  %vm3150_vm3 = vcmp.le.f32.partialorder %v8194_v31, %v8296_v26  ;;  %v8421_v43 = vperm.slane %v8147_v5, 4 }
 0xbdc   :  { %4909 = vrot.lane.b32.xlu0 %v4908_v54, %s4937_s1  ;;  %v4494_v54 = vsel %vm3039_vm4, 1.0, %v9850_v51  ;;  %vm3153_vm4 = vcmp.le.f32.partialorder %v8169_v58, %v8296_v26  ;;  %v3589_v62 = vsel %vm9857_vm8, %v4493_v3, %v4847_v48  ;;  %v4511_v58 = vsel %vm3154_vm7, 1.0, %v9850_v51  ;;  %vm9860_vm7 = vmmov %vm9853_vm0 }
 0xbdd   :  { %v4510_v61 = vsel %vm3153_vm4, 1.0, %v9850_v51  ;;  %v4862_v48 = vunpack.i.h.bf16 %v8289_v14  ;;  %vm9861_vm4 = vmmov %vm9853_vm0  ;;  %v4506_v31 = vsel %vm3149_vm10, 1.0, %v9850_v51  ;;  %v4507_v3 = vsel %vm3150_vm3, 1.0, %v9850_v51 }
 0xbde   :  { %vm9864_vm8 = vmmov %vm9853_vm0  ;;  %vm3268_vm10 = vcmp.le.f32.partialorder %v8235_v39, %v8421_v43  ;;  %vm3267_vm3 = vcmp.le.f32.partialorder %v8245_v49, %v8421_v43 }
 0xbdf   :  { %v8325_v6 = vpop.permute.xlu1 %4839 }
 0xbe7   :  { %v4855_v37 = vpop.permute.xlu1 %4854 }
 0xbe8   :  { %v4857_v22 = vunpack.i.h.bf16 %v4855_v37  ;;  %v4856_v63 = vunpack.i.l.bf16 %v4855_v37  ;;  %v3590_v37 = vsel %vm9853_vm0, %v4494_v54, %v4851_v36  ;;  %v3622_v54 = vpack.c.bf16 %v3589_v62, %v3588_v32 }
 0xbea   :  { %v3593_v12 = vsel %vm9853_vm0, %v4497_v27, %v4857_v22  ;;  %v3592_v29 = vsel %vm9854_vm12, %v4496_v47, %v4856_v63  ;;  %vm9855_vm12 = vmmov %vm9853_vm0  ;;  %v4842_v47 = vunpack.i.h.bf16 %v8325_v6  ;;  %v4841_v27 = vunpack.i.l.bf16 %v8325_v6 }
 0xbeb   :  { %v3630_v38 = vpack.c.bf16 %v3593_v12, %v3592_v29  ;;  %v3591_v22 = vsel %vm9855_vm12, %v4495_v56, %v4852_v28  ;;  %v4866_v28 = vunpack.i.l.bf16 %v4865_v1  ;;  %v4508_v29 = vsel %vm3151_vm9, 1.0, %v9850_v51  ;;  %vm9858_vm12 = vmmov %vm9853_vm0 }
 0xbec   :  { %v3626_v63 = vpack.c.bf16 %v3591_v22, %v3590_v37  ;;  %v4509_v6 = vsel %vm3152_vm1, 1.0, %v9850_v51  ;;  %vm9859_vm9 = vmmov %vm9853_vm0  ;;  %v3587_v22 = vsel %vm9860_vm7, %v4491_v57, %v4842_v47  ;;  %v4527_v47 = vsel %vm3268_vm10, 1.0, %v9850_v51 }
 0xbed   :  { %3638 = vmatpush.bf16.msrb.mxu2 %v3630_v38  ;;  %v4861_v38 = vunpack.i.l.bf16 %v8289_v14  ;;  %v3586_v37 = vsel %vm9859_vm9, %v4490_v46, %v4841_v27  ;;  %v3596_v11 = vsel %vm9861_vm4, %v4508_v29, %v4866_v28  ;;  %vm9862_vm1 = vmmov %vm9853_vm0  ;;  %v3595_v46 = vsel %vm9864_vm8, %v4507_v3, %v4862_v48  ;;  %v9865_v28 = vld [vmem:[#allocation11_spill] sm:$0xff] }
 0xbee   :  { %v3597_v45 = vsel %vm9862_vm1, %v4509_v6, %v4867_v2  ;;  %v3618_v14 = vpack.c.bf16 %v3587_v22, %v3586_v37  ;;  %v4526_v27 = vsel %vm3267_vm3, 1.0, %v9850_v51  ;;  %vm9867_vm9 = vmmov %vm9853_vm0  ;;  %vm3270_vm8 = vcmp.le.f32.partialorder %v8243_v60, %v8421_v43 }
 0xbef   :  { %v4870_v36 = vpop.permute.xlu1 %4869  ;;  %v3623_v32 = vpack.c.bf16 %v3597_v45, %v3596_v11  ;;  %vm9868_vm7 = vmmov %vm9853_vm0  ;;  %v9876_v45 = vld [vmem:[#allocation12_spill] sm:$0xff] }
 0xbf0   :  { %v4872_v12 = vunpack.i.h.bf16 %v4870_v36  ;;  %v4871_v30 = vunpack.i.l.bf16 %v4870_v36  ;;  %v3594_v36 = vsel %vm9863_vm2, %v4506_v31, %v4861_v38  ;;  %vm9870_vm4 = vmmov %vm9853_vm0  ;;  %vm3266_vm2 = vcmp.le.f32.partialorder %v8224_v24, %v8421_v43 }
 0xbf1   :  { %3639 = vmatpush.bf16.msrb.mxu2 %v3626_v63  ;;  %v3619_v57 = vpack.c.bf16 %v3595_v46, %v3594_v36  ;;  %vm9871_vm1 = vmmov %vm9853_vm0  ;;  %v4525_v38 = vsel %vm3266_vm2, 1.0, %v9850_v51  ;;  %vm3264_vm2 = vcmp.le.f32.partialorder %v8229_v33, %v8421_v43  ;;  %v9882_v33 = vld [vmem:[#allocation13_spill] sm:$0xff] }
 0xbf2   :  { %v3598_v56 = vsel %vm9853_vm0, %v4510_v61, %v4871_v30  ;;  %v3599_v35 = vsel %vm9858_vm12, %v4511_v58, %v4872_v12  ;;  %vm9866_vm12 = vmmov %vm9853_vm0  ;;  %v9869_v61 = vld [vmem:[#allocation9_spill] sm:$0xff] }
 0xbf3   :  { %v3627_v1 = vpack.c.bf16 %v3599_v35, %v3598_v56  ;;  %vm9872_vm10 = vmmov %vm9871_vm1 }
 0xbf4   :  { %vm9873_vm3 = vmmov %vm9871_vm1 }
 0xbf5   :  { %3640 = vmatpush.bf16.msrb.mxu2 %v3622_v54  ;;  %3668 = vmatpush.bf16.msrb.mxu3 %v3627_v1  ;;  %v4529_v54 = vsel %vm3270_vm8, 1.0, %v9850_v51  ;;  %vm9878_vm8 = vmmov %vm9873_vm3 }
 0xbf9   :  { %3641 = vmatpush.bf16.msrb.mxu2 %v3618_v14  ;;  %3669 = vmatpush.bf16.msrb.mxu3 %v3623_v32  ;;  %v4523_v32 = vsel %vm3264_vm2, 1.0, %v9850_v51 }
 0xbfc   :  { %4554 = vmatmul.msk.bf16.vlgmr.msrb.gmra.mxu2 %vm9853_vm0, %v9865_v28  ;;  %vm3265_vm0 = vcmp.le.f32.partialorder %v8240_v34, %v8421_v43 }
 0xbfd   :  { %3670 = vmatpush.bf16.msrb.mxu3 %v3619_v57  ;;  %v4524_v24 = vsel %vm3265_vm0, 1.0, %v9850_v51  ;;  %vm9879_vm0 = vmmov %vm9873_vm3 }
 0xbfe   :  { %vm9886_vm2 = vmmov %vm9879_vm0 }
 0xc00   :  { %4558 = vmatmul.msk.bf16.vlgmr.msrb.gmra.mxu3 %vm9866_vm12, %v9865_v28  ;;  %vm3269_vm12 = vcmp.le.f32.partialorder %v8249_v25, %v8421_v43 }
 0xc01   :  { %v4528_v60 = vsel %vm3269_vm12, 1.0, %v9850_v51  ;;  %vm9880_vm12 = vmmov %vm9879_vm0 }
 0xc04   :  { %v4890_v2 = vpop.permute.xlu2 %4889 }
 0xc05   :  { %v4892_v63 = vunpack.i.h.bf16 %v4890_v2  ;;  %v4891_v62 = vunpack.i.l.bf16 %v4890_v2 }
 0xc07   :  { %v3606_v12 = vsel %vm9867_vm9, %v4526_v27, %v4891_v62  ;;  %v3607_v30 = vsel %vm9868_vm7, %v4527_v47, %v4892_v63  ;;  %vm9874_vm9 = vmmov %vm9871_vm1 }
 0xc08   :  { %v3628_v29 = vpack.c.bf16 %v3607_v30, %v3606_v12  ;;  %vm9875_vm7 = vmmov %vm9871_vm1 }
 0xc0c   :  { %v4880_v58 = vpop.permute.xlu0 %4879  ;;  %4555 = vmatmul.msk.bf16.gmra.mxu2 %vm9870_vm4, %v9869_v61  ;;  %vm9877_vm4 = vmmov %vm9871_vm1 }
 0xc0d   :  { %v4882_v31 = vunpack.i.h.bf16 %v4880_v58  ;;  %v4881_v3 = vunpack.i.l.bf16 %v4880_v58 }
 0xc0f   :  { %v3603_v46 = vsel %vm9880_vm12, %v4523_v32, %v4882_v31 }
 0xc10   :  { %4559 = vmatmul.msk.bf16.gmra.mxu3 %vm9871_vm1, %v9869_v61  ;;  %vm3263_vm1 = vcmp.le.f32.partialorder %v8206_v53, %v8421_v43  ;;  %v8466_v53 = vperm.slane %v8147_v5, 6 }
 0xc11   :  { %v4522_v14 = vsel %vm3263_vm1, 1.0, %v9850_v51  ;;  %vm9885_vm1 = vmmov %vm9879_vm0 }
 0xc12   :  { %v3602_v36 = vsel %vm9879_vm0, %v4522_v14, %v4881_v3  ;;  %vm3377_vm12 = vcmp.le.f32.partialorder %v8279_v50, %v8466_v53  ;;  %v9903_v3 = vld [vmem:[#allocation65_spill] sm:$0xff] }
 0xc13   :  { %v3620_v57 = vpack.c.bf16 %v3603_v46, %v3602_v36  ;;  %v9905_v46 = vld [vmem:[#allocation32_spill] sm:$0xff] }
 0xc14   :  { %v4895_v39 = vpop.permute.xlu0 %4894  ;;  %v4885_v49 = vpop.permute.xlu1 %4884 }
 0xc15   :  { %v4897_v6 = vunpack.i.h.bf16 %v4895_v39  ;;  %v4896_v56 = vunpack.i.l.bf16 %v4895_v39  ;;  %v4887_v35 = vunpack.i.h.bf16 %v4885_v49  ;;  %v4886_v48 = vunpack.i.l.bf16 %v4885_v49 }
 0xc16   :  { %v4538_v39 = vsel %vm3377_vm12, 1.0, %v9850_v51  ;;  %vm9892_vm12 = vmmov %vm9885_vm1 }
 0xc17   :  { %v3609_v1 = vsel %vm9872_vm10, %v4529_v54, %v4897_v6  ;;  %v3608_v34 = vsel %vm9873_vm3, %v4528_v60, %v4896_v56  ;;  %v3604_v25 = vsel %vm9874_vm9, %v4524_v24, %v4886_v48  ;;  %v3605_v37 = vsel %vm9875_vm7, %v4525_v38, %v4887_v35  ;;  %vm9881_vm10 = vmmov %vm9879_vm0 }
 0xc18   :  { %v3632_v22 = vpack.c.bf16 %v3609_v1, %v3608_v34  ;;  %v3624_v11 = vpack.c.bf16 %v3605_v37, %v3604_v25  ;;  %vm9883_vm3 = vmmov %vm9879_vm0  ;;  %vm3379_vm9 = vcmp.le.f32.partialorder %v8277_v23, %v8466_v53  ;;  %vm3380_vm7 = vcmp.le.f32.partialorder %v8283_v18, %v8466_v53 }
 0xc19   :  { %v4540_v47 = vsel %vm3379_vm9, 1.0, %v9850_v51  ;;  %v4541_v5 = vsel %vm3380_vm7, 1.0, %v9850_v51  ;;  %vm3383_vm9 = vcmp.le.f32.partialorder %v8254_v42, %v8466_v53  ;;  %vm3384_vm7 = vcmp.le.f32.partialorder %v8281_v7, %v8466_v53 }
 0xc1a   :  { %3696 = vmatpush.bf16.msrb.mxu0 %v3632_v22  ;;  %v4544_v48 = vsel %vm3383_vm9, 1.0, %v9850_v51  ;;  %v4545_v38 = vsel %vm3384_vm7, 1.0, %v9850_v51  ;;  %vm9895_vm9 = vmmov %vm9885_vm1 }
 0xc1b   :  { %vm9896_vm7 = vmmov %vm9885_vm1 }
 0xc1c   :  { %4556 = vmatmul.msk.bf16.gmra.mxu2 %vm9877_vm4, %v9876_v45  ;;  %vm9884_vm4 = vmmov %vm9879_vm0 }
 0xc1e   :  { %3697 = vmatpush.bf16.msrb.mxu0 %v3628_v29 }
 0xc20   :  { %4560 = vmatmul.msk.bf16.gmra.mxu3 %vm9878_vm8, %v9876_v45  ;;  %vm9887_vm8 = vmmov %vm9879_vm0  ;;  %vm3378_vm0 = vcmp.le.f32.partialorder %v8238_v4, %v8466_v53 }
 0xc21   :  { %v4539_v58 = vsel %vm3378_vm0, 1.0, %v9850_v51  ;;  %vm3382_vm0 = vcmp.le.f32.partialorder %v8287_v0, %v8466_v53 }
 0xc22   :  { %3698 = vmatpush.bf16.msrb.mxu0 %v3624_v11  ;;  %v4543_v25 = vsel %vm3382_vm0, 1.0, %v9850_v51 }
 0xc26   :  { %3699 = vmatpush.bf16.msrb.mxu0 %v3620_v57 }
 0xc29   :  { %4562 = vmatmul.msk.bf16.vlgmr.msrb.gmra.mxu0 %vm9881_vm10, %v9865_v28  ;;  %vm9888_vm10 = vmmov %vm9885_vm1 }
 0xc2c   :  { %4557 = vmatmul.msk.bf16.gmra.mxu2 %vm9883_vm3, %v9882_v33  ;;  %vm9889_vm3 = vmmov %vm9885_vm1 }
 0xc2e   :  { %v4905_v2 = vpop.permute.xlu2 %4904 }
 0xc2f   :  { %v4907_v63 = vunpack.i.h.bf16 %v4905_v2  ;;  %v4906_v62 = vunpack.i.l.bf16 %v4905_v2 }
 0xc30   :  { %4561 = vmatmul.msk.bf16.gmra.mxu3 %vm9884_vm4, %v9882_v33  ;;  %vm9890_vm4 = vmmov %vm9885_vm1 }
 0xc31   :  { %v3612_v27 = vsel %vm9885_vm1, %v4540_v47, %v4906_v62  ;;  %v3613_v12 = vsel %vm9886_vm2, %v4541_v5, %v4907_v63  ;;  %vm9891_vm2 = vmmov %vm9885_vm1  ;;  %v9908_v63 = vld [vmem:[#allocation21_spill] sm:$0xff] }
 0xc32   :  { %v3625_v30 = vpack.c.bf16 %v3613_v12, %v3612_v27  ;;  %v9909_v62 = vld [vmem:[#allocation5_spill] sm:$0xff] }
 0xc33   :  { %v9912_v12 = vld [vmem:[#allocation29_spill] sm:$0xff] }
 0xc39   :  { %4563 = vmatmul.msk.bf16.gmra.mxu0 %vm9887_vm8, %v9869_v61  ;;  %vm3381_vm8 = vcmp.le.f32.partialorder %v8247_v16, %v8466_v53 }
 0xc3a   :  { %v4542_v34 = vsel %vm3381_vm8, 1.0, %v9850_v51 }
 0xc3e   :  { %v4900_v23 = vpop.permute.xlu1 %4899 }
 0xc3f   :  { %v4902_v18 = vunpack.i.h.bf16 %v4900_v23  ;;  %v4901_v29 = vunpack.i.l.bf16 %v4900_v23 }
 0xc41   :  { %v3610_v49 = vsel %vm9888_vm10, %v4538_v39, %v4901_v29  ;;  %v3611_v6 = vsel %vm9889_vm3, %v4539_v58, %v4902_v18  ;;  %vm9893_vm10 = vmmov %vm9885_vm1  ;;  %v9915_v29 = vld [vmem:[#allocation24_spill] sm:$0xff] }
 0xc42   :  { %v3621_v56 = vpack.c.bf16 %v3611_v6, %v3610_v49  ;;  %vm9894_vm3 = vmmov %vm9885_vm1  ;;  %v9918_v6 = vld [vmem:[#allocation27_spill] sm:$0xff] }
 0xc43   :  { %vm9899_vm0 = vmmov %vm9894_vm3 }
 0xc46   :  { %v4915_v4 = vpop.permute.xlu1 %4914 }
 0xc47   :  { %v4917_v50 = vunpack.i.h.bf16 %v4915_v4  ;;  %v4916_v35 = vunpack.i.l.bf16 %v4915_v4 }
 0xc49   :  { %v3617_v54 = vsel %vm9890_vm4, %v4545_v38, %v4917_v50  ;;  %v3616_v24 = vsel %vm9885_vm1, %v4544_v48, %v4916_v35  ;;  %4564 = vmatmul.msk.bf16.gmra.mxu0 %vm9891_vm2, %v9876_v45  ;;  %vm9897_vm4 = vmmov %vm9885_vm1  ;;  %vm9898_vm2 = vcmp.gt.f32.partialorder %v9547_v44, 0.5  ;;  %v9921_v50 = vmov 0  }
 0xc4a   :  { %v3633_v60 = vpack.c.bf16 %v3617_v54, %v3616_v24 }
 0xc4c   :  { %3725 = vmatpush.bf16.msrb.mxu1 %v3633_v60 }
 0xc4e   :  { %v4910_v42 = vpop.permute.xlu0 %4909 }
 0xc4f   :  { %v4912_v7 = vunpack.i.h.bf16 %v4910_v42  ;;  %v4911_v1 = vunpack.i.l.bf16 %v4910_v42 }
 0xc51   :  { %v3614_v37 = vsel %vm9892_vm12, %v4542_v34, %v4911_v1  ;;  %v3615_v22 = vsel %vm9893_vm10, %v4543_v25, %v4912_v7  ;;  %vm9900_vm10 = vcmp.gt.f32.partialorder %v9551_v19, 0.5 }
 0xc52   :  { %v3629_v11 = vpack.c.bf16 %v3615_v22, %v3614_v37 }
 0xc54   :  { %3726 = vmatpush.bf16.msrb.mxu1 %v3629_v11 }
 0xc58   :  { %3727 = vmatpush.bf16.msrb.mxu1 %v3625_v30 }
 0xc59   :  { %4565 = vmatmul.msk.bf16.gmra.mxu0 %vm9894_vm3, %v9882_v33 }
 0xc5c   :  { %3728 = vmatpush.bf16.msrb.mxu1 %v3621_v56 }
 0xc5f   :  { %4566 = vmatmul.msk.bf16.vlgmr.msrb.gmra.mxu1 %vm9895_vm9, %v9865_v28  ;;  %vm9901_vm9 = vmmov %vm9899_vm0 }
 0xc6f   :  { %4567 = vmatmul.msk.bf16.gmra.mxu1 %vm9896_vm7, %v9869_v61  ;;  %vm9902_vm7 = vmmov %vm9899_vm0 }
 0xc7f   :  { %v3643_v16 = vpop.f32.mrf.mxu2  ;;  %4568 = vmatmul.msk.bf16.gmra.mxu1 %vm9897_vm4, %v9876_v45 }
 0xc80   :  { %vm3750_vm1 = vcmp.ge.f32.partialorder %v3643_v16, %v6192_v15 }
 0xc81   :  { %vm3758_vm8 = vmand %vm9898_vm2, %vm3750_vm1  ;;  %vm9904_vm2 = vcmp.gt.f32.partialorder %v9557_v21, 0.5  ;;  %v3798_v35 = vsel %vm3750_vm1, 1, %v9921_v50 }
 0xc82   :  { %v3766_v51 = vsel %vm3758_vm8, %v8328_v55, inf }
 0xc83   :  { %v3774_v0 = vsel %vm9899_vm0, %v3766_v51, inf  ;;  %v8602_v7 = vpop.f32.mrf.mxu3 }
 0xc84   :  { %3775 = vmin.xlane.f32.xlu2 %v3774_v0 }
 0xc87   :  { %v3645_v28 = vpop.f32.mrf.mxu2 }
 0xc88   :  { %vm3751_vm12 = vcmp.ge.f32.partialorder %v3645_v28, %v6212_v59 }
 0xc89   :  { %vm3759_vm3 = vmand %vm9900_vm10, %vm3751_vm12  ;;  %v3799_v48 = vsel %vm3751_vm12, 1, %v9921_v50  ;;  %vm9923_vm12 = vcmask 523264  }
 0xc8a   :  { %v3767_v61 = vsel %vm3759_vm3, %v8328_v55, inf  ;;  %vm9906_vm3 = vcmp.gt.f32.partialorder %v9562_v41, 0.5 }
 0xc8b   :  { %v3777_v45 = vsel %vm9901_vm9, %v3767_v61, inf  ;;  %v8606_v34 = vpop.f32.mrf.mxu3 }
 0xc8c   :  { %3778 = vmin.xlane.f32.xlu0 %v3777_v45 }
 0xc8f   :  { %v3648_v31 = vpop.f32.mrf.mxu2  ;;  %4569 = vmatmul.msk.bf16.gmra.mxu1 %vm9902_vm7, %v9882_v33  ;;  %vm9907_vm7 = vmmov %vm9899_vm0 }
 0xc90   :  { %vm3752_vm4 = vcmp.ge.f32.partialorder %v3648_v31, %v9903_v3  ;;  %vm9911_vm14 = vmmov %vm9907_vm7 }
 0xc91   :  { %vm3760_vm8 = vmand %vm9904_vm2, %vm3752_vm4 }
 0xc92   :  { %v3768_v14 = vsel %vm3760_vm8, %v8328_v55, inf  ;;  %vm9910_vm8 = vcmp.gt.f32.partialorder %v9909_v62, 0.5  ;;  %vm9914_vm15 = vmmov %vm9911_vm14 }
 0xc93   :  { %v3780_v32 = vsel %vm9899_vm0, %v3768_v14, inf  ;;  %vm9917_vm6 = vmmov %vm9914_vm15  ;;  %v8610_v37 = vpop.f32.mrf.mxu3 }
 0xc94   :  { %3781 = vmin.xlane.f32.xlu1 %v3780_v32  ;;  %vm9920_vm5 = vmmov %vm9917_vm6 }
 0xc97   :  { %v3650_v36 = vpop.f32.mrf.mxu2 }
 0xc98   :  { %vm3753_vm10 = vcmp.ge.f32.partialorder %v3650_v36, %v9905_v46 }
 0xc99   :  { %vm3761_vm9 = vmand %vm9906_vm3, %vm3753_vm10  ;;  %v3801_v54 = vsel %vm3753_vm10, 1, %v9921_v50  ;;  %vm9924_vm10 = vcmp.gt.f32.partialorder %v9547_v44, 0.5 }
 0xc9a   :  { %v3769_v57 = vsel %vm3761_vm9, %v8328_v55, inf  ;;  %vm9913_vm9 = vcmp.gt.f32.partialorder %v9559_v10, 0.5 }
 0xc9b   :  { %v3783_v33 = vsel %vm9907_vm7, %v3769_v57, inf  ;;  %v8618_v51 = vpop.f32.mrf.mxu3 }
 0xc9c   :  { %3784 = vmin.xlane.f32.xlu2 %v3783_v33 }
 0xc9f   :  { %v3653_v2 = vpop.f32.mrf.mxu2 }
 0xca0   :  { %vm3754_vm2 = vcmp.ge.f32.partialorder %v3653_v2, %v9908_v63 }
 0xca1   :  { %vm3762_vm0 = vmand %vm9910_vm8, %vm3754_vm2  ;;  %v3802_v38 = vsel %vm3754_vm2, 1, %v9921_v50 }
 0xca2   :  { %v3770_v47 = vsel %vm3762_vm0, %v8328_v55, inf }
 0xca3   :  { %v3786_v5 = vsel %vm9911_vm14, %v3770_v47, inf  ;;  %vm9916_vm14 = vcmp.gt.f32.partialorder %v9564_v20, 0.5  ;;  %v8628_v36 = vpop.f32.mrf.mxu3 }
 0xca4   :  { %3787 = vmin.xlane.f32.xlu0 %v3786_v5 }
 0xca7   :  { %v3655_v27 = vpop.f32.mrf.mxu2 }
 0xca8   :  { %vm3755_vm3 = vcmp.ge.f32.partialorder %v3655_v27, %v9912_v12 }
 0xca9   :  { %vm3763_vm7 = vmand %vm9913_vm9, %vm3755_vm3  ;;  %v3803_v60 = vsel %vm3755_vm3, 1, %v9921_v50 }
 0xcaa   :  { %v3771_v30 = vsel %vm3763_vm7, %v8328_v55, inf  ;;  %vm9919_vm7 = vcmp.gt.f32.partialorder %v9565_v9, 0.5 }
 0xcab   :  { %v3789_v23 = vsel %vm9914_vm15, %v3771_v30, inf }
 0xcac   :  { %3790 = vmin.xlane.f32.xlu1 %v3789_v23 }
 0xcaf   :  { %v3658_v18 = vpop.f32.mrf.mxu2 }
 0xcb0   :  { %vm3756_vm8 = vcmp.ge.f32.partialorder %v3658_v18, %v9915_v29  ;;  %v8642_v18 = vpop.f32.mrf.mxu3 }
 0xcb1   :  { %vm3764_vm0 = vmand %vm9916_vm14, %vm3756_vm8  ;;  %v3804_v42 = vsel %vm3756_vm8, 1, %v9921_v50  ;;  %vm9926_vm14 = vcmp.gt.f32.partialorder %v9562_v41, 0.5 }
 0xcb2   :  { %v3772_v58 = vsel %vm3764_vm0, %v8328_v55, inf  ;;  %vm9925_vm8 = vmmov %vm9923_vm12 }
 0xcb3   :  { %v3792_v39 = vsel %vm9917_vm6, %v3772_v58, inf  ;;  %vm9922_vm6 = vcmp.gt.f32.partialorder %v9551_v19, 0.5 }
 0xcb4   :  { %3793 = vmin.xlane.f32.xlu2 %v3792_v39 }
 0xcb7   :  { %v3660_v49 = vpop.f32.mrf.mxu2 }
 0xcb8   :  { %vm3757_vm9 = vcmp.ge.f32.partialorder %v3660_v49, %v9918_v6 }
 0xcb9   :  { %vm3765_vm15 = vmand %vm9919_vm7, %vm3757_vm9  ;;  %v3805_v24 = vsel %vm3757_vm9, 1, %v9921_v50  ;;  %vm9927_vm7 = vcmp.gt.f32.partialorder %v9909_v62, 0.5 }
 0xcba   :  { %v3773_v56 = vsel %vm3765_vm15, %v8328_v55, inf  ;;  %v3800_v55 = vsel %vm3752_vm4, 1, %v9921_v50 }
 0xcbb   :  { %v3795_v4 = vsel %vm9920_vm5, %v3773_v56, inf }
 0xcbc   :  { %3796 = vmin.xlane.f32.xlu0 %v3795_v4 }
 0xcc5   :  { %3806 = vrot.lane.b32.xlu1 %v3798_v35, %s4937_s1 }
 0xccc   :  { %3808 = vrot.lane.b32.xlu2 %v3799_v48, %s4937_s1 }
 0xccd   :  { %3814 = vrot.lane.b32.xlu1 %v3802_v38, %s4937_s1 }
 0xcd0   :  { %3810 = vrot.lane.b32.xlu0 %v3800_v55, %s4937_s1 }
 0xcd4   :  { %3812 = vrot.lane.b32.xlu2 %v3801_v54, %s4937_s1 }
 0xcd5   :  { %3820 = vrot.lane.b32.xlu1 %v3805_v24, %s4937_s1 }
 0xcd8   :  { %3816 = vrot.lane.b32.xlu0 %v3803_v60, %s4937_s1 }
 0xcdc   :  { %3818 = vrot.lane.b32.xlu2 %v3804_v42, %s4937_s1  ;;  %v3687_v42 = vpop.f32.mrf.mxu3 }
 0xcf7   :  { %v8604_v1 = vpop.xlane.xlu2 %3775 }
 0xcff   :  { %v8616_v16 = vpop.xlane.xlu0 %3778 }
 0xd07   :  { %v8612_v22 = vpop.xlane.xlu1 %3781 }
 0xd0f   :  { %v8608_v25 = vpop.xlane.xlu2 %3784 }
 0xd17   :  { %v8624_v61 = vpop.xlane.xlu0 %3787 }
 0xd1f   :  { %v8620_v0 = vpop.xlane.xlu1 %3790 }
 0xd27   :  { %v8614_v11 = vpop.xlane.xlu2 %3793 }
 0xd2f   :  { %v3809_v28 = vpop.permute.xlu2 %3808  ;;  %v8632_v57 = vpop.xlane.xlu0 %3796 }
 0xd30   :  { %vm3823_vm5 = vcmp.ne.s32.totalorder %v3809_v28, 0 }
 0xd31   :  { %vm3831_vm1 = vmand %vm9922_vm6, %vm3823_vm5 }
 0xd32   :  { %v3839_v45 = vsel %vm3831_vm1, %v8153_v40, inf  ;;  %vm9928_vm1 = vmmov %vm9925_vm8 }
 0xd33   :  { %v3849_v31 = vsel %vm9923_vm12, %v3839_v45, inf  ;;  %vm9929_vm12 = vmmov %vm9928_vm1 }
 0xd34   :  { %3850 = vmin.xlane.f32.xlu2 %v3849_v31 }
 0xd37   :  { %v3807_v14 = vpop.permute.xlu1 %3806  ;;  %v3813_v32 = vpop.permute.xlu2 %3812 }
 0xd38   :  { %vm3822_vm4 = vcmp.ne.s32.totalorder %v3807_v14, 0  ;;  %vm3825_vm3 = vcmp.ne.s32.totalorder %v3813_v32, 0 }
 0xd39   :  { %vm3830_vm2 = vmand %vm9924_vm10, %vm3822_vm4  ;;  %vm9930_vm4 = vcmp.gt.f32.partialorder %v9557_v21, 0.5 }
 0xd3a   :  { %v3838_v33 = vsel %vm3830_vm2, %v8153_v40, inf  ;;  %vm3833_vm0 = vmand %vm9926_vm14, %vm3825_vm3  ;;  %vm9931_vm2 = vcmp.gt.f32.partialorder %v9564_v20, 0.5  ;;  %vm3871_vm14 = vcmp.ge.f32.partialorder %v8606_v34, %v6212_v59 }
 0xd3b   :  { %v3846_v2 = vsel %vm9925_vm8, %v3838_v33, inf  ;;  %v3841_v27 = vsel %vm3833_vm0, %v8153_v40, inf  ;;  %vm9934_vm8 = vmmov %vm9928_vm1 }
 0xd3c   :  { %3847 = vmin.xlane.f32.xlu0 %v3846_v2  ;;  %v3855_v39 = vsel %vm9929_vm12, %v3841_v27, inf  ;;  %vm9939_vm12 = vmmov %vm9934_vm8 }
 0xd3f   :  { %v3815_v47 = vpop.permute.xlu1 %3814  ;;  %v3819_v5 = vpop.permute.xlu2 %3818 }
 0xd40   :  { %vm3826_vm9 = vcmp.ne.s32.totalorder %v3815_v47, 0  ;;  %vm3828_vm5 = vcmp.ne.s32.totalorder %v3819_v5, 0  ;;  %v3689_v47 = vpop.f32.mrf.mxu3 }
 0xd41   :  { %vm3834_vm15 = vmand %vm9927_vm7, %vm3826_vm9  ;;  %vm9935_vm9 = vcmp.gt.f32.partialorder %v9565_v9, 0.5 }
 0xd42   :  { %v3842_v30 = vsel %vm3834_vm15, %v8153_v40, inf  ;;  %v3811_v23 = vpop.permute.xlu0 %3810  ;;  %vm8650_vm3 = vmand %vm9931_vm2, %vm3828_vm5  ;;  %vm3872_vm15 = vcmp.ge.f32.partialorder %v8610_v37, %v9903_v3  ;;  %vm9936_vm5 = vcmp.gt.f32.partialorder %v9551_v19, 0.5 }
 0xd43   :  { %vm3824_vm6 = vcmp.ne.s32.totalorder %v3811_v23, 0  ;;  %v3858_v58 = vsel %vm9928_vm1, %v3842_v30, inf  ;;  %v3844_v48 = vsel %vm8650_vm3, %v8153_v40, inf  ;;  %vm3870_vm3 = vcmp.ge.f32.partialorder %v8602_v7, %v6192_v15 }
 0xd44   :  { %vm3832_vm10 = vmand %vm9930_vm4, %vm3824_vm6  ;;  %3859 = vmin.xlane.f32.xlu2 %v3858_v58  ;;  %3856 = vmin.xlane.f32.xlu0 %v3855_v39  ;;  %v3919_v7 = vsel %vm3871_vm14, 1, %v9921_v50 }
 0xd45   :  { %v3840_v56 = vsel %vm3832_vm10, %v8153_v40, inf  ;;  %vm8671_vm6 = vmand %vm9936_vm5, %vm3871_vm14  ;;  %vm9941_vm10 = vcmp.gt.f32.partialorder %v9559_v10, 0.5 }
 0xd46   :  { %v3852_v4 = vsel %vm9934_vm8, %v3840_v56, inf  ;;  %vm9940_vm4 = vmmov %vm9934_vm8  ;;  %vm9942_vm8 = vcmp.gt.f32.partialorder %v9557_v21, 0.5  ;;  %v3887_v31 = vsel %vm8671_vm6, %v8296_v26, inf }
 0xd47   :  { %v3821_v35 = vpop.permute.xlu1 %3820  ;;  %3853 = vmin.xlane.f32.xlu1 %v3852_v4  ;;  %v3864_v60 = vsel %vm9940_vm4, %v3844_v48, inf  ;;  %v3918_v48 = vsel %vm3870_vm3, 1, %v9921_v50 }
 0xd48   :  { %vm3829_vm0 = vcmp.ne.s32.totalorder %v3821_v35, 0 }
 0xd49   :  { %vm3837_vm7 = vmand %vm9935_vm9, %vm3829_vm0 }
 0xd4a   :  { %v3845_v38 = vsel %vm3837_vm7, %v8153_v40, inf  ;;  %v3817_v55 = vpop.permute.xlu0 %3816  ;;  %vm3880_vm0 = vmand %vm9942_vm8, %vm3872_vm15  ;;  %vm9944_vm7 = vcmp.gt.f32.partialorder %v9547_v44, 0.5  ;;  %vm3873_vm8 = vcmp.ge.f32.partialorder %v8618_v51, %v9905_v46 }
 0xd4b   :  { %vm3827_vm1 = vcmp.ne.s32.totalorder %v3817_v55, 0  ;;  %v3867_v24 = vsel %vm9939_vm12, %v3845_v38, inf  ;;  %vm9943_vm9 = vmmov %vm9940_vm4  ;;  %v3888_v14 = vsel %vm3880_vm0, %v8296_v26, inf  ;;  %vm3875_vm12 = vcmp.ge.f32.partialorder %v8642_v18, %v9912_v12 }
 0xd4c   :  { %vm3835_vm2 = vmand %vm9941_vm10, %vm3827_vm1  ;;  %3868 = vmin.xlane.f32.xlu2 %v3867_v24  ;;  %3865 = vmin.xlane.f32.xlu0 %v3864_v60  ;;  %vm3874_vm1 = vcmp.ge.f32.partialorder %v8628_v36, %v9908_v63  ;;  %v3900_v32 = vsel %vm9940_vm4, %v3888_v14, inf  ;;  %vm9947_vm0 = vcmp.gt.f32.partialorder %v9559_v10, 0.5  ;;  %v3920_v38 = vsel %vm3872_vm15, 1, %v9921_v50 }
 0xd4d   :  { %v3843_v28 = vsel %vm3835_vm2, %v8153_v40, inf  ;;  %vm3878_vm5 = vmand %vm9944_vm7, %vm3870_vm3  ;;  %vm9946_vm2 = vcmp.gt.f32.partialorder %v9909_v62, 0.5  ;;  %v3921_v37 = vsel %vm3873_vm8, 1, %v9921_v50  ;;  %v3923_v34 = vsel %vm3875_vm12, 1, %v9921_v50 }
 0xd4e   :  { %v3861_v45 = vsel %vm9943_vm9, %v3843_v28, inf  ;;  %v3886_v40 = vsel %vm3878_vm5, %v8296_v26, inf  ;;  %vm9945_vm10 = vmmov %vm9940_vm4  ;;  %vm9949_vm5 = vcmp.gt.f32.partialorder %v9562_v41, 0.5 }
 0xd4f   :  { %3862 = vmin.xlane.f32.xlu1 %v3861_v45  ;;  %v3897_v33 = vsel %vm9945_vm10, %v3887_v31, inf  ;;  %vm3882_vm6 = vmand %vm9946_vm2, %vm3874_vm1  ;;  %vm3877_vm10 = vcmp.ge.f32.partialorder %v3689_v47, %v9918_v6 }
 0xd50   :  { %vm3883_vm9 = vmand %vm9947_vm0, %vm3875_vm12  ;;  %v3890_v5 = vsel %vm3882_vm6, %v8296_v26, inf  ;;  %v3925_v36 = vsel %vm3877_vm10, 1, %v9921_v50 }
 0xd51   :  { %vm9948_vm7 = vmmov %vm9940_vm4  ;;  %v3891_v27 = vsel %vm3883_vm9, %v8296_v26, inf  ;;  %vm9954_vm9 = vcmp.gt.f32.partialorder %v9564_v20, 0.5 }
 0xd52   :  { %v3894_v2 = vsel %vm9948_vm7, %v3886_v40, inf  ;;  %vm3881_vm4 = vmand %vm9949_vm5, %vm3873_vm8  ;;  %vm9952_vm5 = vcmp.gt.f32.partialorder %v9565_v9, 0.5  ;;  %v8780_v40 = vpop.f32.mrf.mxu0 }
 0xd53   :  { %v3889_v30 = vsel %vm3881_vm4, %v8296_v26, inf  ;;  %vm9950_vm2 = vmmov %vm9948_vm7  ;;  %vm3876_vm7 = vcmp.ge.f32.partialorder %v3687_v42, %v9915_v29 }
 0xd54   :  { %3901 = vmin.xlane.f32.xlu2 %v3900_v32  ;;  %3898 = vmin.xlane.f32.xlu0 %v3897_v33  ;;  %v3909_v23 = vsel %vm9950_vm2, %v3891_v27, inf  ;;  %vm9951_vm0 = vmmov %vm9950_vm2  ;;  %v3924_v51 = vsel %vm3876_vm7, 1, %v9921_v50 }
 0xd55   :  { %v3906_v58 = vsel %vm9951_vm0, %v3890_v5, inf  ;;  %vm3885_vm11 = vmand %vm9952_vm5, %vm3877_vm10 }
 0xd56   :  { %vm9953_vm6 = vmmov %vm9951_vm0  ;;  %v3893_v49 = vsel %vm3885_vm11, %v8296_v26, inf  ;;  %vm9956_vm11 = vcmask 15360  }
 0xd57   :  { %3895 = vmin.xlane.f32.xlu1 %v3894_v2  ;;  %v3903_v39 = vsel %vm9953_vm6, %v3889_v30, inf  ;;  %vm3884_vm4 = vmand %vm9954_vm9, %vm3876_vm7  ;;  %vm9963_vm7 = vcmp.gt.f32.partialorder %v9547_v44, 0.5 }
 0xd58   :  { %v3892_v56 = vsel %vm3884_vm4, %v8296_v26, inf  ;;  %vm9955_vm2 = vmmov %vm9951_vm0  ;;  %v3922_v26 = vsel %vm3874_vm1, 1, %v9921_v50 }
 0xd59   :  { %v3915_v4 = vsel %vm9955_vm2, %v3893_v49, inf  ;;  %v3912_v35 = vsel %vm9951_vm0, %v3892_v56, inf  ;;  %vm9957_vm14 = vmmov %vm9956_vm11  ;;  %vm9966_vm2 = vcmp.gt.f32.partialorder %v9557_v21, 0.5 }
 0xd5a   :  { %vm9958_vm15 = vmmov %vm9956_vm11 }
 0xd5b   :  { %vm9959_vm3 = vmmov %vm9956_vm11 }
 0xd5c   :  { %3910 = vmin.xlane.f32.xlu2 %v3909_v23  ;;  %3907 = vmin.xlane.f32.xlu0 %v3906_v58  ;;  %v8797_v23 = vpop.f32.mrf.mxu0  ;;  %vm9960_vm1 = vmmov %vm9959_vm3 }
 0xd5d   :  { %vm9961_vm12 = vmmov %vm9960_vm1 }
 0xd5e   :  { %vm9962_vm10 = vmmov %vm9960_vm1 }
 0xd5f   :  { %3904 = vmin.xlane.f32.xlu1 %v3903_v39  ;;  %vm9964_vm6 = vmmov %vm9960_vm1 }
 0xd60   :  { %vm9965_vm9 = vmmov %vm9951_vm0 }
 0xd64   :  { %3916 = vmin.xlane.f32.xlu0 %v3915_v4 }
 0xd67   :  { %3913 = vmin.xlane.f32.xlu1 %v3912_v35 }
 0xd74   :  { %3926 = vrot.lane.b32.xlu2 %v3918_v48, %s4937_s1 }
 0xd78   :  { %3930 = vrot.lane.b32.xlu0 %v3920_v38, %s4937_s1 }
 0xd7c   :  { %3934 = vrot.lane.b32.xlu2 %v3922_v26, %s4937_s1  ;;  %v8819_v26 = vpop.f32.mrf.mxu0 }
 0xd80   :  { %3932 = vrot.lane.b32.xlu0 %v3921_v37, %s4937_s1  ;;  %3928 = vrot.lane.b32.xlu1 %v3919_v7, %s4937_s1 }
 0xd84   :  { %3940 = vrot.lane.b32.xlu2 %v3925_v36, %s4937_s1 }
 0xd88   :  { %3938 = vrot.lane.b32.xlu0 %v3924_v51, %s4937_s1  ;;  %3936 = vrot.lane.b32.xlu1 %v3923_v34, %s4937_s1  ;;  %v8830_v34 = vpop.f32.mrf.mxu0 }
 0xda7   :  { %v3851_v55 = vpop.xlane.xlu2 %3850 }
 0xda8   :  { %v4231_v18 = vsel %vm2716_vm13, %v8616_v16, %v3851_v55  ;;  %v8834_v55 = vpop.f32.mrf.mxu0 }
 0xdaf   :  { %v3848_v54 = vpop.xlane.xlu0 %3847 }
 0xdb0   :  { %v4230_v5 = vsel %vm2716_vm13, %v8604_v1, %v3848_v54 }
 0xdb7   :  { %v3860_v24 = vpop.xlane.xlu2 %3859  ;;  %v3857_v60 = vpop.xlane.xlu0 %3856 }
 0xdb8   :  { %v4233_v1 = vsel %vm2716_vm13, %v8608_v25, %v3857_v60 }
 0xdba   :  { %v3854_v28 = vpop.xlane.xlu1 %3853 }
 0xdbb   :  { %v4232_v42 = vsel %vm2716_vm13, %v8612_v22, %v3854_v28  ;;  %v4234_v22 = vsel %vm2716_vm13, %v8624_v61, %v3860_v24 }
 0xdbf   :  { %v3869_v45 = vpop.xlane.xlu2 %3868  ;;  %v3866_v31 = vpop.xlane.xlu0 %3865 }
 0xdc0   :  { %v4237_v61 = vsel %vm2716_vm13, %v8632_v57, %v3869_v45  ;;  %v4236_v25 = vsel %vm2716_vm13, %v8614_v11, %v3866_v31 }
 0xdc2   :  { %v3863_v14 = vpop.xlane.xlu1 %3862 }
 0xdc3   :  { %v4235_v16 = vsel %vm2716_vm13, %v8620_v0, %v3863_v14  ;;  %vm9967_vm13 = vmmov %vm9965_vm9 }
 0xdc7   :  { %v3902_v32 = vpop.xlane.xlu2 %3901  ;;  %v3899_v33 = vpop.xlane.xlu0 %3898 }
 0xdc8   :  { %v8787_v2 = vsel %vm9956_vm11, %v4232_v42, %v3902_v32  ;;  %v8790_v47 = vsel %vm9957_vm14, %v4231_v18, %v3899_v33  ;;  %v8845_v18 = vpop.f32.mrf.mxu0 }
 0xdca   :  { %v3896_v27 = vpop.xlane.xlu1 %3895 }
 0xdcb   :  { %v8795_v30 = vsel %vm9958_vm15, %v4230_v5, %v3896_v27  ;;  %vm9968_vm15 = vcmp.gt.f32.partialorder %v9551_v19, 0.5 }
 0xdcf   :  { %v3911_v58 = vpop.xlane.xlu2 %3910  ;;  %v3908_v39 = vpop.xlane.xlu0 %3907 }
 0xdd0   :  { %v8804_v49 = vsel %vm9959_vm3, %v4235_v16, %v3911_v58  ;;  %v8807_v56 = vsel %vm9960_vm1, %v4234_v22, %v3908_v39 }
 0xdd2   :  { %v3905_v4 = vpop.xlane.xlu1 %3904 }
 0xdd3   :  { %v8812_v35 = vsel %vm9961_vm12, %v4233_v1, %v3905_v4  ;;  %vm9969_vm12 = vcmp.gt.f32.partialorder %v9562_v41, 0.5 }
 0xdd7   :  { %v3927_v48 = vpop.permute.xlu2 %3926  ;;  %v3917_v0 = vpop.xlane.xlu0 %3916 }
 0xdd8   :  { %vm3942_vm8 = vcmp.ne.s32.totalorder %v3927_v48, 0  ;;  %v8817_v38 = vsel %vm9962_vm10, %v4237_v61, %v3917_v0  ;;  %vm9970_vm10 = vmmov %vm9965_vm9  ;;  %v3716_v48 = vpop.f32.mrf.mxu0 }
 0xdd9   :  { %vm3950_vm5 = vmand %vm9963_vm7, %vm3942_vm8 }
 0xdda   :  { %v3958_v7 = vsel %vm3950_vm5, %v8185_v52, inf  ;;  %v3914_v37 = vpop.xlane.xlu1 %3913  ;;  %vm9971_vm7 = vmmov %vm9965_vm9  ;;  %vm9972_vm5 = vcmp.gt.f32.partialorder %v9909_v62, 0.5 }
 0xddb   :  { %v8827_v36 = vsel %vm9964_vm6, %v4236_v25, %v3914_v37  ;;  %v3966_v57 = vsel %vm9965_vm9, %v3958_v7, inf }
 0xddc   :  { %3967 = vmin.xlane.f32.xlu1 %v3966_v57 }
 0xddf   :  { %v3935_v24 = vpop.permute.xlu2 %3934 }
 0xde0   :  { %vm3946_vm1 = vcmp.ne.s32.totalorder %v3935_v24, 0 }
 0xde1   :  { %vm8850_vm6 = vmand %vm9972_vm5, %vm3946_vm1  ;;  %vm9983_vm5 = vcmp.gt.f32.partialorder %v9565_v9, 0.5 }
 0xde2   :  { %v3962_v22 = vsel %vm8850_vm6, %v8185_v52, inf  ;;  %vm9977_vm1 = vmmov %vm9971_vm7 }
 0xde3   :  { %v3978_v39 = vsel %vm9977_vm1, %v3962_v22, inf }
 0xde7   :  { %v3941_v33 = vpop.permute.xlu2 %3940 }
 0xdea   :  { %v3931_v51 = vpop.permute.xlu0 %3930 }
 0xdeb   :  { %vm3944_vm4 = vcmp.ne.s32.totalorder %v3931_v51, 0 }
 0xdec   :  { %vm3952_vm0 = vmand %vm9966_vm2, %vm3944_vm4  ;;  %vm3990_vm2 = vcmp.ge.f32.partialorder %v8780_v40, %v6192_v15 }
 0xded   :  { %v3960_v11 = vsel %vm3952_vm0, %v8185_v52, inf  ;;  %vm9975_vm0 = vcmp.gt.f32.partialorder %v9559_v10, 0.5 }
 0xdee   :  { %v3972_v54 = vsel %vm9967_vm13, %v3960_v11, inf }
 0xdef   :  { %3973 = vmin.xlane.f32.xlu2 %v3972_v54  ;;  %v3718_v54 = vpop.f32.mrf.mxu0 }
 0xdf2   :  { %v3929_v60 = vpop.permute.xlu1 %3928  ;;  %v3933_v28 = vpop.permute.xlu0 %3932 }
 0xdf3   :  { %vm3943_vm11 = vcmp.ne.s32.totalorder %v3929_v60, 0  ;;  %vm3945_vm14 = vcmp.ne.s32.totalorder %v3933_v28, 0 }
 0xdf4   :  { %vm3951_vm3 = vmand %vm9968_vm15, %vm3943_vm11  ;;  %vm3949_vm11 = vcmp.ne.s32.totalorder %v3941_v33, 0 }
 0xdf5   :  { %v3959_v45 = vsel %vm3951_vm3, %v8185_v52, inf  ;;  %vm3953_vm8 = vmand %vm9969_vm12, %vm3945_vm14  ;;  %vm9976_vm14 = vcmp.gt.f32.partialorder %v9564_v20, 0.5  ;;  %vm3991_vm3 = vcmp.ge.f32.partialorder %v8797_v23, %v6212_v59 }
 0xdf6   :  { %v3961_v31 = vsel %vm3953_vm8, %v8185_v52, inf  ;;  %v3969_v14 = vsel %vm9970_vm10, %v3959_v45, inf  ;;  %vm9978_vm12 = vmmov %vm9977_vm1  ;;  %vm9979_vm8 = vcmp.gt.f32.partialorder %v9547_v44, 0.5 }
 0xdf7   :  { %3970 = vmin.xlane.f32.xlu0 %v3969_v14  ;;  %v3975_v42 = vsel %vm9971_vm7, %v3961_v31, inf  ;;  %vm8874_vm10 = vmand %vm9979_vm8, %vm3990_vm2 }
 0xdf8   :  { %3976 = vmin.xlane.f32.xlu1 %v3975_v42  ;;  %vm9982_vm7 = vmmov %vm9977_vm1  ;;  %v4006_v0 = vsel %vm8874_vm10, %v8421_v43, inf  ;;  %vm9989_vm10 = vcmp.gt.f32.partialorder %v9562_v41, 0.5 }
 0xdf9   :  { %vm3957_vm6 = vmand %vm9983_vm5, %vm3949_vm11  ;;  %vm3994_vm11 = vcmp.ge.f32.partialorder %v8834_v55, %v9908_v63  ;;  %vm9990_vm5 = vcmp.gt.f32.partialorder %v9909_v62, 0.5 }
 0xdfa   :  { %v3937_v5 = vpop.permute.xlu1 %3936  ;;  %v3939_v27 = vpop.permute.xlu0 %3938  ;;  %v3965_v25 = vsel %vm3957_vm6, %v8185_v52, inf  ;;  %vm9988_vm8 = vmmov %vm9982_vm7  ;;  %v4042_v23 = vsel %vm3994_vm11, 1, %v9921_v50 }
 0xdfb   :  { %vm3947_vm9 = vcmp.ne.s32.totalorder %v3937_v5, 0  ;;  %vm3948_vm4 = vcmp.ne.s32.totalorder %v3939_v27, 0  ;;  %vm4002_vm6 = vmand %vm9990_vm5, %vm3994_vm11  ;;  %v4038_v27 = vsel %vm3990_vm2, 1, %v9921_v50  ;;  %vm9999_vm2 = vcmask 23552  }
 0xdfc   :  { %vm3955_vm13 = vmand %vm9975_vm0, %vm3947_vm9  ;;  %vm9984_vm9 = vcmp.gt.f32.partialorder %v9551_v19, 0.5  ;;  %vm3992_vm0 = vcmp.ge.f32.partialorder %v8819_v26, %v9903_v3  ;;  %v4010_v24 = vsel %vm4002_vm6, %v8421_v43, inf  ;;  %vm9996_vm6 = vcmp.gt.f32.partialorder %v9565_v9, 0.5 }
 0xdfd   :  { %v3963_v16 = vsel %vm3955_vm13, %v8185_v52, inf  ;;  %vm3956_vm15 = vmand %vm9976_vm14, %vm3948_vm4  ;;  %vm3993_vm13 = vcmp.ge.f32.partialorder %v8830_v34, %v9905_v46  ;;  %v4040_v22 = vsel %vm3992_vm0, 1, %v9921_v50 }
 0xdfe   :  { %v3964_v58 = vsel %vm3956_vm15, %v8185_v52, inf  ;;  %v3981_v1 = vsel %vm9978_vm12, %v3963_v16, inf  ;;  %vm3999_vm4 = vmand %vm9984_vm9, %vm3991_vm3  ;;  %vm3995_vm9 = vcmp.ge.f32.partialorder %v8845_v18, %v9912_v12  ;;  %v4041_v40 = vsel %vm3993_vm13, 1, %v9921_v50 }
 0xdff   :  { %3979 = vmin.xlane.f32.xlu0 %v3978_v39  ;;  %3982 = vmin.xlane.f32.xlu2 %v3981_v1  ;;  %v3984_v61 = vsel %vm9982_vm7, %v3964_v58, inf  ;;  %v4007_v7 = vsel %vm3999_vm4, %v8421_v43, inf  ;;  %vm9985_vm14 = vmmov %vm9977_vm1  ;;  %vm3996_vm4 = vcmp.ge.f32.partialorder %v3716_v48, %v9915_v29  ;;  %v4043_v34 = vsel %vm3995_vm9, 1, %v9921_v50 }
 0xe00   :  { %3985 = vmin.xlane.f32.xlu1 %v3984_v61  ;;  %v3987_v37 = vsel %vm9985_vm14, %v3965_v25, inf  ;;  %vm9986_vm15 = vmmov %vm9977_vm1  ;;  %vm9987_vm1 = vcmp.gt.f32.partialorder %v9557_v21, 0.5  ;;  %v4017_v52 = vsel %vm9988_vm8, %v4007_v7, inf  ;;  %vm3997_vm14 = vcmp.ge.f32.partialorder %v3718_v54, %v9918_v6 }
 0xe01   :  { %v4014_v57 = vsel %vm9986_vm15, %v4006_v0, inf  ;;  %vm4000_vm12 = vmand %vm9987_vm1, %vm3992_vm0  ;;  %v4044_v26 = vsel %vm3996_vm4, 1, %v9921_v50  ;;  %v4045_v55 = vsel %vm3997_vm14, 1, %v9921_v50 }
 0xe02   :  { %vm4001_vm7 = vmand %vm9989_vm10, %vm3993_vm13  ;;  %v4008_v51 = vsel %vm4000_vm12, %v8421_v43, inf  ;;  %vm9993_vm12 = vcmp.gt.f32.partialorder %v9559_v10, 0.5 }
 0xe03   :  { %v4009_v11 = vsel %vm4001_vm7, %v8421_v43, inf  ;;  %vm9991_vm15 = vmmov %vm9988_vm8  ;;  %vm9995_vm7 = vcmp.gt.f32.partialorder %v9564_v20, 0.5 }
 0xe04   :  { %v4020_v60 = vsel %vm9991_vm15, %v4008_v51, inf  ;;  %vm9992_vm1 = vmmov %vm9988_vm8 }
 0xe05   :  { %v4023_v28 = vsel %vm9992_vm1, %v4009_v11, inf  ;;  %vm4003_vm8 = vmand %vm9993_vm12, %vm3995_vm9 }
 0xe06   :  { %vm9994_vm10 = vmmov %vm9992_vm1  ;;  %v4011_v31 = vsel %vm4003_vm8, %v8421_v43, inf }
 0xe07   :  { %3988 = vmin.xlane.f32.xlu0 %v3987_v37  ;;  %4015 = vmin.xlane.f32.xlu2 %v4014_v57  ;;  %v4026_v45 = vsel %vm9994_vm10, %v4010_v24, inf  ;;  %vm4004_vm5 = vmand %vm9995_vm7, %vm3996_vm4  ;;  %v4029_v32 = vsel %vm9992_vm1, %v4011_v31, inf  ;;  %v9004_v24 = vpop.f32.mrf.mxu1 }
 0xe08   :  { %4018 = vmin.xlane.f32.xlu1 %v4017_v52  ;;  %vm4005_vm15 = vmand %vm9996_vm6, %vm3997_vm14  ;;  %v4012_v14 = vsel %vm4004_vm5, %v8421_v43, inf  ;;  %vm10006_vm14 = vcmask 31744  }
 0xe09   :  { %v4013_v42 = vsel %vm4005_vm15, %v8421_v43, inf  ;;  %vm9997_vm12 = vmmov %vm9992_vm1  ;;  %v4039_v43 = vsel %vm3991_vm3, 1, %v9921_v50 }
 0xe0a   :  { %v4032_v33 = vsel %vm9997_vm12, %v4012_v14, inf  ;;  %vm9998_vm10 = vmmov %vm9992_vm1 }
 0xe0b   :  { %v4035_v5 = vsel %vm9998_vm10, %v4013_v42, inf  ;;  %vm10000_vm3 = vmmov %vm9999_vm2 }
 0xe0c   :  { %vm10001_vm0 = vmmov %vm9999_vm2 }
 0xe0d   :  { %vm10002_vm13 = vmmov %vm10001_vm0 }
 0xe0e   :  { %vm10003_vm11 = vmmov %vm10001_vm0 }
 0xe0f   :  { %4021 = vmin.xlane.f32.xlu0 %v4020_v60  ;;  %4024 = vmin.xlane.f32.xlu2 %v4023_v28  ;;  %vm10004_vm9 = vmmov %vm10001_vm0 }
 0xe10   :  { %4027 = vmin.xlane.f32.xlu1 %v4026_v45  ;;  %vm10005_vm4 = vmmov %vm10001_vm0 }
 0xe11   :  { %vm10007_vm8 = vmmov %vm10001_vm0 }
 0xe12   :  { %vm10008_vm7 = vmmov %vm10006_vm14 }
 0xe13   :  { %vm10009_vm5 = vmmov %vm10008_vm7 }
 0xe14   :  { %vm10010_vm6 = vmmov %vm10009_vm5 }
 0xe15   :  { %vm10011_vm15 = vmmov %vm10009_vm5 }
 0xe16   :  { %vm10012_vm1 = vmmov %vm10009_vm5 }
 0xe17   :  { %4030 = vmin.xlane.f32.xlu0 %v4029_v32  ;;  %4033 = vmin.xlane.f32.xlu2 %v4032_v33  ;;  %vm10013_vm12 = vmmov %vm10012_vm1  ;;  %v9024_v33 = vpop.f32.mrf.mxu1 }
 0xe18   :  { %4036 = vmin.xlane.f32.xlu1 %v4035_v5  ;;  %vm10014_vm10 = vmmov %vm10012_vm1 }
 0xe2b   :  { %4046 = vrot.lane.b32.xlu0 %v4038_v27, %s4937_s1 }
 0xe2f   :  { %4048 = vrot.lane.b32.xlu2 %v4039_v43, %s4937_s1 }
 0xe31   :  { %4050 = vrot.lane.b32.xlu1 %v4040_v22, %s4937_s1  ;;  %v9030_v22 = vpop.f32.mrf.mxu1 }
 0xe33   :  { %4052 = vrot.lane.b32.xlu0 %v4041_v40, %s4937_s1 }
 0xe37   :  { %4054 = vrot.lane.b32.xlu2 %v4042_v23, %s4937_s1 }
 0xe39   :  { %4058 = vrot.lane.b32.xlu1 %v4044_v26, %s4937_s1 }
 0xe3b   :  { %4056 = vrot.lane.b32.xlu0 %v4043_v34, %s4937_s1 }
 0xe3f   :  { %4060 = vrot.lane.b32.xlu2 %v4045_v55, %s4937_s1 }
 0xe4f   :  { %v3968_v16 = vpop.xlane.xlu1 %3967 }
 0xe50   :  { %v4246_v58 = vsel %vm9999_vm2, %v8795_v30, %v3968_v16  ;;  %v9039_v16 = vpop.f32.mrf.mxu1 }
 0xe62   :  { %v3974_v39 = vpop.xlane.xlu2 %3973 }
 0xe63   :  { %v4248_v1 = vsel %vm10000_vm3, %v8787_v2, %v3974_v39  ;;  %vm10015_vm3 = vcmp.gt.f32.partialorder %v9551_v19, 0.5 }
 0xe6a   :  { %v3971_v4 = vpop.xlane.xlu0 %3970 }
 0xe6b   :  { %v3977_v61 = vpop.xlane.xlu1 %3976  ;;  %v4247_v18 = vsel %vm10001_vm0, %v8790_v47, %v3971_v4 }
 0xe6c   :  { %v4249_v48 = vsel %vm10002_vm13, %v8812_v35, %v3977_v61  ;;  %vm10016_vm13 = vcmask 523264  }
 0xe72   :  { %v3983_v0 = vpop.xlane.xlu2 %3982  ;;  %v3980_v25 = vpop.xlane.xlu0 %3979 }
 0xe73   :  { %v4251_v7 = vsel %vm10003_vm11, %v8804_v49, %v3983_v0  ;;  %v3986_v37 = vpop.xlane.xlu1 %3985  ;;  %v4250_v30 = vsel %vm10004_vm9, %v8807_v56, %v3980_v25  ;;  %vm10017_vm9 = vcmp.gt.f32.partialorder %v9909_v62, 0.5 }
 0xe74   :  { %v4252_v2 = vsel %vm10005_vm4, %v8827_v36, %v3986_v37  ;;  %v3740_v37 = vpop.f32.mrf.mxu1 }
 0xe7a   :  { %v4016_v57 = vpop.xlane.xlu2 %4015  ;;  %v3989_v52 = vpop.xlane.xlu0 %3988 }
 0xe7b   :  { %v8997_v51 = vsel %vm10006_vm14, %v4246_v58, %v4016_v57  ;;  %v4019_v47 = vpop.xlane.xlu1 %4018  ;;  %v4253_v35 = vsel %vm10007_vm8, %v8817_v38, %v3989_v52  ;;  %vm10018_vm8 = vmmov %vm10016_vm13 }
 0xe7c   :  { %v9002_v11 = vsel %vm10008_vm7, %v4247_v18, %v4019_v47  ;;  %vm10019_vm7 = vcmp.gt.f32.partialorder %v9547_v44, 0.5 }
 0xe82   :  { %v4025_v49 = vpop.xlane.xlu2 %4024  ;;  %v4022_v54 = vpop.xlane.xlu0 %4021 }
 0xe83   :  { %v9007_v56 = vsel %vm10009_vm5, %v4249_v48, %v4025_v49  ;;  %v4028_v36 = vpop.xlane.xlu1 %4027  ;;  %v9010_v60 = vsel %vm10010_vm6, %v4248_v1, %v4022_v54  ;;  %vm10020_vm6 = vmmov %vm10018_vm8  ;;  %v3742_v49 = vpop.f32.mrf.mxu1 }
 0xe84   :  { %v9013_v28 = vsel %vm10011_vm15, %v4250_v30, %v4028_v36 }
 0xe8a   :  { %v4034_v45 = vpop.xlane.xlu2 %4033  ;;  %v4031_v31 = vpop.xlane.xlu0 %4030 }
 0xe8b   :  { %v9016_v38 = vsel %vm10012_vm1, %v4252_v2, %v4034_v45  ;;  %v4037_v14 = vpop.xlane.xlu1 %4036  ;;  %v9019_v42 = vsel %vm10013_vm12, %v4251_v7, %v4031_v31  ;;  %vm10021_vm1 = vcmp.gt.f32.partialorder %v9565_v9, 0.5  ;;  %v3745_v45 = vpop.f32.mrf.mxu1 }
 0xe8c   :  { %v9022_v32 = vsel %vm10014_vm10, %v4253_v35, %v4037_v14 }
 0xe92   :  { %v4049_v5 = vpop.permute.xlu2 %4048 }
 0xe93   :  { %vm4063_vm2 = vcmp.ne.s32.totalorder %v4049_v5, 0  ;;  %v3747_v5 = vpop.f32.mrf.mxu1 }
 0xe94   :  { %vm4071_vm0 = vmand %vm10015_vm3, %vm4063_vm2  ;;  %vm10022_vm2 = vcmp.gt.f32.partialorder %v9557_v21, 0.5 }
 0xe95   :  { %v4079_v27 = vsel %vm4071_vm0, %v8252_v17, inf }
 0xe96   :  { %v4089_v43 = vsel %vm10016_vm13, %v4079_v27, inf  ;;  %vm10023_vm13 = vmmov %vm10020_vm6 }
 0xe97   :  { %4090 = vmin.xlane.f32.xlu1 %v4089_v43 }
 0xe9a   :  { %v4055_v40 = vpop.permute.xlu2 %4054 }
 0xe9b   :  { %vm4066_vm11 = vcmp.ne.s32.totalorder %v4055_v40, 0 }
 0xe9c   :  { %vm4074_vm4 = vmand %vm10017_vm9, %vm4066_vm11  ;;  %vm10024_vm11 = vcmp.gt.f32.partialorder %v9562_v41, 0.5 }
 0xe9d   :  { %v4082_v23 = vsel %vm4074_vm4, %v8252_v17, inf  ;;  %v4047_v26 = vpop.permute.xlu0 %4046  ;;  %vm10025_vm4 = vmmov %vm10020_vm6 }
 0xe9e   :  { %vm4062_vm14 = vcmp.ne.s32.totalorder %v4047_v26, 0  ;;  %v4098_v34 = vsel %vm10018_vm8, %v4082_v23, inf }
 0xe9f   :  { %vm4070_vm5 = vmand %vm10019_vm7, %vm4062_vm14  ;;  %4099 = vmin.xlane.f32.xlu1 %v4098_v34  ;;  %vm10027_vm7 = vcmp.gt.f32.partialorder %v9564_v20, 0.5 }
 0xea0   :  { %v4078_v55 = vsel %vm4070_vm5, %v8252_v17, inf  ;;  %vm10026_vm14 = vmmov %vm10025_vm4 }
 0xea1   :  { %v4086_v58 = vsel %vm10020_vm6, %v4078_v55, inf }
 0xea2   :  { %v4061_v39 = vpop.permute.xlu2 %4060  ;;  %4087 = vmin.xlane.f32.xlu0 %v4086_v58 }
 0xea3   :  { %vm4069_vm15 = vcmp.ne.s32.totalorder %v4061_v39, 0  ;;  %v4051_v1 = vpop.permute.xlu1 %4050 }
 0xea4   :  { %vm4077_vm12 = vmand %vm10021_vm1, %vm4069_vm15  ;;  %vm4064_vm10 = vcmp.ne.s32.totalorder %v4051_v1, 0  ;;  %vm10028_vm15 = vcmp.gt.f32.partialorder %v9559_v10, 0.5 }
 0xea5   :  { %v4085_v4 = vsel %vm4077_vm12, %v8252_v17, inf  ;;  %vm4072_vm3 = vmand %vm10022_vm2, %vm4064_vm10  ;;  %v4053_v61 = vpop.permute.xlu0 %4052  ;;  %vm4110_vm12 = vcmp.ge.f32.partialorder %v9004_v24, %v6192_v15 }
 0xea6   :  { %v4080_v18 = vsel %vm4072_vm3, %v8252_v17, inf  ;;  %vm4065_vm0 = vcmp.ne.s32.totalorder %v4053_v61, 0  ;;  %v4107_v48 = vsel %vm10023_vm13, %v4085_v4, inf  ;;  %vm10029_vm10 = vmmov %vm10025_vm4  ;;  %vm10031_vm3 = vcmp.gt.f32.partialorder %v9547_v44, 0.5 }
 0xea7   :  { %vm4073_vm9 = vmand %vm10024_vm11, %vm4065_vm0  ;;  %4108 = vmin.xlane.f32.xlu1 %v4107_v48  ;;  %v4092_v0 = vsel %vm10025_vm4, %v4080_v18, inf  ;;  %vm4111_vm11 = vcmp.ge.f32.partialorder %v9024_v33, %v6212_v59  ;;  %v4158_v31 = vsel %vm4110_vm12, 1, %v9921_v50 }
 0xea8   :  { %v4081_v25 = vsel %vm4073_vm9, %v8252_v17, inf  ;;  %4093 = vmin.xlane.f32.xlu2 %v4092_v0  ;;  %vm10030_vm2 = vmmov %vm10025_vm4  ;;  %vm4114_vm9 = vcmp.ge.f32.partialorder %v3740_v37, %v9908_v63  ;;  %vm4113_vm4 = vcmp.ge.f32.partialorder %v9039_v16, %v9905_v46 }
 0xea9   :  { %v4095_v7 = vsel %vm10026_vm14, %v4081_v25, inf  ;;  %vm4118_vm0 = vmand %vm10031_vm3, %vm4110_vm12  ;;  %v4162_v14 = vsel %vm4114_vm9, 1, %v9921_v50  ;;  %vm4117_vm14 = vcmp.ge.f32.partialorder %v3747_v5, %v9918_v6  ;;  %v4161_v15 = vsel %vm4113_vm4, 1, %v9921_v50 }
 0xeaa   :  { %4096 = vmin.xlane.f32.xlu0 %v4095_v7  ;;  %v4126_v54 = vsel %vm4118_vm0, %v8466_v53, inf  ;;  %vm10032_vm13 = vmmov %vm10030_vm2  ;;  %v4165_v24 = vsel %vm4117_vm14, 1, %v9921_v50  ;;  %vm10037_vm0 = vcmp.gt.f32.partialorder %v9551_v19, 0.5 }
 0xeab   :  { %v4059_v30 = vpop.permute.xlu1 %4058  ;;  %v4134_v36 = vsel %vm10032_vm13, %v4126_v54, inf  ;;  %vm4119_vm13 = vmand %vm10037_vm0, %vm4111_vm11 }
 0xeac   :  { %vm4068_vm8 = vcmp.ne.s32.totalorder %v4059_v30, 0  ;;  %v4127_v40 = vsel %vm4119_vm13, %v8466_v53, inf }
 0xead   :  { %vm4076_vm5 = vmand %vm10027_vm7, %vm4068_vm8  ;;  %v4057_v2 = vpop.permute.xlu0 %4056  ;;  %vm4112_vm8 = vcmp.ge.f32.partialorder %v9030_v22, %v9903_v3  ;;  %vm4116_vm7 = vcmp.ge.f32.partialorder %v3745_v45, %v9915_v29 }
 0xeae   :  { %v4084_v57 = vsel %vm4076_vm5, %v8252_v17, inf  ;;  %vm4067_vm6 = vcmp.ne.s32.totalorder %v4057_v2, 0  ;;  %v4160_v27 = vsel %vm4112_vm8, 1, %v9921_v50  ;;  %v4164_v43 = vsel %vm4116_vm7, 1, %v9921_v50 }
 0xeaf   :  { %vm4075_vm1 = vmand %vm10028_vm15, %vm4067_vm6  ;;  %v4104_v47 = vsel %vm10029_vm10, %v4084_v57, inf  ;;  %vm4115_vm5 = vcmp.ge.f32.partialorder %v3742_v49, %v9912_v12  ;;  %vm10033_vm6 = vcmp.gt.f32.partialorder %v9562_v41, 0.5 }
 0xeb0   :  { %v4083_v52 = vsel %vm4075_vm1, %v8252_v17, inf  ;;  %v4159_v17 = vsel %vm4111_vm11, 1, %v9921_v50  ;;  %v4163_v3 = vsel %vm4115_vm5, 1, %v9921_v50  ;;  %vm4121_vm15 = vmand %vm10033_vm6, %vm4113_vm4  ;;  %vm10034_vm1 = vcmp.gt.f32.partialorder %v9557_v21, 0.5 }
 0xeb1   :  { %v4101_v35 = vsel %vm10030_vm2, %v4083_v52, inf  ;;  %v4129_v29 = vsel %vm4121_vm15, %v8466_v53, inf  ;;  %vm4120_vm12 = vmand %vm10034_vm1, %vm4112_vm8  ;;  %vm10039_vm8 = vcmp.gt.f32.partialorder %v9559_v10, 0.5  ;;  %vm10042_vm11 = vcmp.gt.f32.partialorder %v9909_v62, 0.5 }
 0xeb2   :  { %4105 = vmin.xlane.f32.xlu0 %v4104_v47  ;;  %4102 = vmin.xlane.f32.xlu2 %v4101_v35  ;;  %vm10035_vm10 = vmmov %vm10030_vm2  ;;  %vm10036_vm2 = vcmp.gt.f32.partialorder %v9564_v20, 0.5  ;;  %v4128_v46 = vsel %vm4120_vm12, %v8466_v53, inf }
 0xeb3   :  { %v4143_v22 = vsel %vm10035_vm10, %v4129_v29, inf  ;;  %vm4124_vm3 = vmand %vm10036_vm2, %vm4116_vm7  ;;  %vm10046_vm2 = vcmp.gt.f32.partialorder %v9565_v9, 0.5 }
 0xeb4   :  { %v4132_v50 = vsel %vm4124_vm3, %v8466_v53, inf  ;;  %vm10038_vm4 = vmmov %vm10035_vm10  ;;  %vm10045_vm10 = vcmask 39936  }
 0xeb5   :  { %v4140_v23 = vsel %vm10038_vm4, %v4128_v46, inf  ;;  %vm4123_vm7 = vmand %vm10039_vm8, %vm4115_vm5 }
 0xeb6   :  { %vm10040_vm6 = vmmov %vm10038_vm4  ;;  %v4131_v33 = vsel %vm4123_vm7, %v8466_v53, inf }
 0xeb7   :  { %v4152_v26 = vsel %vm10040_vm6, %v4132_v50, inf  ;;  %vm10041_vm15 = vmmov %vm10038_vm4 }
 0xeb8   :  { %v4137_v59 = vsel %vm10041_vm15, %v4127_v40, inf  ;;  %vm4122_vm1 = vmand %vm10042_vm11, %vm4114_vm9  ;;  %vm10055_vm15 = vcmask 48128  }
 0xeb9   :  { %v4130_v34 = vsel %vm4122_vm1, %v8466_v53, inf  ;;  %vm10043_vm12 = vmmov %vm10038_vm4  ;;  %vm10056_vm1 = vcmp.gt.f32.partialorder %v9551_v19, 0.5 }
 0xeba   :  { %4135 = vmin.xlane.f32.xlu2 %v4134_v36  ;;  %v4149_v12 = vsel %vm10043_vm12, %v4131_v33, inf  ;;  %vm10044_vm5 = vmmov %vm10038_vm4 }
 0xebb   :  { %v4146_v16 = vsel %vm10044_vm5, %v4130_v34, inf  ;;  %vm4125_vm9 = vmand %vm10046_vm2, %vm4117_vm14  ;;  %vm10058_vm2 = vcmp.gt.f32.partialorder %v9557_v21, 0.5 }
 0xebc   :  { %v4133_v63 = vsel %vm4125_vm9, %v8466_v53, inf  ;;  %vm10047_vm3 = vmmov %vm10038_vm4 }
 0xebd   :  { %v4155_v1 = vsel %vm10047_vm3, %v4133_v63, inf  ;;  %vm10048_vm0 = vmmov %vm10045_vm10 }
 0xebe   :  { %vm10049_vm13 = vmmov %vm10048_vm0 }
 0xebf   :  { %vm10050_vm4 = vmmov %vm10048_vm0 }
 0xec0   :  { %4168 = vrot.lane.b32.xlu1 %v4159_v17, %s4937_s1  ;;  %vm10051_vm14 = vmmov %vm10048_vm0 }
 0xec1   :  { %vm10052_vm8 = vmmov %vm10048_vm0 }
 0xec2   :  { %vm10053_vm7 = vmmov %vm10048_vm0 }
 0xec3   :  { %vm10054_vm6 = vmmov %vm10048_vm0 }
 0xec6   :  { %4166 = vrot.lane.b32.xlu0 %v4158_v31, %s4937_s1 }
 0xec8   :  { %4174 = vrot.lane.b32.xlu1 %v4162_v14, %s4937_s1 }
 0xece   :  { %4172 = vrot.lane.b32.xlu0 %v4161_v15, %s4937_s1 }
 0xed0   :  { %4180 = vrot.lane.b32.xlu1 %v4165_v24, %s4937_s1 }
 0xed2   :  { %4170 = vrot.lane.b32.xlu2 %v4160_v27, %s4937_s1 }
 0xed6   :  { %4178 = vrot.lane.b32.xlu0 %v4164_v43, %s4937_s1 }
 0xeda   :  { %4176 = vrot.lane.b32.xlu2 %v4163_v3, %s4937_s1 }
 0xefa   :  { %4144 = vmin.xlane.f32.xlu1 %v4143_v22 }
 0xf00   :  { %4141 = vmin.xlane.f32.xlu0 %v4140_v23 }
 0xf02   :  { %4153 = vmin.xlane.f32.xlu1 %v4152_v26 }
 0xf03   :  { %4138 = vmin.xlane.f32.xlu2 %v4137_v59  ;;  %v10078_v59 = vld [vmem:[#allocation14_spill] sm:$0xff] }
 0xf08   :  { %4150 = vmin.xlane.f32.xlu0 %v4149_v12 }
 0xf0a   :  { %v4091_v55 = vpop.xlane.xlu1 %4090 }
 0xf0b   :  { %v9148_v58 = vsel %vm10045_vm10, %v9002_v11, %v4091_v55  ;;  %4147 = vmin.xlane.f32.xlu2 %v4146_v16  ;;  %vm10057_vm10 = vmmov %vm10047_vm3  ;;  %v10083_v55 = vld [vmem:[#allocation15_spill] sm:$0xff] }
 0xf12   :  { %v4100_v39 = vpop.xlane.xlu1 %4099 }
 0xf13   :  { %v9158_v4 = vsel %vm10048_vm0, %v9013_v28, %v4100_v39  ;;  %4156 = vmin.xlane.f32.xlu2 %v4155_v1  ;;  %vm10059_vm0 = vmmov %vm10057_vm10  ;;  %v10087_v39 = vld [vmem:[#allocation30_spill] sm:$0xff] }
 0xf15   :  { %v4088_v61 = vpop.xlane.xlu0 %4087 }
 0xf16   :  { %v4262_v11 = vsel %vm10049_vm13, %v8997_v51, %v4088_v61  ;;  %vm10060_vm13 = vcmp.gt.f32.partialorder %v9547_v44, 0.5 }
 0xf1a   :  { %v4109_v18 = vpop.xlane.xlu1 %4108 }
 0xf1b   :  { %v4094_v48 = vpop.xlane.xlu2 %4093  ;;  %v9164_v6 = vsel %vm10050_vm4, %v9022_v32, %v4109_v18  ;;  %v10092_v18 = vld [vmem:[#allocation31_spill] sm:$0xff] }
 0xf1c   :  { %v9168_v53 = vsel %vm10051_vm14, %v9010_v60, %v4094_v48 }
 0xf1d   :  { %v4097_v0 = vpop.xlane.xlu0 %4096 }
 0xf1e   :  { %v9172_v28 = vsel %vm10052_vm8, %v9007_v56, %v4097_v0  ;;  %vm10061_vm8 = vcmp.gt.f32.partialorder %v9909_v62, 0.5 }
 0xf25   :  { %v4103_v25 = vpop.xlane.xlu2 %4102  ;;  %v4106_v7 = vpop.xlane.xlu0 %4105 }
 0xf26   :  { %v9176_v51 = vsel %vm10053_vm7, %v9019_v42, %v4103_v25  ;;  %v9180_v37 = vsel %vm10054_vm6, %v9016_v38, %v4106_v7  ;;  %vm10062_vm6 = vmmov %vm10059_vm0 }
 0xf2d   :  { %v4136_v32 = vpop.xlane.xlu2 %4135 }
 0xf2e   :  { %v9183_v30 = vsel %vm10055_vm15, %v4262_v11, %v4136_v32 }
 0xf32   :  { %v4169_v60 = vpop.permute.xlu1 %4168 }
 0xf33   :  { %vm4183_vm11 = vcmp.ne.s32.totalorder %v4169_v60, 0  ;;  %v10100_v60 = vld [vmem:[#allocation18_spill] sm:$0xff] }
 0xf34   :  { %vm4191_vm12 = vmand %vm10056_vm1, %vm4183_vm11  ;;  %vm10064_vm1 = vcmp.gt.f32.partialorder %v9559_v10, 0.5 }
 0xf35   :  { %v4199_v56 = vsel %vm4191_vm12, %v8292_v13, inf  ;;  %v4171_v2 = vpop.permute.xlu2 %4170  ;;  %vm10063_vm11 = vmmov %vm10059_vm0 }
 0xf36   :  { %vm4184_vm5 = vcmp.ne.s32.totalorder %v4171_v2, 0  ;;  %v4209_v42 = vsel %vm10057_vm10, %v4199_v56, inf  ;;  %vm10065_vm10 = vmmov %vm10059_vm0 }
 0xf37   :  { %vm4192_vm9 = vmand %vm10058_vm2, %vm4184_vm5  ;;  %4210 = vmin.xlane.f32.xlu1 %v4209_v42  ;;  %vm10066_vm2 = vcmp.gt.f32.partialorder %v9562_v41, 0.5 }
 0xf38   :  { %v4200_v38 = vsel %vm4192_vm9, %v8292_v13, inf  ;;  %v4167_v57 = vpop.permute.xlu0 %4166 }
 0xf39   :  { %vm4182_vm3 = vcmp.ne.s32.totalorder %v4167_v57, 0  ;;  %v4212_v52 = vsel %vm10059_vm0, %v4200_v38, inf  ;;  %vm10067_vm0 = vcmp.gt.f32.partialorder %v9565_v9, 0.5  ;;  %v10105_v38 = vld [vmem:[#allocation19_spill] sm:$0xff] }
 0xf3a   :  { %vm4190_vm4 = vmand %vm10060_vm13, %vm4182_vm3  ;;  %v4175_v19 = vpop.permute.xlu1 %4174  ;;  %4213 = vmin.xlane.f32.xlu2 %v4212_v52 }
 0xf3b   :  { %v4198_v47 = vsel %vm4190_vm4, %v8292_v13, inf  ;;  %vm4186_vm14 = vcmp.ne.s32.totalorder %v4175_v19, 0  ;;  %vm10068_vm4 = vmmov %vm10062_vm6 }
 0xf3c   :  { %vm4194_vm7 = vmand %vm10061_vm8, %vm4186_vm14  ;;  %v4206_v21 = vsel %vm10062_vm6, %v4198_v47, inf }
 0xf3d   :  { %v4202_v35 = vsel %vm4194_vm7, %v8292_v13, inf  ;;  %v4177_v49 = vpop.permute.xlu2 %4176  ;;  %4207 = vmin.xlane.f32.xlu0 %v4206_v21  ;;  %vm10069_vm14 = vmmov %vm10068_vm4  ;;  %vm10070_vm7 = vcmp.gt.f32.partialorder %v9564_v20, 0.5 }
 0xf3e   :  { %vm4187_vm15 = vcmp.ne.s32.totalorder %v4177_v49, 0  ;;  %v4218_v54 = vsel %vm10063_vm11, %v4202_v35, inf  ;;  %vm10072_vm11 = vcmask 48128  }
 0xf3f   :  { %vm4195_vm12 = vmand %vm10064_vm1, %vm4187_vm15  ;;  %4219 = vmin.xlane.f32.xlu1 %v4218_v54  ;;  %vm10073_vm1 = vcmask 56320  }
 0xf40   :  { %v4203_v44 = vsel %vm4195_vm12, %v8292_v13, inf  ;;  %v4173_v36 = vpop.permute.xlu0 %4172  ;;  %vm10071_vm15 = vmmov %vm10068_vm4  ;;  %vm10074_vm12 = vcmp.gt.f32.partialorder %v9758_v8, 0.5 }
 0xf41   :  { %vm4185_vm5 = vcmp.ne.s32.totalorder %v4173_v36, 0  ;;  %v4221_v62 = vsel %vm10065_vm10, %v4203_v44, inf  ;;  %vm10076_vm10 = vcmask 64512  }
 0xf42   :  { %vm4193_vm9 = vmand %vm10066_vm2, %vm4185_vm5  ;;  %v4181_v17 = vpop.permute.xlu1 %4180  ;;  %4222 = vmin.xlane.f32.xlu2 %v4221_v62 }
 0xf43   :  { %v4201_v45 = vsel %vm4193_vm9, %v8292_v13, inf  ;;  %vm4189_vm3 = vcmp.ne.s32.totalorder %v4181_v17, 0  ;;  %vm10075_vm5 = vmmov %vm10072_vm11  ;;  %vm10079_vm9 = vcmp.gt.f32.partialorder %v10078_v59, 0.5 }
 0xf44   :  { %vm4197_vm13 = vmand %vm10067_vm0, %vm4189_vm3  ;;  %v4215_v10 = vsel %vm10068_vm4, %v4201_v45, inf  ;;  %vm10084_vm4 = vcmp.gt.f32.partialorder %v10083_v55, 0.5 }
 0xf45   :  { %v4205_v31 = vsel %vm4197_vm13, %v8292_v13, inf  ;;  %4216 = vmin.xlane.f32.xlu0 %v4215_v10  ;;  %vm10077_vm2 = vmmov %vm10073_vm1 }
 0xf46   :  { %v4227_v14 = vsel %vm10069_vm14, %v4205_v31, inf  ;;  %vm10080_vm3 = vmmov %vm10076_vm10 }
 0xf47   :  { %4228 = vmin.xlane.f32.xlu1 %v4227_v14  ;;  %vm10081_vm0 = vmmov %vm10073_vm1 }
 0xf48   :  { %v4179_v5 = vpop.permute.xlu0 %4178  ;;  %vm10082_vm13 = vmmov %vm10075_vm5 }
 0xf49   :  { %vm4188_vm8 = vcmp.ne.s32.totalorder %v4179_v5, 0  ;;  %vm10085_vm14 = vmmov %vm10080_vm3 }
 0xf4a   :  { %vm4196_vm6 = vmand %vm10070_vm7, %vm4188_vm8  ;;  %vm10088_vm7 = vcmp.gt.f32.partialorder %v10087_v39, 0.5 }
 0xf4b   :  { %v4204_v41 = vsel %vm4196_vm6, %v8292_v13, inf  ;;  %vm10086_vm8 = vmmov %vm10081_vm0 }
 0xf4c   :  { %v4224_v15 = vsel %vm10071_vm15, %v4204_v41, inf  ;;  %vm10089_vm6 = vmmov %vm10075_vm5 }
 0xf4d   :  { %4225 = vmin.xlane.f32.xlu0 %v4224_v15  ;;  %vm10090_vm15 = vmmov %vm10080_vm3 }
 0xf6d   :  { %v4145_v24 = vpop.xlane.xlu1 %4144 }
 0xf73   :  { %v4142_v43 = vpop.xlane.xlu0 %4141 }
 0xf74   :  { %v4272_v13 = vsel %vm10075_vm5, %v9168_v53, %v4142_v43 }
 0xf75   :  { %v4154_v3 = vpop.xlane.xlu1 %4153 }
 0xf76   :  { %v4139_v9 = vpop.xlane.xlu2 %4138 }
 0xf77   :  { %v4271_v46 = vsel %vm10072_vm11, %v9148_v58, %v4139_v9  ;;  %vm10091_vm11 = vmmov %vm10081_vm0 }
 0xf7b   :  { %v4151_v22 = vpop.xlane.xlu0 %4150 }
 0xf7c   :  { %v4275_v61 = vsel %vm10089_vm6, %v9176_v51, %v4151_v22  ;;  %v10098_v51 = vld [vmem:[#allocation16_spill] sm:$0xff] }
 0xf7e   :  { %v4148_v27 = vpop.xlane.xlu2 %4147 }
 0xf7f   :  { %v4274_v12 = vsel %vm10082_vm13, %v9158_v4, %v4148_v27  ;;  %vm10101_vm13 = vcmp.gt.f32.partialorder %v10100_v60, 0.5 }
 0xf86   :  { %v4157_v29 = vpop.xlane.xlu2 %4156 }
 0xfaa   :  { %v4211_v50 = vpop.xlane.xlu1 %4210 }
 0xfab   :  { %v4279_v40 = vsel %vm10073_vm1, %v4271_v46, %v4211_v50  ;;  %vm10093_vm1 = vcmp.gt.f32.partialorder %v10092_v18, 0.5 }
 0xfac   :  { %v4287_v20 = vsel %vm10074_vm12, %v4279_v40, 0.0  ;;  %vm10094_vm12 = vmmov %vm10075_vm5 }
 0xfad   :  { %4295 = vst.msk [vmem:[%s9294_s6 + $0x8] sm:$0xff] %vm10076_vm10, %v4287_v20  ;;  %v4214_v23 = vpop.xlane.xlu2 %4213  ;;  %v4273_v53 = vsel %vm10094_vm12, %v9172_v28, %v4145_v24  ;;  %vm10095_vm5 = vmmov %vm10080_vm3 }
 0xfae   :  { %v4280_v26 = vsel %vm10077_vm2, %v4272_v13, %v4214_v23  ;;  %vm10096_vm10 = vmmov %vm10081_vm0 }
 0xfaf   :  { %v4288_v33 = vsel %vm10079_vm9, %v4280_v26, 0.0  ;;  %vm10097_vm2 = vmmov %vm10089_vm6  ;;  %vm10099_vm9 = vcmp.gt.f32.partialorder %v10098_v51, 0.5 }
 0xfb0   :  { %4296 = vst.msk [vmem:[%s9294_s6 + $0x10] sm:$0xff] %vm10080_vm3, %v4288_v33  ;;  %v4208_v8 = vpop.xlane.xlu0 %4207  ;;  %v4277_v7 = vsel %vm10097_vm2, %v9164_v6, %v4157_v29  ;;  %vm10107_vm6 = vmmov %vm10080_vm3 }
 0xfb1   :  { %v4278_v34 = vsel %vm10081_vm0, %v9183_v30, %v4208_v8 }
 0xfb2   :  { %v4286_v16 = vsel %vm10084_vm4, %v4278_v34, 0.0  ;;  %v4220_v58 = vpop.xlane.xlu1 %4219  ;;  %vm10102_vm4 = vmmov %vm10080_vm3 }
 0xfb3   :  { %4294 = vst.msk [vmem:[%s9294_s6] sm:$0xff] %vm10085_vm14, %v4286_v16  ;;  %v4282_v63 = vsel %vm10086_vm8, %v4274_v12, %v4220_v58  ;;  %vm10103_vm14 = vmmov %vm10097_vm2 }
 0xfb4   :  { %v4290_v1 = vsel %vm10088_vm7, %v4282_v63, 0.0  ;;  %v4276_v6 = vsel %vm10103_vm14, %v9180_v37, %v4154_v3  ;;  %vm10104_vm8 = vmmov %vm10081_vm0  ;;  %vm10106_vm7 = vcmp.gt.f32.partialorder %v10105_v38, 0.5 }
 0xfb5   :  { %4298 = vst.msk [vmem:[%s9294_s6 + $0x20] sm:$0xff] %vm10090_vm15, %v4290_v1  ;;  %v4223_v4 = vpop.xlane.xlu2 %4222 }
 0xfb6   :  { %v4283_v11 = vsel %vm10091_vm11, %v4275_v61, %v4223_v4 }
 0xfb7   :  { %v4291_v48 = vsel %vm10093_vm1, %v4283_v11, 0.0 }
 0xfb8   :  { %4299 = vst.msk [vmem:[%s9294_s6 + $0x28] sm:$0xff] %vm10095_vm5, %v4291_v48  ;;  %v4217_v0 = vpop.xlane.xlu0 %4216 }
 0xfb9   :  { %v4281_v25 = vsel %vm10096_vm10, %v4273_v53, %v4217_v0 }
 0xfba   :  { %v4289_v32 = vsel %vm10099_vm9, %v4281_v25, 0.0  ;;  %v4229_v30 = vpop.xlane.xlu1 %4228 }
 0xfbb   :  { %4297 = vst.msk [vmem:[%s9294_s6 + $0x18] sm:$0xff] %vm10080_vm3, %v4289_v32  ;;  %v4285_v28 = vsel %vm10081_vm0, %v4277_v7, %v4229_v30 }
 0xfbc   :  { %v4293_v56 = vsel %vm10101_vm13, %v4285_v28, 0.0 }
 0xfbd   :  { %4301 = vst.msk [vmem:[%s9294_s6 + $0x38] sm:$0xff] %vm10102_vm4, %v4293_v56 }
 0xfc0   :  { %v4226_v2 = vpop.xlane.xlu0 %4225 }
 0xfc1   :  { %v4284_v42 = vsel %vm10104_vm8, %v4276_v6, %v4226_v2 }
 0xfc2   :  { %v4292_v57 = vsel %vm10106_vm7, %v4284_v42, 0.0 }
 0xfc3   :  { %4300 = vst.msk [vmem:[%s9294_s6 + $0x30] sm:$0xff] %vm10107_vm6, %v4292_v57 }

</bundles_post_ra>
